<compile_context>
chip_gen: v7x
topology: tpu7x:2x2x1
jax: 0.10.0
libtpu: 0.0.40
codegen_flags: <defaults>
</compile_context>

<pallas_src>
import functools

import jax
import jax.numpy as jnp
from jax import lax
from jax.experimental import pallas as pl
from jax.experimental.pallas import tpu as pltpu

EPS = 1e-5
LANE = 128                        # TPU lane width: channel axis padded to a multiple of this


def _round_up(x, m):
    return (x + m - 1) // m * m


def _vmem_limit_bytes():
    # Generation-aware scoped-VMEM limit: ~3/4 of physical, capped at 100 MiB
    # (v5e/v6e: 128 MiB physical -> 96 MiB; v7x: 64 MiB -> 48 MiB).
    try:
        cap = int(pltpu.get_tpu_info().vmem_capacity_bytes)
        return min(cap * 3 // 4, 100 * 1024 * 1024)
    except Exception:
        return 48 * 1024 * 1024   # conservative, valid on every generation


def _cparams(n_axes):
    return pltpu.CompilerParams(
        dimension_semantics=("parallel",) * n_axes,
        vmem_limit_bytes=_vmem_limit_bytes(),
    )


def _zero_border(pad_ref, hp, wp, cch):
    """Zero only the 1-pixel border of a (hp, wp, cch) halo scratch (cheap, every step)."""
    zt = jnp.zeros((1, wp, cch), pad_ref.dtype)
    zc = jnp.zeros((hp, 1, cch), pad_ref.dtype)
    pad_ref[0:1, :, :] = zt
    pad_ref[hp - 1:hp, :, :] = zt
    pad_ref[:, 0:1, :] = zc
    pad_ref[:, wp - 1:wp, :] = zc


# --------------------------------------------------------------------------- #
# Stage 1: conv1 (3x3, stride s) + per-image BN1 partial stats, fused with the
# projection-shortcut 1x1 conv (+ its stats).  One grid step == one image.
# The halo is built in a zero-bordered bf16 VMEM scratch (input is read from HBM
# exactly once, unpadded).  The conv is 9 accumulated bf16 matmuls into f32.
# --------------------------------------------------------------------------- #
def _stage1_kernel(*refs, stride, h, w, ho, wo, cin_p, cp, has_proj):
    if has_proj:
        x_ref, w1_ref, ws_ref, out1_ref, st1_ref, sc_ref, sts_ref, xpad = refs
    else:
        x_ref, w1_ref, out1_ref, st1_ref, xpad = refs

    hp, wp = h + 2, w + 2
    _zero_border(xpad, hp, wp, cin_p)
    # single f32->bf16 cast of the input, stored once into the halo scratch
    xpad[1:h + 1, 1:w + 1, :] = x_ref[...].reshape(h, w, cin_p).astype(jnp.bfloat16)

    def tap(dy, dx):
        if stride == 1:
            t = xpad[dy:dy + ho, dx:dx + wo, :]
        else:
            # TODO(synk): stride-2 on the W (sublane) axis is a strided load; a
            # phase-major (W/2, 2) host layout would make it a plain slice.
            t = xpad[pl.ds(dy, ho, stride=stride), pl.ds(dx, wo, stride=stride), :]
        return t.reshape(ho * wo, cin_p)

    acc = jnp.zeros((ho * wo, cp), jnp.float32)
    center = None
    t_idx = 0
    for dy in range(3):
        for dx in range(3):
            p = tap(dy, dx)                           # bf16 (ho*wo, cin_p)
            if dy == 1 and dx == 1:
                center = p                            # reused by the 1x1 shortcut
            acc = acc + jnp.dot(p, w1_ref[t_idx], preferred_element_type=jnp.float32)
            t_idx += 1

    out1_ref[...] = acc.astype(jnp.bfloat16).reshape(1, ho, wo, cp)
    s0 = jnp.sum(acc, axis=0, keepdims=True)          # per-channel partial sums (f32)
    s1 = jnp.sum(acc * acc, axis=0, keepdims=True)
    st1_ref[...] = jnp.concatenate(
        [s0, s1, jnp.zeros((6, cp), jnp.float32)], axis=0).reshape(1, 8, cp)

    if has_proj:
        # TODO(synk): on v6e/v7x (256-wide MXU) ws could be packed into extra N
        # columns of the conv1 matmul instead of a second dot.
        s = jnp.dot(center, ws_ref[...], preferred_element_type=jnp.float32)
        sc_ref[...] = s.astype(jnp.bfloat16).reshape(1, ho, wo, cp)
        p0 = jnp.sum(s, axis=0, keepdims=True)
        p1 = jnp.sum(s * s, axis=0, keepdims=True)
        sts_ref[...] = jnp.concatenate(
            [p0, p1, jnp.zeros((6, cp), jnp.float32)], axis=0).reshape(1, 8, cp)


# --------------------------------------------------------------------------- #
# Stage 2: bn1-apply (precomputed per-channel scale/shift, f32) + relu, cast once
# to bf16 into a zero-bordered halo scratch, then conv2 (3x3, stride 1) as 9
# accumulated bf16 matmuls + per-image BN2 partial stats.
# --------------------------------------------------------------------------- #
def _stage2_kernel(out1_ref, a1_ref, b1_ref, w2_ref, out2_ref, st2_ref, pad_ref,
                   *, ho, wo, cp):
    hp, wp = ho + 2, wo + 2
    _zero_border(pad_ref, hp, wp, cp)

    y = (out1_ref[...].astype(jnp.float32) * a1_ref[...].reshape(1, 1, 1, cp)
         + b1_ref[...].reshape(1, 1, 1, cp))
    y = jnp.maximum(y, 0.0)
    pad_ref[1:ho + 1, 1:wo + 1, :] = y.reshape(ho, wo, cp).astype(jnp.bfloat16)

    acc = jnp.zeros((ho * wo, cp), jnp.float32)
    t_idx = 0
    for dy in range(3):
        for dx in range(3):
            p = pad_ref[dy:dy + ho, dx:dx + wo, :].reshape(ho * wo, cp)
            acc = acc + jnp.dot(p, w2_ref[t_idx], preferred_element_type=jnp.float32)
            t_idx += 1

    out2_ref[...] = acc.astype(jnp.bfloat16).reshape(1, ho, wo, cp)
    s0 = jnp.sum(acc, axis=0, keepdims=True)
    s1 = jnp.sum(acc * acc, axis=0, keepdims=True)
    st2_ref[...] = jnp.concatenate(
        [s0, s1, jnp.zeros((6, cp), jnp.float32)], axis=0).reshape(1, 8, cp)


# --------------------------------------------------------------------------- #
# Stage 3: bn2-apply (+ shortcut BN-apply for the projection path) + add + relu.
# Pure elementwise, memory-bound -> whole-image blocks (MB-scale DMAs), batch
# axis parallel.
# --------------------------------------------------------------------------- #
def _stage3_proj_kernel(out2_ref, a2_ref, b2_ref, sc_ref, as_ref, bs_ref, o_ref, *, cp):
    y = (out2_ref[...].astype(jnp.float32) * a2_ref[...].reshape(1, 1, 1, cp)
         + b2_ref[...].reshape(1, 1, 1, cp))
    s = (sc_ref[...].astype(jnp.float32) * as_ref[...].reshape(1, 1, 1, cp)
         + bs_ref[...].reshape(1, 1, 1, cp))
    o_ref[...] = jnp.maximum(y + s, 0.0)


def _stage3_ident_kernel(out2_ref, a2_ref, b2_ref, x_ref, o_ref, *, cp):
    y = (out2_ref[...].astype(jnp.float32) * a2_ref[...].reshape(1, 1, 1, cp)
         + b2_ref[...].reshape(1, 1, 1, cp))
    o_ref[...] = jnp.maximum(y + x_ref[...], 0.0)


# ------------------------------ BasicBlock forward --------------------------- #
def basic_block_forward(x_nchw, params, *, stride):
    """Forward of BasicBlock.  x_nchw: (N, C, H, W) float32.  Returns NCHW float32."""
    B, cin, H, W = x_nchw.shape
    planes = params["w1"].shape[-1]
    has_proj = (stride != 1) or (cin != planes)

    ho = (H - 1) // stride + 1
    wo = (W - 1) // stride + 1
    cin_p = _round_up(cin, LANE)          # lane-dense channel padding
    cp = _round_up(planes, LANE)

    # ---- host-side prep: NCHW -> NHWC, channel pad to lane width (no spatial pad).
    x_nhwc = jnp.transpose(x_nchw, (0, 2, 3, 1))
    x_cpad = jnp.pad(x_nhwc, ((0, 0), (0, 0), (0, 0), (0, cin_p - cin)))

    def pack3x3(w, ci_p, co_p):           # (3,3,Cin,Cout) -> (9, Cin_p, Cout_p) bf16
        _, _, ci, co = w.shape
        wpk = jnp.pad(w, ((0, 0), (0, 0), (0, ci_p - ci), (0, co_p - co)))
        return wpk.reshape(9, ci_p, co_p).astype(jnp.bfloat16)

    def pad_vec(v):
        return jnp.pad(v, (0, cp - planes))   # zero-pad gamma/beta -> padded chans stay 0

    w1p = pack3x3(params["w1"], cin_p, cp)
    w2p = pack3x3(params["w2"], cp, cp)

    # ------------------------------- stage 1 -------------------------------- #
    # TODO(synk): for very large spatial extents (e.g. 112x112 on v7x) stages 1-2
    # would additionally need a row-tile grid axis with overlapping-halo DMA.
    in_specs1 = [
        pl.BlockSpec((1, H, W, cin_p), lambda b: (b, 0, 0, 0)),
        pl.BlockSpec((9, cin_p, cp), lambda b: (0, 0, 0)),
    ]
    args1 = [x_cpad, w1p]
    out_shape1 = [
        jax.ShapeDtypeStruct((B, ho, wo, cp), jnp.bfloat16),
        jax.ShapeDtypeStruct((B, 8, cp), jnp.float32),
    ]
    out_specs1 = [
        pl.BlockSpec((1, ho, wo, cp), lambda b: (b, 0, 0, 0)),
        pl.BlockSpec((1, 8, cp), lambda b: (b, 0, 0)),
    ]
    if has_proj:
        wsp = jnp.pad(params["ws"],
                      ((0, cin_p - cin), (0, cp - planes))).astype(jnp.bfloat16)
        in_specs1.append(pl.BlockSpec((cin_p, cp), lambda b: (0, 0)))
        args1.append(wsp)
        out_shape1 += [jax.ShapeDtypeStruct((B, ho, wo, cp), jnp.bfloat16),
                       jax.ShapeDtypeStruct((B, 8, cp), jnp.float32)]
        out_specs1 += [pl.BlockSpec((1, ho, wo, cp), lambda b: (b, 0, 0, 0)),
                       pl.BlockSpec((1, 8, cp), lambda b: (b, 0, 0))]

    res1 = pl.pallas_call(
        functools.partial(_stage1_kernel, stride=stride, h=H, w=W, ho=ho, wo=wo,
                          cin_p=cin_p, cp=cp, has_proj=has_proj),
        grid=(B,),
        in_specs=in_specs1,
        out_specs=tuple(out_specs1),
        out_shape=tuple(out_shape1),
        scratch_shapes=[pltpu.VMEM((H + 2, W + 2, cin_p), jnp.bfloat16)],
        compiler_params=_cparams(1),
    )(*args1)
    if has_proj:
        out1, st1, sc_raw, sts = res1
    else:
        out1, st1 = res1

    # tiny host-side glue: fold partial stats into per-channel BN scale/shift (f32)
    n = B * ho * wo

    def bn_affine(stats, gamma, beta):
        s = jnp.sum(stats[:, 0, :], axis=0)
        ss = jnp.sum(stats[:, 1, :], axis=0)
        mean = s / n
        # TODO(synk): one-pass E[x^2]-E[x]^2 can lose precision at very large n;
        # fine at these sizes (f32 partial sums).
        var = ss / n - mean * mean            # biased variance (PyTorch batch stats)
        scale = gamma * lax.rsqrt(var + EPS)
        shift = beta - mean * scale
        return scale.reshape(1, cp), shift.reshape(1, cp)

    a1, c1 = bn_affine(st1, pad_vec(params["g1"]), pad_vec(params["b1"]))

    # ------------------------------- stage 2 -------------------------------- #
    out2, st2 = pl.pallas_call(
        functools.partial(_stage2_kernel, ho=ho, wo=wo, cp=cp),
        grid=(B,),
        in_specs=[
            pl.BlockSpec((1, ho, wo, cp), lambda b: (b, 0, 0, 0)),
            pl.BlockSpec((1, cp), lambda b: (0, 0)),
            pl.BlockSpec((1, cp), lambda b: (0, 0)),
            pl.BlockSpec((9, cp, cp), lambda b: (0, 0, 0)),
        ],
        out_specs=(
            pl.BlockSpec((1, ho, wo, cp), lambda b: (b, 0, 0, 0)),
            pl.BlockSpec((1, 8, cp), lambda b: (b, 0, 0)),
        ),
        out_shape=(
            jax.ShapeDtypeStruct((B, ho, wo, cp), jnp.bfloat16),
            jax.ShapeDtypeStruct((B, 8, cp), jnp.float32),
        ),
        scratch_shapes=[pltpu.VMEM((ho + 2, wo + 2, cp), jnp.bfloat16)],
        compiler_params=_cparams(1),
    )(out1, a1, c1, w2p)

    a2, c2 = bn_affine(st2, pad_vec(params["g2"]), pad_vec(params["b2"]))

    # ------------------------------- stage 3 -------------------------------- #
    fm_bf = pl.BlockSpec((1, ho, wo, cp), lambda b: (b, 0, 0, 0))
    vec_spec = pl.BlockSpec((1, cp), lambda b: (0, 0))
    if has_proj:
        as_, cs_ = bn_affine(sts, pad_vec(params["gs"]), pad_vec(params["bs"]))
        kernel3 = functools.partial(_stage3_proj_kernel, cp=cp)
        in_specs3 = [fm_bf, vec_spec, vec_spec, fm_bf, vec_spec, vec_spec]
        args3 = (out2, a2, c2, sc_raw, as_, cs_)
    else:
        kernel3 = functools.partial(_stage3_ident_kernel, cp=cp)
        in_specs3 = [fm_bf, vec_spec, vec_spec, fm_bf]   # x block is f32, same shape
        args3 = (out2, a2, c2, x_cpad)        # identity: stride==1, cin_p==cp, H==ho

    out = pl.pallas_call(
        kernel3,
        grid=(B,),
        in_specs=in_specs3,
        out_specs=pl.BlockSpec((1, ho, wo, cp), lambda b: (b, 0, 0, 0)),
        out_shape=jax.ShapeDtypeStruct((B, ho, wo, cp), jnp.float32),
        compiler_params=_cparams(1),
    )(*args3)

    # crop padded channels, NHWC -> NCHW
    return jnp.transpose(out[:, :, :, :planes], (0, 3, 1, 2))


# ------------------------------ reference (JAX) ------------------------------ #
def _conv_ref(x_nchw, w_hwio, stride, pad):
    # Same matmul numerics as the kernels: bf16 operands, f32 accumulation.
    w_oihw = jnp.transpose(w_hwio, (3, 2, 0, 1)).astype(jnp.bfloat16)
    return lax.conv_general_dilated(
        x_nchw.astype(jnp.bfloat16), w_oihw, (stride, stride),
        ((pad, pad), (pad, pad)),
        dimension_numbers=("NCHW", "OIHW", "NCHW"),
        preferred_element_type=jnp.float32)


def _bn_ref(x_nchw, g, b):
    mean = x_nchw.mean(axis=(0, 2, 3), keepdims=True)
    var = ((x_nchw - mean) ** 2).mean(axis=(0, 2, 3), keepdims=True)
    return (x_nchw - mean) * lax.rsqrt(var + EPS) * g.reshape(1, -1, 1, 1) + b.reshape(1, -1, 1, 1)


def basic_block_ref(x_nchw, params, *, stride):
    in_planes = x_nchw.shape[1]
    planes = params["w1"].shape[-1]
    out = jnp.maximum(_bn_ref(_conv_ref(x_nchw, params["w1"], stride, 1),
                              params["g1"], params["b1"]), 0.0)
    out = _bn_ref(_conv_ref(out, params["w2"], 1, 1), params["g2"], params["b2"])
    if stride != 1 or in_planes != planes:
        ws = params["ws"].reshape(1, 1, *params["ws"].shape)
        sc = _bn_ref(_conv_ref(x_nchw, ws, stride, 0), params["gs"], params["bs"])
    else:
        sc = x_nchw
    return jnp.maximum(out + sc, 0.0)


# ----------------------------------- main ------------------------------------ #
if __name__ == "__main__":
    def make_params(key, cin, planes, proj):
        ks = jax.random.split(key, 9)
        p = {
            "w1": jax.random.normal(ks[0], (3, 3, cin, planes), jnp.float32) * 0.2,
            "w2": jax.random.normal(ks[1], (3, 3, planes, planes), jnp.float32) * 0.2,
            "g1": 1.0 + 0.1 * jax.random.normal(ks[2], (planes,), jnp.float32),
            "b1": 0.1 * jax.random.normal(ks[3], (planes,), jnp.float32),
            "g2": 1.0 + 0.1 * jax.random.normal(ks[4], (planes,), jnp.float32),
            "b2": 0.1 * jax.random.normal(ks[5], (planes,), jnp.float32),
        }
        if proj:
            p["ws"] = jax.random.normal(ks[6], (cin, planes), jnp.float32) * 0.2
            p["gs"] = 1.0 + 0.1 * jax.random.normal(ks[7], (planes,), jnp.float32)
            p["bs"] = 0.1 * jax.random.normal(ks[8], (planes,), jnp.float32)
        return p

    key = jax.random.PRNGKey(0)
    configs = [
        # (in_planes, planes, stride, B, H, W)
        (4, 8, 1, 2, 16, 16),    # projection shortcut (channel change), stride 1
        (8, 16, 2, 2, 16, 16),   # projection shortcut, stride 2 (in-kernel striding)
        (8, 8, 1, 2, 16, 16),    # identity shortcut
    ]
    for idx, (cin, planes, stride, B, H, W) in enumerate(configs):
        k1, k2, key = jax.random.split(key, 3)
        x = jax.random.normal(k1, (B, cin, H, W), jnp.float32)
        proj = stride != 1 or cin != planes
        params = make_params(k2, cin, planes, proj)

        fwd = jax.jit(functools.partial(basic_block_forward, stride=stride))
        out = fwd(x, params)
        jax.block_until_ready(out)

        ref = basic_block_ref(x, params, stride=stride)
        ho = (H - 1) // stride + 1
        wo = (W - 1) // stride + 1
        assert out.shape == (B, planes, ho, wo), (idx, out.shape)
        err = float(jnp.max(jnp.abs(out - ref)))
        # bf16 matmul operands + bf16 inter-stage intermediates -> slightly looser
        # tolerance than a pure-f32 comparison.
        assert jnp.allclose(out, ref, atol=3e-2, rtol=2e-2), (idx, err)

    print("KERNEL_OK")
</pallas_src>

<mosaic_0001>
module attributes {stable_mosaic.version = 11 : i64} {
  func.func @_stage1_kernel(%arg0: i32, %arg1: memref<1x16x16x128xf32, #tpu.memory_space<vmem>>, %arg2: memref<9x128x128xbf16, #tpu.memory_space<vmem>>, %arg3: memref<128x128xbf16, #tpu.memory_space<vmem>>, %arg4: memref<1x16x16x128xbf16, #tpu.memory_space<vmem>>, %arg5: memref<1x8x128xf32, #tpu.memory_space<vmem>>, %arg6: memref<1x16x16x128xbf16, #tpu.memory_space<vmem>>, %arg7: memref<1x8x128xf32, #tpu.memory_space<vmem>>, %arg8: memref<18x18x128xbf16, #tpu.memory_space<vmem>>) attributes {dimension_semantics = [#tpu.dimension_semantics<parallel>], iteration_bounds = array<i64: 2>, scalar_prefetch = 0 : i64, scratch_operands = 1 : i64, tpu.core_type = #tpu.core_type<tc>, window_params = [{transform_indices = @transform_0, window_bounds = array<i64: 1, 16, 16, 128>}, {pipeline_mode = #tpu.pipeline_mode<synchronous>, transform_indices = @transform_1, window_bounds = array<i64: 9, 128, 128>}, {pipeline_mode = #tpu.pipeline_mode<synchronous>, transform_indices = @transform_2, window_bounds = array<i64: 128, 128>}, {transform_indices = @transform_3, window_bounds = array<i64: 1, 16, 16, 128>}, {transform_indices = @transform_4, window_bounds = array<i64: 1, 8, 128>}, {transform_indices = @transform_5, window_bounds = array<i64: 1, 16, 16, 128>}, {transform_indices = @transform_6, window_bounds = array<i64: 1, 8, 128>}]} {
    %cst = arith.constant 0.000000e+00 : bf16
    %0 = vector.broadcast %cst : bf16 to vector<1x18x128xbf16>
    %cst_0 = arith.constant 0.000000e+00 : bf16
    %1 = vector.broadcast %cst_0 : bf16 to vector<18x1x128xbf16>
    %c0 = arith.constant 0 : index
    %c0_1 = arith.constant 0 : index
    %c0_2 = arith.constant 0 : index
    %2 = vector.load %arg8[%c0, %c0_1, %c0_2] : memref<18x18x128xbf16, #tpu.memory_space<vmem>>, vector<1x18x128xbf16>
    tpu.vector_store %arg8[%c0, %c0_1, %c0_2], %0 {strides = array<i32>} : memref<18x18x128xbf16, #tpu.memory_space<vmem>>, vector<1x18x128xbf16>,
    %c17 = arith.constant 17 : index
    %c0_3 = arith.constant 0 : index
    %c0_4 = arith.constant 0 : index
    %3 = vector.load %arg8[%c17, %c0_3, %c0_4] : memref<18x18x128xbf16, #tpu.memory_space<vmem>>, vector<1x18x128xbf16>
    tpu.vector_store %arg8[%c17, %c0_3, %c0_4], %0 {strides = array<i32>} : memref<18x18x128xbf16, #tpu.memory_space<vmem>>, vector<1x18x128xbf16>,
    %c0_5 = arith.constant 0 : index
    %c0_6 = arith.constant 0 : index
    %c0_7 = arith.constant 0 : index
    %4 = vector.load %arg8[%c0_5, %c0_6, %c0_7] : memref<18x18x128xbf16, #tpu.memory_space<vmem>>, vector<18x1x128xbf16>
    tpu.vector_store %arg8[%c0_5, %c0_6, %c0_7], %1 {strides = array<i32>} : memref<18x18x128xbf16, #tpu.memory_space<vmem>>, vector<18x1x128xbf16>,
    %c0_8 = arith.constant 0 : index
    %c17_9 = arith.constant 17 : index
    %c0_10 = arith.constant 0 : index
    %5 = vector.load %arg8[%c0_8, %c17_9, %c0_10] : memref<18x18x128xbf16, #tpu.memory_space<vmem>>, vector<18x1x128xbf16>
    tpu.vector_store %arg8[%c0_8, %c17_9, %c0_10], %1 {strides = array<i32>} : memref<18x18x128xbf16, #tpu.memory_space<vmem>>, vector<18x1x128xbf16>,
    %c0_11 = arith.constant 0 : index
    %c0_12 = arith.constant 0 : index
    %c0_13 = arith.constant 0 : index
    %c0_14 = arith.constant 0 : index
    %6 = vector.load %arg1[%c0_11, %c0_12, %c0_13, %c0_14] : memref<1x16x16x128xf32, #tpu.memory_space<vmem>>, vector<1x16x16x128xf32>
    %7 = vector.shape_cast %6 : vector<1x16x16x128xf32> to vector<16x16x128xf32>
    %8 = arith.truncf %7 : vector<16x16x128xf32> to vector<16x16x128xbf16>
    %c1 = arith.constant 1 : index
    %c1_15 = arith.constant 1 : index
    %c0_16 = arith.constant 0 : index
    %9 = vector.load %arg8[%c1, %c1_15, %c0_16] : memref<18x18x128xbf16, #tpu.memory_space<vmem>>, vector<16x16x128xbf16>
    tpu.vector_store %arg8[%c1, %c1_15, %c0_16], %8 {strides = array<i32>} : memref<18x18x128xbf16, #tpu.memory_space<vmem>>, vector<16x16x128xbf16>,
    %cst_17 = arith.constant 0.000000e+00 : f32
    %10 = vector.broadcast %cst_17 : f32 to vector<256x128xf32>
    %c0_18 = arith.constant 0 : index
    %c0_19 = arith.constant 0 : index
    %c0_20 = arith.constant 0 : index
    %11 = vector.load %arg8[%c0_18, %c0_19, %c0_20] : memref<18x18x128xbf16, #tpu.memory_space<vmem>>, vector<16x16x128xbf16>
    %12 = vector.shape_cast %11 : vector<16x16x128xbf16> to vector<256x128xbf16>
    %c0_21 = arith.constant 0 : index
    %c0_22 = arith.constant 0 : index
    %c0_23 = arith.constant 0 : index
    %13 = vector.load %arg2[%c0_21, %c0_22, %c0_23] : memref<9x128x128xbf16, #tpu.memory_space<vmem>>, vector<1x128x128xbf16>
    %14 = vector.shape_cast %13 : vector<1x128x128xbf16> to vector<128x128xbf16>
    %cst_24 = arith.constant dense<0.000000e+00> : vector<256x128xf32>
    %15 = tpu.matmul %12, %14, %cst_24 {dimension_numbers = #tpu.dot_dimension_numbers<[1], [0], [0], [1], [0, 0, 1, 1], [], []>} : vector<256x128xbf16>, vector<128x128xbf16>, vector<256x128xf32> -> vector<256x128xf32>
    %16 = arith.addf %10, %15 : vector<256x128xf32>
    %c0_25 = arith.constant 0 : index
    %c1_26 = arith.constant 1 : index
    %c0_27 = arith.constant 0 : index
    %17 = vector.load %arg8[%c0_25, %c1_26, %c0_27] : memref<18x18x128xbf16, #tpu.memory_space<vmem>>, vector<16x16x128xbf16>
    %18 = vector.shape_cast %17 : vector<16x16x128xbf16> to vector<256x128xbf16>
    %c1_28 = arith.constant 1 : index
    %c0_29 = arith.constant 0 : index
    %c0_30 = arith.constant 0 : index
    %19 = vector.load %arg2[%c1_28, %c0_29, %c0_30] : memref<9x128x128xbf16, #tpu.memory_space<vmem>>, vector<1x128x128xbf16>
    %20 = vector.shape_cast %19 : vector<1x128x128xbf16> to vector<128x128xbf16>
    %cst_31 = arith.constant dense<0.000000e+00> : vector<256x128xf32>
    %21 = tpu.matmul %18, %20, %cst_31 {dimension_numbers = #tpu.dot_dimension_numbers<[1], [0], [0], [1], [0, 0, 1, 1], [], []>} : vector<256x128xbf16>, vector<128x128xbf16>, vector<256x128xf32> -> vector<256x128xf32>
    %22 = arith.addf %16, %21 : vector<256x128xf32>
    %c0_32 = arith.constant 0 : index
    %c2 = arith.constant 2 : index
    %c0_33 = arith.constant 0 : index
    %23 = vector.load %arg8[%c0_32, %c2, %c0_33] : memref<18x18x128xbf16, #tpu.memory_space<vmem>>, vector<16x16x128xbf16>
    %24 = vector.shape_cast %23 : vector<16x16x128xbf16> to vector<256x128xbf16>
    %c2_34 = arith.constant 2 : index
    %c0_35 = arith.constant 0 : index
    %c0_36 = arith.constant 0 : index
    %25 = vector.load %arg2[%c2_34, %c0_35, %c0_36] : memref<9x128x128xbf16, #tpu.memory_space<vmem>>, vector<1x128x128xbf16>
    %26 = vector.shape_cast %25 : vector<1x128x128xbf16> to vector<128x128xbf16>
    %cst_37 = arith.constant dense<0.000000e+00> : vector<256x128xf32>
    %27 = tpu.matmul %24, %26, %cst_37 {dimension_numbers = #tpu.dot_dimension_numbers<[1], [0], [0], [1], [0, 0, 1, 1], [], []>} : vector<256x128xbf16>, vector<128x128xbf16>, vector<256x128xf32> -> vector<256x128xf32>
    %28 = arith.addf %22, %27 : vector<256x128xf32>
    %c1_38 = arith.constant 1 : index
    %c0_39 = arith.constant 0 : index
    %c0_40 = arith.constant 0 : index
    %29 = vector.load %arg8[%c1_38, %c0_39, %c0_40] : memref<18x18x128xbf16, #tpu.memory_space<vmem>>, vector<16x16x128xbf16>
    %30 = vector.shape_cast %29 : vector<16x16x128xbf16> to vector<256x128xbf16>
    %c3 = arith.constant 3 : index
    %c0_41 = arith.constant 0 : index
    %c0_42 = arith.constant 0 : index
    %31 = vector.load %arg2[%c3, %c0_41, %c0_42] : memref<9x128x128xbf16, #tpu.memory_space<vmem>>, vector<1x128x128xbf16>
    %32 = vector.shape_cast %31 : vector<1x128x128xbf16> to vector<128x128xbf16>
    %cst_43 = arith.constant dense<0.000000e+00> : vector<256x128xf32>
    %33 = tpu.matmul %30, %32, %cst_43 {dimension_numbers = #tpu.dot_dimension_numbers<[1], [0], [0], [1], [0, 0, 1, 1], [], []>} : vector<256x128xbf16>, vector<128x128xbf16>, vector<256x128xf32> -> vector<256x128xf32>
    %34 = arith.addf %28, %33 : vector<256x128xf32>
    %c1_44 = arith.constant 1 : index
    %c1_45 = arith.constant 1 : index
    %c0_46 = arith.constant 0 : index
    %35 = vector.load %arg8[%c1_44, %c1_45, %c0_46] : memref<18x18x128xbf16, #tpu.memory_space<vmem>>, vector<16x16x128xbf16>
    %36 = vector.shape_cast %35 : vector<16x16x128xbf16> to vector<256x128xbf16>
    %c4 = arith.constant 4 : index
    %c0_47 = arith.constant 0 : index
    %c0_48 = arith.constant 0 : index
    %37 = vector.load %arg2[%c4, %c0_47, %c0_48] : memref<9x128x128xbf16, #tpu.memory_space<vmem>>, vector<1x128x128xbf16>
    %38 = vector.shape_cast %37 : vector<1x128x128xbf16> to vector<128x128xbf16>
    %cst_49 = arith.constant dense<0.000000e+00> : vector<256x128xf32>
    %39 = tpu.matmul %36, %38, %cst_49 {dimension_numbers = #tpu.dot_dimension_numbers<[1], [0], [0], [1], [0, 0, 1, 1], [], []>} : vector<256x128xbf16>, vector<128x128xbf16>, vector<256x128xf32> -> vector<256x128xf32>
    %40 = arith.addf %34, %39 : vector<256x128xf32>
    %c1_50 = arith.constant 1 : index
    %c2_51 = arith.constant 2 : index
    %c0_52 = arith.constant 0 : index
    %41 = vector.load %arg8[%c1_50, %c2_51, %c0_52] : memref<18x18x128xbf16, #tpu.memory_space<vmem>>, vector<16x16x128xbf16>
    %42 = vector.shape_cast %41 : vector<16x16x128xbf16> to vector<256x128xbf16>
    %c5 = arith.constant 5 : index
    %c0_53 = arith.constant 0 : index
    %c0_54 = arith.constant 0 : index
    %43 = vector.load %arg2[%c5, %c0_53, %c0_54] : memref<9x128x128xbf16, #tpu.memory_space<vmem>>, vector<1x128x128xbf16>
    %44 = vector.shape_cast %43 : vector<1x128x128xbf16> to vector<128x128xbf16>
    %cst_55 = arith.constant dense<0.000000e+00> : vector<256x128xf32>
    %45 = tpu.matmul %42, %44, %cst_55 {dimension_numbers = #tpu.dot_dimension_numbers<[1], [0], [0], [1], [0, 0, 1, 1], [], []>} : vector<256x128xbf16>, vector<128x128xbf16>, vector<256x128xf32> -> vector<256x128xf32>
    %46 = arith.addf %40, %45 : vector<256x128xf32>
    %c2_56 = arith.constant 2 : index
    %c0_57 = arith.constant 0 : index
    %c0_58 = arith.constant 0 : index
    %47 = vector.load %arg8[%c2_56, %c0_57, %c0_58] : memref<18x18x128xbf16, #tpu.memory_space<vmem>>, vector<16x16x128xbf16>
    %48 = vector.shape_cast %47 : vector<16x16x128xbf16> to vector<256x128xbf16>
    %c6 = arith.constant 6 : index
    %c0_59 = arith.constant 0 : index
    %c0_60 = arith.constant 0 : index
    %49 = vector.load %arg2[%c6, %c0_59, %c0_60] : memref<9x128x128xbf16, #tpu.memory_space<vmem>>, vector<1x128x128xbf16>
    %50 = vector.shape_cast %49 : vector<1x128x128xbf16> to vector<128x128xbf16>
    %cst_61 = arith.constant dense<0.000000e+00> : vector<256x128xf32>
    %51 = tpu.matmul %48, %50, %cst_61 {dimension_numbers = #tpu.dot_dimension_numbers<[1], [0], [0], [1], [0, 0, 1, 1], [], []>} : vector<256x128xbf16>, vector<128x128xbf16>, vector<256x128xf32> -> vector<256x128xf32>
    %52 = arith.addf %46, %51 : vector<256x128xf32>
    %c2_62 = arith.constant 2 : index
    %c1_63 = arith.constant 1 : index
    %c0_64 = arith.constant 0 : index
    %53 = vector.load %arg8[%c2_62, %c1_63, %c0_64] : memref<18x18x128xbf16, #tpu.memory_space<vmem>>, vector<16x16x128xbf16>
    %54 = vector.shape_cast %53 : vector<16x16x128xbf16> to vector<256x128xbf16>
    %c7 = arith.constant 7 : index
    %c0_65 = arith.constant 0 : index
    %c0_66 = arith.constant 0 : index
    %55 = vector.load %arg2[%c7, %c0_65, %c0_66] : memref<9x128x128xbf16, #tpu.memory_space<vmem>>, vector<1x128x128xbf16>
    %56 = vector.shape_cast %55 : vector<1x128x128xbf16> to vector<128x128xbf16>
    %cst_67 = arith.constant dense<0.000000e+00> : vector<256x128xf32>
    %57 = tpu.matmul %54, %56, %cst_67 {dimension_numbers = #tpu.dot_dimension_numbers<[1], [0], [0], [1], [0, 0, 1, 1], [], []>} : vector<256x128xbf16>, vector<128x128xbf16>, vector<256x128xf32> -> vector<256x128xf32>
    %58 = arith.addf %52, %57 : vector<256x128xf32>
    %c2_68 = arith.constant 2 : index
    %c2_69 = arith.constant 2 : index
    %c0_70 = arith.constant 0 : index
    %59 = vector.load %arg8[%c2_68, %c2_69, %c0_70] : memref<18x18x128xbf16, #tpu.memory_space<vmem>>, vector<16x16x128xbf16>
    %60 = vector.shape_cast %59 : vector<16x16x128xbf16> to vector<256x128xbf16>
    %c8 = arith.constant 8 : index
    %c0_71 = arith.constant 0 : index
    %c0_72 = arith.constant 0 : index
    %61 = vector.load %arg2[%c8, %c0_71, %c0_72] : memref<9x128x128xbf16, #tpu.memory_space<vmem>>, vector<1x128x128xbf16>
    %62 = vector.shape_cast %61 : vector<1x128x128xbf16> to vector<128x128xbf16>
    %cst_73 = arith.constant dense<0.000000e+00> : vector<256x128xf32>
    %63 = tpu.matmul %60, %62, %cst_73 {dimension_numbers = #tpu.dot_dimension_numbers<[1], [0], [0], [1], [0, 0, 1, 1], [], []>} : vector<256x128xbf16>, vector<128x128xbf16>, vector<256x128xf32> -> vector<256x128xf32>
    %64 = arith.addf %58, %63 : vector<256x128xf32>
    %65 = arith.truncf %64 : vector<256x128xf32> to vector<256x128xbf16>
    %66 = vector.shape_cast %65 : vector<256x128xbf16> to vector<1x16x16x128xbf16>
    %c0_74 = arith.constant 0 : index
    %c0_75 = arith.constant 0 : index
    %c0_76 = arith.constant 0 : index
    %c0_77 = arith.constant 0 : index
    %67 = vector.load %arg4[%c0_74, %c0_75, %c0_76, %c0_77] : memref<1x16x16x128xbf16, #tpu.memory_space<vmem>>, vector<1x16x16x128xbf16>
    tpu.vector_store %arg4[%c0_74, %c0_75, %c0_76, %c0_77], %66 {strides = array<i32>} : memref<1x16x16x128xbf16, #tpu.memory_space<vmem>>, vector<1x16x16x128xbf16>,
    %cst_78 = arith.constant dense<0.000000e+00> : vector<128xf32>
    %68 = vector.multi_reduction <add>, %64, %cst_78 [0] : vector<256x128xf32> to vector<128xf32>
    %69 = vector.shape_cast %68 : vector<128xf32> to vector<1x128xf32>
    %70 = arith.mulf %64, %64 : vector<256x128xf32>
    %cst_79 = arith.constant dense<0.000000e+00> : vector<128xf32>
    %71 = vector.multi_reduction <add>, %70, %cst_79 [0] : vector<256x128xf32> to vector<128xf32>
    %72 = vector.shape_cast %71 : vector<128xf32> to vector<1x128xf32>
    %cst_80 = arith.constant 0.000000e+00 : f32
    %73 = vector.broadcast %cst_80 : f32 to vector<6x128xf32>
    %74 = tpu.concatenate %69, %72, %73 in 0 : vector<1x128xf32>, vector<1x128xf32>, vector<6x128xf32> -> vector<8x128xf32>
    %75 = vector.shape_cast %74 : vector<8x128xf32> to vector<1x8x128xf32>
    %c0_81 = arith.constant 0 : index
    %c0_82 = arith.constant 0 : index
    %c0_83 = arith.constant 0 : index
    %76 = vector.load %arg5[%c0_81, %c0_82, %c0_83] : memref<1x8x128xf32, #tpu.memory_space<vmem>>, vector<1x8x128xf32>
    tpu.vector_store %arg5[%c0_81, %c0_82, %c0_83], %75 {strides = array<i32>} : memref<1x8x128xf32, #tpu.memory_space<vmem>>, vector<1x8x128xf32>,
    %c0_84 = arith.constant 0 : index
    %c0_85 = arith.constant 0 : index
    %77 = vector.load %arg3[%c0_84, %c0_85] : memref<128x128xbf16, #tpu.memory_space<vmem>>, vector<128x128xbf16>
    %cst_86 = arith.constant dense<0.000000e+00> : vector<256x128xf32>
    %78 = tpu.matmul %36, %77, %cst_86 {dimension_numbers = #tpu.dot_dimension_numbers<[1], [0], [0], [1], [0, 0, 1, 1], [], []>} : vector<256x128xbf16>, vector<128x128xbf16>, vector<256x128xf32> -> vector<256x128xf32>
    %79 = arith.truncf %78 : vector<256x128xf32> to vector<256x128xbf16>
    %80 = vector.shape_cast %79 : vector<256x128xbf16> to vector<1x16x16x128xbf16>
    %c0_87 = arith.constant 0 : index
    %c0_88 = arith.constant 0 : index
    %c0_89 = arith.constant 0 : index
    %c0_90 = arith.constant 0 : index
    %81 = vector.load %arg6[%c0_87, %c0_88, %c0_89, %c0_90] : memref<1x16x16x128xbf16, #tpu.memory_space<vmem>>, vector<1x16x16x128xbf16>
    tpu.vector_store %arg6[%c0_87, %c0_88, %c0_89, %c0_90], %80 {strides = array<i32>} : memref<1x16x16x128xbf16, #tpu.memory_space<vmem>>, vector<1x16x16x128xbf16>,
    %cst_91 = arith.constant dense<0.000000e+00> : vector<128xf32>
    %82 = vector.multi_reduction <add>, %78, %cst_91 [0] : vector<256x128xf32> to vector<128xf32>
    %83 = vector.shape_cast %82 : vector<128xf32> to vector<1x128xf32>
    %84 = arith.mulf %78, %78 : vector<256x128xf32>
    %cst_92 = arith.constant dense<0.000000e+00> : vector<128xf32>
    %85 = vector.multi_reduction <add>, %84, %cst_92 [0] : vector<256x128xf32> to vector<128xf32>
    %86 = vector.shape_cast %85 : vector<128xf32> to vector<1x128xf32>
    %cst_93 = arith.constant 0.000000e+00 : f32
    %87 = vector.broadcast %cst_93 : f32 to vector<6x128xf32>
    %88 = tpu.concatenate %83, %86, %87 in 0 : vector<1x128xf32>, vector<1x128xf32>, vector<6x128xf32> -> vector<8x128xf32>
    %89 = vector.shape_cast %88 : vector<8x128xf32> to vector<1x8x128xf32>
    %c0_94 = arith.constant 0 : index
    %c0_95 = arith.constant 0 : index
    %c0_96 = arith.constant 0 : index
    %90 = vector.load %arg7[%c0_94, %c0_95, %c0_96] : memref<1x8x128xf32, #tpu.memory_space<vmem>>, vector<1x8x128xf32>
    tpu.vector_store %arg7[%c0_94, %c0_95, %c0_96], %89 {strides = array<i32>} : memref<1x8x128xf32, #tpu.memory_space<vmem>>, vector<1x8x128xf32>,
    return
  }
  func.func @transform_0(%arg0: i32) -> (i32, i32, i32, i32) {
    %c0_i32 = arith.constant 0 : i32
    %c0_i32_0 = arith.constant 0 : i32
    %c0_i32_1 = arith.constant 0 : i32
    %c0_i32_2 = arith.constant 0 : i32
    return %arg0, %c0_i32, %c0_i32_0, %c0_i32_1 : i32, i32, i32, i32
  }
  func.func @transform_1(%arg0: i32) -> (i32, i32, i32) {
    %c0_i32 = arith.constant 0 : i32
    %c0_i32_0 = arith.constant 0 : i32
    %c0_i32_1 = arith.constant 0 : i32
    %c0_i32_2 = arith.constant 0 : i32
    return %c0_i32, %c0_i32_0, %c0_i32_1 : i32, i32, i32
  }
  func.func @transform_2(%arg0: i32) -> (i32, i32) {
    %c0_i32 = arith.constant 0 : i32
    %c0_i32_0 = arith.constant 0 : i32
    %c0_i32_1 = arith.constant 0 : i32
    return %c0_i32, %c0_i32_0 : i32, i32
  }
  func.func @transform_3(%arg0: i32) -> (i32, i32, i32, i32) {
    %c0_i32 = arith.constant 0 : i32
    %c0_i32_0 = arith.constant 0 : i32
    %c0_i32_1 = arith.constant 0 : i32
    %c0_i32_2 = arith.constant 0 : i32
    return %arg0, %c0_i32, %c0_i32_0, %c0_i32_1 : i32, i32, i32, i32
  }
  func.func @transform_4(%arg0: i32) -> (i32, i32, i32) {
    %c0_i32 = arith.constant 0 : i32
    %c0_i32_0 = arith.constant 0 : i32
    %c0_i32_1 = arith.constant 0 : i32
    return %arg0, %c0_i32, %c0_i32_0 : i32, i32, i32
  }
  func.func @transform_5(%arg0: i32) -> (i32, i32, i32, i32) {
    %c0_i32 = arith.constant 0 : i32
    %c0_i32_0 = arith.constant 0 : i32
    %c0_i32_1 = arith.constant 0 : i32
    %c0_i32_2 = arith.constant 0 : i32
    return %arg0, %c0_i32, %c0_i32_0, %c0_i32_1 : i32, i32, i32, i32
  }
  func.func @transform_6(%arg0: i32) -> (i32, i32, i32) {
    %c0_i32 = arith.constant 0 : i32
    %c0_i32_0 = arith.constant 0 : i32
    %c0_i32_1 = arith.constant 0 : i32
    return %arg0, %c0_i32, %c0_i32_0 : i32, i32, i32
  }
}

module attributes {stable_mosaic.version = 11 : i64} {
  func.func @_stage2_kernel(%arg0: i32, %arg1: memref<1x16x16x128xbf16, #tpu.memory_space<vmem>>, %arg2: memref<1x128xf32, #tpu.memory_space<vmem>>, %arg3: memref<1x128xf32, #tpu.memory_space<vmem>>, %arg4: memref<9x128x128xbf16, #tpu.memory_space<vmem>>, %arg5: memref<1x16x16x128xbf16, #tpu.memory_space<vmem>>, %arg6: memref<1x8x128xf32, #tpu.memory_space<vmem>>, %arg7: memref<18x18x128xbf16, #tpu.memory_space<vmem>>) attributes {dimension_semantics = [#tpu.dimension_semantics<parallel>], iteration_bounds = array<i64: 2>, scalar_prefetch = 0 : i64, scratch_operands = 1 : i64, tpu.core_type = #tpu.core_type<tc>, window_params = [{transform_indices = @transform_0, window_bounds = array<i64: 1, 16, 16, 128>}, {pipeline_mode = #tpu.pipeline_mode<synchronous>, transform_indices = @transform_1, window_bounds = array<i64: 1, 128>}, {pipeline_mode = #tpu.pipeline_mode<synchronous>, transform_indices = @transform_2, window_bounds = array<i64: 1, 128>}, {pipeline_mode = #tpu.pipeline_mode<synchronous>, transform_indices = @transform_3, window_bounds = array<i64: 9, 128, 128>}, {transform_indices = @transform_4, window_bounds = array<i64: 1, 16, 16, 128>}, {transform_indices = @transform_5, window_bounds = array<i64: 1, 8, 128>}]} {
    %cst = arith.constant 0.000000e+00 : bf16
    %0 = vector.broadcast %cst : bf16 to vector<1x18x128xbf16>
    %cst_0 = arith.constant 0.000000e+00 : bf16
    %1 = vector.broadcast %cst_0 : bf16 to vector<18x1x128xbf16>
    %c0 = arith.constant 0 : index
    %c0_1 = arith.constant 0 : index
    %c0_2 = arith.constant 0 : index
    %2 = vector.load %arg7[%c0, %c0_1, %c0_2] : memref<18x18x128xbf16, #tpu.memory_space<vmem>>, vector<1x18x128xbf16>
    tpu.vector_store %arg7[%c0, %c0_1, %c0_2], %0 {strides = array<i32>} : memref<18x18x128xbf16, #tpu.memory_space<vmem>>, vector<1x18x128xbf16>,
    %c17 = arith.constant 17 : index
    %c0_3 = arith.constant 0 : index
    %c0_4 = arith.constant 0 : index
    %3 = vector.load %arg7[%c17, %c0_3, %c0_4] : memref<18x18x128xbf16, #tpu.memory_space<vmem>>, vector<1x18x128xbf16>
    tpu.vector_store %arg7[%c17, %c0_3, %c0_4], %0 {strides = array<i32>} : memref<18x18x128xbf16, #tpu.memory_space<vmem>>, vector<1x18x128xbf16>,
    %c0_5 = arith.constant 0 : index
    %c0_6 = arith.constant 0 : index
    %c0_7 = arith.constant 0 : index
    %4 = vector.load %arg7[%c0_5, %c0_6, %c0_7] : memref<18x18x128xbf16, #tpu.memory_space<vmem>>, vector<18x1x128xbf16>
    tpu.vector_store %arg7[%c0_5, %c0_6, %c0_7], %1 {strides = array<i32>} : memref<18x18x128xbf16, #tpu.memory_space<vmem>>, vector<18x1x128xbf16>,
    %c0_8 = arith.constant 0 : index
    %c17_9 = arith.constant 17 : index
    %c0_10 = arith.constant 0 : index
    %5 = vector.load %arg7[%c0_8, %c17_9, %c0_10] : memref<18x18x128xbf16, #tpu.memory_space<vmem>>, vector<18x1x128xbf16>
    tpu.vector_store %arg7[%c0_8, %c17_9, %c0_10], %1 {strides = array<i32>} : memref<18x18x128xbf16, #tpu.memory_space<vmem>>, vector<18x1x128xbf16>,
    %c0_11 = arith.constant 0 : index
    %c0_12 = arith.constant 0 : index
    %c0_13 = arith.constant 0 : index
    %c0_14 = arith.constant 0 : index
    %6 = vector.load %arg1[%c0_11, %c0_12, %c0_13, %c0_14] : memref<1x16x16x128xbf16, #tpu.memory_space<vmem>>, vector<1x16x16x128xbf16>
    %7 = arith.extf %6 : vector<1x16x16x128xbf16> to vector<1x16x16x128xf32>
    %c0_15 = arith.constant 0 : index
    %c0_16 = arith.constant 0 : index
    %8 = vector.load %arg2[%c0_15, %c0_16] : memref<1x128xf32, #tpu.memory_space<vmem>>, vector<1x128xf32>
    %9 = vector.shape_cast %8 : vector<1x128xf32> to vector<1x1x1x128xf32>
    %10 = vector.broadcast %9 : vector<1x1x1x128xf32> to vector<1x16x16x128xf32>
    %11 = arith.mulf %7, %10 : vector<1x16x16x128xf32>
    %c0_17 = arith.constant 0 : index
    %c0_18 = arith.constant 0 : index
    %12 = vector.load %arg3[%c0_17, %c0_18] : memref<1x128xf32, #tpu.memory_space<vmem>>, vector<1x128xf32>
    %13 = vector.shape_cast %12 : vector<1x128xf32> to vector<1x1x1x128xf32>
    %14 = vector.broadcast %13 : vector<1x1x1x128xf32> to vector<1x16x16x128xf32>
    %15 = arith.addf %11, %14 : vector<1x16x16x128xf32>
    %cst_19 = arith.constant 0.000000e+00 : f32
    %16 = vector.broadcast %cst_19 : f32 to vector<1x16x16x128xf32>
    %17 = arith.maximumf %15, %16 : vector<1x16x16x128xf32>
    %18 = vector.shape_cast %17 : vector<1x16x16x128xf32> to vector<16x16x128xf32>
    %19 = arith.truncf %18 : vector<16x16x128xf32> to vector<16x16x128xbf16>
    %c1 = arith.constant 1 : index
    %c1_20 = arith.constant 1 : index
    %c0_21 = arith.constant 0 : index
    %20 = vector.load %arg7[%c1, %c1_20, %c0_21] : memref<18x18x128xbf16, #tpu.memory_space<vmem>>, vector<16x16x128xbf16>
    tpu.vector_store %arg7[%c1, %c1_20, %c0_21], %19 {strides = array<i32>} : memref<18x18x128xbf16, #tpu.memory_space<vmem>>, vector<16x16x128xbf16>,
    %cst_22 = arith.constant 0.000000e+00 : f32
    %21 = vector.broadcast %cst_22 : f32 to vector<256x128xf32>
    %c0_23 = arith.constant 0 : index
    %c0_24 = arith.constant 0 : index
    %c0_25 = arith.constant 0 : index
    %22 = vector.load %arg7[%c0_23, %c0_24, %c0_25] : memref<18x18x128xbf16, #tpu.memory_space<vmem>>, vector<16x16x128xbf16>
    %23 = vector.shape_cast %22 : vector<16x16x128xbf16> to vector<256x128xbf16>
    %c0_26 = arith.constant 0 : index
    %c0_27 = arith.constant 0 : index
    %c0_28 = arith.constant 0 : index
    %24 = vector.load %arg4[%c0_26, %c0_27, %c0_28] : memref<9x128x128xbf16, #tpu.memory_space<vmem>>, vector<1x128x128xbf16>
    %25 = vector.shape_cast %24 : vector<1x128x128xbf16> to vector<128x128xbf16>
    %cst_29 = arith.constant dense<0.000000e+00> : vector<256x128xf32>
    %26 = tpu.matmul %23, %25, %cst_29 {dimension_numbers = #tpu.dot_dimension_numbers<[1], [0], [0], [1], [0, 0, 1, 1], [], []>} : vector<256x128xbf16>, vector<128x128xbf16>, vector<256x128xf32> -> vector<256x128xf32>
    %27 = arith.addf %21, %26 : vector<256x128xf32>
    %c0_30 = arith.constant 0 : index
    %c1_31 = arith.constant 1 : index
    %c0_32 = arith.constant 0 : index
    %28 = vector.load %arg7[%c0_30, %c1_31, %c0_32] : memref<18x18x128xbf16, #tpu.memory_space<vmem>>, vector<16x16x128xbf16>
    %29 = vector.shape_cast %28 : vector<16x16x128xbf16> to vector<256x128xbf16>
    %c1_33 = arith.constant 1 : index
    %c0_34 = arith.constant 0 : index
    %c0_35 = arith.constant 0 : index
    %30 = vector.load %arg4[%c1_33, %c0_34, %c0_35] : memref<9x128x128xbf16, #tpu.memory_space<vmem>>, vector<1x128x128xbf16>
    %31 = vector.shape_cast %30 : vector<1x128x128xbf16> to vector<128x128xbf16>
    %cst_36 = arith.constant dense<0.000000e+00> : vector<256x128xf32>
    %32 = tpu.matmul %29, %31, %cst_36 {dimension_numbers = #tpu.dot_dimension_numbers<[1], [0], [0], [1], [0, 0, 1, 1], [], []>} : vector<256x128xbf16>, vector<128x128xbf16>, vector<256x128xf32> -> vector<256x128xf32>
    %33 = arith.addf %27, %32 : vector<256x128xf32>
    %c0_37 = arith.constant 0 : index
    %c2 = arith.constant 2 : index
    %c0_38 = arith.constant 0 : index
    %34 = vector.load %arg7[%c0_37, %c2, %c0_38] : memref<18x18x128xbf16, #tpu.memory_space<vmem>>, vector<16x16x128xbf16>
    %35 = vector.shape_cast %34 : vector<16x16x128xbf16> to vector<256x128xbf16>
    %c2_39 = arith.constant 2 : index
    %c0_40 = arith.constant 0 : index
    %c0_41 = arith.constant 0 : index
    %36 = vector.load %arg4[%c2_39, %c0_40, %c0_41] : memref<9x128x128xbf16, #tpu.memory_space<vmem>>, vector<1x128x128xbf16>
    %37 = vector.shape_cast %36 : vector<1x128x128xbf16> to vector<128x128xbf16>
    %cst_42 = arith.constant dense<0.000000e+00> : vector<256x128xf32>
    %38 = tpu.matmul %35, %37, %cst_42 {dimension_numbers = #tpu.dot_dimension_numbers<[1], [0], [0], [1], [0, 0, 1, 1], [], []>} : vector<256x128xbf16>, vector<128x128xbf16>, vector<256x128xf32> -> vector<256x128xf32>
    %39 = arith.addf %33, %38 : vector<256x128xf32>
    %c1_43 = arith.constant 1 : index
    %c0_44 = arith.constant 0 : index
    %c0_45 = arith.constant 0 : index
    %40 = vector.load %arg7[%c1_43, %c0_44, %c0_45] : memref<18x18x128xbf16, #tpu.memory_space<vmem>>, vector<16x16x128xbf16>
    %41 = vector.shape_cast %40 : vector<16x16x128xbf16> to vector<256x128xbf16>
    %c3 = arith.constant 3 : index
    %c0_46 = arith.constant 0 : index
    %c0_47 = arith.constant 0 : index
    %42 = vector.load %arg4[%c3, %c0_46, %c0_47] : memref<9x128x128xbf16, #tpu.memory_space<vmem>>, vector<1x128x128xbf16>
    %43 = vector.shape_cast %42 : vector<1x128x128xbf16> to vector<128x128xbf16>
    %cst_48 = arith.constant dense<0.000000e+00> : vector<256x128xf32>
    %44 = tpu.matmul %41, %43, %cst_48 {dimension_numbers = #tpu.dot_dimension_numbers<[1], [0], [0], [1], [0, 0, 1, 1], [], []>} : vector<256x128xbf16>, vector<128x128xbf16>, vector<256x128xf32> -> vector<256x128xf32>
    %45 = arith.addf %39, %44 : vector<256x128xf32>
    %c1_49 = arith.constant 1 : index
    %c1_50 = arith.constant 1 : index
    %c0_51 = arith.constant 0 : index
    %46 = vector.load %arg7[%c1_49, %c1_50, %c0_51] : memref<18x18x128xbf16, #tpu.memory_space<vmem>>, vector<16x16x128xbf16>
    %47 = vector.shape_cast %46 : vector<16x16x128xbf16> to vector<256x128xbf16>
    %c4 = arith.constant 4 : index
    %c0_52 = arith.constant 0 : index
    %c0_53 = arith.constant 0 : index
    %48 = vector.load %arg4[%c4, %c0_52, %c0_53] : memref<9x128x128xbf16, #tpu.memory_space<vmem>>, vector<1x128x128xbf16>
    %49 = vector.shape_cast %48 : vector<1x128x128xbf16> to vector<128x128xbf16>
    %cst_54 = arith.constant dense<0.000000e+00> : vector<256x128xf32>
    %50 = tpu.matmul %47, %49, %cst_54 {dimension_numbers = #tpu.dot_dimension_numbers<[1], [0], [0], [1], [0, 0, 1, 1], [], []>} : vector<256x128xbf16>, vector<128x128xbf16>, vector<256x128xf32> -> vector<256x128xf32>
    %51 = arith.addf %45, %50 : vector<256x128xf32>
    %c1_55 = arith.constant 1 : index
    %c2_56 = arith.constant 2 : index
    %c0_57 = arith.constant 0 : index
    %52 = vector.load %arg7[%c1_55, %c2_56, %c0_57] : memref<18x18x128xbf16, #tpu.memory_space<vmem>>, vector<16x16x128xbf16>
    %53 = vector.shape_cast %52 : vector<16x16x128xbf16> to vector<256x128xbf16>
    %c5 = arith.constant 5 : index
    %c0_58 = arith.constant 0 : index
    %c0_59 = arith.constant 0 : index
    %54 = vector.load %arg4[%c5, %c0_58, %c0_59] : memref<9x128x128xbf16, #tpu.memory_space<vmem>>, vector<1x128x128xbf16>
    %55 = vector.shape_cast %54 : vector<1x128x128xbf16> to vector<128x128xbf16>
    %cst_60 = arith.constant dense<0.000000e+00> : vector<256x128xf32>
    %56 = tpu.matmul %53, %55, %cst_60 {dimension_numbers = #tpu.dot_dimension_numbers<[1], [0], [0], [1], [0, 0, 1, 1], [], []>} : vector<256x128xbf16>, vector<128x128xbf16>, vector<256x128xf32> -> vector<256x128xf32>
    %57 = arith.addf %51, %56 : vector<256x128xf32>
    %c2_61 = arith.constant 2 : index
    %c0_62 = arith.constant 0 : index
    %c0_63 = arith.constant 0 : index
    %58 = vector.load %arg7[%c2_61, %c0_62, %c0_63] : memref<18x18x128xbf16, #tpu.memory_space<vmem>>, vector<16x16x128xbf16>
    %59 = vector.shape_cast %58 : vector<16x16x128xbf16> to vector<256x128xbf16>
    %c6 = arith.constant 6 : index
    %c0_64 = arith.constant 0 : index
    %c0_65 = arith.constant 0 : index
    %60 = vector.load %arg4[%c6, %c0_64, %c0_65] : memref<9x128x128xbf16, #tpu.memory_space<vmem>>, vector<1x128x128xbf16>
    %61 = vector.shape_cast %60 : vector<1x128x128xbf16> to vector<128x128xbf16>
    %cst_66 = arith.constant dense<0.000000e+00> : vector<256x128xf32>
    %62 = tpu.matmul %59, %61, %cst_66 {dimension_numbers = #tpu.dot_dimension_numbers<[1], [0], [0], [1], [0, 0, 1, 1], [], []>} : vector<256x128xbf16>, vector<128x128xbf16>, vector<256x128xf32> -> vector<256x128xf32>
    %63 = arith.addf %57, %62 : vector<256x128xf32>
    %c2_67 = arith.constant 2 : index
    %c1_68 = arith.constant 1 : index
    %c0_69 = arith.constant 0 : index
    %64 = vector.load %arg7[%c2_67, %c1_68, %c0_69] : memref<18x18x128xbf16, #tpu.memory_space<vmem>>, vector<16x16x128xbf16>
    %65 = vector.shape_cast %64 : vector<16x16x128xbf16> to vector<256x128xbf16>
    %c7 = arith.constant 7 : index
    %c0_70 = arith.constant 0 : index
    %c0_71 = arith.constant 0 : index
    %66 = vector.load %arg4[%c7, %c0_70, %c0_71] : memref<9x128x128xbf16, #tpu.memory_space<vmem>>, vector<1x128x128xbf16>
    %67 = vector.shape_cast %66 : vector<1x128x128xbf16> to vector<128x128xbf16>
    %cst_72 = arith.constant dense<0.000000e+00> : vector<256x128xf32>
    %68 = tpu.matmul %65, %67, %cst_72 {dimension_numbers = #tpu.dot_dimension_numbers<[1], [0], [0], [1], [0, 0, 1, 1], [], []>} : vector<256x128xbf16>, vector<128x128xbf16>, vector<256x128xf32> -> vector<256x128xf32>
    %69 = arith.addf %63, %68 : vector<256x128xf32>
    %c2_73 = arith.constant 2 : index
    %c2_74 = arith.constant 2 : index
    %c0_75 = arith.constant 0 : index
    %70 = vector.load %arg7[%c2_73, %c2_74, %c0_75] : memref<18x18x128xbf16, #tpu.memory_space<vmem>>, vector<16x16x128xbf16>
    %71 = vector.shape_cast %70 : vector<16x16x128xbf16> to vector<256x128xbf16>
    %c8 = arith.constant 8 : index
    %c0_76 = arith.constant 0 : index
    %c0_77 = arith.constant 0 : index
    %72 = vector.load %arg4[%c8, %c0_76, %c0_77] : memref<9x128x128xbf16, #tpu.memory_space<vmem>>, vector<1x128x128xbf16>
    %73 = vector.shape_cast %72 : vector<1x128x128xbf16> to vector<128x128xbf16>
    %cst_78 = arith.constant dense<0.000000e+00> : vector<256x128xf32>
    %74 = tpu.matmul %71, %73, %cst_78 {dimension_numbers = #tpu.dot_dimension_numbers<[1], [0], [0], [1], [0, 0, 1, 1], [], []>} : vector<256x128xbf16>, vector<128x128xbf16>, vector<256x128xf32> -> vector<256x128xf32>
    %75 = arith.addf %69, %74 : vector<256x128xf32>
    %76 = arith.truncf %75 : vector<256x128xf32> to vector<256x128xbf16>
    %77 = vector.shape_cast %76 : vector<256x128xbf16> to vector<1x16x16x128xbf16>
    %c0_79 = arith.constant 0 : index
    %c0_80 = arith.constant 0 : index
    %c0_81 = arith.constant 0 : index
    %c0_82 = arith.constant 0 : index
    %78 = vector.load %arg5[%c0_79, %c0_80, %c0_81, %c0_82] : memref<1x16x16x128xbf16, #tpu.memory_space<vmem>>, vector<1x16x16x128xbf16>
    tpu.vector_store %arg5[%c0_79, %c0_80, %c0_81, %c0_82], %77 {strides = array<i32>} : memref<1x16x16x128xbf16, #tpu.memory_space<vmem>>, vector<1x16x16x128xbf16>,
    %cst_83 = arith.constant dense<0.000000e+00> : vector<128xf32>
    %79 = vector.multi_reduction <add>, %75, %cst_83 [0] : vector<256x128xf32> to vector<128xf32>
    %80 = vector.shape_cast %79 : vector<128xf32> to vector<1x128xf32>
    %81 = arith.mulf %75, %75 : vector<256x128xf32>
    %cst_84 = arith.constant dense<0.000000e+00> : vector<128xf32>
    %82 = vector.multi_reduction <add>, %81, %cst_84 [0] : vector<256x128xf32> to vector<128xf32>
    %83 = vector.shape_cast %82 : vector<128xf32> to vector<1x128xf32>
    %cst_85 = arith.constant 0.000000e+00 : f32
    %84 = vector.broadcast %cst_85 : f32 to vector<6x128xf32>
    %85 = tpu.concatenate %80, %83, %84 in 0 : vector<1x128xf32>, vector<1x128xf32>, vector<6x128xf32> -> vector<8x128xf32>
    %86 = vector.shape_cast %85 : vector<8x128xf32> to vector<1x8x128xf32>
    %c0_86 = arith.constant 0 : index
    %c0_87 = arith.constant 0 : index
    %c0_88 = arith.constant 0 : index
    %87 = vector.load %arg6[%c0_86, %c0_87, %c0_88] : memref<1x8x128xf32, #tpu.memory_space<vmem>>, vector<1x8x128xf32>
    tpu.vector_store %arg6[%c0_86, %c0_87, %c0_88], %86 {strides = array<i32>} : memref<1x8x128xf32, #tpu.memory_space<vmem>>, vector<1x8x128xf32>,
    return
  }
  func.func @transform_0(%arg0: i32) -> (i32, i32, i32, i32) {
    %c0_i32 = arith.constant 0 : i32
    %c0_i32_0 = arith.constant 0 : i32
    %c0_i32_1 = arith.constant 0 : i32
    %c0_i32_2 = arith.constant 0 : i32
    return %arg0, %c0_i32, %c0_i32_0, %c0_i32_1 : i32, i32, i32, i32
  }
  func.func @transform_1(%arg0: i32) -> (i32, i32) {
    %c0_i32 = arith.constant 0 : i32
    %c0_i32_0 = arith.constant 0 : i32
    %c0_i32_1 = arith.constant 0 : i32
    return %c0_i32, %c0_i32_0 : i32, i32
  }
  func.func @transform_2(%arg0: i32) -> (i32, i32) {
    %c0_i32 = arith.constant 0 : i32
    %c0_i32_0 = arith.constant 0 : i32
    %c0_i32_1 = arith.constant 0 : i32
    return %c0_i32, %c0_i32_0 : i32, i32
  }
  func.func @transform_3(%arg0: i32) -> (i32, i32, i32) {
    %c0_i32 = arith.constant 0 : i32
    %c0_i32_0 = arith.constant 0 : i32
    %c0_i32_1 = arith.constant 0 : i32
    %c0_i32_2 = arith.constant 0 : i32
    return %c0_i32, %c0_i32_0, %c0_i32_1 : i32, i32, i32
  }
  func.func @transform_4(%arg0: i32) -> (i32, i32, i32, i32) {
    %c0_i32 = arith.constant 0 : i32
    %c0_i32_0 = arith.constant 0 : i32
    %c0_i32_1 = arith.constant 0 : i32
    %c0_i32_2 = arith.constant 0 : i32
    return %arg0, %c0_i32, %c0_i32_0, %c0_i32_1 : i32, i32, i32, i32
  }
  func.func @transform_5(%arg0: i32) -> (i32, i32, i32) {
    %c0_i32 = arith.constant 0 : i32
    %c0_i32_0 = arith.constant 0 : i32
    %c0_i32_1 = arith.constant 0 : i32
    return %arg0, %c0_i32, %c0_i32_0 : i32, i32, i32
  }
}

module attributes {stable_mosaic.version = 11 : i64} {
  func.func @_stage3_proj_kernel(%arg0: i32, %arg1: memref<1x16x16x128xbf16, #tpu.memory_space<vmem>>, %arg2: memref<1x128xf32, #tpu.memory_space<vmem>>, %arg3: memref<1x128xf32, #tpu.memory_space<vmem>>, %arg4: memref<1x16x16x128xbf16, #tpu.memory_space<vmem>>, %arg5: memref<1x128xf32, #tpu.memory_space<vmem>>, %arg6: memref<1x128xf32, #tpu.memory_space<vmem>>, %arg7: memref<1x16x16x128xf32, #tpu.memory_space<vmem>>) attributes {dimension_semantics = [#tpu.dimension_semantics<parallel>], iteration_bounds = array<i64: 2>, scalar_prefetch = 0 : i64, scratch_operands = 0 : i64, tpu.core_type = #tpu.core_type<tc>, window_params = [{transform_indices = @transform_0, window_bounds = array<i64: 1, 16, 16, 128>}, {pipeline_mode = #tpu.pipeline_mode<synchronous>, transform_indices = @transform_1, window_bounds = array<i64: 1, 128>}, {pipeline_mode = #tpu.pipeline_mode<synchronous>, transform_indices = @transform_2, window_bounds = array<i64: 1, 128>}, {transform_indices = @transform_3, window_bounds = array<i64: 1, 16, 16, 128>}, {pipeline_mode = #tpu.pipeline_mode<synchronous>, transform_indices = @transform_4, window_bounds = array<i64: 1, 128>}, {pipeline_mode = #tpu.pipeline_mode<synchronous>, transform_indices = @transform_5, window_bounds = array<i64: 1, 128>}, {transform_indices = @transform_6, window_bounds = array<i64: 1, 16, 16, 128>}]} {
    %c0 = arith.constant 0 : index
    %c0_0 = arith.constant 0 : index
    %c0_1 = arith.constant 0 : index
    %c0_2 = arith.constant 0 : index
    %0 = vector.load %arg1[%c0, %c0_0, %c0_1, %c0_2] : memref<1x16x16x128xbf16, #tpu.memory_space<vmem>>, vector<1x16x16x128xbf16>
    %1 = arith.extf %0 : vector<1x16x16x128xbf16> to vector<1x16x16x128xf32>
    %c0_3 = arith.constant 0 : index
    %c0_4 = arith.constant 0 : index
    %2 = vector.load %arg2[%c0_3, %c0_4] : memref<1x128xf32, #tpu.memory_space<vmem>>, vector<1x128xf32>
    %3 = vector.shape_cast %2 : vector<1x128xf32> to vector<1x1x1x128xf32>
    %4 = vector.broadcast %3 : vector<1x1x1x128xf32> to vector<1x16x16x128xf32>
    %5 = arith.mulf %1, %4 : vector<1x16x16x128xf32>
    %c0_5 = arith.constant 0 : index
    %c0_6 = arith.constant 0 : index
    %6 = vector.load %arg3[%c0_5, %c0_6] : memref<1x128xf32, #tpu.memory_space<vmem>>, vector<1x128xf32>
    %7 = vector.shape_cast %6 : vector<1x128xf32> to vector<1x1x1x128xf32>
    %8 = vector.broadcast %7 : vector<1x1x1x128xf32> to vector<1x16x16x128xf32>
    %9 = arith.addf %5, %8 : vector<1x16x16x128xf32>
    %c0_7 = arith.constant 0 : index
    %c0_8 = arith.constant 0 : index
    %c0_9 = arith.constant 0 : index
    %c0_10 = arith.constant 0 : index
    %10 = vector.load %arg4[%c0_7, %c0_8, %c0_9, %c0_10] : memref<1x16x16x128xbf16, #tpu.memory_space<vmem>>, vector<1x16x16x128xbf16>
    %11 = arith.extf %10 : vector<1x16x16x128xbf16> to vector<1x16x16x128xf32>
    %c0_11 = arith.constant 0 : index
    %c0_12 = arith.constant 0 : index
    %12 = vector.load %arg5[%c0_11, %c0_12] : memref<1x128xf32, #tpu.memory_space<vmem>>, vector<1x128xf32>
    %13 = vector.shape_cast %12 : vector<1x128xf32> to vector<1x1x1x128xf32>
    %14 = vector.broadcast %13 : vector<1x1x1x128xf32> to vector<1x16x16x128xf32>
    %15 = arith.mulf %11, %14 : vector<1x16x16x128xf32>
    %c0_13 = arith.constant 0 : index
    %c0_14 = arith.constant 0 : index
    %16 = vector.load %arg6[%c0_13, %c0_14] : memref<1x128xf32, #tpu.memory_space<vmem>>, vector<1x128xf32>
    %17 = vector.shape_cast %16 : vector<1x128xf32> to vector<1x1x1x128xf32>
    %18 = vector.broadcast %17 : vector<1x1x1x128xf32> to vector<1x16x16x128xf32>
    %19 = arith.addf %15, %18 : vector<1x16x16x128xf32>
    %20 = arith.addf %9, %19 : vector<1x16x16x128xf32>
    %cst = arith.constant 0.000000e+00 : f32
    %21 = vector.broadcast %cst : f32 to vector<1x16x16x128xf32>
    %22 = arith.maximumf %20, %21 : vector<1x16x16x128xf32>
    %c0_15 = arith.constant 0 : index
    %c0_16 = arith.constant 0 : index
    %c0_17 = arith.constant 0 : index
    %c0_18 = arith.constant 0 : index
    %23 = vector.load %arg7[%c0_15, %c0_16, %c0_17, %c0_18] : memref<1x16x16x128xf32, #tpu.memory_space<vmem>>, vector<1x16x16x128xf32>
    tpu.vector_store %arg7[%c0_15, %c0_16, %c0_17, %c0_18], %22 {strides = array<i32>} : memref<1x16x16x128xf32, #tpu.memory_space<vmem>>, vector<1x16x16x128xf32>,
    return
  }
  func.func @transform_0(%arg0: i32) -> (i32, i32, i32, i32) {
    %c0_i32 = arith.constant 0 : i32
    %c0_i32_0 = arith.constant 0 : i32
    %c0_i32_1 = arith.constant 0 : i32
    %c0_i32_2 = arith.constant 0 : i32
    return %arg0, %c0_i32, %c0_i32_0, %c0_i32_1 : i32, i32, i32, i32
  }
  func.func @transform_1(%arg0: i32) -> (i32, i32) {
    %c0_i32 = arith.constant 0 : i32
    %c0_i32_0 = arith.constant 0 : i32
    %c0_i32_1 = arith.constant 0 : i32
    return %c0_i32, %c0_i32_0 : i32, i32
  }
  func.func @transform_2(%arg0: i32) -> (i32, i32) {
    %c0_i32 = arith.constant 0 : i32
    %c0_i32_0 = arith.constant 0 : i32
    %c0_i32_1 = arith.constant 0 : i32
    return %c0_i32, %c0_i32_0 : i32, i32
  }
  func.func @transform_3(%arg0: i32) -> (i32, i32, i32, i32) {
    %c0_i32 = arith.constant 0 : i32
    %c0_i32_0 = arith.constant 0 : i32
    %c0_i32_1 = arith.constant 0 : i32
    %c0_i32_2 = arith.constant 0 : i32
    return %arg0, %c0_i32, %c0_i32_0, %c0_i32_1 : i32, i32, i32, i32
  }
  func.func @transform_4(%arg0: i32) -> (i32, i32) {
    %c0_i32 = arith.constant 0 : i32
    %c0_i32_0 = arith.constant 0 : i32
    %c0_i32_1 = arith.constant 0 : i32
    return %c0_i32, %c0_i32_0 : i32, i32
  }
  func.func @transform_5(%arg0: i32) -> (i32, i32) {
    %c0_i32 = arith.constant 0 : i32
    %c0_i32_0 = arith.constant 0 : i32
    %c0_i32_1 = arith.constant 0 : i32
    return %c0_i32, %c0_i32_0 : i32, i32
  }
  func.func @transform_6(%arg0: i32) -> (i32, i32, i32, i32) {
    %c0_i32 = arith.constant 0 : i32
    %c0_i32_0 = arith.constant 0 : i32
    %c0_i32_1 = arith.constant 0 : i32
    %c0_i32_2 = arith.constant 0 : i32
    return %arg0, %c0_i32, %c0_i32_0, %c0_i32_1 : i32, i32, i32, i32
  }
}

</mosaic_0001>

<bundles_post_ra>
// kernel: basic_block_forward.5
= control target key start
LH: loop header
LB: loop body
LE: loop exit
PB: predicated region body
PF: predicated region fallthrough
CT: control target
= control target key end

     0   :  { %s948_s21 = smov 0   ;;  %s1190_s0 = inlined_call_operand.vmem [shape: bf16[2,16,16,128], index: 0, kind: input, shape index: {}]   ;;  %s1191_s1 = inlined_call_operand.vmem [shape: f32[1,128], index: 1, kind: input, shape index: {}]   ;;  %s1192_s2 = inlined_call_operand.vmem [shape: f32[1,128], index: 2, kind: input, shape index: {}]   ;;  %s1193_s3 = inlined_call_operand.vmem [shape: bf16[2,16,16,128], index: 3, kind: input, shape index: {}]   ;;  %s1194_s4 = inlined_call_operand.vmem [shape: f32[1,128], index: 4, kind: input, shape index: {}]   ;;  %s1195_s5 = inlined_call_operand.vmem [shape: f32[1,128], index: 5, kind: input, shape index: {}]   ;;  %s1196_s6 = inlined_call_operand.vmem [shape: f32[2,16,16,128], index: 6, kind: output, shape index: {}]  }
   0x1 LB: > { %s719_s22 = sadd.s32 4294967295, %s911_s21   ;;  %p723_p0 = scmp.ge.s32.totalorder %s911_s21, 1  ;;  %s911_s21 = sphi %s948_s21, %s16_s21  }
   0x2   : > { %p222_p1 = scmp.lt.s32.totalorder %s911_s21, 3 }
   0x4   : > { %p223_p2 = pnand %p723_p0, %p222_p1 }
   0x5   : > { %p257_p3 = scmp.lt.s32.totalorder (!%p223_p2), %s719_s22, 1  ;;  %v972_v0 = vld [vmem:[%s1191_s1] ss:$0 sm:$0xff] (!%p223_p2) }
   0x6   : > { %226 = sbr.rel (%p223_p2) target bundleno = 88 (0x58), region = 44  ;;  %v977_v1 = vld [vmem:[%s1194_s4] ss:$0 sm:$0xff] (!%p223_p2) }
   0x7   : > { %v986_v10 = vld [vmem:[%s1192_s2] ss:$0 sm:$0xff] (!%p223_p2) }
   0x8   : > { %v991_v11 = vld [vmem:[%s1195_s5] ss:$0 sm:$0xff] (!%p223_p2) }
   0xd   : > { %s1198_s22 = smov (!%p257_p3, %s719_s22), 1 }
   0xe   : > { %s736_s23 = sshll.u32 %s1198_s22, 7  ;;  %s738_s14 = sshll.u32 %s1198_s22, 8 }
   0xf   : > { %s962_s26 = scalar_lea.vmem %s1190_s0, %s736_s23  ;;  %s967_s29 = scalar_lea.vmem %s1193_s3, %s736_s23 }
  0x10   : > { %v740_v2 = vld [vmem:[%s962_s26] sm:$0xff]   ;;  %v867_v4 = vld [vmem:[%s962_s26 + $0x8] sm:$0xff]   ;;  %v868_v24 = vld [vmem:[%s962_s26 + $0x10] sm:$0xff]   ;;  %s1015_s17 = scalar_lea.vmem %s1196_s6, %s738_s14 }
  0x11   : > { %v804_v3 = vld [vmem:[%s967_s29] sm:$0xff]   ;;  %v741_v5 = vunpack.c.l.bf16 %v740_v2  ;;  %v742_v7 = vunpack.c.h.bf16 %v740_v2  ;;  %v882_v9 = vld [vmem:[%s967_s29 + $0x8] sm:$0xff]   ;;  %v745_v12 = vunpack.c.l.bf16 %v867_v4  ;;  %v746_v14 = vunpack.c.h.bf16 %v867_v4  ;;  %v883_v25 = vld [vmem:[%s967_s29 + $0x10] sm:$0xff]  }
  0x12   : > { %v805_v6 = vunpack.c.l.bf16 %v804_v3  ;;  %v806_v8 = vunpack.c.h.bf16 %v804_v3  ;;  %v809_v13 = vunpack.c.l.bf16 %v882_v9  ;;  %v810_v15 = vunpack.c.h.bf16 %v882_v9  ;;  %v869_v42 = vld [vmem:[%s962_s26 + $0x18] sm:$0xff]   ;;  %v870_v52 = vld [vmem:[%s962_s26 + $0x20] sm:$0xff]  }
  0x13   : > { %v343_v16 = vmul.f32 %v741_v5, %v972_v0  ;;  %v344_v18 = vmul.f32 %v742_v7, %v972_v0  ;;  %v345_v20 = vmul.f32 %v745_v12, %v972_v0  ;;  %v346_v22 = vmul.f32 %v746_v14, %v972_v0  ;;  %v884_v43 = vld [vmem:[%s967_s29 + $0x18] sm:$0xff]   ;;  %v885_v57 = vld [vmem:[%s967_s29 + $0x20] sm:$0xff]   ;;  %v871_v14 = vld [vmem:[%s962_s26 + $0x28] sm:$0xff]  }
  0x14   : > { %v485_v17 = vmul.f32 %v805_v6, %v977_v1  ;;  %v486_v19 = vmul.f32 %v806_v8, %v977_v1  ;;  %v487_v21 = vmul.f32 %v809_v13, %v977_v1  ;;  %v488_v23 = vmul.f32 %v810_v15, %v977_v1  ;;  %v886_v15 = vld [vmem:[%s967_s29 + $0x28] sm:$0xff]  }
  0x15   : > { %v382_v26 = vadd.f32 %v986_v10, %v343_v16  ;;  %v383_v28 = vadd.f32 %v986_v10, %v344_v18  ;;  %v384_v30 = vadd.f32 %v986_v10, %v345_v20  ;;  %v385_v32 = vadd.f32 %v986_v10, %v346_v22 }
  0x16   : > { %v524_v27 = vadd.f32 %v991_v11, %v485_v17  ;;  %v525_v29 = vadd.f32 %v991_v11, %v486_v19  ;;  %v526_v31 = vadd.f32 %v991_v11, %v487_v21  ;;  %v527_v33 = vadd.f32 %v991_v11, %v488_v23 }
  0x17   : > { %v749_v36 = vunpack.c.l.bf16 %v868_v24  ;;  %v813_v37 = vunpack.c.l.bf16 %v883_v25  ;;  %v750_v40 = vunpack.c.h.bf16 %v868_v24  ;;  %v814_v41 = vunpack.c.h.bf16 %v883_v25 }
  0x18   : > { %v556_v34 = vadd.f32 %v524_v27, %v382_v26  ;;  %v557_v35 = vadd.f32 %v525_v29, %v383_v28  ;;  %v558_v38 = vadd.f32 %v526_v31, %v384_v30  ;;  %v559_v39 = vadd.f32 %v527_v33, %v385_v32  ;;  %v872_v32 = vld [vmem:[%s962_s26 + $0x30] sm:$0xff]  }
  0x19   : > { %v347_v46 = vmul.f32 %v749_v36, %v972_v0  ;;  %v489_v47 = vmul.f32 %v813_v37, %v977_v1  ;;  %v348_v50 = vmul.f32 %v750_v40, %v972_v0  ;;  %v490_v51 = vmul.f32 %v814_v41, %v977_v1  ;;  %v887_v37 = vld [vmem:[%s967_s29 + $0x30] sm:$0xff]  }
  0x1a   : > { %v588_v44 = vmax.f32 %v556_v34, 0.0  ;;  %v589_v45 = vmax.f32 %v557_v35, 0.0  ;;  %v590_v48 = vmax.f32 %v558_v38, 0.0  ;;  %v591_v49 = vmax.f32 %v559_v39, 0.0 }
  0x1b   : > { %v386_v53 = vadd.f32 %v986_v10, %v347_v46  ;;  %v528_v54 = vadd.f32 %v991_v11, %v489_v47  ;;  %v753_v55 = vunpack.c.l.bf16 %v869_v42  ;;  %v817_v56 = vunpack.c.l.bf16 %v884_v43  ;;  %v873_v46 = vld [vmem:[%s962_s26 + $0x38] sm:$0xff]  }
  0x1c   : > { %620 = vst [vmem:[%s1015_s17] sm:$0xff] %v588_v44  ;;  %621 = vst [vmem:[%s1015_s17 + $0x8] sm:$0xff] %v589_v45  ;;  %v387_v58 = vadd.f32 %v986_v10, %v348_v50  ;;  %v529_v59 = vadd.f32 %v991_v11, %v490_v51  ;;  %v754_v60 = vunpack.c.h.bf16 %v869_v42  ;;  %v818_v61 = vunpack.c.h.bf16 %v884_v43 }
  0x1d   : > { %622 = vst [vmem:[%s1015_s17 + $0x10] sm:$0xff] %v590_v48  ;;  %623 = vst [vmem:[%s1015_s17 + $0x18] sm:$0xff] %v591_v49  ;;  %v560_v62 = vadd.f32 %v528_v54, %v386_v53  ;;  %v349_v63 = vmul.f32 %v753_v55, %v972_v0  ;;  %v491_v2 = vmul.f32 %v817_v56, %v977_v1  ;;  %v757_v3 = vunpack.c.l.bf16 %v870_v52  ;;  %v888_v55 = vld [vmem:[%s967_s29 + $0x38] sm:$0xff]  }
  0x1e   : > { %v561_v4 = vadd.f32 %v529_v59, %v387_v58  ;;  %v350_v5 = vmul.f32 %v754_v60, %v972_v0  ;;  %v492_v6 = vmul.f32 %v818_v61, %v977_v1  ;;  %v821_v7 = vunpack.c.l.bf16 %v885_v57 }
  0x1f   : > { %v592_v8 = vmax.f32 %v560_v62, 0.0  ;;  %v388_v9 = vadd.f32 %v986_v10, %v349_v63  ;;  %v530_v12 = vadd.f32 %v991_v11, %v491_v2  ;;  %v351_v13 = vmul.f32 %v757_v3, %v972_v0 }
  0x20   : > { %v593_v16 = vmax.f32 %v561_v4, 0.0  ;;  %v389_v17 = vadd.f32 %v986_v10, %v350_v5  ;;  %v531_v18 = vadd.f32 %v991_v11, %v492_v6  ;;  %v493_v19 = vmul.f32 %v821_v7, %v977_v1  ;;  %v874_v6 = vld [vmem:[%s962_s26 + $0x40] sm:$0xff]  }
  0x21   : > { %624 = vst [vmem:[%s1015_s17 + $0x20] sm:$0xff] %v592_v8  ;;  %v562_v20 = vadd.f32 %v530_v12, %v388_v9  ;;  %v390_v21 = vadd.f32 %v986_v10, %v351_v13  ;;  %v758_v22 = vunpack.c.h.bf16 %v870_v52  ;;  %v822_v23 = vunpack.c.h.bf16 %v885_v57  ;;  %v889_v13 = vld [vmem:[%s967_s29 + $0x40] sm:$0xff]  }
  0x22   : > { %625 = vst [vmem:[%s1015_s17 + $0x28] sm:$0xff] %v593_v16  ;;  %v563_v24 = vadd.f32 %v531_v18, %v389_v17  ;;  %v532_v25 = vadd.f32 %v991_v11, %v493_v19  ;;  %v761_v26 = vunpack.c.l.bf16 %v871_v14  ;;  %v825_v27 = vunpack.c.l.bf16 %v886_v15 }
  0x23   : > { %v594_v28 = vmax.f32 %v562_v20, 0.0  ;;  %v352_v29 = vmul.f32 %v758_v22, %v972_v0  ;;  %v494_v30 = vmul.f32 %v822_v23, %v977_v1  ;;  %v762_v31 = vunpack.c.h.bf16 %v871_v14 }
  0x24   : > { %v595_v33 = vmax.f32 %v563_v24, 0.0  ;;  %v564_v34 = vadd.f32 %v532_v25, %v390_v21  ;;  %v353_v35 = vmul.f32 %v761_v26, %v972_v0  ;;  %v495_v36 = vmul.f32 %v825_v27, %v977_v1  ;;  %v875_v26 = vld [vmem:[%s962_s26 + $0x48] sm:$0xff]  }
  0x25   : > { %626 = vst [vmem:[%s1015_s17 + $0x30] sm:$0xff] %v594_v28  ;;  %v391_v38 = vadd.f32 %v986_v10, %v352_v29  ;;  %v533_v39 = vadd.f32 %v991_v11, %v494_v30  ;;  %v354_v40 = vmul.f32 %v762_v31, %v972_v0  ;;  %v826_v41 = vunpack.c.h.bf16 %v886_v15  ;;  %v890_v27 = vld [vmem:[%s967_s29 + $0x48] sm:$0xff]  }
  0x26   : > { %627 = vst [vmem:[%s1015_s17 + $0x38] sm:$0xff] %v595_v33  ;;  %v596_v42 = vmax.f32 %v564_v34, 0.0  ;;  %v392_v43 = vadd.f32 %v986_v10, %v353_v35  ;;  %v534_v44 = vadd.f32 %v991_v11, %v495_v36  ;;  %v765_v45 = vunpack.c.l.bf16 %v872_v32 }
  0x27   : > { %v565_v47 = vadd.f32 %v533_v39, %v391_v38  ;;  %v393_v48 = vadd.f32 %v986_v10, %v354_v40  ;;  %v496_v49 = vmul.f32 %v826_v41, %v977_v1  ;;  %v829_v50 = vunpack.c.l.bf16 %v887_v37  ;;  %v876_v40 = vld [vmem:[%s962_s26 + $0x50] sm:$0xff]  }
  0x28   : > { %628 = vst [vmem:[%s1015_s17 + $0x40] sm:$0xff] %v596_v42  ;;  %v566_v51 = vadd.f32 %v534_v44, %v392_v43  ;;  %v355_v52 = vmul.f32 %v765_v45, %v972_v0  ;;  %v766_v53 = vunpack.c.h.bf16 %v872_v32  ;;  %v830_v54 = vunpack.c.h.bf16 %v887_v37  ;;  %v891_v45 = vld [vmem:[%s967_s29 + $0x50] sm:$0xff]  }
  0x29   : > { %v597_v56 = vmax.f32 %v565_v47, 0.0  ;;  %v535_v57 = vadd.f32 %v991_v11, %v496_v49  ;;  %v497_v58 = vmul.f32 %v829_v50, %v977_v1  ;;  %v769_v59 = vunpack.c.l.bf16 %v873_v46 }
  0x2a   : > { %v598_v60 = vmax.f32 %v566_v51, 0.0  ;;  %v394_v61 = vadd.f32 %v986_v10, %v355_v52  ;;  %v356_v62 = vmul.f32 %v766_v53, %v972_v0  ;;  %v498_v63 = vmul.f32 %v830_v54, %v977_v1 }
  0x2b   : > { %629 = vst [vmem:[%s1015_s17 + $0x48] sm:$0xff] %v597_v56  ;;  %v567_v2 = vadd.f32 %v535_v57, %v393_v48  ;;  %v536_v3 = vadd.f32 %v991_v11, %v497_v58  ;;  %v357_v4 = vmul.f32 %v769_v59, %v972_v0  ;;  %v833_v5 = vunpack.c.l.bf16 %v888_v55 }
  0x2c   : > { %630 = vst [vmem:[%s1015_s17 + $0x50] sm:$0xff] %v598_v60  ;;  %v395_v7 = vadd.f32 %v986_v10, %v356_v62  ;;  %v537_v8 = vadd.f32 %v991_v11, %v498_v63  ;;  %v770_v9 = vunpack.c.h.bf16 %v873_v46  ;;  %v834_v12 = vunpack.c.h.bf16 %v888_v55  ;;  %v877_v62 = vld [vmem:[%s962_s26 + $0x58] sm:$0xff]  }
  0x2d   : > { %v599_v14 = vmax.f32 %v567_v2, 0.0  ;;  %v568_v15 = vadd.f32 %v536_v3, %v394_v61  ;;  %v396_v16 = vadd.f32 %v986_v10, %v357_v4  ;;  %v499_v17 = vmul.f32 %v833_v5, %v977_v1  ;;  %v892_v5 = vld [vmem:[%s967_s29 + $0x58] sm:$0xff]  }
  0x2e   : > { %v569_v18 = vadd.f32 %v537_v8, %v395_v7  ;;  %v358_v19 = vmul.f32 %v770_v9, %v972_v0  ;;  %v500_v20 = vmul.f32 %v834_v12, %v977_v1  ;;  %v773_v21 = vunpack.c.l.bf16 %v874_v6 }
  0x2f   : > { %631 = vst [vmem:[%s1015_s17 + $0x58] sm:$0xff] %v599_v14  ;;  %v600_v22 = vmax.f32 %v568_v15, 0.0  ;;  %v538_v23 = vadd.f32 %v991_v11, %v499_v17  ;;  %v837_v24 = vunpack.c.l.bf16 %v889_v13  ;;  %v774_v25 = vunpack.c.h.bf16 %v874_v6 }
  0x30   : > { %v601_v28 = vmax.f32 %v569_v18, 0.0  ;;  %v397_v29 = vadd.f32 %v986_v10, %v358_v19  ;;  %v539_v30 = vadd.f32 %v991_v11, %v500_v20  ;;  %v359_v31 = vmul.f32 %v773_v21, %v972_v0  ;;  %v878_v20 = vld [vmem:[%s962_s26 + $0x60] sm:$0xff]  }
  0x31   : > { %632 = vst [vmem:[%s1015_s17 + $0x60] sm:$0xff] %v600_v22  ;;  %v570_v32 = vadd.f32 %v538_v23, %v396_v16  ;;  %v501_v33 = vmul.f32 %v837_v24, %v977_v1  ;;  %v360_v34 = vmul.f32 %v774_v25, %v972_v0  ;;  %v838_v35 = vunpack.c.h.bf16 %v889_v13  ;;  %v893_v25 = vld [vmem:[%s967_s29 + $0x60] sm:$0xff]  }
  0x32   : > { %633 = vst [vmem:[%s1015_s17 + $0x68] sm:$0xff] %v601_v28  ;;  %v571_v36 = vadd.f32 %v539_v30, %v397_v29  ;;  %v398_v37 = vadd.f32 %v986_v10, %v359_v31  ;;  %v777_v38 = vunpack.c.l.bf16 %v875_v26  ;;  %v841_v39 = vunpack.c.l.bf16 %v890_v27 }
  0x33   : > { %v602_v41 = vmax.f32 %v570_v32, 0.0  ;;  %v540_v42 = vadd.f32 %v991_v11, %v501_v33  ;;  %v399_v43 = vadd.f32 %v986_v10, %v360_v34  ;;  %v502_v44 = vmul.f32 %v838_v35, %v977_v1  ;;  %v879_v34 = vld [vmem:[%s962_s26 + $0x68] sm:$0xff]  }
  0x34   : > { %v603_v46 = vmax.f32 %v571_v36, 0.0  ;;  %v361_v47 = vmul.f32 %v777_v38, %v972_v0  ;;  %v503_v48 = vmul.f32 %v841_v39, %v977_v1  ;;  %v778_v49 = vunpack.c.h.bf16 %v875_v26 }
  0x35   : > { %634 = vst [vmem:[%s1015_s17 + $0x70] sm:$0xff] %v602_v41  ;;  %v572_v50 = vadd.f32 %v540_v42, %v398_v37  ;;  %v541_v51 = vadd.f32 %v991_v11, %v502_v44  ;;  %v842_v52 = vunpack.c.h.bf16 %v890_v27  ;;  %v781_v53 = vunpack.c.l.bf16 %v876_v40 }
  0x36   : > { %635 = vst [vmem:[%s1015_s17 + $0x78] sm:$0xff] %v603_v46  ;;  %v400_v54 = vadd.f32 %v986_v10, %v361_v47  ;;  %v542_v55 = vadd.f32 %v991_v11, %v503_v48  ;;  %v362_v56 = vmul.f32 %v778_v49, %v972_v0  ;;  %v845_v57 = vunpack.c.l.bf16 %v891_v45 }
  0x37   : > { %v604_v58 = vmax.f32 %v572_v50, 0.0  ;;  %v573_v59 = vadd.f32 %v541_v51, %v399_v43  ;;  %v504_v60 = vmul.f32 %v842_v52, %v977_v1  ;;  %v363_v61 = vmul.f32 %v781_v53, %v972_v0  ;;  %v894_v43 = vld [vmem:[%s967_s29 + $0x68] sm:$0xff]  }
  0x38   : > { %v574_v63 = vadd.f32 %v542_v55, %v400_v54  ;;  %v401_v2 = vadd.f32 %v986_v10, %v362_v56  ;;  %v505_v3 = vmul.f32 %v845_v57, %v977_v1  ;;  %v782_v4 = vunpack.c.h.bf16 %v876_v40  ;;  %v880_v56 = vld [vmem:[%s962_s26 + $0x70] sm:$0xff]  }
  0x39   : > { %636 = vst [vmem:[%s1015_s17 + $0x80] sm:$0xff] %v604_v58  ;;  %v605_v6 = vmax.f32 %v573_v59, 0.0  ;;  %v543_v7 = vadd.f32 %v991_v11, %v504_v60  ;;  %v402_v8 = vadd.f32 %v986_v10, %v363_v61  ;;  %v846_v9 = vunpack.c.h.bf16 %v891_v45  ;;  %v895_v57 = vld [vmem:[%s967_s29 + $0x70] sm:$0xff]  }
  0x3a   : > { %v606_v12 = vmax.f32 %v574_v63, 0.0  ;;  %v544_v13 = vadd.f32 %v991_v11, %v505_v3  ;;  %v364_v14 = vmul.f32 %v782_v4, %v972_v0  ;;  %v785_v15 = vunpack.c.l.bf16 %v877_v62 }
  0x3b   : > { %637 = vst [vmem:[%s1015_s17 + $0x88] sm:$0xff] %v605_v6  ;;  %v575_v16 = vadd.f32 %v543_v7, %v401_v2  ;;  %v506_v17 = vmul.f32 %v846_v9, %v977_v1  ;;  %v849_v18 = vunpack.c.l.bf16 %v892_v5  ;;  %v786_v19 = vunpack.c.h.bf16 %v877_v62 }
  0x3c   : > { %638 = vst [vmem:[%s1015_s17 + $0x90] sm:$0xff] %v606_v12  ;;  %v576_v21 = vadd.f32 %v544_v13, %v402_v8  ;;  %v403_v22 = vadd.f32 %v986_v10, %v364_v14  ;;  %v365_v23 = vmul.f32 %v785_v15, %v972_v0  ;;  %v850_v24 = vunpack.c.h.bf16 %v892_v5  ;;  %v881_v14 = vld [vmem:[%s962_s26 + $0x78] sm:$0xff]  }
  0x3d   : > { %v607_v26 = vmax.f32 %v575_v16, 0.0  ;;  %v545_v27 = vadd.f32 %v991_v11, %v506_v17  ;;  %v507_v28 = vmul.f32 %v849_v18, %v977_v1  ;;  %v366_v29 = vmul.f32 %v786_v19, %v972_v0  ;;  %v896_v15 = vld [vmem:[%s967_s29 + $0x78] sm:$0xff]  }
  0x3e   : > { %v608_v30 = vmax.f32 %v576_v21, 0.0  ;;  %v404_v31 = vadd.f32 %v986_v10, %v365_v23  ;;  %v508_v32 = vmul.f32 %v850_v24, %v977_v1  ;;  %v789_v33 = vunpack.c.l.bf16 %v878_v20 }
  0x3f   : > { %639 = vst [vmem:[%s1015_s17 + $0x98] sm:$0xff] %v607_v26  ;;  %v577_v35 = vadd.f32 %v545_v27, %v403_v22  ;;  %v546_v36 = vadd.f32 %v991_v11, %v507_v28  ;;  %v405_v37 = vadd.f32 %v986_v10, %v366_v29  ;;  %v853_v38 = vunpack.c.l.bf16 %v893_v25 }
  0x40   : > { %640 = vst [vmem:[%s1015_s17 + $0xa0] sm:$0xff] %v608_v30  ;;  %v547_v39 = vadd.f32 %v991_v11, %v508_v32  ;;  %v367_v40 = vmul.f32 %v789_v33, %v972_v0  ;;  %v790_v41 = vunpack.c.h.bf16 %v878_v20  ;;  %v854_v42 = vunpack.c.h.bf16 %v893_v25 }
  0x41   : > { %v609_v44 = vmax.f32 %v577_v35, 0.0  ;;  %v578_v45 = vadd.f32 %v546_v36, %v404_v31  ;;  %v509_v46 = vmul.f32 %v853_v38, %v977_v1  ;;  %v793_v47 = vunpack.c.l.bf16 %v879_v34 }
  0x42   : > { %v579_v48 = vadd.f32 %v547_v39, %v405_v37  ;;  %v406_v49 = vadd.f32 %v986_v10, %v367_v40  ;;  %v368_v50 = vmul.f32 %v790_v41, %v972_v0  ;;  %v510_v51 = vmul.f32 %v854_v42, %v977_v1 }
  0x43   : > { %641 = vst [vmem:[%s1015_s17 + $0xa8] sm:$0xff] %v609_v44  ;;  %v610_v52 = vmax.f32 %v578_v45, 0.0  ;;  %v548_v53 = vadd.f32 %v991_v11, %v509_v46  ;;  %v369_v54 = vmul.f32 %v793_v47, %v972_v0  ;;  %v857_v55 = vunpack.c.l.bf16 %v894_v43 }
  0x44   : > { %v611_v58 = vmax.f32 %v579_v48, 0.0  ;;  %v407_v59 = vadd.f32 %v986_v10, %v368_v50  ;;  %v549_v60 = vadd.f32 %v991_v11, %v510_v51  ;;  %v794_v61 = vunpack.c.h.bf16 %v879_v34 }
  0x45   : > { %642 = vst [vmem:[%s1015_s17 + $0xb0] sm:$0xff] %v610_v52  ;;  %v580_v62 = vadd.f32 %v548_v53, %v406_v49  ;;  %v408_v63 = vadd.f32 %v986_v10, %v369_v54  ;;  %v511_v2 = vmul.f32 %v857_v55, %v977_v1  ;;  %v858_v3 = vunpack.c.h.bf16 %v894_v43 }
  0x46   : > { %643 = vst [vmem:[%s1015_s17 + $0xb8] sm:$0xff] %v611_v58  ;;  %v581_v4 = vadd.f32 %v549_v60, %v407_v59  ;;  %v370_v5 = vmul.f32 %v794_v61, %v972_v0  ;;  %v797_v6 = vunpack.c.l.bf16 %v880_v56  ;;  %v861_v7 = vunpack.c.l.bf16 %v895_v57 }
  0x47   : > { %v612_v8 = vmax.f32 %v580_v62, 0.0  ;;  %v550_v9 = vadd.f32 %v991_v11, %v511_v2  ;;  %v512_v12 = vmul.f32 %v858_v3, %v977_v1  ;;  %v798_v13 = vunpack.c.h.bf16 %v880_v56 }
  0x48   : > { %v613_v16 = vmax.f32 %v581_v4, 0.0  ;;  %v409_v17 = vadd.f32 %v986_v10, %v370_v5  ;;  %v371_v18 = vmul.f32 %v797_v6, %v972_v0  ;;  %v513_v19 = vmul.f32 %v861_v7, %v977_v1 }
  0x49   : > { %644 = vst [vmem:[%s1015_s17 + $0xc0] sm:$0xff] %v612_v8  ;;  %v582_v20 = vadd.f32 %v550_v9, %v408_v63  ;;  %v551_v21 = vadd.f32 %v991_v11, %v512_v12  ;;  %v372_v22 = vmul.f32 %v798_v13, %v972_v0  ;;  %v862_v23 = vunpack.c.h.bf16 %v895_v57 }
  0x4a   : > { %645 = vst [vmem:[%s1015_s17 + $0xc8] sm:$0xff] %v613_v16  ;;  %v410_v24 = vadd.f32 %v986_v10, %v371_v18  ;;  %v552_v25 = vadd.f32 %v991_v11, %v513_v19  ;;  %v801_v26 = vunpack.c.l.bf16 %v881_v14  ;;  %v865_v27 = vunpack.c.l.bf16 %v896_v15 }
  0x4b   : > { %v614_v28 = vmax.f32 %v582_v20, 0.0  ;;  %v583_v29 = vadd.f32 %v551_v21, %v409_v17  ;;  %v411_v30 = vadd.f32 %v986_v10, %v372_v22  ;;  %v514_v31 = vmul.f32 %v862_v23, %v977_v1 }
  0x4c   : > { %v584_v32 = vadd.f32 %v552_v25, %v410_v24  ;;  %v373_v33 = vmul.f32 %v801_v26, %v972_v0  ;;  %v515_v34 = vmul.f32 %v865_v27, %v977_v1  ;;  %v802_v35 = vunpack.c.h.bf16 %v881_v14 }
  0x4d   : > { %646 = vst [vmem:[%s1015_s17 + $0xd0] sm:$0xff] %v614_v28  ;;  %v615_v36 = vmax.f32 %v583_v29, 0.0  ;;  %v553_v37 = vadd.f32 %v991_v11, %v514_v31  ;;  %v866_v38 = vunpack.c.h.bf16 %v896_v15 }
  0x4e   : > { %v616_v39 = vmax.f32 %v584_v32, 0.0  ;;  %v412_v40 = vadd.f32 %v986_v10, %v373_v33  ;;  %v554_v41 = vadd.f32 %v991_v11, %v515_v34  ;;  %v374_v42 = vmul.f32 %v802_v35, %v972_v0 }
  0x4f   : > { %647 = vst [vmem:[%s1015_s17 + $0xd8] sm:$0xff] %v615_v36  ;;  %v585_v43 = vadd.f32 %v553_v37, %v411_v30  ;;  %v516_v44 = vmul.f32 %v866_v38, %v977_v1 }
  0x50   : > { %648 = vst [vmem:[%s1015_s17 + $0xe0] sm:$0xff] %v616_v39  ;;  %v586_v45 = vadd.f32 %v554_v41, %v412_v40  ;;  %v413_v46 = vadd.f32 %v986_v10, %v374_v42 }
  0x51   : > { %v617_v47 = vmax.f32 %v585_v43, 0.0  ;;  %v555_v48 = vadd.f32 %v991_v11, %v516_v44 }
  0x52   : > { %v618_v49 = vmax.f32 %v586_v45, 0.0 }
  0x53   : > { %649 = vst [vmem:[%s1015_s17 + $0xe8] sm:$0xff] %v617_v47  ;;  %v587_v50 = vadd.f32 %v555_v48, %v413_v46 }
  0x54   : > { %650 = vst [vmem:[%s1015_s17 + $0xf0] sm:$0xff] %v618_v49 }
  0x55   : > { %v619_v51 = vmax.f32 %v587_v50, 0.0 }
  0x57   : > { %651 = vst [vmem:[%s1015_s17 + $0xf8] sm:$0xff] %v619_v51 }
  0x58 PF: > { %s16_s21 = sadd.s32 1, %s911_s21  }
  0x59   : > { %p13_p4 = scmp.ge.s32.totalorder %s16_s21, 4  }
  0x5b   :  { %15 = sbr.rel (!%p13_p4) target bundleno = 1 (0x1), region = 77 }

// kernel: basic_block_forward.4
= control target key start
LH: loop header
LB: loop body
LE: loop exit
PB: predicated region body
PF: predicated region fallthrough
CT: control target
= control target key end

     0   :  { %s8112_s18 = smov 0   ;;  %s10028_s0 = inlined_call_operand.vmem [shape: bf16[2,16,16,128], index: 0, kind: input, shape index: {}]   ;;  %s10029_s1 = inlined_call_operand.vmem [shape: f32[1,128], index: 1, kind: input, shape index: {}]   ;;  %s10030_s2 = inlined_call_operand.vmem [shape: f32[1,128], index: 2, kind: input, shape index: {}]   ;;  %s10031_s3 = inlined_call_operand.vmem [shape: bf16[9,128,128], index: 3, kind: input, shape index: {}]   ;;  %s10032_s4 = inlined_call_operand.vmem [shape: bf16[2,16,16,128], index: 4, kind: output, shape index: {0}]   ;;  %s10033_s5 = inlined_call_operand.vmem [shape: f32[2,8,128], index: 5, kind: output, shape index: {1}]  }
   0x1 LB: > { %s6229_s19 = sadd.s32 4294967295, %s8079_s18   ;;  %p6233_p0 = scmp.ge.s32.totalorder %s8079_s18, 1  ;;  %s8079_s18 = sphi %s8112_s18, %s16_s18  }
   0x2   : > { %p190_p1 = scmp.lt.s32.totalorder %s8079_s18, 3 }
   0x4   : > { %p191_p2 = pnand %p6233_p0, %p190_p1 }
   0x6   : > { %194 = sbr.rel (%p191_p2) target bundleno = 720 (0x2d0), region = 36 }
   0xd   : > { %v7868_v0 = vld [vmem:[%s10031_s3 + $0x40] sm:$0xff]   ;;  %v8081_v2 = vmov 0   ;;  %v7870_v3 = vld [vmem:[%s10031_s3 + $0x48] sm:$0xff]   ;;  %v7872_v5 = vld [vmem:[%s10031_s3 + $0x50] sm:$0xff]   ;;  %p222_p3 = scmp.lt.s32.totalorder %s6229_s19, 1  ;;  %vm244_vm0 = vcmask 1040384  }
   0xe   : > { %v7869_v1 = vld [vmem:[%s10031_s3 + $0x100] sm:$0xff]   ;;  %237 = vst [vmem:[#allocation2] sm:$0xf] %v8081_v2  ;;  %238 = vst [vmem:[#allocation2 + $0x4] sm:$0xf] %v8081_v2  ;;  %7155 = vmatprep.subr.bf16.mxu1 %v7868_v0  ;;  %v7871_v4 = vld [vmem:[%s10031_s3 + $0x108] sm:$0xff]  }
   0xf   : > { %239 = vst [vmem:[#allocation2 + $0x8] sm:$0x1] %v8081_v2  ;;  %241 = vst [vmem:[#allocation2 + $0xcc] sm:$0xf] %v8081_v2  ;;  %7347 = vmatprep.subr.bf16.mxu0 %v7869_v1  ;;  %7156 = vmatpush3.bf16.msra.mxu1 %v7868_v0  ;;  %v7873_v6 = vld [vmem:[%s10031_s3 + $0x110] sm:$0xff]   ;;  %v7874_v7 = vld [vmem:[%s10031_s3 + $0x58] sm:$0xff]  }
  0x10   : > { %242 = vst [vmem:[#allocation2 + $0xd0] sm:$0xf] %v8081_v2  ;;  %243 = vst [vmem:[#allocation2 + $0xd4] sm:$0x1] %v8081_v2  ;;  %7348 = vmatpush3.bf16.msra.mxu0 %v7869_v1  ;;  %7157 = vmatprep.subr.bf16.mxu1 %v7870_v3  ;;  %s10110_s19 = smov (!%p222_p3, %s6229_s19), 1  ;;  %v7875_v8 = vld [vmem:[%s10031_s3 + $0x118] sm:$0xff]  }
  0x11   : > { %7349 = vmatprep.subr.bf16.mxu0 %v7871_v4  ;;  %v7876_v9 = vld [vmem:[%s10031_s3 + $0x60] sm:$0xff]   ;;  %s6699_s13 = sshll.u32 %s10110_s19, 7  ;;  %v7878_v11 = vld [vmem:[%s10031_s3 + $0x68] sm:$0xff]   ;;  %vm245_vm1 = vsmask.f32 256  ;;  %v7880_v22 = vld [vmem:[%s10031_s3 + $0x70] sm:$0xff]  }
  0x12   : > { %v7877_v10 = vld [vmem:[%s10031_s3 + $0x120] sm:$0xff]   ;;  %v7879_v12 = vld [vmem:[%s10031_s3 + $0x128] sm:$0xff]   ;;  %s8164_s24 = scalar_lea.vmem %s10028_s0, %s6699_s13  ;;  %vm301_vm2 = vsmask.f32 7938  ;;  %vm8168_vm3 = vmand %vm244_vm0, %vm245_vm1  ;;  %vm1128_vm5 = vsmask.f32 3328  ;;  %s9998_s26 = scalar_lea.vmem %s10032_s4, %s6699_s13 }
  0x13   : > { %7158 = vmatpush3.bf16.msra.mxu1 %v7870_v3  ;;  %vm8176_vm4 = vmand %vm244_vm0, %vm301_vm2  ;;  %v6766_v21 = vld [vmem:[%s8164_s24] sm:$0xff]   ;;  %v250_v24 = vld [vmem:[#allocation2 + $0xc] sm:$0x1]  ;;  %vm1129_vm6 = vsmask.f32 7440  ;;  %vm950_vm7 = vcmask 1043456  }
  0x14   : > { %7350 = vmatpush3.bf16.msra.mxu0 %v7871_v4  ;;  %7159 = vmatprep.subr.bf16.mxu1 %v7872_v5  ;;  %v306_v25 = vld [vmem:[#allocation2 + $0x14] sm:$0x1]  ;;  %v6767_v26 = vunpack.c.l.bf16 %v6766_v21  ;;  %v6768_v27 = vunpack.c.h.bf16 %v6766_v21  ;;  %v251_v30 = vsel %vm8168_vm3, 0, %v250_v24  ;;  %v8195_v32 = vld [vmem:[%s10029_s1] ss:$0 sm:$0xff]  ;;  %v7882_v37 = vld [vmem:[%s10031_s3 + $0x78] sm:$0xff]  }
  0x15   : > { %7351 = vmatprep.subr.bf16.mxu0 %v7873_v6  ;;  %v247_v13 = vld [vmem:[#allocation2] sm:$0x1]  ;;  %v1065_v16 = vld [vmem:[#allocation2 + $0x4] sm:$0xf]  ;;  %v307_v31 = vsel %vm8176_vm4, 0, %v306_v25  ;;  %v7881_v33 = vld [vmem:[%s10031_s3 + $0x130] sm:$0xff]  }
  0x16   : > { %v303_v15 = vld [vmem:[#allocation2 + $0x8] sm:$0x1]  ;;  %v248_v17 = vsel %vm8168_vm3, 0, %v247_v13  ;;  %v1141_v19 = vshll.u32 %v1065_v16, 16  ;;  %v1145_v20 = vshrl.u32 %v1065_v16, 16  ;;  %v428_v34 = vmul.f32 %v6767_v26, %v8195_v32  ;;  %v7883_v38 = vld [vmem:[%s10031_s3 + $0x138] sm:$0xff]   ;;  %vm8235_vm9 = vmor %vm1128_vm5, %vm1129_vm6 }
  0x17   : > { %7160 = vmatpush3.bf16.msra.mxu1 %v7872_v5  ;;  %249 = vst [vmem:[#allocation2] sm:$0x1] %v248_v17  ;;  %v304_v23 = vsel %vm8176_vm4, 0, %v303_v15  ;;  %252 = vst [vmem:[#allocation2 + $0xc] sm:$0x1] %v251_v30  ;;  %v429_v35 = vmul.f32 %v6768_v27, %v8195_v32  ;;  %v6909_v44 = vld [vmem:[%s8164_s24 + $0x8] sm:$0xff]  }
  0x18   : > { %7352 = vmatpush3.bf16.msra.mxu0 %v7873_v6  ;;  %7161 = vmatprep.subr.bf16.mxu1 %v7874_v7  ;;  %305 = vst [vmem:[#allocation2 + $0x8] sm:$0x1] %v304_v23  ;;  %v8186_v28 = vrot.slane %v1141_v19, 5  ;;  %v1147_v29 = vrot.slane %v1145_v20, 4  ;;  %308 = vst [vmem:[#allocation2 + $0x14] sm:$0x1] %v307_v31  ;;  %v6771_v50 = vunpack.c.l.bf16 %v6909_v44  ;;  %v6772_v51 = vunpack.c.h.bf16 %v6909_v44 }
  0x19   : > { %7353 = vmatprep.subr.bf16.mxu0 %v7875_v8  ;;  %v8205_v36 = vld [vmem:[%s10030_s2] ss:$0 sm:$0xff]  ;;  %v253_v42 = vld [vmem:[#allocation2 + $0x18] sm:$0x1]  ;;  %vm627_vm8 = vsmask.f32 4368  ;;  %vm8248_vm10 = vmand %vm950_vm7, %vm301_vm2 }
  0x1a   : > { %v467_v39 = vadd.f32 %v8205_v36, %v428_v34  ;;  %v468_v40 = vadd.f32 %v8205_v36, %v429_v35  ;;  %v1148_v41 = vor.u32 %v1147_v29, %v8186_v28  ;;  %v309_v43 = vld [vmem:[#allocation2 + $0x20] sm:$0x1]  ;;  %v254_v47 = vsel %vm8168_vm3, 0, %v253_v42  ;;  %v256_v63 = vld [vmem:[#allocation2 + $0x24] sm:$0x1]  ;;  %v6910_v16 = vld [vmem:[%s8164_s24 + $0x10] sm:$0xff]  }
  0x1b   : > { %7162 = vmatpush3.bf16.msra.mxu1 %v7874_v7  ;;  %v310_v48 = vsel %vm8176_vm4, 0, %v309_v43  ;;  %255 = vst [vmem:[#allocation2 + $0x18] sm:$0x1] %v254_v47  ;;  %v8224_v59 = vld [vmem:[%s10031_s3] sm:$0xff]   ;;  %v430_v61 = vmul.f32 %v6771_v50, %v8195_v32  ;;  %v431_v62 = vmul.f32 %v6772_v51, %v8195_v32  ;;  %v312_v5 = vld [vmem:[#allocation2 + $0x2c] sm:$0x1]  ;;  %vm8257_vm11 = vmor %vm245_vm1, %vm627_vm8  ;;  %v6775_v34 = vunpack.c.l.bf16 %v6910_v16 }
  0x1c   : > { %7354 = vmatpush3.bf16.msra.mxu0 %v7875_v8  ;;  %7163 = vmatprep.subr.bf16.mxu1 %v7876_v9  ;;  %v499_v45 = vmax.f32 %v467_v39, 0.0  ;;  %v500_v46 = vmax.f32 %v468_v40, 0.0  ;;  %311 = vst [vmem:[#allocation2 + $0x20] sm:$0x1] %v310_v48  ;;  %v1149_v57 = vrot.slane %v1148_v41, 4  ;;  %v8229_v60 = vld [vmem:[%s10031_s3 + $0x140] sm:$0xff]   ;;  %v6776_v39 = vunpack.c.h.bf16 %v6910_v16 }
  0x1d   : > { %7355 = vmatprep.subr.bf16.mxu0 %v7877_v10  ;;  %v470_v13 = vadd.f32 %v8205_v36, %v431_v62  ;;  %v257_v15 = vsel %vm8168_vm3, 0, %v256_v63  ;;  %v259_v40 = vld [vmem:[#allocation2 + $0x30] sm:$0x1]  ;;  %v315_v41 = vld [vmem:[#allocation2 + $0x38] sm:$0x1]  ;;  %v432_v50 = vmul.f32 %v6775_v34, %v8195_v32  ;;  %vm2158_vm12 = vcmask 1042432  }
  0x1e   : > { %v1064_v49 = vld [vmem:[#allocation2] sm:$0xf]  ;;  %v6701_v55 = vpack.c.bf16 %v499_v45, %v499_v45  ;;  %v6702_v56 = vpack.c.bf16 %v500_v46, %v500_v46  ;;  %258 = vst [vmem:[#allocation2 + $0x24] sm:$0x1] %v257_v15  ;;  %v6911_v46 = vld [vmem:[%s8164_s24 + $0x18] sm:$0xff]   ;;  %vm2159_vm13 = vcmask 1046532  }
  0x1f   : > { %7164 = vmatpush3.bf16.msra.mxu1 %v7876_v9  ;;  %v1112_v52 = vld [vmem:[#allocation2 + $0x8] sm:$0x1]  ;;  %v1132_v53 = vshrl.u32 %v1064_v49, 16  ;;  %v1135_v54 = vshll.u32 %v1064_v49, 16  ;;  %v952_v9 = vld [vmem:[#allocation2 + $0xc] sm:$0xf]  ;;  %vm8568_vm14 = vmor %vm2158_vm12, %vm2159_vm13 }
  0x20   : > { %7356 = vmatpush3.bf16.msra.mxu0 %v7877_v10  ;;  %7165 = vmatprep.subr.bf16.mxu1 %v7878_v11  ;;  %v1151_v58 = vshll.u32 %v1112_v52, 16  ;;  %v630_v3 = vshrl.u32 %v6701_v55, 16  ;;  %v633_v4 = vshll.u32 %v6701_v55, 16  ;;  %v638_v7 = vshrl.u32 %v6702_v56, 16  ;;  %v956_v27 = vld [vmem:[#allocation2 + $0x14] sm:$0x1] }
  0x21   : > { %7357 = vmatprep.subr.bf16.mxu0 %v7879_v12  ;;  %v1134_v1 = vrot.slane %v1132_v53, 4  ;;  %v1137_v2 = vrot.slane %v1135_v54, 5  ;;  %v641_v8 = vshll.u32 %v6702_v56, 16  ;;  %v469_v10 = vadd.f32 %v8205_v36, %v430_v61  ;;  %v262_v51 = vld [vmem:[#allocation2 + $0x3c] sm:$0x1]  ;;  %s6238_s13 = sshll.u32 %s10110_s19, 3 }
  0x22   : > { %v1153_v6 = vrot.slane %v1151_v58, 5  ;;  %v640_v19 = vrot.slane %v638_v7, 7  ;;  %v502_v29 = vmax.f32 %v470_v13, 0.0  ;;  %v959_v49 = vld [vmem:[#allocation2 + $0x18] sm:$0xf]  ;;  %v433_v53 = vmul.f32 %v6776_v39, %v8195_v32  ;;  %s235_s29 = scalar_lea.vmem %s10033_s5, %s6238_s13 }
  0x23   : > { %7166 = vmatpush3.bf16.msra.mxu1 %v7878_v11  ;;  %v1138_v11 = vor.u32 %v1137_v2, %v1134_v1  ;;  %v501_v21 = vmax.f32 %v469_v10, 0.0  ;;  %v260_v54 = vsel %vm8168_vm3, 0, %v259_v40  ;;  %v316_v55 = vsel %vm8176_vm4, 0, %v315_v41  ;;  %v318_v62 = vld [vmem:[#allocation2 + $0x44] sm:$0x1] }
  0x24   : > { %7358 = vmatpush3.bf16.msra.mxu0 %v7879_v12  ;;  %7167 = vmatprep.subr.bf16.mxu1 %v7880_v22  ;;  %v632_v12 = vrot.slane %v630_v3, 7  ;;  %v1154_v17 = vsel %vm8235_vm9, %v1149_v57, %v1153_v6  ;;  %v643_v30 = vor.u32 %v641_v8, %v640_v19  ;;  %v645_v31 = vrot.slane %v640_v19, 4  ;;  %261 = vst [vmem:[#allocation2 + $0x30] sm:$0x1] %v260_v54  ;;  %v963_v2 = vld [vmem:[#allocation2 + $0x20] sm:$0x1] }
  0x25   : > { %7359 = vmatprep.subr.bf16.mxu0 %v7881_v33  ;;  %v1139_v23 = vrot.slane %v1138_v11, 4  ;;  %v471_v57 = vadd.f32 %v8205_v36, %v432_v50  ;;  %317 = vst [vmem:[#allocation2 + $0x38] sm:$0x1] %v316_v55  ;;  %v6779_v58 = vunpack.c.l.bf16 %v6911_v46  ;;  %v6780_v61 = vunpack.c.h.bf16 %v6911_v46 }
  0x26   : > { %v635_v25 = vor.u32 %v633_v4, %v632_v12  ;;  %v636_v26 = vrot.slane %v632_v12, 4  ;;  %v957_v44 = vsel %vm8168_vm3, %v645_v31, %v956_v27  ;;  %v472_v3 = vadd.f32 %v8205_v36, %v433_v53 }
  0x27   : > { %7168 = vmatpush3.bf16.msra.mxu1 %v7880_v22  ;;  %v313_v22 = vsel %vm8176_vm4, 0, %v312_v5  ;;  %v1144_v35 = vsel %vm8235_vm9, %v1139_v23, %v8186_v28  ;;  %958 = vst [vmem:[#allocation2 + $0x14] sm:$0x1] %v957_v44  ;;  %v263_v4 = vsel %vm8168_vm3, 0, %v262_v51  ;;  %v503_v7 = vmax.f32 %v471_v57, 0.0 }
  0x28   : > { %7360 = vmatpush3.bf16.msra.mxu0 %v7881_v33  ;;  %7169 = vmatprep.subr.bf16.mxu1 %v7882_v37  ;;  %314 = vst [vmem:[#allocation2 + $0x2c] sm:$0x1] %v313_v22  ;;  %v6703_v33 = vpack.c.bf16 %v501_v21, %v501_v21  ;;  %v6289_v42 = vcombine.low %v1144_v35, %v1154_v17  ;;  %264 = vst [vmem:[#allocation2 + $0x3c] sm:$0x1] %v263_v4  ;;  %v504_v10 = vmax.f32 %v472_v3, 0.0  ;;  %vm6140_vm15 = vcmask 1041408  }
  0x29   : > { %7361 = vmatprep.subr.bf16.mxu0 %v7883_v38  ;;  %v644_v43 = vsel %vm8257_vm11, %v636_v26, %v643_v30  ;;  %v434_v8 = vmul.f32 %v6779_v58, %v8195_v32  ;;  %v319_v11 = vsel %vm8176_vm4, 0, %v318_v62  ;;  %v435_v17 = vmul.f32 %v6780_v61, %v8195_v32 }
  0x2a   : > { %v647_v45 = vshrl.u32 %v6703_v33, 16  ;;  %955 = vst [vmem:[#allocation2 + $0x10] sm:$0xf] %v644_v43  ;;  %v650_v28 = vshll.u32 %v6703_v33, 16  ;;  %7171 = vmatprep.mubr.bf16.mxu1 %v6289_v42  ;;  %320 = vst [vmem:[#allocation2 + $0x44] sm:$0x1] %v319_v11  ;;  %v8297_v33 = vpack.c.bf16 %v504_v10, %v504_v10 }
  0x2b   : > { %7170 = vmatpush3.bf16.msra.mxu1 %v7882_v37  ;;  %v953_v37 = vsel %vm8248_vm10, %v635_v25, %v952_v9  ;;  %v8292_v25 = vpack.c.bf16 %v503_v7, %v503_v7  ;;  %v8295_v26 = vadd.f32 %v8205_v36, %v434_v8  ;;  %v8302_v43 = vadd.f32 %v8205_v36, %v435_v17  ;;  %v8322_v11 = vld [vmem:[%s8164_s24 + $0x28] sm:$0xff]  }
  0x2c   : > { %7362 = vmatpush3.bf16.msra.mxu0 %v7883_v38  ;;  %7203 = vmatprep.subr.bf16.mxu1 %v8224_v59  ;;  %v6704_v38 = vpack.c.bf16 %v502_v29, %v502_v29  ;;  %954 = vst [vmem:[#allocation2 + $0xc] sm:$0xf] %v953_v37  ;;  %v649_v52 = vrot.slane %v647_v45, 7 }
  0x2d   : > { %7395 = vmatprep.subr.bf16.mxu0 %v8229_v60 }
  0x2e   : > { %v655_v47 = vshrl.u32 %v6704_v38, 16  ;;  %v658_v48 = vshll.u32 %v6704_v38, 16  ;;  %v652_v63 = vor.u32 %v650_v28, %v649_v52  ;;  %v653_v1 = vrot.slane %v649_v52, 4  ;;  %v1113_v21 = vld [vmem:[#allocation2 + $0x14] sm:$0x1] }
  0x2f   : > { %v1175_v30 = vshll.u32 %v1113_v21, 16  ;;  %v8299_v37 = vld [vmem:[#allocation2 + $0x14] sm:$0x1] }
  0x30   : > { %v657_v56 = vrot.slane %v655_v47, 7  ;;  %v960_v9 = vsel %vm8248_vm10, %v652_v63, %v959_v49  ;;  %v8305_v47 = vld [vmem:[%s8164_s24 + $0x20] sm:$0xff]   ;;  %v3049_v51 = vshll.u32 %v8299_v37, 16  ;;  %v3804_v55 = vrot.slane %v8299_v37, 5 }
  0x31   : > { %961 = vst [vmem:[#allocation2 + $0x18] sm:$0xf] %v960_v9  ;;  %v1067_v19 = vld [vmem:[#allocation2 + $0x10] sm:$0xf]  ;;  %v1177_v49 = vrot.slane %v1175_v30, 5  ;;  %v6783_v62 = vunpack.c.l.bf16 %v8305_v47  ;;  %v6784_v63 = vunpack.c.h.bf16 %v8305_v47 }
  0x32   : > { %v660_v5 = vor.u32 %v658_v48, %v657_v56  ;;  %v662_v6 = vrot.slane %v657_v56, 4  ;;  %v1165_v27 = vshll.u32 %v1067_v19, 16  ;;  %v1169_v29 = vshrl.u32 %v1067_v19, 16  ;;  %v2982_v31 = vld [vmem:[#allocation2 + $0x10] sm:$0xf]  ;;  %v7887_v19 = vld [vmem:[%s10031_s3 + $0x8] sm:$0xff]  }
  0x33   : > { %v1066_v12 = vld [vmem:[#allocation2 + $0xc] sm:$0xf]  ;;  %v3039_v42 = vshll.u32 %v2982_v31, 16  ;;  %v3043_v28 = vshrl.u32 %v2982_v31, 16  ;;  %v3051_v58 = vrot.slane %v3049_v51, 5 }
  0x34   : > { %v2981_v13 = vld [vmem:[#allocation2 + $0xc] sm:$0xf]  ;;  %v661_v15 = vsel %vm8257_vm11, %v653_v1, %v660_v5  ;;  %v964_v16 = vsel %vm8168_vm3, %v662_v6, %v963_v2  ;;  %v1156_v22 = vshrl.u32 %v1066_v12, 16  ;;  %v1159_v23 = vshll.u32 %v1066_v12, 16 }
  0x35   : > { %962 = vst [vmem:[#allocation2 + $0x1c] sm:$0xf] %v661_v15  ;;  %965 = vst [vmem:[#allocation2 + $0x20] sm:$0x1] %v964_v16  ;;  %v3030_v38 = vshrl.u32 %v2981_v13, 16  ;;  %v3033_v39 = vshll.u32 %v2981_v13, 16 }
  0x36   : > { %v1158_v34 = vrot.slane %v1156_v22, 4  ;;  %v1161_v35 = vrot.slane %v1159_v23, 5  ;;  %v1167_v40 = vrot.slane %v1165_v27, 5  ;;  %v1171_v41 = vrot.slane %v1169_v29, 4 }
  0x37   : > { %v3032_v45 = vrot.slane %v3030_v38, 4  ;;  %v3035_v46 = vrot.slane %v3033_v39, 5  ;;  %v3041_v50 = vrot.slane %v3039_v42, 5  ;;  %v3045_v54 = vrot.slane %v3043_v28, 4  ;;  %v7890_v28 = vld [vmem:[%s10031_s3 + $0x10] sm:$0xff]  }
  0x38   : > { %v1162_v44 = vor.u32 %v1161_v35, %v1158_v34  ;;  %v1172_v48 = vor.u32 %v1171_v41, %v1167_v40  ;;  %v2984_v56 = vld [vmem:[#allocation2 + $0x18] sm:$0xf]  ;;  %v6787_v35 = vunpack.c.l.bf16 %v8322_v11 }
  0x39   : > { %v3036_v53 = vor.u32 %v3035_v46, %v3032_v45  ;;  %v3046_v3 = vor.u32 %v3045_v54, %v3041_v50  ;;  %v3054_v5 = vshrl.u32 %v2984_v56, 16  ;;  %v3057_v7 = vshll.u32 %v2984_v56, 16  ;;  %v1068_v10 = vld [vmem:[#allocation2 + $0x18] sm:$0xf] }
  0x3a   : > { %v1163_v52 = vrot.slane %v1162_v44, 4  ;;  %v1173_v57 = vrot.slane %v1172_v48, 4  ;;  %v1180_v34 = vshrl.u32 %v1068_v10, 16  ;;  %v1183_v45 = vshll.u32 %v1068_v10, 16 }
  0x3b   : > { %v3037_v2 = vrot.slane %v3036_v53, 4  ;;  %v3047_v15 = vrot.slane %v3046_v3, 4  ;;  %v3056_v16 = vrot.slane %v3054_v5, 4  ;;  %v3059_v21 = vrot.slane %v3057_v7, 5  ;;  %v7886_v3 = vld [vmem:[%s10031_s3 + $0x148] sm:$0xff]  }
  0x3c   : > { %v8309_v61 = vld [vmem:[#allocation2 + $0x1c] sm:$0xf]  ;;  %v1168_v1 = vsel %vm8235_vm9, %v1163_v52, %v1167_v40  ;;  %v8315_v4 = vld [vmem:[#allocation2 + $0x20] sm:$0x1]  ;;  %v1178_v6 = vsel %vm8235_vm9, %v1173_v57, %v1177_v49  ;;  %v1182_v44 = vrot.slane %v1180_v34, 4  ;;  %v1185_v52 = vrot.slane %v1183_v45, 5 }
  0x3d   : > { %v3063_v8 = vshll.u32 %v8309_v61, 16  ;;  %v3067_v9 = vshrl.u32 %v8309_v61, 16  ;;  %v6290_v12 = vcombine.low %v1168_v1, %v1178_v6  ;;  %v3042_v13 = vsel %vm8235_vm9, %v3037_v2, %v3041_v50  ;;  %v1069_v17 = vld [vmem:[#allocation2 + $0x1c] sm:$0xf]  ;;  %v1114_v31 = vld [vmem:[#allocation2 + $0x20] sm:$0x1] }
  0x3e   : > { %v3073_v27 = vshll.u32 %v8315_v4, 16  ;;  %v3052_v29 = vsel %vm8235_vm9, %v3047_v15, %v3051_v58  ;;  %v3808_v30 = vrot.slane %v8309_v61, 5  ;;  %v3060_v39 = vor.u32 %v3059_v21, %v3056_v16  ;;  %v265_v34 = vld [vmem:[#allocation2 + $0x48] sm:$0x1] }
  0x3f   : > { %v3065_v22 = vrot.slane %v3063_v8, 5  ;;  %v3069_v23 = vrot.slane %v3067_v9, 4  ;;  %7172 = vmatmul.mubr.bf16.vlgmr.msra.gmra.mrb[0].mxu1 %v6290_v12  ;;  %v6449_v38 = vcombine.low %v3042_v13, %v3052_v29  ;;  %v3811_v42 = vrot.slane %v8315_v4, 5  ;;  %v966_v8 = vld [vmem:[#allocation2 + $0x24] sm:$0xf] }
  0x40   : > { %7204 = vmatpush3.bf16.msra.mxu1 %v8224_v59  ;;  %v3075_v41 = vrot.slane %v3073_v27, 5  ;;  %v1189_v46 = vshll.u32 %v1069_v17, 16  ;;  %v3061_v48 = vrot.slane %v3060_v39, 4  ;;  %v1193_v50 = vshrl.u32 %v1069_v17, 16 }
  0x41   : > { %v3070_v40 = vor.u32 %v3069_v23, %v3065_v22  ;;  %7205 = vmatprep.subr.bf16.mxu1 %v7887_v19  ;;  %7363 = vmatprep.mubr.bf16.mxu0 %v6449_v38  ;;  %v1199_v51 = vshll.u32 %v1114_v31, 16  ;;  %v664_v53 = vshrl.u32 %v8292_v25, 16  ;;  %v667_v54 = vshll.u32 %v8292_v25, 16  ;;  %v7893_v25 = vld [vmem:[%s10031_s3 + $0x18] sm:$0xff]  }
  0x42   : > { %v1191_v59 = vrot.slane %v1189_v46, 5  ;;  %v3066_v56 = vsel %vm8235_vm9, %v3061_v48, %v3065_v22  ;;  %v1195_v58 = vrot.slane %v1193_v50, 4  ;;  %v1186_v5 = vor.u32 %v1185_v52, %v1182_v44  ;;  %v970_v22 = vld [vmem:[#allocation2 + $0x2c] sm:$0x1]  ;;  %v7896_v44 = vld [vmem:[%s10031_s3 + $0x20] sm:$0xff]  }
  0x43   : > { %v3071_v49 = vrot.slane %v3070_v40, 4  ;;  %v1201_v1 = vrot.slane %v1199_v51, 5  ;;  %v666_v6 = vrot.slane %v664_v53, 7  ;;  %v672_v7 = vshrl.u32 %v8297_v33, 16  ;;  %v977_v50 = vld [vmem:[#allocation2 + $0x38] sm:$0x1] }
  0x44   : > { %7206 = vmatpush3.bf16.msra.mxu1 %v7887_v19  ;;  %v1196_v9 = vor.u32 %v1195_v58, %v1191_v59  ;;  %v675_v10 = vshll.u32 %v8297_v33, 16  ;;  %v505_v12 = vmax.f32 %v8295_v26, 0.0  ;;  %v506_v13 = vmax.f32 %v8302_v43, 0.0  ;;  %v268_v51 = vld [vmem:[#allocation2 + $0x54] sm:$0x1]  ;;  %v7889_v53 = vld [vmem:[%s10031_s3 + $0x158] sm:$0xff]  }
  0x45   : > { %v3076_v57 = vsel %vm8235_vm9, %v3071_v49, %v3075_v41  ;;  %7207 = vmatprep.subr.bf16.mxu1 %v7890_v28  ;;  %v1187_v15 = vrot.slane %v1186_v5, 4  ;;  %v669_v16 = vor.u32 %v667_v54, %v666_v6  ;;  %v670_v17 = vrot.slane %v666_v6, 4  ;;  %v321_v41 = vld [vmem:[#allocation2 + $0x50] sm:$0x1] }
  0x46   : > { %v6450_v2 = vcombine.low %v3066_v56, %v3076_v57  ;;  %v674_v19 = vrot.slane %v672_v7, 7  ;;  %v1197_v21 = vrot.slane %v1196_v9, 4  ;;  %v6707_v23 = vpack.c.bf16 %v505_v12, %v505_v12  ;;  %v973_v49 = vld [vmem:[#allocation2 + $0x30] sm:$0xf]  ;;  %v7898_v57 = vld [vmem:[%s10031_s3 + $0x28] sm:$0xff]   ;;  %v7891_v12 = vld [vmem:[%s10031_s3 + $0x160] sm:$0xff]  }
  0x47   : > { %v6708_v27 = vpack.c.bf16 %v506_v13, %v506_v13  ;;  %v436_v29 = vmul.f32 %v6783_v62, %v8195_v32  ;;  %v1192_v26 = vsel %vm8235_vm9, %v1187_v15, %v1191_v59  ;;  %v967_v31 = vsel %vm8248_vm10, %v669_v16, %v966_v8  ;;  %v8408_v15 = vld [vmem:[%s8164_s24 + $0x30] sm:$0xff]  }
  0x48   : > { %7364 = vmatmul.mubr.bf16.vlgmr.msra.gmra.mrb[0].mxu0 %v6450_v2  ;;  %7208 = vmatpush3.bf16.msra.mxu1 %v7890_v28  ;;  %v677_v33 = vor.u32 %v675_v10, %v674_v19  ;;  %v679_v43 = vrot.slane %v674_v19, 4  ;;  %v1202_v38 = vsel %vm8235_vm9, %v1197_v21, %v1201_v1  ;;  %968 = vst [vmem:[#allocation2 + $0x24] sm:$0xf] %v967_v31  ;;  %v681_v62 = vshrl.u32 %v6707_v23, 16 }
  0x49   : > { %7396 = vmatpush3.bf16.msra.mxu0 %v8229_v60  ;;  %v7888_v60 = vld [vmem:[%s10031_s3 + $0x150] sm:$0xff]   ;;  %7209 = vmatprep.subr.bf16.mxu1 %v7893_v25  ;;  %v684_v39 = vshll.u32 %v6707_v23, 16  ;;  %v689_v40 = vshrl.u32 %v6708_v27, 16  ;;  %v6291_v45 = vcombine.low %v1192_v26, %v1202_v38  ;;  %v692_v48 = vshll.u32 %v6708_v27, 16 }
  0x4a   : > { %7397 = vmatprep.subr.bf16.mxu0 %v7886_v3  ;;  %v678_v46 = vsel %vm8257_vm11, %v670_v17, %v677_v33  ;;  %v971_v28 = vsel %vm8168_vm3, %v679_v43, %v970_v22  ;;  %v683_v52 = vrot.slane %v681_v62, 7  ;;  %v437_v54 = vmul.f32 %v6784_v63, %v8195_v32 }
  0x4b   : > { %969 = vst [vmem:[#allocation2 + $0x28] sm:$0xf] %v678_v46  ;;  %972 = vst [vmem:[#allocation2 + $0x2c] sm:$0x1] %v971_v28  ;;  %v691_v59 = vrot.slane %v689_v40, 7  ;;  %v475_v56 = vadd.f32 %v8205_v36, %v436_v29  ;;  %7175 = vmatprep.mubr.bf16.mxu1 %v6291_v45  ;;  %v266_v58 = vsel %vm8168_vm3, 0, %v265_v34  ;;  %v6788_v2 = vunpack.c.h.bf16 %v8322_v11 }
  0x4c   : > { %7210 = vmatpush3.bf16.msra.mxu1 %v7893_v25  ;;  %v322_v1 = vsel %vm8176_vm4, 0, %v321_v41  ;;  %v438_v47 = vmul.f32 %v6787_v35, %v8195_v32  ;;  %v686_v63 = vor.u32 %v684_v39, %v683_v52  ;;  %267 = vst [vmem:[#allocation2 + $0x48] sm:$0x1] %v266_v58  ;;  %v476_v7 = vadd.f32 %v8205_v36, %v437_v54 }
  0x4d   : > { %7398 = vmatpush3.bf16.msra.mxu0 %v7886_v3  ;;  %v687_v3 = vrot.slane %v683_v52, 4  ;;  %v694_v5 = vor.u32 %v692_v48, %v691_v59  ;;  %v696_v6 = vrot.slane %v691_v59, 4  ;;  %323 = vst [vmem:[#allocation2 + $0x50] sm:$0x1] %v322_v1  ;;  %7211 = vmatprep.subr.bf16.mxu1 %v7896_v44  ;;  %v507_v8 = vmax.f32 %v475_v56, 0.0 }
  0x4e   : > { %7399 = vmatprep.subr.bf16.mxu0 %v7888_v60  ;;  %v439_v25 = vmul.f32 %v6788_v2, %v8195_v32  ;;  %v477_v9 = vadd.f32 %v8205_v36, %v438_v47  ;;  %v974_v11 = vsel %vm8248_vm10, %v686_v63, %v973_v49  ;;  %v269_v13 = vsel %vm8168_vm3, 0, %v268_v51  ;;  %v7892_v51 = vld [vmem:[%s10031_s3 + $0x168] sm:$0xff]  }
  0x4f   : > { %v695_v10 = vsel %vm8257_vm11, %v687_v3, %v694_v5  ;;  %v978_v35 = vsel %vm8168_vm3, %v696_v6, %v977_v50  ;;  %v1070_v16 = vld [vmem:[#allocation2 + $0x24] sm:$0xf]  ;;  %975 = vst [vmem:[#allocation2 + $0x30] sm:$0xf] %v974_v11  ;;  %v508_v19 = vmax.f32 %v476_v7, 0.0  ;;  %v8410_v21 = vpack.c.bf16 %v507_v8, %v507_v8 }
  0x50   : > { %7212 = vmatpush3.bf16.msra.mxu1 %v7896_v44  ;;  %v2987_v17 = vld [vmem:[#allocation2 + $0x24] sm:$0xf]  ;;  %976 = vst [vmem:[#allocation2 + $0x34] sm:$0xf] %v695_v10  ;;  %979 = vst [vmem:[#allocation2 + $0x38] sm:$0x1] %v978_v35  ;;  %v8413_v22 = vadd.f32 %v8205_v36, %v439_v25  ;;  %v6791_v62 = vunpack.c.l.bf16 %v8408_v15  ;;  %v6792_v39 = vunpack.c.h.bf16 %v8408_v15 }
  0x51   : > { %7400 = vmatpush3.bf16.msra.mxu0 %v7888_v60  ;;  %v509_v23 = vmax.f32 %v477_v9, 0.0  ;;  %270 = vst [vmem:[#allocation2 + $0x54] sm:$0x1] %v269_v13  ;;  %7213 = vmatprep.subr.bf16.mxu1 %v7898_v57  ;;  %v1204_v27 = vshrl.u32 %v1070_v16, 16  ;;  %v1207_v29 = vshll.u32 %v1070_v16, 16  ;;  %v3078_v26 = vshrl.u32 %v2987_v17, 16 }
  0x52   : > { %7401 = vmatprep.subr.bf16.mxu0 %v7889_v53  ;;  %v3081_v33 = vshll.u32 %v2987_v17, 16  ;;  %v1071_v43 = vld [vmem:[#allocation2 + $0x28] sm:$0xf]  ;;  %v1115_v31 = vld [vmem:[#allocation2 + $0x2c] sm:$0x1]  ;;  %v8415_v34 = vpack.c.bf16 %v508_v19, %v508_v19  ;;  %v8430_v7 = vmul.f32 %v6791_v62, %v8195_v32 }
  0x53   : > { %v2988_v60 = vld [vmem:[#allocation2 + $0x28] sm:$0xf]  ;;  %v8417_v38 = vpack.c.bf16 %v509_v23, %v509_v23  ;;  %v1206_v40 = vrot.slane %v1204_v27, 4  ;;  %v1209_v41 = vrot.slane %v1207_v29, 5  ;;  %v1213_v44 = vshll.u32 %v1071_v43, 16 }
  0x54   : > { %v1217_v45 = vshrl.u32 %v1071_v43, 16  ;;  %v2989_v46 = vld [vmem:[#allocation2 + $0x2c] sm:$0x1]  ;;  %7214 = vmatpush3.bf16.msra.mxu1 %v7898_v57  ;;  %v1223_v28 = vshll.u32 %v1115_v31, 16  ;;  %v3080_v48 = vrot.slane %v3078_v26, 4  ;;  %v3083_v49 = vrot.slane %v3081_v33, 5 }
  0x55   : > { %7402 = vmatpush3.bf16.msra.mxu0 %v7889_v53  ;;  %v3087_v50 = vshll.u32 %v2988_v60, 16  ;;  %v1210_v52 = vor.u32 %v1209_v41, %v1206_v40  ;;  %v1215_v59 = vrot.slane %v1213_v44, 5  ;;  %v3091_v56 = vshrl.u32 %v2988_v60, 16  ;;  %v7894_v53 = vld [vmem:[%s10031_s3 + $0x170] sm:$0xff]   ;;  %v7895_v60 = vld [vmem:[%s10031_s3 + $0x178] sm:$0xff]  }
  0x56   : > { %7403 = vmatprep.subr.bf16.mxu0 %v7891_v12  ;;  %v1219_v54 = vrot.slane %v1217_v45, 4  ;;  %v1225_v58 = vrot.slane %v1223_v28, 5  ;;  %v3084_v1 = vor.u32 %v3083_v49, %v3080_v48  ;;  %v3097_v47 = vshll.u32 %v2989_v46, 16  ;;  %v2990_v5 = vld [vmem:[#allocation2 + $0x30] sm:$0xf] }
  0x57   : > { %v3089_v2 = vrot.slane %v3087_v50, 5  ;;  %v1211_v57 = vrot.slane %v1210_v52, 4  ;;  %v3093_v3 = vrot.slane %v3091_v56, 4  ;;  %v8427_v6 = vld [vmem:[#allocation2 + $0x34] sm:$0xf]  ;;  %v3102_v10 = vshrl.u32 %v2990_v5, 16 }
  0x58   : > { %v1220_v63 = vor.u32 %v1219_v54, %v1215_v59  ;;  %v3085_v8 = vrot.slane %v3084_v1, 4  ;;  %v3099_v25 = vrot.slane %v3097_v47, 5  ;;  %v8432_v9 = vld [vmem:[#allocation2 + $0x38] sm:$0x1]  ;;  %v3105_v11 = vshll.u32 %v2990_v5, 16 }
  0x59   : > { %7404 = vmatpush3.bf16.msra.mxu0 %v7891_v12  ;;  %v1216_v35 = vsel %vm8235_vm9, %v1211_v57, %v1215_v59  ;;  %v3094_v16 = vor.u32 %v3093_v3, %v3089_v2  ;;  %v3111_v17 = vshll.u32 %v8427_v6, 16  ;;  %v1072_v19 = vld [vmem:[#allocation2 + $0x30] sm:$0xf]  ;;  %v3104_v32 = vrot.slane %v3102_v10, 4  ;;  %v1073_v29 = vld [vmem:[#allocation2 + $0x34] sm:$0xf] }
  0x5a   : > { %7405 = vmatprep.subr.bf16.mxu0 %v7892_v51  ;;  %v1221_v13 = vrot.slane %v1220_v63, 4  ;;  %v3090_v12 = vsel %vm8235_vm9, %v3085_v8, %v3089_v2  ;;  %v3107_v23 = vrot.slane %v3105_v11, 5  ;;  %v3115_v27 = vshrl.u32 %v8427_v6, 16  ;;  %v1116_v44 = vld [vmem:[#allocation2 + $0x38] sm:$0x1]  ;;  %v8455_v3 = vld [vmem:[%s10031_s3 + $0x180] sm:$0xff]  }
  0x5b   : > { %v3095_v33 = vrot.slane %v3094_v16, 4  ;;  %v3113_v43 = vrot.slane %v3111_v17, 5  ;;  %v3121_v31 = vshll.u32 %v8432_v9, 16  ;;  %v1228_v45 = vshrl.u32 %v1072_v19, 16  ;;  %v980_v10 = vld [vmem:[#allocation2 + $0x3c] sm:$0xf] }
  0x5c   : > { %v1226_v26 = vsel %vm8235_vm9, %v1221_v13, %v1225_v58  ;;  %v3108_v40 = vor.u32 %v3107_v23, %v3104_v32  ;;  %v3117_v41 = vrot.slane %v3115_v27, 4  ;;  %v1231_v48 = vshll.u32 %v1072_v19, 16  ;;  %v984_v16 = vld [vmem:[#allocation2 + $0x44] sm:$0x1]  ;;  %v7900_v23 = vld [vmem:[%s10031_s3 + $0x30] sm:$0xff]  }
  0x5d   : > { %7406 = vmatpush3.bf16.msra.mxu0 %v7892_v51  ;;  %v6292_v62 = vcombine.low %v1216_v35, %v1226_v26  ;;  %v3100_v46 = vsel %vm8235_vm9, %v3095_v33, %v3099_v25  ;;  %v3123_v28 = vrot.slane %v3121_v31, 5  ;;  %v1237_v49 = vshll.u32 %v1073_v29, 16  ;;  %v271_v31 = vld [vmem:[#allocation2 + $0x60] sm:$0x1]  ;;  %7215 = vmatprep.subr.bf16.mxu1 %v7900_v23 }
  0x5e   : > { %7407 = vmatprep.subr.bf16.mxu0 %v7894_v53  ;;  %v6451_v50 = vcombine.low %v3090_v12, %v3100_v46  ;;  %v3109_v52 = vrot.slane %v3108_v40, 4  ;;  %v3118_v51 = vor.u32 %v3117_v41, %v3113_v43  ;;  %v1230_v59 = vrot.slane %v1228_v45, 4  ;;  %v987_v40 = vld [vmem:[#allocation2 + $0x48] sm:$0xf]  ;;  %7216 = vmatpush3.bf16.msra.mxu1 %v7900_v23 }
  0x5f   : > { %7176 = vmatmul.mubr.bf16.gmra.mrb[4].mxu1 %v6292_v62  ;;  %v1233_v54 = vrot.slane %v1231_v48, 5  ;;  %v1239_v56 = vrot.slane %v1237_v49, 5  ;;  %v1241_v58 = vshrl.u32 %v1073_v29, 16  ;;  %v1247_v1 = vshll.u32 %v1116_v44, 16  ;;  %v327_v41 = vld [vmem:[#allocation2 + $0x68] sm:$0x1] }
  0x60   : > { %7367 = vmatprep.mubr.bf16.mxu0 %v6451_v50  ;;  %v3114_v2 = vsel %vm8235_vm9, %v3109_v52, %v3113_v43  ;;  %v3119_v47 = vrot.slane %v3118_v51, 4  ;;  %v698_v57 = vshrl.u32 %v8410_v21, 16  ;;  %v701_v63 = vshll.u32 %v8410_v21, 16  ;;  %v324_v43 = vld [vmem:[#allocation2 + $0x5c] sm:$0x1] }
  0x61   : > { %7408 = vmatpush3.bf16.msra.mxu0 %v7894_v53  ;;  %v1234_v5 = vor.u32 %v1233_v54, %v1230_v59  ;;  %v1243_v8 = vrot.slane %v1241_v58, 4  ;;  %v1249_v25 = vrot.slane %v1247_v1, 5  ;;  %v706_v53 = vshrl.u32 %v8415_v34, 16  ;;  %v991_v51 = vld [vmem:[#allocation2 + $0x50] sm:$0x1]  ;;  %v6915_v59 = vld [vmem:[%s8164_s24 + $0x38] sm:$0xff]  }
  0x62   : > { %7409 = vmatprep.subr.bf16.mxu0 %v7895_v60  ;;  %v3124_v11 = vsel %vm8235_vm9, %v3119_v47, %v3123_v28  ;;  %v700_v35 = vrot.slane %v698_v57, 7  ;;  %v709_v13 = vshll.u32 %v8415_v34, 16  ;;  %v510_v21 = vmax.f32 %v8413_v22, 0.0  ;;  %v274_v54 = vld [vmem:[#allocation2 + $0x6c] sm:$0x1] }
  0x63   : > { %v6452_v17 = vcombine.low %v3114_v2, %v3124_v11  ;;  %v1235_v19 = vrot.slane %v1234_v5, 4  ;;  %v1244_v12 = vor.u32 %v1243_v8, %v1239_v56  ;;  %v708_v32 = vrot.slane %v706_v53, 7  ;;  %v8484_v57 = vld [vmem:[%s10029_s1] ss:$0 sm:$0xff] }
  0x64   : > { %v703_v27 = vor.u32 %v701_v63, %v700_v35  ;;  %v704_v29 = vrot.slane %v700_v35, 4  ;;  %v6712_v26 = vpack.c.bf16 %v510_v21, %v510_v21  ;;  %v715_v33 = vshrl.u32 %v8417_v38, 16 }
  0x65   : > { %7410 = vmatpush3.bf16.msra.mxu0 %v7895_v60  ;;  %v1240_v22 = vsel %vm8235_vm9, %v1235_v19, %v1239_v56  ;;  %v1245_v34 = vrot.slane %v1244_v12, 4  ;;  %v711_v62 = vor.u32 %v709_v13, %v708_v32  ;;  %v713_v60 = vrot.slane %v708_v32, 4  ;;  %v330_v56 = vld [vmem:[#allocation2 + $0x74] sm:$0x1]  ;;  %v8504_v13 = vld [vmem:[%s8164_s24 + $0x40] sm:$0xff]  }
  0x66   : > { %7443 = vmatprep.subr.bf16.mxu0 %v8455_v3  ;;  %7368 = vmatmul.mubr.bf16.gmra.mrb[4].mxu0 %v6452_v17  ;;  %v981_v44 = vsel %vm8248_vm10, %v703_v27, %v980_v10  ;;  %v717_v45 = vrot.slane %v715_v33, 7  ;;  %v718_v46 = vshll.u32 %v8417_v38, 16  ;;  %v723_v28 = vshrl.u32 %v6712_v26, 16 }
  0x67   : > { %v1250_v48 = vsel %vm8235_vm9, %v1245_v34, %v1249_v25  ;;  %v712_v49 = vsel %vm8257_vm11, %v704_v29, %v711_v62  ;;  %982 = vst [vmem:[#allocation2 + $0x3c] sm:$0xf] %v981_v44  ;;  %v985_v50 = vsel %vm8168_vm3, %v713_v60, %v984_v16  ;;  %v726_v52 = vshll.u32 %v6712_v26, 16 }
  0x68   : > { %v6293_v58 = vcombine.low %v1240_v22, %v1250_v48  ;;  %983 = vst [vmem:[#allocation2 + $0x40] sm:$0xf] %v712_v49  ;;  %986 = vst [vmem:[#allocation2 + $0x44] sm:$0x1] %v985_v50  ;;  %v720_v38 = vor.u32 %v718_v46, %v717_v45  ;;  %v721_v1 = vrot.slane %v717_v45, 4  ;;  %v725_v2 = vrot.slane %v723_v28, 7 }
  0x69   : > { %v325_v47 = vsel %vm8176_vm4, 0, %v324_v43  ;;  %v441_v63 = vmul.f32 %v8484_v57, %v6792_v39  ;;  %v479_v5 = vadd.f32 %v8205_v36, %v8430_v7  ;;  %v272_v8 = vsel %vm8168_vm3, 0, %v271_v31  ;;  %v8500_v36 = vld [vmem:[%s10030_s2] ss:$0 sm:$0xff] }
  0x6a   : > { %7179 = vmatprep.mubr.bf16.mxu1 %v6293_v58  ;;  %v728_v25 = vor.u32 %v726_v52, %v725_v2  ;;  %v730_v53 = vrot.slane %v725_v2, 4  ;;  %v988_v10 = vsel %vm8248_vm10, %v720_v38, %v987_v40  ;;  %326 = vst [vmem:[#allocation2 + $0x5c] sm:$0x1] %v325_v47  ;;  %273 = vst [vmem:[#allocation2 + $0x60] sm:$0x1] %v272_v8  ;;  %v328_v15 = vsel %vm8176_vm4, 0, %v327_v41 }
  0x6b   : > { %989 = vst [vmem:[#allocation2 + $0x48] sm:$0xf] %v988_v10  ;;  %v480_v39 = vadd.f32 %v8500_v36, %v441_v63  ;;  %v511_v7 = vmax.f32 %v479_v5, 0.0  ;;  %329 = vst [vmem:[#allocation2 + $0x68] sm:$0x1] %v328_v15  ;;  %v6795_v11 = vunpack.c.l.bf16 %v6915_v59  ;;  %v6796_v35 = vunpack.c.h.bf16 %v6915_v59 }
  0x6c   : > { %v729_v16 = vsel %vm8257_vm11, %v721_v1, %v728_v25  ;;  %v992_v21 = vsel %vm8168_vm3, %v730_v53, %v991_v51  ;;  %v275_v17 = vsel %vm8168_vm3, 0, %v274_v54  ;;  %v331_v19 = vsel %vm8176_vm4, 0, %v330_v56 }
  0x6d   : > { %v8516_v12 = vrot.slane %v3808_v30, 4  ;;  %990 = vst [vmem:[#allocation2 + $0x4c] sm:$0xf] %v729_v16  ;;  %993 = vst [vmem:[#allocation2 + $0x50] sm:$0x1] %v992_v21  ;;  %v512_v32 = vmax.f32 %v480_v39, 0.0  ;;  %v442_v23 = vmul.f32 %v8484_v57, %v6795_v11  ;;  %v8519_v26 = vpack.c.bf16 %v511_v7, %v511_v7 }
  0x6e   : > { %276 = vst [vmem:[#allocation2 + $0x6c] sm:$0x1] %v275_v17  ;;  %332 = vst [vmem:[#allocation2 + $0x74] sm:$0x1] %v331_v19  ;;  %v1074_v27 = vld [vmem:[#allocation2 + $0x3c] sm:$0xf]  ;;  %v443_v33 = vmul.f32 %v8484_v57, %v6796_v35  ;;  %v6799_v43 = vunpack.c.l.bf16 %v8504_v13  ;;  %v6800_v31 = vunpack.c.h.bf16 %v8504_v13 }
  0x6f   : > { %v2993_v29 = vld [vmem:[#allocation2 + $0x3c] sm:$0xf]  ;;  %v1075_v22 = vld [vmem:[#allocation2 + $0x40] sm:$0xf]  ;;  %v1117_v34 = vld [vmem:[#allocation2 + $0x44] sm:$0x1]  ;;  %v8524_v40 = vpack.c.bf16 %v512_v32, %v512_v32  ;;  %v8527_v41 = vadd.f32 %v8500_v36, %v442_v23 }
  0x70   : > { %v1252_v62 = vshrl.u32 %v1074_v27, 16  ;;  %v1255_v60 = vshll.u32 %v1074_v27, 16  ;;  %v1261_v44 = vshll.u32 %v1075_v22, 16  ;;  %v1265_v45 = vshrl.u32 %v1075_v22, 16  ;;  %v8529_v28 = vld [vmem:[#allocation2 + $0x40] sm:$0xf] }
  0x71   : > { %v1271_v46 = vshll.u32 %v1117_v34, 16  ;;  %v3126_v48 = vshrl.u32 %v2993_v29, 16  ;;  %v2995_v52 = vld [vmem:[#allocation2 + $0x44] sm:$0x1]  ;;  %v3129_v51 = vshll.u32 %v2993_v29, 16  ;;  %v3135_v59 = vshll.u32 %v8529_v28, 16 }
  0x72   : > { %v1254_v49 = vrot.slane %v1252_v62, 4  ;;  %v1257_v50 = vrot.slane %v1255_v60, 5  ;;  %v1263_v54 = vrot.slane %v1261_v44, 5  ;;  %v1267_v56 = vrot.slane %v1265_v45, 4  ;;  %v2996_v1 = vld [vmem:[#allocation2 + $0x48] sm:$0xf] }
  0x73   : > { %v1273_v58 = vrot.slane %v1271_v46, 5  ;;  %v3128_v38 = vrot.slane %v3126_v48, 4  ;;  %v3131_v47 = vrot.slane %v3129_v51, 5  ;;  %v3137_v63 = vrot.slane %v3135_v59, 5  ;;  %v1076_v34 = vld [vmem:[#allocation2 + $0x48] sm:$0xf] }
  0x74   : > { %v1258_v2 = vor.u32 %v1257_v50, %v1254_v49  ;;  %v3139_v5 = vshrl.u32 %v8529_v28, 16  ;;  %v1268_v8 = vor.u32 %v1267_v56, %v1263_v54  ;;  %v3145_v25 = vshll.u32 %v2995_v52, 16  ;;  %v2997_v53 = vld [vmem:[#allocation2 + $0x4c] sm:$0xf]  ;;  %v2998_v35 = vld [vmem:[#allocation2 + $0x50] sm:$0x1] }
  0x75   : > { %v3150_v10 = vshrl.u32 %v2996_v1, 16  ;;  %v8534_v15 = vadd.f32 %v8500_v36, %v443_v33  ;;  %v3132_v7 = vor.u32 %v3131_v47, %v3128_v38  ;;  %v3153_v16 = vshll.u32 %v2996_v1, 16  ;;  %v1077_v45 = vld [vmem:[#allocation2 + $0x4c] sm:$0xf]  ;;  %v1118_v59 = vld [vmem:[#allocation2 + $0x50] sm:$0x1] }
  0x76   : > { %v1259_v39 = vrot.slane %v1258_v2, 4  ;;  %v3141_v11 = vrot.slane %v3139_v5, 4  ;;  %v1269_v21 = vrot.slane %v1268_v8, 4  ;;  %v3147_v17 = vrot.slane %v3145_v25, 5  ;;  %v7902_v47 = vld [vmem:[%s10031_s3 + $0x38] sm:$0xff]  }
  0x77   : > { %v3152_v19 = vrot.slane %v3150_v10, 4  ;;  %v3159_v32 = vshll.u32 %v2997_v53, 16  ;;  %v3133_v27 = vrot.slane %v3132_v7, 4  ;;  %v3155_v22 = vrot.slane %v3153_v16, 5  ;;  %7217 = vmatprep.subr.bf16.mxu1 %v7902_v47 }
  0x78   : > { %v1264_v23 = vsel %vm8235_vm9, %v1259_v39, %v1263_v54  ;;  %v3142_v29 = vor.u32 %v3141_v11, %v3137_v63  ;;  %v1274_v33 = vsel %vm8235_vm9, %v1269_v21, %v1273_v58  ;;  %v3163_v60 = vshrl.u32 %v2997_v53, 16  ;;  %7218 = vmatpush3.bf16.msra.mxu1 %v7902_v47 }
  0x79   : > { %v3161_v62 = vrot.slane %v3159_v32, 5  ;;  %v3169_v44 = vshll.u32 %v2998_v35, 16  ;;  %v6294_v46 = vcombine.low %v1264_v23, %v1274_v33  ;;  %v3138_v48 = vsel %vm8235_vm9, %v3133_v27, %v3137_v63  ;;  %v994_v27 = vld [vmem:[#allocation2 + $0x54] sm:$0xf]  ;;  %v998_v33 = vld [vmem:[#allocation2 + $0x5c] sm:$0x1] }
  0x7a   : > { %v3143_v49 = vrot.slane %v3142_v29, 4  ;;  %v3156_v50 = vor.u32 %v3155_v22, %v3152_v19  ;;  %v3165_v52 = vrot.slane %v3163_v60, 4  ;;  %v1276_v54 = vshrl.u32 %v1076_v34, 16 }
  0x7b   : > { %v3171_v51 = vrot.slane %v3169_v44, 5  ;;  %v1279_v56 = vshll.u32 %v1076_v34, 16  ;;  %7180 = vmatmul.mubr.bf16.gmra.mrb[8].mxu1 %v6294_v46  ;;  %v1285_v1 = vshll.u32 %v1077_v45, 16  ;;  %v1289_v2 = vshrl.u32 %v1077_v45, 16 }
  0x7c   : > { %v3148_v58 = vsel %vm8235_vm9, %v3143_v49, %v3147_v17  ;;  %v3157_v38 = vrot.slane %v3156_v50, 4  ;;  %v3166_v5 = vor.u32 %v3165_v52, %v3161_v62  ;;  %v1278_v8 = vrot.slane %v1276_v54, 4  ;;  %v3735_v54 = vld [vmem:[#allocation2 + $0xc] sm:$0xe] }
  0x7d   : > { %v6453_v63 = vcombine.low %v3138_v48, %v3148_v58  ;;  %v1281_v25 = vrot.slane %v1279_v56, 5  ;;  %v1287_v10 = vrot.slane %v1285_v1, 5  ;;  %v1291_v39 = vrot.slane %v1289_v2, 4  ;;  %v3736_v2 = vld [vmem:[#allocation2 + $0x18] sm:$0xe] }
  0x7e   : > { %v3162_v53 = vsel %vm8235_vm9, %v3157_v38, %v3161_v62  ;;  %v1295_v7 = vshll.u32 %v1118_v59, 16  ;;  %v3167_v11 = vrot.slane %v3166_v5, 4  ;;  %v732_v16 = vshrl.u32 %v8519_v26, 16 }
  0x7f   : > { %7371 = vmatprep.mubr.bf16.mxu0 %v6453_v63  ;;  %v1282_v35 = vor.u32 %v1281_v25, %v1278_v8  ;;  %v735_v21 = vshll.u32 %v8519_v26, 16  ;;  %v1292_v17 = vor.u32 %v1291_v39, %v1287_v10  ;;  %v740_v32 = vshrl.u32 %v8524_v40, 16  ;;  %v1001_v25 = vld [vmem:[#allocation2 + $0x60] sm:$0xf] }
  0x80   : > { %v1297_v19 = vrot.slane %v1295_v7, 5  ;;  %v743_v23 = vshll.u32 %v8524_v40, 16  ;;  %v3172_v29 = vsel %vm8235_vm9, %v3167_v11, %v3171_v51  ;;  %v734_v34 = vrot.slane %v732_v16, 7  ;;  %v7990_v16 = vld [vmem:[#allocation2 + $0x10] sm:$0xf] }
  0x81   : > { %v1283_v22 = vrot.slane %v1282_v35, 4  ;;  %v513_v62 = vmax.f32 %v8527_v41, 0.0  ;;  %v6454_v60 = vcombine.low %v3162_v53, %v3172_v29  ;;  %v1293_v44 = vrot.slane %v1292_v17, 4  ;;  %v7906_v41 = vld [vmem:[%s10031_s3 + $0x80] sm:$0xff]  }
  0x82   : > { %v742_v45 = vrot.slane %v740_v32, 7  ;;  %v514_v26 = vmax.f32 %v8534_v15, 0.0  ;;  %v737_v48 = vor.u32 %v735_v21, %v734_v34  ;;  %v738_v49 = vrot.slane %v734_v34, 4  ;;  %7251 = vmatprep.subr.bf16.mxu1 %v7906_v41  ;;  %v277_v32 = vld [vmem:[#allocation2 + $0x78] sm:$0x1] }
  0x83   : > { %v1288_v46 = vsel %vm8235_vm9, %v1283_v22, %v1287_v10  ;;  %v6715_v40 = vpack.c.bf16 %v513_v62, %v513_v62  ;;  %7372 = vmatmul.mubr.bf16.gmra.mrb[8].mxu0 %v6454_v60  ;;  %v1298_v50 = vsel %vm8235_vm9, %v1293_v44, %v1297_v19  ;;  %v1005_v10 = vld [vmem:[#allocation2 + $0x68] sm:$0x1]  ;;  %v444_v39 = vmul.f32 %v8484_v57, %v6799_v43 }
  0x84   : > { %v745_v52 = vor.u32 %v743_v23, %v742_v45  ;;  %v747_v51 = vrot.slane %v742_v45, 4  ;;  %v6716_v59 = vpack.c.bf16 %v514_v26, %v514_v26  ;;  %v6295_v56 = vcombine.low %v1288_v46, %v1298_v50 }
  0x85   : > { %v995_v15 = vsel %vm8248_vm10, %v737_v48, %v994_v27  ;;  %v749_v58 = vshrl.u32 %v6715_v40, 16  ;;  %v752_v38 = vshll.u32 %v6715_v40, 16  ;;  %v445_v7 = vmul.f32 %v8484_v57, %v6800_v31  ;;  %v6917_v31 = vld [vmem:[%s8164_s24 + $0x48] sm:$0xff]  }
  0x86   : > { %v746_v47 = vsel %vm8257_vm11, %v738_v49, %v745_v52  ;;  %996 = vst [vmem:[#allocation2 + $0x54] sm:$0xf] %v995_v15  ;;  %v999_v63 = vsel %vm8168_vm3, %v747_v51, %v998_v33  ;;  %v757_v5 = vshrl.u32 %v6716_v59, 16  ;;  %v760_v8 = vshll.u32 %v6716_v59, 16  ;;  %7183 = vmatprep.mubr.bf16.mxu1 %v6295_v56 }
  0x87   : > { %997 = vst [vmem:[#allocation2 + $0x58] sm:$0xf] %v746_v47  ;;  %1000 = vst [vmem:[#allocation2 + $0x5c] sm:$0x1] %v999_v63  ;;  %v751_v53 = vrot.slane %v749_v58, 7  ;;  %v6473_v11 = vrot.slane %v3735_v54, 9  ;;  %v8587_v19 = vsel %vm8568_vm14, %v8516_v12, %v3811_v42  ;;  %v483_v43 = vadd.f32 %v8500_v36, %v444_v39 }
  0x88   : > { %v759_v35 = vrot.slane %v757_v5, 7  ;;  %v3801_v21 = vrot.slane %v7990_v16, 5  ;;  %v6474_v17 = vrot.slane %v3736_v2, 9  ;;  %v484_v13 = vadd.f32 %v8500_v36, %v445_v7 }
  0x89   : > { %v754_v23 = vor.u32 %v752_v38, %v751_v53  ;;  %v755_v27 = vrot.slane %v751_v53, 4  ;;  %v515_v42 = vmax.f32 %v483_v43, 0.0  ;;  %v278_v37 = vsel %vm8168_vm3, 0, %v277_v32 }
  0x8a   : > { %v762_v29 = vor.u32 %v760_v8, %v759_v35  ;;  %v764_v22 = vrot.slane %v759_v35, 4  ;;  %v8594_v34 = vsel %vm8568_vm14, %v6473_v11, %v3801_v21  ;;  %v3803_v4 = vrot.slane %v3801_v21, 4  ;;  %279 = vst [vmem:[#allocation2 + $0x78] sm:$0x1] %v278_v37 }
  0x8b   : > { %v1002_v33 = vsel %vm8248_vm10, %v754_v23, %v1001_v25  ;;  %v516_v12 = vmax.f32 %v484_v13, 0.0  ;;  %v8602_v62 = vsel %vm8568_vm14, %v6474_v17, %v3808_v30  ;;  %v8616_v30 = vpack.c.bf16 %v515_v42, %v515_v42 }
  0x8c   : > { %v763_v60 = vsel %vm8257_vm11, %v755_v27, %v762_v29  ;;  %1003 = vst [vmem:[#allocation2 + $0x60] sm:$0xf] %v1002_v33  ;;  %v1006_v44 = vsel %vm8168_vm3, %v764_v22, %v1005_v10  ;;  %v8612_v45 = vsel %vm8568_vm14, %v3803_v4, %v3804_v55  ;;  %v6506_v61 = vcombine.low %v8602_v62, %v8587_v19  ;;  %v7901_v19 = vld [vmem:[%s10031_s3 + $0x190] sm:$0xff]  }
  0x8d   : > { %v1078_v26 = vld [vmem:[#allocation2 + $0x54] sm:$0xf]  ;;  %1004 = vst [vmem:[#allocation2 + $0x64] sm:$0xf] %v763_v60  ;;  %1007 = vst [vmem:[#allocation2 + $0x68] sm:$0x1] %v1006_v44  ;;  %v8618_v48 = vpack.c.bf16 %v516_v12, %v516_v12  ;;  %v6505_v49 = vcombine.low %v8594_v34, %v8612_v45  ;;  %v6803_v51 = vunpack.c.l.bf16 %v6917_v31  ;;  %v6804_v59 = vunpack.c.h.bf16 %v6917_v31 }
  0x8e   : > { %v2999_v46 = vld [vmem:[#allocation2 + $0x54] sm:$0xf]  ;;  %v1079_v40 = vld [vmem:[#allocation2 + $0x58] sm:$0xf]  ;;  %v1119_v55 = vld [vmem:[#allocation2 + $0x5c] sm:$0x1] }
  0x8f   : > { %v1300_v50 = vshrl.u32 %v1078_v26, 16  ;;  %v1303_v52 = vshll.u32 %v1078_v26, 16  ;;  %v1309_v54 = vshll.u32 %v1079_v40, 16  ;;  %v1313_v41 = vshrl.u32 %v1079_v40, 16  ;;  %v8624_v15 = vld [vmem:[#allocation2 + $0x58] sm:$0xf] }
  0x90   : > { %v1319_v56 = vshll.u32 %v1119_v55, 16  ;;  %v3174_v58 = vshrl.u32 %v2999_v46, 16  ;;  %v8626_v47 = vld [vmem:[#allocation2 + $0x5c] sm:$0x1]  ;;  %v3177_v63 = vshll.u32 %v2999_v46, 16  ;;  %v3183_v5 = vshll.u32 %v8624_v15, 16 }
  0x91   : > { %v1302_v38 = vrot.slane %v1300_v50, 4  ;;  %v1305_v2 = vrot.slane %v1303_v52, 5  ;;  %v1311_v8 = vrot.slane %v1309_v54, 5  ;;  %v1315_v25 = vrot.slane %v1313_v41, 4 }
  0x92   : > { %v1321_v53 = vrot.slane %v1319_v56, 5  ;;  %v3176_v10 = vrot.slane %v3174_v58, 4  ;;  %v3179_v7 = vrot.slane %v3177_v63, 5  ;;  %v3185_v11 = vrot.slane %v3183_v5, 5 }
  0x93   : > { %v1306_v39 = vor.u32 %v1305_v2, %v1302_v38  ;;  %v3187_v35 = vshrl.u32 %v8624_v15, 16  ;;  %v1316_v16 = vor.u32 %v1315_v25, %v1311_v8  ;;  %v3193_v21 = vshll.u32 %v8626_v47, 16  ;;  %v3002_v17 = vld [vmem:[#allocation2 + $0x60] sm:$0xf] }
  0x94   : > { %v766_v32 = vshrl.u32 %v8616_v30, 16  ;;  %v8633_v23 = vmul.f32 %v8484_v57, %v6803_v51  ;;  %v3180_v43 = vor.u32 %v3179_v7, %v3176_v10  ;;  %v8635_v31 = vld [vmem:[#allocation2 + $0x64] sm:$0xf]  ;;  %v8638_v29 = vmul.f32 %v8484_v57, %v6804_v59  ;;  %v8642_v26 = vld [vmem:[#allocation2 + $0x68] sm:$0x1] }
  0x95   : > { %v1307_v27 = vrot.slane %v1306_v39, 4  ;;  %v3189_v13 = vrot.slane %v3187_v35, 4  ;;  %v1317_v22 = vrot.slane %v1316_v16, 4  ;;  %v3195_v4 = vrot.slane %v3193_v21, 5  ;;  %v1080_v37 = vld [vmem:[#allocation2 + $0x60] sm:$0xf] }
  0x96   : > { %v3198_v33 = vshrl.u32 %v3002_v17, 16  ;;  %v3201_v42 = vshll.u32 %v3002_v17, 16  ;;  %v3181_v60 = vrot.slane %v3180_v43, 4  ;;  %v3207_v46 = vshll.u32 %v8635_v31, 16  ;;  %v1081_v51 = vld [vmem:[#allocation2 + $0x64] sm:$0xf] }
  0x97   : > { %v1312_v12 = vsel %vm8235_vm9, %v1307_v27, %v1311_v8  ;;  %v3190_v44 = vor.u32 %v3189_v13, %v3185_v11  ;;  %v1322_v40 = vsel %vm8235_vm9, %v1317_v22, %v1321_v53  ;;  %v3211_v52 = vshrl.u32 %v8635_v31, 16  ;;  %v1120_v58 = vld [vmem:[#allocation2 + $0x68] sm:$0x1]  ;;  %v333_v43 = vld [vmem:[#allocation2 + $0x80] sm:$0x1] }
  0x98   : > { %v3200_v55 = vrot.slane %v3198_v33, 4  ;;  %v3203_v50 = vrot.slane %v3201_v42, 5  ;;  %v6296_v59 = vcombine.low %v1312_v12, %v1322_v40  ;;  %v3186_v54 = vsel %vm8235_vm9, %v3181_v60, %v3185_v11  ;;  %v1008_v42 = vld [vmem:[#allocation2 + $0x6c] sm:$0xf]  ;;  %v280_v12 = vld [vmem:[#allocation2 + $0x84] sm:$0x1] }
  0x99   : > { %v3191_v41 = vrot.slane %v3190_v44, 4  ;;  %v3209_v56 = vrot.slane %v3207_v46, 5  ;;  %v3213_v2 = vrot.slane %v3211_v52, 4  ;;  %v3217_v63 = vshll.u32 %v8642_v26, 16 }
  0x9a   : > { %v3204_v38 = vor.u32 %v3203_v50, %v3200_v55  ;;  %v1324_v5 = vshrl.u32 %v1080_v37, 16  ;;  %7184 = vmatmul.mubr.bf16.gmra.mrb[12].mxu1 %v6296_v59  ;;  %v1327_v25 = vshll.u32 %v1080_v37, 16  ;;  %v1333_v53 = vshll.u32 %v1081_v51, 16  ;;  %v6918_v59 = vld [vmem:[%s8164_s24 + $0x50] sm:$0xff]  }
  0x9b   : > { %v3196_v8 = vsel %vm8235_vm9, %v3191_v41, %v3195_v4  ;;  %v1337_v10 = vshrl.u32 %v1081_v51, 16  ;;  %v3214_v35 = vor.u32 %v3213_v2, %v3209_v56  ;;  %v3219_v16 = vrot.slane %v3217_v63, 5  ;;  %v336_v51 = vld [vmem:[#allocation2 + $0x8c] sm:$0x1] }
  0x9c   : > { %v6455_v39 = vcombine.low %v3186_v54, %v3196_v8  ;;  %v3205_v7 = vrot.slane %v3204_v38, 4  ;;  %v1326_v11 = vrot.slane %v1324_v5, 4  ;;  %v1329_v21 = vrot.slane %v1327_v25, 5  ;;  %v3737_v38 = vld [vmem:[#allocation2 + $0x24] sm:$0xe] }
  0x9d   : > { %v1335_v17 = vrot.slane %v1333_v53, 5  ;;  %v1339_v27 = vrot.slane %v1337_v10, 4  ;;  %v3215_v22 = vrot.slane %v3214_v35, 4  ;;  %v1343_v33 = vshll.u32 %v1120_v58, 16  ;;  %v1012_v58 = vld [vmem:[#allocation2 + $0x74] sm:$0x1] }
  0x9e   : > { %7375 = vmatprep.mubr.bf16.mxu0 %v6455_v39  ;;  %v3210_v13 = vsel %vm8235_vm9, %v3205_v7, %v3209_v56  ;;  %v768_v4 = vrot.slane %v766_v32, 7  ;;  %v1330_v60 = vor.u32 %v1329_v21, %v1326_v11  ;;  %v769_v46 = vshll.u32 %v8616_v30, 16  ;;  %v8680_v21 = vld [vmem:[#allocation2 + $0x30] sm:$0xe] }
  0x9f   : > { %v1340_v44 = vor.u32 %v1339_v27, %v1335_v17  ;;  %v774_v37 = vshrl.u32 %v8618_v48, 16  ;;  %v3220_v40 = vsel %vm8235_vm9, %v3215_v22, %v3219_v16  ;;  %v1345_v55 = vrot.slane %v1343_v33, 5  ;;  %v7991_v22 = vld [vmem:[#allocation2 + $0x28] sm:$0xf] }
  0xa0   : > { %v772_v50 = vrot.slane %v768_v4, 4  ;;  %v777_v52 = vshll.u32 %v8618_v48, 16  ;;  %v6456_v54 = vcombine.low %v3210_v13, %v3220_v40  ;;  %v1331_v41 = vrot.slane %v1330_v60, 4  ;;  %v7992_v60 = vld [vmem:[#allocation2 + $0x2c] sm:$0x1] }
  0xa1   : > { %v1341_v32 = vrot.slane %v1340_v44, 4  ;;  %v771_v56 = vor.u32 %v769_v46, %v768_v4  ;;  %v776_v2 = vrot.slane %v774_v37, 7  ;;  %v334_v30 = vsel %vm8176_vm4, 0, %v333_v43  ;;  %v7899_v4 = vld [vmem:[%s10031_s3 + $0x188] sm:$0xff]  }
  0xa2   : > { %v485_v63 = vadd.f32 %v8500_v36, %v8633_v23  ;;  %v486_v5 = vadd.f32 %v8500_v36, %v8638_v29  ;;  %7376 = vmatmul.mubr.bf16.gmra.mrb[12].mxu0 %v6456_v54  ;;  %v1336_v48 = vsel %vm8235_vm9, %v1331_v41, %v1335_v17  ;;  %335 = vst [vmem:[#allocation2 + $0x80] sm:$0x1] %v334_v30  ;;  %v281_v53 = vsel %vm8168_vm3, 0, %v280_v12 }
  0xa3   : > { %v1346_v8 = vsel %vm8235_vm9, %v1341_v32, %v1345_v55  ;;  %v1009_v25 = vsel %vm8248_vm10, %v771_v56, %v1008_v42  ;;  %v779_v39 = vor.u32 %v777_v52, %v776_v2  ;;  %v781_v23 = vrot.slane %v776_v2, 4  ;;  %7411 = vmatprep.mubr.bf16.mxu0 %v6505_v49  ;;  %282 = vst [vmem:[#allocation2 + $0x84] sm:$0x1] %v281_v53 }
  0xa4   : > { %v6297_v10 = vcombine.low %v1336_v48, %v1346_v8  ;;  %1010 = vst [vmem:[#allocation2 + $0x6c] sm:$0xf] %v1009_v25  ;;  %v517_v29 = vmax.f32 %v485_v63, 0.0  ;;  %v518_v7 = vmax.f32 %v486_v5, 0.0  ;;  %v337_v35 = vsel %vm8176_vm4, 0, %v336_v51 }
  0xa5   : > { %v6807_v16 = vunpack.c.l.bf16 %v6918_v59  ;;  %v6808_v11 = vunpack.c.h.bf16 %v6918_v59  ;;  %v780_v17 = vsel %vm8257_vm11, %v772_v50, %v779_v39  ;;  %v1013_v27 = vsel %vm8168_vm3, %v781_v23, %v1012_v58  ;;  %338 = vst [vmem:[#allocation2 + $0x8c] sm:$0x1] %v337_v35  ;;  %v1015_v51 = vld [vmem:[#allocation2 + $0x78] sm:$0xf] }
  0xa6   : > { %7187 = vmatprep.mubr.bf16.mxu1 %v6297_v10  ;;  %v6719_v43 = vpack.c.bf16 %v517_v29, %v517_v29  ;;  %v6475_v34 = vrot.slane %v3737_v38, 9  ;;  %1011 = vst [vmem:[#allocation2 + $0x70] sm:$0xf] %v780_v17  ;;  %1014 = vst [vmem:[#allocation2 + $0x74] sm:$0x1] %v1013_v27  ;;  %v6720_v45 = vpack.c.bf16 %v518_v7, %v518_v7  ;;  %v3815_v33 = vrot.slane %v7991_v22, 5 }
  0xa7   : > { %v448_v49 = vmul.f32 %v8484_v57, %v6807_v16  ;;  %v449_v13 = vmul.f32 %v8484_v57, %v6808_v11  ;;  %v3818_v44 = vrot.slane %v7992_v60, 5  ;;  %v6476_v46 = vrot.slane %v8680_v21, 9 }
  0xa8   : > { %v783_v42 = vshrl.u32 %v6719_v43, 16  ;;  %v786_v12 = vshll.u32 %v6719_v43, 16  ;;  %v791_v37 = vshrl.u32 %v6720_v45, 16  ;;  %v794_v40 = vshll.u32 %v6720_v45, 16  ;;  %v7903_v45 = vld [vmem:[%s10031_s3 + $0x198] sm:$0xff]  }
  0xa9   : > { %v487_v55 = vadd.f32 %v8500_v36, %v448_v49  ;;  %v488_v50 = vadd.f32 %v8500_v36, %v449_v13  ;;  %v3816_v59 = vsel %vm8568_vm14, %v6475_v34, %v3815_v33  ;;  %v3817_v54 = vrot.slane %v3815_v33, 4  ;;  %v1019_v53 = vld [vmem:[#allocation2 + $0x80] sm:$0x1]  ;;  %v283_v34 = vld [vmem:[#allocation2 + $0x90] sm:$0x1] }
  0xaa   : > { %v785_v52 = vrot.slane %v783_v42, 7  ;;  %v3822_v41 = vrot.slane %v8427_v6, 5  ;;  %7412 = vmatmul.mubr.bf16.vlgmr.msra.gmra.mrb[0].mxu0 %v6506_v61  ;;  %v793_v56 = vrot.slane %v791_v37, 7  ;;  %v3825_v2 = vrot.slane %v8432_v9, 5  ;;  %v1022_v42 = vld [vmem:[#allocation2 + $0x84] sm:$0xf] }
  0xab   : > { %v1082_v32 = vld [vmem:[#allocation2 + $0x6c] sm:$0xf]  ;;  %v519_v58 = vmax.f32 %v487_v55, 0.0  ;;  %v520_v38 = vmax.f32 %v488_v50, 0.0  ;;  %7444 = vmatpush3.bf16.msra.mxu0 %v8455_v3  ;;  %v3819_v3 = vsel %vm8568_vm14, %v3817_v54, %v3818_v44  ;;  %v6919_v55 = vld [vmem:[%s8164_s24 + $0x58] sm:$0xff]  }
  0xac   : > { %v1348_v30 = vshrl.u32 %v1082_v32, 16  ;;  %v1351_v63 = vshll.u32 %v1082_v32, 16  ;;  %v788_v5 = vor.u32 %v786_v12, %v785_v52  ;;  %v789_v48 = vrot.slane %v785_v52, 4  ;;  %7445 = vmatprep.subr.bf16.mxu0 %v7899_v4  ;;  %v339_v12 = vld [vmem:[#allocation2 + $0x98] sm:$0x1] }
  0xad   : > { %v796_v8 = vor.u32 %v794_v40, %v793_v56  ;;  %v798_v25 = vrot.slane %v793_v56, 4  ;;  %v6721_v6 = vpack.c.bf16 %v519_v58, %v519_v58  ;;  %v6722_v10 = vpack.c.bf16 %v520_v38, %v520_v38  ;;  %v1083_v62 = vld [vmem:[#allocation2 + $0x70] sm:$0xf]  ;;  %v1121_v61 = vld [vmem:[#allocation2 + $0x74] sm:$0x1] }
  0xae   : > { %v1350_v39 = vrot.slane %v1348_v30, 4  ;;  %v1353_v9 = vrot.slane %v1351_v63, 5  ;;  %v1016_v23 = vsel %vm8248_vm10, %v788_v5, %v1015_v51  ;;  %v1357_v29 = vshll.u32 %v1083_v62, 16  ;;  %v1026_v63 = vld [vmem:[#allocation2 + $0x8c] sm:$0x1] }
  0xaf   : > { %v1361_v7 = vshrl.u32 %v1083_v62, 16  ;;  %v1367_v35 = vshll.u32 %v1121_v61, 16  ;;  %v797_v16 = vsel %vm8257_vm11, %v789_v48, %v796_v8  ;;  %1017 = vst [vmem:[#allocation2 + $0x78] sm:$0xf] %v1016_v23  ;;  %v1020_v17 = vsel %vm8168_vm3, %v798_v25, %v1019_v53  ;;  %7446 = vmatpush3.bf16.msra.mxu0 %v7899_v4  ;;  %v286_v25 = vld [vmem:[#allocation2 + $0x9c] sm:$0x1] }
  0xb0   : > { %v1354_v11 = vor.u32 %v1353_v9, %v1350_v39  ;;  %1018 = vst [vmem:[#allocation2 + $0x7c] sm:$0xf] %v797_v16  ;;  %v800_v27 = vshrl.u32 %v6721_v6, 16  ;;  %v803_v43 = vshll.u32 %v6721_v6, 16  ;;  %v1359_v49 = vrot.slane %v1357_v29, 5  ;;  %7447 = vmatprep.subr.bf16.mxu0 %v7901_v19  ;;  %v7907_v53 = vld [vmem:[%s10031_s3 + $0x1a0] sm:$0xff]  }
  0xb1   : > { %v1363_v13 = vrot.slane %v1361_v7, 4  ;;  %v1369_v22 = vrot.slane %v1367_v35, 5  ;;  %1021 = vst [vmem:[#allocation2 + $0x80] sm:$0x1] %v1020_v17  ;;  %v808_v33 = vshrl.u32 %v6722_v10, 16  ;;  %v811_v37 = vshll.u32 %v6722_v10, 16 }
  0xb2   : > { %v1355_v60 = vrot.slane %v1354_v11, 4  ;;  %v802_v44 = vrot.slane %v800_v27, 7  ;;  %v6507_v40 = vcombine.low %v3816_v59, %v3819_v3  ;;  %v3823_v52 = vsel %vm8568_vm14, %v6476_v46, %v3822_v41  ;;  %v342_v61 = vld [vmem:[#allocation2 + $0xa4] sm:$0x1]  ;;  %v8740_v7 = vld [vmem:[#allocation2 + $0x3c] sm:$0xe] }
  0xb3   : > { %v1364_v50 = vor.u32 %v1363_v13, %v1359_v49  ;;  %v810_v4 = vrot.slane %v808_v33, 7  ;;  %v3824_v51 = vrot.slane %v3822_v41, 4  ;;  %v284_v58 = vsel %vm8168_vm3, 0, %v283_v34  ;;  %7448 = vmatpush3.bf16.msra.mxu0 %v7901_v19  ;;  %v6920_v27 = vld [vmem:[%s8164_s24 + $0x60] sm:$0xff]  }
  0xb4   : > { %v1360_v54 = vsel %vm8235_vm9, %v1355_v60, %v1359_v49  ;;  %v805_v32 = vor.u32 %v803_v43, %v802_v44  ;;  %v806_v56 = vrot.slane %v802_v44, 4  ;;  %7415 = vmatprep.mubr.bf16.mxu0 %v6507_v40  ;;  %285 = vst [vmem:[#allocation2 + $0x90] sm:$0x1] %v284_v58  ;;  %7449 = vmatprep.subr.bf16.mxu0 %v7903_v45  ;;  %v340_v48 = vsel %vm8176_vm4, 0, %v339_v12 }
  0xb5   : > { %v1365_v59 = vrot.slane %v1364_v50, 4  ;;  %v813_v38 = vor.u32 %v811_v37, %v810_v4  ;;  %v815_v30 = vrot.slane %v810_v4, 4  ;;  %v3826_v21 = vsel %vm8568_vm14, %v3824_v51, %v3825_v2  ;;  %341 = vst [vmem:[#allocation2 + $0x98] sm:$0x1] %v340_v48 }
  0xb6   : > { %v1084_v46 = vld [vmem:[#allocation2 + $0x78] sm:$0xf]  ;;  %v1023_v41 = vsel %vm8248_vm10, %v805_v32, %v1022_v42  ;;  %v6508_v5 = vcombine.low %v3823_v52, %v3826_v21  ;;  %v6811_v8 = vunpack.c.l.bf16 %v6919_v55  ;;  %v6812_v17 = vunpack.c.h.bf16 %v6919_v55  ;;  %v8759_v32 = vld [vmem:[%s10029_s1] ss:$0 sm:$0xff] }
  0xb7   : > { %v1370_v6 = vsel %vm8235_vm9, %v1365_v59, %v1369_v22  ;;  %v1085_v2 = vld [vmem:[#allocation2 + $0x7c] sm:$0xf]  ;;  %v1372_v10 = vshrl.u32 %v1084_v46, 16  ;;  %v1375_v19 = vshll.u32 %v1084_v46, 16  ;;  %v814_v62 = vsel %vm8257_vm11, %v806_v56, %v813_v38  ;;  %1024 = vst [vmem:[#allocation2 + $0x84] sm:$0xf] %v1023_v41  ;;  %7450 = vmatpush3.bf16.msra.mxu0 %v7903_v45 }
  0xb8   : > { %v6298_v39 = vcombine.low %v1360_v54, %v1370_v6  ;;  %v1122_v9 = vld [vmem:[#allocation2 + $0x80] sm:$0x1]  ;;  %v1381_v23 = vshll.u32 %v1085_v2, 16  ;;  %v1385_v3 = vshrl.u32 %v1085_v2, 16  ;;  %1025 = vst [vmem:[#allocation2 + $0x88] sm:$0xf] %v814_v62  ;;  %v1027_v29 = vsel %vm8168_vm3, %v815_v30, %v1026_v63  ;;  %7416 = vmatmul.mubr.bf16.gmra.mrb[4].mxu0 %v6508_v5  ;;  %7451 = vmatprep.subr.bf16.mxu0 %v7907_v53 }
  0xb9   : > { %v1374_v35 = vrot.slane %v1372_v10, 4  ;;  %v1377_v16 = vrot.slane %v1375_v19, 5  ;;  %v1391_v11 = vshll.u32 %v1122_v9, 16  ;;  %1028 = vst [vmem:[#allocation2 + $0x8c] sm:$0x1] %v1027_v29  ;;  %v450_v49 = vmul.f32 %v8484_v57, %v6811_v8  ;;  %v7911_v22 = vld [vmem:[%s10031_s3 + $0x1a8] sm:$0xff]  }
  0xba   : > { %7188 = vmatmul.mubr.bf16.gmra.mrb[16].mxu1 %v6298_v39  ;;  %v1383_v43 = vrot.slane %v1381_v23, 5  ;;  %v1387_v34 = vrot.slane %v1385_v3, 4  ;;  %v287_v13 = vsel %vm8168_vm3, 0, %v286_v25  ;;  %v451_v12 = vmul.f32 %v8484_v57, %v6812_v17  ;;  %v8776_v3 = vld [vmem:[%s10030_s2] ss:$0 sm:$0xff] }
  0xbb   : > { %v1378_v33 = vor.u32 %v1377_v16, %v1374_v35  ;;  %v1393_v42 = vrot.slane %v1391_v11, 5  ;;  %288 = vst [vmem:[#allocation2 + $0x9c] sm:$0x1] %v287_v13  ;;  %v343_v45 = vsel %vm8176_vm4, 0, %v342_v61  ;;  %v489_v44 = vadd.f32 %v8500_v36, %v450_v49  ;;  %7452 = vmatpush3.bf16.msra.mxu0 %v7907_v53  ;;  %v7919_v61 = vld [vmem:[%s10031_s3 + $0x1b8] sm:$0xff]  }
  0xbc   : > { %v1388_v60 = vor.u32 %v1387_v34, %v1383_v43  ;;  %344 = vst [vmem:[#allocation2 + $0xa4] sm:$0x1] %v343_v45  ;;  %v6815_v37 = vunpack.c.l.bf16 %v6920_v27  ;;  %v6816_v40 = vunpack.c.h.bf16 %v6920_v27  ;;  %v490_v50 = vadd.f32 %v8500_v36, %v451_v12  ;;  %7453 = vmatprep.subr.bf16.mxu0 %v7911_v22  ;;  %v7915_v36 = vld [vmem:[%s10031_s3 + $0x1b0] sm:$0xff]   ;;  %v3740_v13 = vld [vmem:[#allocation2 + $0x48] sm:$0xe]  ;;  %v8787_v45 = vld [vmem:[%s10031_s3 + $0x1c0] sm:$0xff]  }
  0xbd   : > { %v1379_v55 = vrot.slane %v1378_v33, 4  ;;  %v6477_v4 = vrot.slane %v8740_v7, 9  ;;  %v3829_v52 = vrot.slane %v8529_v28, 5  ;;  %v521_v54 = vmax.f32 %v489_v44, 0.0  ;;  %v1029_v27 = vld [vmem:[#allocation2 + $0x90] sm:$0xf] }
  0xbe   : > { %v1389_v51 = vrot.slane %v1388_v60, 4  ;;  %v1086_v57 = vld [vmem:[#allocation2 + $0x84] sm:$0xf]  ;;  %v452_v56 = vmul.f32 %v8759_v32, %v6815_v37  ;;  %v453_v58 = vmul.f32 %v8759_v32, %v6816_v40  ;;  %v522_v63 = vmax.f32 %v490_v50, 0.0  ;;  %v1033_v44 = vld [vmem:[#allocation2 + $0x98] sm:$0x1] }
  0xbf   : > { %v1384_v28 = vsel %vm8235_vm9, %v1379_v55, %v1383_v43  ;;  %v1087_v59 = vld [vmem:[#allocation2 + $0x88] sm:$0xf]  ;;  %v1396_v38 = vshrl.u32 %v1086_v57, 16  ;;  %v1399_v30 = vshll.u32 %v1086_v57, 16  ;;  %v6723_v48 = vpack.c.bf16 %v521_v54, %v521_v54  ;;  %7454 = vmatpush3.bf16.msra.mxu0 %v7911_v22 }
  0xc0   : > { %v1394_v21 = vsel %vm8235_vm9, %v1389_v51, %v1393_v42  ;;  %v1123_v46 = vld [vmem:[#allocation2 + $0x8c] sm:$0x1]  ;;  %v1405_v41 = vshll.u32 %v1087_v59, 16  ;;  %v1409_v5 = vshrl.u32 %v1087_v59, 16  ;;  %v6724_v19 = vpack.c.bf16 %v522_v63, %v522_v63  ;;  %7455 = vmatprep.subr.bf16.mxu0 %v7915_v36  ;;  %v345_v59 = vld [vmem:[#allocation2 + $0xb0] sm:$0x1] }
  0xc1   : > { %v6299_v8 = vcombine.low %v1384_v28, %v1394_v21  ;;  %v1398_v25 = vrot.slane %v1396_v38, 4  ;;  %v1401_v53 = vrot.slane %v1399_v30, 5  ;;  %v1415_v6 = vshll.u32 %v1123_v46, 16  ;;  %v289_v28 = vld [vmem:[#allocation2 + $0xa8] sm:$0x1] }
  0xc2   : > { %v1407_v2 = vrot.slane %v1405_v41, 5  ;;  %v1411_v10 = vrot.slane %v1409_v5, 4  ;;  %v817_v62 = vshrl.u32 %v6723_v48, 16  ;;  %v820_v23 = vshll.u32 %v6723_v48, 16  ;;  %v6921_v38 = vld [vmem:[%s8164_s24 + $0x68] sm:$0xff]  }
  0xc3   : > { %7191 = vmatprep.mubr.bf16.mxu1 %v6299_v8  ;;  %v1402_v39 = vor.u32 %v1401_v53, %v1398_v25  ;;  %v1417_v9 = vrot.slane %v1415_v6, 5  ;;  %v491_v29 = vadd.f32 %v8776_v3, %v452_v56  ;;  %v825_v16 = vshrl.u32 %v6724_v19, 16  ;;  %7456 = vmatpush3.bf16.msra.mxu0 %v7915_v36  ;;  %v1036_v63 = vld [vmem:[#allocation2 + $0x9c] sm:$0xf]  ;;  %v7995_v21 = vld [vmem:[#allocation2 + $0x44] sm:$0x1] }
  0xc4   : > { %v1412_v7 = vor.u32 %v1411_v10, %v1407_v2  ;;  %v819_v35 = vrot.slane %v817_v62, 7  ;;  %v828_v11 = vshll.u32 %v6724_v19, 16  ;;  %v492_v43 = vadd.f32 %v8776_v3, %v453_v58  ;;  %7457 = vmatprep.subr.bf16.mxu0 %v7919_v61  ;;  %v292_v5 = vld [vmem:[#allocation2 + $0xb4] sm:$0x1]  ;;  %v7996_v53 = vld [vmem:[#allocation2 + $0x4c] sm:$0xf] }
  0xc5   : > { %v1403_v17 = vrot.slane %v1402_v39, 4  ;;  %v523_v34 = vmax.f32 %v491_v29, 0.0  ;;  %v8782_v49 = vsel %vm8568_vm14, %v6477_v4, %v3829_v52  ;;  %v827_v12 = vrot.slane %v825_v16, 7  ;;  %v7997_v19 = vld [vmem:[#allocation2 + $0x50] sm:$0x1] }
  0xc6   : > { %v1413_v22 = vrot.slane %v1412_v7, 4  ;;  %v822_v33 = vor.u32 %v820_v23, %v819_v35  ;;  %v823_v42 = vrot.slane %v819_v35, 4  ;;  %v524_v37 = vmax.f32 %v492_v43, 0.0  ;;  %v1040_v7 = vld [vmem:[#allocation2 + $0xa4] sm:$0x1]  ;;  %v6922_v43 = vld [vmem:[%s8164_s24 + $0x70] sm:$0xff]  }
  0xc7   : > { %v1408_v60 = vsel %vm8235_vm9, %v1403_v17, %v1407_v2  ;;  %v6725_v40 = vpack.c.bf16 %v523_v34, %v523_v34  ;;  %v3831_v55 = vrot.slane %v3829_v52, 4  ;;  %v830_v4 = vor.u32 %v828_v11, %v827_v12  ;;  %7458 = vmatpush3.bf16.msra.mxu0 %v7919_v61  ;;  %v348_v2 = vld [vmem:[#allocation2 + $0xbc] sm:$0x1] }
  0xc8   : > { %v1418_v50 = vsel %vm8235_vm9, %v1413_v22, %v1417_v9  ;;  %v832_v51 = vrot.slane %v827_v12, 4  ;;  %v1030_v57 = vsel %vm8248_vm10, %v822_v33, %v1029_v27  ;;  %v6726_v56 = vpack.c.bf16 %v524_v37, %v524_v37  ;;  %7491 = vmatprep.subr.bf16.mxu0 %v8787_v45 }
  0xc9   : > { %v6300_v54 = vcombine.low %v1408_v60, %v1418_v50  ;;  %1031 = vst [vmem:[#allocation2 + $0x90] sm:$0xf] %v1030_v57  ;;  %v834_v58 = vshrl.u32 %v6725_v40, 16  ;;  %v837_v36 = vshll.u32 %v6725_v40, 16  ;;  %v831_v52 = vsel %vm8257_vm11, %v823_v42, %v830_v4 }
  0xca   : > { %v1034_v30 = vsel %vm8168_vm3, %v832_v51, %v1033_v44  ;;  %v3832_v46 = vrot.slane %v7995_v21, 5  ;;  %v6478_v41 = vrot.slane %v3740_v13, 9  ;;  %1032 = vst [vmem:[#allocation2 + $0x94] sm:$0xf] %v831_v52  ;;  %v842_v8 = vshrl.u32 %v6726_v56, 16 }
  0xcb   : > { %7192 = vmatmul.mubr.bf16.gmra.mrb[20].mxu1 %v6300_v54  ;;  %1035 = vst [vmem:[#allocation2 + $0x98] sm:$0x1] %v1034_v30  ;;  %v836_v48 = vrot.slane %v834_v58, 7  ;;  %v845_v25 = vshll.u32 %v6726_v56, 16  ;;  %v3836_v6 = vrot.slane %v7996_v53, 5  ;;  %v3839_v62 = vrot.slane %v7997_v19, 5 }
  0xcc   : > { %v3833_v10 = vsel %vm8568_vm14, %v3831_v55, %v3832_v46  ;;  %v290_v61 = vsel %vm8168_vm3, 0, %v289_v28  ;;  %v346_v39 = vsel %vm8176_vm4, 0, %v345_v59  ;;  %v844_v29 = vrot.slane %v842_v8, 7  ;;  %v3741_v46 = vld [vmem:[#allocation2 + $0x54] sm:$0xe] }
  0xcd   : > { %v839_v9 = vor.u32 %v837_v36, %v836_v48  ;;  %v840_v23 = vrot.slane %v836_v48, 4  ;;  %v6509_v35 = vcombine.low %v8782_v49, %v3833_v10  ;;  %291 = vst [vmem:[#allocation2 + $0xa8] sm:$0x1] %v290_v61  ;;  %347 = vst [vmem:[#allocation2 + $0xb0] sm:$0x1] %v346_v39  ;;  %v3837_v16 = vsel %vm8568_vm14, %v6478_v41, %v3836_v6 }
  0xce   : > { %v3838_v11 = vrot.slane %v3836_v6, 4  ;;  %v6819_v17 = vunpack.c.l.bf16 %v6921_v38  ;;  %v6820_v27 = vunpack.c.h.bf16 %v6921_v38  ;;  %v847_v34 = vor.u32 %v845_v25, %v844_v29 }
  0xcf   : > { %v849_v13 = vrot.slane %v844_v29, 4  ;;  %v1037_v22 = vsel %vm8248_vm10, %v839_v9, %v1036_v63  ;;  %7419 = vmatprep.mubr.bf16.mxu0 %v6509_v35  ;;  %v293_v33 = vsel %vm8168_vm3, 0, %v292_v5  ;;  %v349_v44 = vsel %vm8176_vm4, 0, %v348_v2 }
  0xd0   : > { %v8815_v42 = vld [vmem:[#allocation2 + $0x90] sm:$0xf]  ;;  %1038 = vst [vmem:[#allocation2 + $0x9c] sm:$0xf] %v1037_v22  ;;  %v3840_v49 = vsel %vm8568_vm14, %v3838_v11, %v3839_v62  ;;  %v454_v12 = vmul.f32 %v8759_v32, %v6819_v17  ;;  %v455_v60 = vmul.f32 %v8759_v32, %v6820_v27  ;;  %294 = vst [vmem:[#allocation2 + $0xb4] sm:$0x1] %v293_v33  ;;  %v6823_v58 = vunpack.c.l.bf16 %v6922_v43 }
  0xd1   : > { %v1420_v37 = vshrl.u32 %v8815_v42, 16  ;;  %v1423_v40 = vshll.u32 %v8815_v42, 16  ;;  %v848_v55 = vsel %vm8257_vm11, %v840_v23, %v847_v34  ;;  %v1041_v50 = vsel %vm8168_vm3, %v849_v13, %v1040_v7  ;;  %350 = vst [vmem:[#allocation2 + $0xbc] sm:$0x1] %v349_v44  ;;  %v8829_v4 = vld [vmem:[#allocation2 + $0x94] sm:$0xf] }
  0xd2   : > { %v1124_v51 = vld [vmem:[#allocation2 + $0x98] sm:$0x1]  ;;  %1039 = vst [vmem:[#allocation2 + $0xa0] sm:$0xf] %v848_v55  ;;  %1042 = vst [vmem:[#allocation2 + $0xa4] sm:$0x1] %v1041_v50  ;;  %v6510_v57 = vcombine.low %v3837_v16, %v3840_v49  ;;  %v493_v54 = vadd.f32 %v8776_v3, %v454_v12  ;;  %v494_v56 = vadd.f32 %v8776_v3, %v455_v60  ;;  %v6824_v21 = vunpack.c.h.bf16 %v6922_v43 }
  0xd3   : > { %v1422_v36 = vrot.slane %v1420_v37, 4  ;;  %v1425_v28 = vrot.slane %v1423_v40, 5  ;;  %v1429_v59 = vshll.u32 %v8829_v4, 16  ;;  %v1433_v38 = vshrl.u32 %v8829_v4, 16 }
  0xd4   : > { %v1439_v52 = vshll.u32 %v1124_v51, 16  ;;  %7420 = vmatmul.mubr.bf16.gmra.mrb[8].mxu0 %v6510_v57  ;;  %v525_v30 = vmax.f32 %v493_v54, 0.0  ;;  %v526_v63 = vmax.f32 %v494_v56, 0.0  ;;  %v456_v8 = vmul.f32 %v8759_v32, %v6823_v58  ;;  %v1043_v37 = vld [vmem:[#allocation2 + $0xa8] sm:$0xf] }
  0xd5   : > { %v1426_v41 = vor.u32 %v1425_v28, %v1422_v36  ;;  %v1431_v5 = vrot.slane %v1429_v59, 5  ;;  %v1435_v48 = vrot.slane %v1433_v38, 4  ;;  %v457_v2 = vmul.f32 %v8759_v32, %v6824_v21  ;;  %v1047_v57 = vld [vmem:[#allocation2 + $0xb0] sm:$0x1] }
  0xd6   : > { %v1441_v25 = vrot.slane %v1439_v52, 5  ;;  %v6727_v53 = vpack.c.bf16 %v525_v30, %v525_v30  ;;  %v6728_v6 = vpack.c.bf16 %v526_v63, %v526_v63  ;;  %v495_v61 = vadd.f32 %v8776_v3, %v456_v8 }
  0xd7   : > { %v1427_v10 = vrot.slane %v1426_v41, 4  ;;  %v1436_v19 = vor.u32 %v1435_v48, %v1431_v5  ;;  %v8837_v62 = vld [vmem:[#allocation2 + $0x9c] sm:$0xf]  ;;  %v6479_v39 = vrot.slane %v3741_v46, 9  ;;  %v496_v43 = vadd.f32 %v8776_v3, %v457_v2 }
  0xd8   : > { %v1444_v9 = vshrl.u32 %v8837_v62, 16  ;;  %v1447_v23 = vshll.u32 %v8837_v62, 16  ;;  %v851_v29 = vshrl.u32 %v6727_v53, 16  ;;  %v854_v7 = vshll.u32 %v6727_v53, 16 }
  0xd9   : > { %v1432_v35 = vsel %vm8235_vm9, %v1427_v10, %v1431_v5  ;;  %v1437_v16 = vrot.slane %v1436_v19, 4  ;;  %v8844_v11 = vld [vmem:[#allocation2 + $0xa0] sm:$0xf]  ;;  %v1125_v17 = vld [vmem:[#allocation2 + $0xa4] sm:$0x1]  ;;  %v859_v27 = vshrl.u32 %v6728_v6, 16 }
  0xda   : > { %v1446_v34 = vrot.slane %v1444_v9, 4  ;;  %v1449_v13 = vrot.slane %v1447_v23, 5  ;;  %v1453_v22 = vshll.u32 %v8844_v11, 16  ;;  %v1457_v33 = vshrl.u32 %v8844_v11, 16 }
  0xdb   : > { %v1442_v49 = vsel %vm8235_vm9, %v1437_v16, %v1441_v25  ;;  %v1463_v12 = vshll.u32 %v1125_v17, 16  ;;  %v853_v60 = vrot.slane %v851_v29, 7  ;;  %v861_v44 = vrot.slane %v859_v27, 7  ;;  %v3742_v25 = vld [vmem:[#allocation2 + $0x60] sm:$0xe] }
  0xdc   : > { %v6301_v40 = vcombine.low %v1432_v35, %v1442_v49  ;;  %v1450_v55 = vor.u32 %v1449_v13, %v1446_v34  ;;  %v1455_v50 = vrot.slane %v1453_v22, 5  ;;  %v1459_v51 = vrot.slane %v1457_v33, 4  ;;  %v3743_v16 = vld [vmem:[#allocation2 + $0x6c] sm:$0xe]  ;;  %v3006_v34 = vld [vmem:[#allocation2 + $0x70] sm:$0xf] }
  0xdd   : > { %v1465_v54 = vrot.slane %v1463_v12, 5  ;;  %v856_v56 = vor.u32 %v854_v7, %v853_v60  ;;  %v857_v58 = vrot.slane %v853_v60, 4  ;;  %v862_v36 = vshll.u32 %v6728_v6, 16  ;;  %v1050_v22 = vld [vmem:[#allocation2 + $0xb4] sm:$0xf] }
  0xde   : > { %7195 = vmatprep.mubr.bf16.mxu1 %v6301_v40  ;;  %v1451_v28 = vrot.slane %v1450_v55, 4  ;;  %v1460_v59 = vor.u32 %v1459_v51, %v1455_v50  ;;  %v866_v38 = vrot.slane %v861_v44, 4  ;;  %v527_v52 = vmax.f32 %v495_v61, 0.0  ;;  %v1054_v12 = vld [vmem:[#allocation2 + $0xbc] sm:$0x1] }
  0xdf   : > { %v864_v30 = vor.u32 %v862_v36, %v861_v44  ;;  %v1044_v63 = vsel %vm8248_vm10, %v856_v56, %v1043_v37  ;;  %v528_v21 = vmax.f32 %v496_v43, 0.0  ;;  %v3843_v46 = vrot.slane %v8624_v15, 5 }
  0xe0   : > { %v1456_v41 = vsel %vm8235_vm9, %v1451_v28, %v1455_v50  ;;  %v1461_v5 = vrot.slane %v1460_v59, 4  ;;  %1045 = vst [vmem:[#allocation2 + $0xa8] sm:$0xf] %v1044_v63  ;;  %v1048_v48 = vsel %vm8168_vm3, %v866_v38, %v1047_v57  ;;  %v6729_v8 = vpack.c.bf16 %v527_v52, %v527_v52 }
  0xe1   : > { %v865_v53 = vsel %vm8257_vm11, %v857_v58, %v864_v30  ;;  %1049 = vst [vmem:[#allocation2 + $0xb0] sm:$0x1] %v1048_v48  ;;  %v6730_v6 = vpack.c.bf16 %v528_v21, %v528_v21  ;;  %v3844_v2 = vsel %vm8568_vm14, %v6479_v39, %v3843_v46  ;;  %v3845_v10 = vrot.slane %v3843_v46, 4  ;;  %v3007_v58 = vld [vmem:[#allocation2 + $0x74] sm:$0x1] }
  0xe2   : > { %v1466_v15 = vsel %vm8235_vm9, %v1461_v5, %v1465_v54  ;;  %1046 = vst [vmem:[#allocation2 + $0xac] sm:$0xf] %v865_v53  ;;  %v868_v19 = vshrl.u32 %v6729_v8, 16  ;;  %v871_v61 = vshll.u32 %v6729_v8, 16  ;;  %v3846_v9 = vrot.slane %v8626_v47, 5 }
  0xe3   : > { %v6302_v23 = vcombine.low %v1456_v41, %v1466_v15  ;;  %v876_v29 = vshrl.u32 %v6730_v6, 16  ;;  %v879_v7 = vshll.u32 %v6730_v6, 16  ;;  %v6480_v35 = vrot.slane %v3742_v25, 9  ;;  %v3744_v6 = vld [vmem:[#allocation2 + $0x78] sm:$0xe] }
  0xe4   : > { %v870_v17 = vrot.slane %v868_v19, 7  ;;  %v3847_v27 = vsel %vm8568_vm14, %v3845_v10, %v3846_v9  ;;  %v3850_v39 = vrot.slane %v8635_v31, 5  ;;  %v3853_v43 = vrot.slane %v8642_v26, 5  ;;  %v8891_v10 = vld [vmem:[#allocation2 + $0x7c] sm:$0xf] }
  0xe5   : > { %7196 = vmatmul.mubr.bf16.gmra.mrb[24].mxu1 %v6302_v23  ;;  %v878_v13 = vrot.slane %v876_v29, 7  ;;  %v6511_v33 = vcombine.low %v3844_v2, %v3847_v27  ;;  %v6481_v31 = vrot.slane %v3743_v16, 9  ;;  %v3857_v50 = vrot.slane %v3006_v34, 5  ;;  %v8893_v15 = vld [vmem:[#allocation2 + $0x80] sm:$0x1] }
  0xe6   : > { %v873_v49 = vor.u32 %v871_v61, %v870_v17  ;;  %v874_v47 = vrot.slane %v870_v17, 4  ;;  %v3851_v60 = vsel %vm8568_vm14, %v6480_v35, %v3850_v39  ;;  %v3852_v44 = vrot.slane %v3850_v39, 4  ;;  %v3012_v39 = vld [vmem:[#allocation2 + $0x88] sm:$0xf]  ;;  %v3745_v34 = vld [vmem:[#allocation2 + $0x84] sm:$0xe] }
  0xe7   : > { %v8871_v37 = vld [vmem:[#allocation2 + $0xa8] sm:$0xf]  ;;  %v881_v40 = vor.u32 %v879_v7, %v878_v13  ;;  %v883_v55 = vrot.slane %v878_v13, 4  ;;  %7423 = vmatprep.mubr.bf16.mxu0 %v6511_v33  ;;  %v3858_v41 = vsel %vm8568_vm14, %v6481_v31, %v3857_v50  ;;  %v3859_v5 = vrot.slane %v3857_v50, 4 }
  0xe8   : > { %v1126_v26 = vld [vmem:[#allocation2 + $0xb0] sm:$0x1]  ;;  %v1468_v51 = vshrl.u32 %v8871_v37, 16  ;;  %v1471_v57 = vshll.u32 %v8871_v37, 16  ;;  %v1051_v54 = vsel %vm8248_vm10, %v873_v49, %v1050_v22  ;;  %v3854_v56 = vsel %vm8568_vm14, %v3852_v44, %v3853_v43  ;;  %v3013_v43 = vld [vmem:[#allocation2 + $0x8c] sm:$0x1] }
  0xe9   : > { %v8879_v36 = vld [vmem:[#allocation2 + $0xac] sm:$0xf]  ;;  %v1487_v28 = vshll.u32 %v1126_v26, 16  ;;  %v882_v59 = vsel %vm8257_vm11, %v874_v47, %v881_v40  ;;  %1052 = vst [vmem:[#allocation2 + $0xb4] sm:$0xf] %v1051_v54  ;;  %v1055_v38 = vsel %vm8168_vm3, %v883_v55, %v1054_v12  ;;  %v6512_v52 = vcombine.low %v3851_v60, %v3854_v56 }
  0xea   : > { %v1470_v30 = vrot.slane %v1468_v51, 4  ;;  %v1473_v63 = vrot.slane %v1471_v57, 5  ;;  %v1477_v21 = vshll.u32 %v8879_v36, 16  ;;  %v1481_v46 = vshrl.u32 %v8879_v36, 16  ;;  %1053 = vst [vmem:[#allocation2 + $0xb8] sm:$0xf] %v882_v59 }
  0xeb   : > { %1056 = vst [vmem:[#allocation2 + $0xbc] sm:$0x1] %v1055_v38  ;;  %7424 = vmatmul.mubr.bf16.gmra.mrb[12].mxu0 %v6512_v52  ;;  %v3860_v48 = vrot.slane %v3007_v58, 5  ;;  %v1489_v9 = vrot.slane %v1487_v28, 5  ;;  %v6482_v29 = vrot.slane %v3744_v6, 9  ;;  %v3864_v17 = vrot.slane %v8891_v10, 5 }
  0xec   : > { %v1474_v8 = vor.u32 %v1473_v63, %v1470_v30  ;;  %v1479_v25 = vrot.slane %v1477_v21, 5  ;;  %v1483_v53 = vrot.slane %v1481_v46, 4  ;;  %v3867_v27 = vrot.slane %v8893_v15, 5  ;;  %v3746_v40 = vld [vmem:[#allocation2 + $0x90] sm:$0xe] }
  0xed   : > { %v3861_v2 = vsel %vm8568_vm14, %v3859_v5, %v3860_v48  ;;  %v3865_v26 = vsel %vm8568_vm14, %v6482_v29, %v3864_v17  ;;  %v3015_v51 = vld [vmem:[#allocation2 + $0x94] sm:$0xf]  ;;  %v3016_v57 = vld [vmem:[#allocation2 + $0x98] sm:$0x1]  ;;  %v3866_v28 = vrot.slane %v3864_v17, 4  ;;  %v6483_v38 = vrot.slane %v3745_v34, 9 }
  0xee   : > { %v1475_v19 = vrot.slane %v1474_v8, 4  ;;  %v1484_v61 = vor.u32 %v1483_v53, %v1479_v25  ;;  %v6513_v23 = vcombine.low %v3858_v41, %v3861_v2  ;;  %v3871_v52 = vrot.slane %v3012_v39, 5  ;;  %v3018_v53 = vld [vmem:[#allocation2 + $0xa0] sm:$0xf]  ;;  %v3747_v6 = vld [vmem:[#allocation2 + $0x9c] sm:$0xe] }
  0xef   : > { %v3874_v30 = vrot.slane %v3013_v43, 5  ;;  %v3868_v21 = vsel %vm8568_vm14, %v3866_v28, %v3867_v27  ;;  %v6484_v46 = vrot.slane %v3746_v40, 9  ;;  %v3878_v41 = vrot.slane %v3015_v51, 5  ;;  %v8917_v29 = vld [vmem:[#allocation2 + $0x4] sm:$0xf] }
  0xf0   : > { %v1480_v7 = vsel %vm8235_vm9, %v1475_v19, %v1479_v25  ;;  %v1485_v35 = vrot.slane %v1484_v61, 4  ;;  %v8897_v16 = vld [vmem:[#allocation2 + $0xb4] sm:$0xf]  ;;  %7427 = vmatprep.mubr.bf16.mxu0 %v6513_v23  ;;  %v6514_v48 = vcombine.low %v3865_v26, %v3868_v21  ;;  %v3872_v8 = vsel %vm8568_vm14, %v6483_v38, %v3871_v52  ;;  %v3021_v39 = vld [vmem:[#allocation2 + $0xac] sm:$0xf] }
  0xf1   : > { %v8901_v13 = vld [vmem:[#allocation2 + $0xb8] sm:$0xf]  ;;  %v1492_v33 = vshrl.u32 %v8897_v16, 16  ;;  %v1495_v49 = vshll.u32 %v8897_v16, 16  ;;  %v3873_v25 = vrot.slane %v3871_v52, 4  ;;  %v3880_v19 = vrot.slane %v3878_v41, 4 }
  0xf2   : > { %v1127_v22 = vld [vmem:[#allocation2 + $0xbc] sm:$0x1]  ;;  %v1490_v47 = vsel %vm8235_vm9, %v1485_v35, %v1489_v9  ;;  %v1501_v12 = vshll.u32 %v8901_v13, 16  ;;  %v1505_v60 = vshrl.u32 %v8901_v13, 16  ;;  %v3881_v61 = vrot.slane %v3016_v57, 5 }
  0xf3   : > { %v1511_v44 = vshll.u32 %v1127_v22, 16  ;;  %v6303_v55 = vcombine.low %v1480_v7, %v1490_v47  ;;  %v1494_v31 = vrot.slane %v1492_v33, 4  ;;  %v1497_v50 = vrot.slane %v1495_v49, 5  ;;  %v3019_v9 = vld [vmem:[#allocation2 + $0xa4] sm:$0x1]  ;;  %7428 = vmatmul.mubr.bf16.gmra.mrb[16].mxu0 %v6514_v48 }
  0xf4   : > { %v1503_v54 = vrot.slane %v1501_v12, 5  ;;  %v1507_v56 = vrot.slane %v1505_v60, 4  ;;  %v7999_v7 = vld [vmem:[#allocation2] sm:$0xf]  ;;  %v3875_v17 = vsel %vm8568_vm14, %v3873_v25, %v3874_v30  ;;  %v3879_v27 = vsel %vm8568_vm14, %v6484_v46, %v3878_v41  ;;  %v3022_v43 = vld [vmem:[#allocation2 + $0xb0] sm:$0x1] }
  0xf5   : > { %v1513_v58 = vrot.slane %v1511_v44, 5  ;;  %7199 = vmatprep.mubr.bf16.mxu1 %v6303_v55  ;;  %v1498_v59 = vor.u32 %v1497_v50, %v1494_v31  ;;  %v6313_v35 = vcombine.low %v7999_v7, %v8917_v29  ;;  %v6515_v22 = vcombine.low %v3872_v8, %v3875_v17  ;;  %v3748_v47 = vld [vmem:[#allocation2 + $0xa8] sm:$0xe]  ;;  %v3749_v12 = vld [vmem:[#allocation2 + $0xb4] sm:$0xe] }
  0xf6   : > { %v1508_v63 = vor.u32 %v1507_v56, %v1503_v54  ;;  %v3882_v33 = vsel %vm8568_vm14, %v3880_v19, %v3881_v61  ;;  %v6485_v49 = vrot.slane %v3747_v6, 9  ;;  %v3885_v44 = vrot.slane %v3018_v53, 5  ;;  %v3024_v55 = vld [vmem:[#allocation2 + $0xb8] sm:$0xf]  ;;  %v3025_v31 = vld [vmem:[#allocation2 + $0xbc] sm:$0x1] }
  0xf7   : > { %v1499_v5 = vrot.slane %v1498_v59, 4  ;;  %v3888_v40 = vrot.slane %v3019_v9, 5  ;;  %7431 = vmatprep.mubr.bf16.mxu0 %v6515_v22  ;;  %v6516_v50 = vcombine.low %v3879_v27, %v3882_v33  ;;  %v3892_v26 = vrot.slane %v3021_v39, 5  ;;  %v295_v51 = vld [vmem:[#allocation2 + $0xc0] sm:$0x1]  ;;  %v7910_v17 = vld [vmem:[%s10031_s3 + $0x88] sm:$0xff]  }
  0xf8   : > { %v1509_v2 = vrot.slane %v1508_v63, 4  ;;  %v351_v57 = vld [vmem:[#allocation2 + $0xc8] sm:$0x1]  ;;  %v3886_v56 = vsel %vm8568_vm14, %v6485_v49, %v3885_v44  ;;  %v6486_v28 = vrot.slane %v3748_v47, 9  ;;  %v3895_v59 = vrot.slane %v3022_v43, 5  ;;  %v8004_v47 = vld [vmem:[%s10031_s3 + $0x80] sm:$0xff]  }
  0xf9   : > { %v1504_v23 = vsel %vm8235_vm9, %v1499_v5, %v1503_v54  ;;  %v6923_v54 = vld [vmem:[%s8164_s24 + $0x78] sm:$0xff]   ;;  %v3894_v38 = vrot.slane %v3892_v26, 4  ;;  %v6487_v52 = vrot.slane %v3749_v12, 9  ;;  %v3899_v30 = vrot.slane %v3024_v55, 5  ;;  %v8000_v25 = vld [vmem:[#allocation2 + $0xc] sm:$0xf] }
  0xfa   : > { %v1514_v34 = vsel %vm8235_vm9, %v1509_v2, %v1513_v58  ;;  %v3887_v58 = vrot.slane %v3885_v44, 4  ;;  %v3902_v63 = vrot.slane %v3025_v31, 5  ;;  %v296_v46 = vsel %vm8168_vm3, 0, %v295_v51  ;;  %v8937_v53 = vld [vmem:[#allocation2 + $0x10] sm:$0xf] }
  0xfb   : > { %v6304_v60 = vcombine.low %v1504_v23, %v1514_v34  ;;  %v352_v41 = vsel %vm8176_vm4, 0, %v351_v57  ;;  %v6827_v5 = vunpack.c.l.bf16 %v6923_v54  ;;  %v3901_v8 = vrot.slane %v3899_v30, 4  ;;  %297 = vst [vmem:[#allocation2 + $0xc0] sm:$0x1] %v296_v46  ;;  %7432 = vmatmul.mubr.bf16.gmra.mrb[20].mxu0 %v6516_v50  ;;  %v8002_v61 = vld [vmem:[#allocation2 + $0x18] sm:$0xf] }
  0xfc   : > { %v3889_v21 = vsel %vm8568_vm14, %v3887_v58, %v3888_v40  ;;  %353 = vst [vmem:[#allocation2 + $0xc8] sm:$0x1] %v352_v41  ;;  %v6314_v6 = vcombine.low %v8000_v25, %v8937_v53  ;;  %v6828_v2 = vunpack.c.h.bf16 %v6923_v54  ;;  %v8941_v9 = vld [vmem:[#allocation2 + $0x1c] sm:$0xf]  ;;  %v3893_v7 = vsel %vm8568_vm14, %v6486_v28, %v3892_v26  ;;  %v8005_v40 = vld [vmem:[#allocation2 + $0x24] sm:$0xf] }
  0xfd   : > { %7200 = vmatmul.mubr.bf16.gmra.mrb[28].mxu1 %v6304_v60  ;;  %v6517_v48 = vcombine.low %v3886_v56, %v3889_v21  ;;  %v458_v19 = vmul.f32 %v8759_v32, %v6827_v5  ;;  %v6315_v23 = vcombine.low %v8002_v61, %v8941_v9  ;;  %v3900_v27 = vsel %vm8568_vm14, %v6487_v52, %v3899_v30  ;;  %v7914_v60 = vld [vmem:[%s10031_s3 + $0x90] sm:$0xff]   ;;  %v8964_v55 = vld [vmem:[#allocation2 + $0x28] sm:$0xf]  ;;  %v7918_v56 = vld [vmem:[%s10031_s3 + $0x98] sm:$0xff]  }
  0xfe   : > { %7219 = vmatprep.mubr.bf16.mxu1 %v6313_v35  ;;  %v3896_v35 = vsel %vm8568_vm14, %v3894_v38, %v3895_v59  ;;  %v3903_v39 = vsel %vm8568_vm14, %v3901_v8, %v3902_v63  ;;  %v459_v43 = vmul.f32 %v8759_v32, %v6828_v2  ;;  %v8007_v51 = vld [vmem:[#allocation2 + $0x30] sm:$0xf]  ;;  %v8967_v57 = vld [vmem:[#allocation2 + $0x34] sm:$0xf]  ;;  %v8009_v8 = vld [vmem:[#allocation2 + $0x3c] sm:$0xf] }
  0xff   : > { %7435 = vmatprep.mubr.bf16.mxu0 %v6517_v48  ;;  %v497_v34 = vadd.f32 %v8776_v3, %v458_v19  ;;  %v6518_v22 = vcombine.low %v3893_v7, %v3896_v35  ;;  %v6519_v12 = vcombine.low %v3900_v27, %v3903_v39  ;;  %v6317_v54 = vcombine.low %v8007_v51, %v8967_v57  ;;  %v7922_v48 = vld [vmem:[%s10031_s3 + $0xa0] sm:$0xff]   ;;  %v8011_v61 = vld [vmem:[#allocation2 + $0x48] sm:$0xf]  ;;  %v298_v7 = vld [vmem:[#allocation2 + $0xcc] sm:$0x1] }
 0x100   : > { %v498_v33 = vadd.f32 %v8776_v3, %v459_v43  ;;  %v6316_v3 = vcombine.low %v8005_v40, %v8964_v55  ;;  %v8978_v25 = vld [vmem:[#allocation2 + $0x40] sm:$0xf]  ;;  %v7928_v35 = vld [vmem:[%s10031_s3 + $0xa8] sm:$0xff]   ;;  %v299_v24 = vsel %vm8168_vm3, 0, %v298_v7  ;;  %v7934_v27 = vld [vmem:[%s10031_s3 + $0xb0] sm:$0xff]   ;;  %v3255_v40 = vshll.u32 %v8891_v10, 16 }
 0x101   : > { %v529_v49 = vmax.f32 %v497_v34, 0.0  ;;  %300 = vst [vmem:[#allocation2 + $0xcc] sm:$0x1] %v299_v24  ;;  %v8013_v43 = vld [vmem:[#allocation2 + $0x54] sm:$0xf] }
 0x102   : > { %v530_v32 = vmax.f32 %v498_v33, 0.0  ;;  %v1057_v38 = vld [vmem:[#allocation2 + $0xc0] sm:$0xf]  ;;  %v8996_v34 = vld [vmem:[#allocation2 + $0x58] sm:$0xf] }
 0x103   : > { %v6731_v44 = vpack.c.bf16 %v529_v49, %v529_v49  ;;  %7436 = vmatmul.mubr.bf16.gmra.mrb[24].mxu0 %v6518_v22  ;;  %v1061_v21 = vld [vmem:[#allocation2 + $0xc8] sm:$0x1]  ;;  %v6320_v22 = vcombine.low %v8013_v43, %v8996_v34  ;;  %v9026_v24 = vld [vmem:[#allocation2 + $0x7c] sm:$0xf]  ;;  %v2113_v43 = vld [vmem:[#allocation2 + $0x24] sm:$0xe] }
 0x104   : > { %v6732_v31 = vpack.c.bf16 %v530_v32, %v530_v32  ;;  %7439 = vmatprep.mubr.bf16.mxu0 %v6519_v12  ;;  %v8015_v12 = vld [vmem:[#allocation2 + $0x60] sm:$0xf] }
 0x105   : > { %7220 = vmatmul.mubr.bf16.vlgmr.msra.gmra.mrb[0].mxu1 %v6314_v6  ;;  %v885_v50 = vshrl.u32 %v6731_v44, 16  ;;  %v888_v26 = vshll.u32 %v6731_v44, 16  ;;  %v6318_v6 = vcombine.low %v8009_v8, %v8978_v25  ;;  %v7940_v44 = vld [vmem:[%s10031_s3 + $0xb8] sm:$0xff]  }
 0x106   : > { %7252 = vmatpush3.bf16.msra.mxu1 %v8004_v47  ;;  %7223 = vmatprep.mubr.bf16.mxu1 %v6315_v23  ;;  %v893_v28 = vshrl.u32 %v6732_v31, 16  ;;  %v896_v59 = vshll.u32 %v6732_v31, 16  ;;  %v8985_v23 = vld [vmem:[#allocation2 + $0x4c] sm:$0xf]  ;;  %v2110_v31 = vld [vmem:[#allocation2] sm:$0xe] }
 0x107   : > { %7253 = vmatprep.subr.bf16.mxu1 %v7910_v17  ;;  %v887_v58 = vrot.slane %v885_v50, 7  ;;  %v6319_v20 = vcombine.low %v8011_v61, %v8985_v23  ;;  %v2111_v50 = vld [vmem:[#allocation2 + $0xc] sm:$0xe] }
 0x108   : > { %v895_v63 = vrot.slane %v893_v28, 7  ;;  %v2177_v28 = vrot.slane %v8941_v9, 5  ;;  %v9023_v9 = vld [vmem:[#allocation2 + $0x70] sm:$0xf]  ;;  %v6338_v8 = vrot.slane %v2111_v50, 9 }
 0x109   : > { %v890_v52 = vor.u32 %v888_v26, %v887_v58  ;;  %v891_v30 = vrot.slane %v887_v58, 4  ;;  %v2170_v58 = vrot.slane %v8937_v53, 5  ;;  %v8019_v53 = vld [vmem:[#allocation2 + $0x6c] sm:$0xf] }
 0x10a   : > { %7254 = vmatpush3.bf16.msra.mxu1 %v7910_v17  ;;  %v898_v46 = vor.u32 %v896_v59, %v895_v63  ;;  %v900_v41 = vrot.slane %v895_v63, 4  ;;  %v8017_v59 = vld [vmem:[#allocation2 + $0x8] sm:$0x1]  ;;  %v2179_v61 = vrot.slane %v2177_v28, 4 }
 0x10b   : > { %7255 = vmatprep.subr.bf16.mxu1 %v7914_v60  ;;  %v1058_v5 = vsel %vm8248_vm10, %v890_v52, %v1057_v38  ;;  %v2166_v38 = vrot.slane %v8017_v59, 5  ;;  %v7923_v52 = vld [vmem:[#allocation2 + $0x18] sm:$0xff]   ;;  %v9063_v59 = vld [vmem:[#allocation2 + $0x88] sm:$0xf] }
 0x10c   : > { %1059 = vst [vmem:[#allocation2 + $0xc0] sm:$0xf] %v1058_v5  ;;  %v899_v2 = vsel %vm8257_vm11, %v891_v30, %v898_v46  ;;  %v1062_v19 = vsel %vm8168_vm3, %v900_v41, %v1061_v21  ;;  %v8018_v30 = vld [vmem:[#allocation2 + $0x14] sm:$0x1]  ;;  %v9014_v21 = vrot.slane %v3255_v40, 5  ;;  %v6322_v5 = vcombine.low %v8019_v53, %v9023_v9 }
 0x10d   : > { %7224 = vmatmul.mubr.bf16.gmra.mrb[4].mxu1 %v6316_v3  ;;  %1060 = vst [vmem:[#allocation2 + $0xc4] sm:$0xf] %v899_v2  ;;  %1063 = vst [vmem:[#allocation2 + $0xc8] sm:$0x1] %v1062_v19  ;;  %v3259_v3 = vshrl.u32 %v8891_v10, 16  ;;  %v2173_v63 = vrot.slane %v8018_v30, 5 }
 0x10e   : > { %7227 = vmatprep.mubr.bf16.mxu1 %v6317_v54  ;;  %7256 = vmatpush3.bf16.msra.mxu1 %v7914_v60  ;;  %v8999_v60 = vld [vmem:[#allocation2 + $0x64] sm:$0xf]  ;;  %v2112_v54 = vld [vmem:[#allocation2 + $0x18] sm:$0xe]  ;;  %10058 = vst [vmem:[#allocation3_spill] sm:$0xff] %v9014_v21  ;;  %v2172_v19 = vrot.slane %v2170_v58, 4 }
 0x10f   : > { %7257 = vmatprep.subr.bf16.mxu1 %v7918_v56  ;;  %v6321_v32 = vcombine.low %v8015_v12, %v8999_v60  ;;  %v9016_v46 = vrot.slane %v3259_v3, 4  ;;  %v9059_v3 = vld [vmem:[#allocation2 + $0x3c] sm:$0xe] }
 0x112   : > { %7258 = vmatpush3.bf16.msra.mxu1 %v7918_v56  ;;  %v2163_v56 = vrot.slane %v8917_v29, 5  ;;  %v9021_v29 = vld [vmem:[%s10031_s3 + $0xc0] sm:$0xff]  }
 0x113   : > { %7259 = vmatprep.subr.bf16.mxu1 %v7922_v48  ;;  %v3750_v17 = vld [vmem:[#allocation2 + $0xc0] sm:$0xe] }
 0x114   : > { %v6488_v39 = vrot.slane %v3750_v17, 9  ;;  %v3027_v33 = vld [vmem:[#allocation2 + $0xc4] sm:$0xf]  ;;  %v3028_v49 = vld [vmem:[#allocation2 + $0xc8] sm:$0x1]  ;;  %v2165_v2 = vrot.slane %v2163_v56, 4 }
 0x115   : > { %7228 = vmatmul.mubr.bf16.gmra.mrb[8].mxu1 %v6318_v6  ;;  %v3906_v47 = vrot.slane %v3027_v33, 5  ;;  %v3909_v14 = vrot.slane %v3028_v49, 5  ;;  %v6339_v6 = vrot.slane %v2112_v54, 9  ;;  %v2191_v33 = vrot.slane %v8967_v57, 5  ;;  %v2118_v49 = vld [vmem:[#allocation2 + $0x60] sm:$0xe] }
 0x116   : > { %7231 = vmatprep.mubr.bf16.mxu1 %v6319_v20  ;;  %7260 = vmatpush3.bf16.msra.mxu1 %v7922_v48  ;;  %v6337_v48 = vrot.slane %v2110_v31, 9  ;;  %v8021_v20 = vld [vmem:[#allocation2 + $0x20] sm:$0x1]  ;;  %v9049_v57 = vsel %vm8568_vm14, %v2172_v19, %v2173_v63  ;;  %v6340_v31 = vrot.slane %v2113_v43, 9  ;;  %v2198_v63 = vrot.slane %v8978_v25, 5 }
 0x117   : > { %7261 = vmatprep.subr.bf16.mxu1 %v7928_v35  ;;  %v3907_v26 = vsel %vm8568_vm14, %v6488_v39, %v3906_v47  ;;  %v3908_v51 = vrot.slane %v3906_v47, 4  ;;  %v2180_v7 = vrot.slane %v8021_v20, 5  ;;  %v7925_v39 = vld [vmem:[#allocation2 + $0x24] sm:$0xff]  }
 0x118   : > { %v9037_v12 = vsel %vm8568_vm14, %v6337_v48, %v2163_v56  ;;  %v9061_v56 = vld [vmem:[#allocation2 + $0x48] sm:$0xe]  ;;  %v2200_v43 = vrot.slane %v2198_v63, 4 }
 0x119   : > { %v3910_v10 = vsel %vm8568_vm14, %v3908_v51, %v3909_v14  ;;  %v7929_v14 = vld [vmem:[#allocation2 + $0x30] sm:$0xff]   ;;  %v9057_v40 = vsel %vm8568_vm14, %v2179_v61, %v2180_v7  ;;  %v6342_v7 = vrot.slane %v9059_v3, 9 }
 0x11a   : > { %7262 = vmatpush3.bf16.msra.mxu1 %v7928_v35  ;;  %v6520_v41 = vcombine.low %v3907_v26, %v3910_v10  ;;  %v8022_v35 = vld [vmem:[#allocation2 + $0x78] sm:$0xf]  ;;  %v8024_v26 = vld [vmem:[#allocation2 + $0x2c] sm:$0x1]  ;;  %v2193_v10 = vrot.slane %v2191_v33, 4 }
 0x11b   : > { %7263 = vmatprep.subr.bf16.mxu1 %v7934_v27  ;;  %v6323_v17 = vcombine.low %v8022_v35, %v9026_v24  ;;  %v2187_v51 = vrot.slane %v8024_v26, 5  ;;  %v4621_v35 = vld [vmem:[#allocation2 + $0x1c] sm:$0xf]  ;;  %v9109_v3 = vld [vmem:[#allocation2 + $0x50] sm:$0x1]  ;;  %v9123_v47 = vsel %vm8568_vm14, %v6342_v7, %v2198_v63 }
 0x11c   : > { %7440 = vmatmul.mubr.bf16.gmra.mrb[28].mxu0 %v6520_v41  ;;  %v6325_v41 = vcombine.low %v8815_v42, %v8829_v4  ;;  %v10034_v4 = vrot.slane %v8985_v23, 5  ;;  %v2119_v42 = vld [vmem:[#allocation2 + $0x6c] sm:$0xe]  ;;  %v8030_v26 = vld [vmem:[#allocation2 + $0x5c] sm:$0x1] }
 0x11d   : > { %7232 = vmatmul.mubr.bf16.gmra.mrb[12].mxu1 %v6320_v22  ;;  %7459 = vmatprep.mubr.bf16.mxu0 %v7923_v52  ;;  %v2114_v22 = vld [vmem:[#allocation2 + $0x30] sm:$0xe]  ;;  %v8027_v52 = vld [vmem:[#allocation2 + $0x38] sm:$0x1] }
 0x11e   : > { %7235 = vmatprep.mubr.bf16.mxu1 %v6321_v32  ;;  %7264 = vmatpush3.bf16.msra.mxu1 %v7934_v27  ;;  %v2184_v27 = vrot.slane %v8964_v55, 5  ;;  %v9041_v55 = vsel %vm8568_vm14, %v6338_v8, %v2170_v58  ;;  %v9045_v32 = vsel %vm8568_vm14, %v2165_v2, %v2166_v38  ;;  %v6341_v54 = vrot.slane %v2114_v22, 9  ;;  %v8025_v58 = vld [vmem:[#allocation2 + $0x84] sm:$0xf]  ;;  %v7930_v38 = vld [vmem:[%s10031_s3 + $0x1c8] sm:$0xff]  }
 0x11f   : > { %7265 = vmatprep.subr.bf16.mxu1 %v7940_v44  ;;  %v2194_v30 = vrot.slane %v8027_v52, 5  ;;  %v9078_v8 = vld [vmem:[#allocation2 + $0x54] sm:$0xe]  ;;  %v4620_v2 = vld [vmem:[#allocation2 + $0x18] sm:$0xf]  ;;  %v2207_v52 = vrot.slane %v10034_v4, 4 }
 0x120   : > { %v2186_v50 = vrot.slane %v2184_v27, 4  ;;  %v9090_v19 = vsel %vm8568_vm14, %v6340_v31, %v2184_v27  ;;  %v9098_v20 = vsel %vm8568_vm14, %v6341_v54, %v2191_v33  ;;  %v8028_v22 = vld [vmem:[#allocation2 + $0x44] sm:$0x1]  ;;  %v6343_v33 = vrot.slane %v9061_v56, 9  ;;  %v4624_v31 = vld [vmem:[#allocation2 + $0x28] sm:$0xf] }
 0x121   : > { %v9106_v27 = vsel %vm8568_vm14, %v2193_v10, %v2194_v30  ;;  %v4669_v54 = vshrl.u32 %v4620_v2, 16  ;;  %v7942_v10 = vld [vmem:[%s10031_s3 + $0x1d8] sm:$0xff]   ;;  %v2212_v56 = vrot.slane %v8996_v34, 5  ;;  %v4678_v30 = vshll.u32 %v4621_v35, 16 }
 0x122   : > { %7266 = vmatpush3.bf16.msra.mxu1 %v7940_v44  ;;  %v9053_v44 = vsel %vm8568_vm14, %v6339_v6, %v2177_v28  ;;  %v6324_v28 = vcombine.low %v8025_v58, %v9063_v59  ;;  %v9094_v61 = vsel %vm8568_vm14, %v2186_v50, %v2187_v51  ;;  %v7935_v50 = vld [vmem:[#allocation2 + $0x48] sm:$0xff]   ;;  %v6344_v51 = vrot.slane %v9078_v8, 9 }
 0x123   : > { %7299 = vmatprep.subr.bf16.mxu1 %v9021_v29  ;;  %v4672_v58 = vshll.u32 %v4620_v2, 16  ;;  %v4702_v6 = vshll.u32 %v4624_v31, 16  ;;  %v4706_v2 = vshrl.u32 %v4624_v31, 16  ;;  %v2219_v34 = vrot.slane %v8999_v60, 5  ;;  %v4625_v60 = vld [vmem:[#allocation2 + $0x2c] sm:$0x1] }
 0x124   : > { %7460 = vmatmul.mubr.bf16.vlgmr.msra.gmra.mrb[0].mxu0 %v7925_v39  ;;  %v7931_v39 = vld [vmem:[#allocation2 + $0x3c] sm:$0xff]   ;;  %v4671_v31 = vrot.slane %v4669_v54, 4  ;;  %v9133_v63 = vrot.slane %v4678_v30, 5  ;;  %v8031_v54 = vld [vmem:[#allocation2 + $0x68] sm:$0x1] }
 0x125   : > { %7236 = vmatmul.mubr.bf16.gmra.mrb[16].mxu1 %v6322_v5  ;;  %7492 = vmatpush3.bf16.msra.mxu0 %v8787_v45  ;;  %v7936_v45 = vld [vmem:[%s10031_s3 + $0x1d0] sm:$0xff]   ;;  %v4674_v48 = vrot.slane %v4672_v58, 5  ;;  %v2215_v5 = vrot.slane %v8030_v26, 5  ;;  %v9135_v53 = vrot.slane %v4702_v6, 5  ;;  %v2222_v26 = vrot.slane %v8031_v54, 5 }
 0x126   : > { %7239 = vmatprep.mubr.bf16.mxu1 %v6323_v17  ;;  %7463 = vmatprep.mubr.bf16.mxu0 %v7929_v14  ;;  %v4623_v17 = vld [vmem:[#allocation2 + $0x24] sm:$0xf]  ;;  %v2201_v14 = vrot.slane %v8028_v22, 5  ;;  %v4682_v22 = vshrl.u32 %v4621_v35, 16  ;;  %v2226_v35 = vrot.slane %v9023_v9, 5  ;;  %v6346_v58 = vrot.slane %v2119_v42, 9 }
 0x127   : > { %7493 = vmatprep.subr.bf16.mxu0 %v7930_v38  ;;  %v4693_v25 = vshrl.u32 %v4623_v17, 16  ;;  %v4696_v8 = vshll.u32 %v4623_v17, 16  ;;  %v10059_v6 = vcombine.low %v8837_v62, %v8844_v11  ;;  %v4712_v54 = vshll.u32 %v4625_v60, 16  ;;  %v7941_v62 = vld [vmem:[#allocation2 + $0x60] sm:$0xff]  }
 0x128   : > { %v9131_v17 = vsel %vm8568_vm14, %v2200_v43, %v2201_v14  ;;  %v4684_v7 = vrot.slane %v4682_v22, 4  ;;  %v7946_v43 = vld [vmem:[%s10031_s3 + $0x1e0] sm:$0xff]   ;;  %v2221_v14 = vrot.slane %v2219_v34, 4  ;;  %v2228_v30 = vrot.slane %v2226_v35, 4  ;;  %v8032_v22 = vld [vmem:[#allocation2 + $0x74] sm:$0x1] }
 0x129   : > { %7494 = vmatpush3.bf16.msra.mxu0 %v7930_v38  ;;  %v4622_v38 = vld [vmem:[#allocation2 + $0x20] sm:$0x1]  ;;  %v4695_v9 = vrot.slane %v4693_v25, 4  ;;  %v4698_v4 = vrot.slane %v4696_v8, 5  ;;  %v2229_v21 = vrot.slane %v8032_v22, 5  ;;  %v7937_v25 = vld [vmem:[#allocation2 + $0x54] sm:$0xff]  }
 0x12a   : > { %7495 = vmatprep.subr.bf16.mxu0 %v7936_v45  ;;  %v10060_v8 = vrot.slane %v8985_v23, 5  ;;  %v4685_v42 = vor.u32 %v4684_v7, %v9133_v63  ;;  %v10062_v11 = vrot.slane %v9109_v3, 5  ;;  %v8033_v60 = vld [vmem:[#allocation2 + $0x80] sm:$0x1] }
 0x12c   : > { %7464 = vmatmul.mubr.bf16.gmra.mrb[4].mxu0 %v7931_v39  ;;  %v6345_v39 = vrot.slane %v2118_v49, 9  ;;  %v9151_v49 = vsel %vm8568_vm14, %v6344_v51, %v2212_v56  ;;  %v9161_v23 = vsel %vm8568_vm14, %v2207_v52, %v10062_v11  ;;  %v2120_v51 = vld [vmem:[#allocation2 + $0x78] sm:$0xe]  ;;  %v9183_v52 = vsel %vm8568_vm14, %v2221_v14, %v2222_v26 }
 0x12d   : > { %7240 = vmatmul.mubr.bf16.gmra.mrb[20].mxu1 %v6324_v28  ;;  %v2214_v28 = vrot.slane %v2212_v56, 4  ;;  %7467 = vmatprep.mubr.bf16.mxu0 %v7935_v50  ;;  %v4675_v50 = vor.u32 %v4674_v48, %v4671_v31  ;;  %v10061_v48 = vcombine.low %v8871_v37, %v8879_v36  ;;  %v2233_v56 = vrot.slane %v9026_v24, 5  ;;  %v7950_v37 = vld [vmem:[%s10031_s3 + $0x1e8] sm:$0xff]  }
 0x12e   : > { %7243 = vmatprep.mubr.bf16.mxu1 %v6325_v41  ;;  %7496 = vmatpush3.bf16.msra.mxu0 %v7936_v45  ;;  %v4708_v41 = vrot.slane %v4706_v2, 4  ;;  %v4688_v45 = vshll.u32 %v4622_v38, 16  ;;  %v9147_v2 = vsel %vm8568_vm14, %v6343_v33, %v10060_v8  ;;  %v4699_v33 = vor.u32 %v4698_v4, %v4695_v9  ;;  %v9272_v8 = vld [vmem:[#allocation2 + $0x58] sm:$0xf] }
 0x12f   : > { %7497 = vmatprep.subr.bf16.mxu0 %v7942_v10  ;;  %v9170_v36 = vsel %vm8568_vm14, %v2214_v28, %v2215_v5  ;;  %v9174_v3 = vsel %vm8568_vm14, %v6345_v39, %v2219_v34  ;;  %v9178_v4 = vsel %vm8568_vm14, %v6346_v58, %v2226_v35  ;;  %v2240_v24 = vrot.slane %v9063_v59, 5  ;;  %v4626_v34 = vld [vmem:[#allocation2 + $0x30] sm:$0xf]  ;;  %10069 = vst [vmem:[#allocation7_spill] sm:$0xff] %v9272_v8 }
 0x130   : > { %v4709_v38 = vor.u32 %v4708_v41, %v9135_v53  ;;  %v9187_v41 = vsel %vm8568_vm14, %v2228_v30, %v2229_v21  ;;  %v9189_v5 = vrot.slane %v4675_v50, 4  ;;  %v9191_v28 = vrot.slane %v4688_v45, 5  ;;  %v7954_v21 = vld [vmem:[%s10031_s3 + $0x1f0] sm:$0xff]   ;;  %v8034_v30 = vld [vmem:[#allocation2 + $0x8c] sm:$0x1] }
 0x131   : > { %v4686_v31 = vrot.slane %v4685_v42, 4  ;;  %v9193_v35 = vrot.slane %v4712_v54, 5  ;;  %v6347_v7 = vrot.slane %v2120_v51, 9  ;;  %v2236_v59 = vrot.slane %v8033_v60, 5  ;;  %v7943_v54 = vld [vmem:[#allocation2 + $0x6c] sm:$0xff]  }
 0x132   : > { %7498 = vmatpush3.bf16.msra.mxu0 %v7942_v10  ;;  %v2121_v10 = vld [vmem:[#allocation2 + $0x84] sm:$0xe]  ;;  %v4700_v9 = vrot.slane %v4699_v33, 4  ;;  %v4710_v39 = vrot.slane %v4709_v38, 4  ;;  %v2235_v14 = vrot.slane %v2233_v56, 4  ;;  %v2242_v58 = vrot.slane %v2240_v24, 4 }
 0x133   : > { %7499 = vmatprep.subr.bf16.mxu0 %v7946_v43  ;;  %v6348_v26 = vrot.slane %v2121_v10, 9  ;;  %v2243_v22 = vrot.slane %v8034_v30, 5  ;;  %v4717_v50 = vshrl.u32 %v4626_v34, 16  ;;  %v4720_v45 = vshll.u32 %v4626_v34, 16  ;;  %v4627_v38 = vld [vmem:[#allocation2 + $0x34] sm:$0xf] }
 0x134   : > { %7468 = vmatmul.mubr.bf16.gmra.mrb[8].mxu0 %v7937_v25  ;;  %v10063_v42 = vcombine.low %v8897_v16, %v8901_v13  ;;  %v4691_v11 = vsel %vm8235_vm9, %v4686_v31, %v9191_v28  ;;  %v9220_v33 = vsel %vm8568_vm14, %v6347_v7, %v2233_v56  ;;  %v4629_v16 = vld [vmem:[#allocation2 + $0x3c] sm:$0xf]  ;;  %v10064_v13 = vshll.u32 %v8893_v15, 16  ;;  %v4630_v15 = vld [vmem:[#allocation2 + $0x40] sm:$0xf] }
 0x135   : > { %7244 = vmatmul.mubr.bf16.gmra.mrb[24].mxu1 %v10059_v6  ;;  %7471 = vmatprep.mubr.bf16.mxu0 %v7941_v62  ;;  %v4681_v62 = vsel %vm8235_vm9, %v9189_v5, %v9133_v63  ;;  %v10066_v10 = vcombine.low %v9037_v12, %v9045_v32  ;;  %v7945_v34 = vld [vmem:[#allocation2 + $0x78] sm:$0xff]   ;;  %v4705_v63 = vsel %vm8235_vm9, %v4700_v9, %v9135_v53  ;;  %v4632_v28 = vld [vmem:[#allocation2 + $0x48] sm:$0xf]  ;;  %v4722_v31 = vrot.slane %v4720_v45, 5  ;;  %v9250_v7 = vld [vmem:[#allocation2 + $0x4c] sm:$0xf] }
 0x136   : > { %7247 = vmatprep.mubr.bf16.mxu1 %v10061_v48  ;;  %7500 = vmatpush3.bf16.msra.mxu0 %v7946_v43  ;;  %v9224_v51 = vrot.slane %v10064_v13, 5  ;;  %v9234_v56 = vsel %vm8568_vm14, %v2235_v14, %v2236_v59  ;;  %v9238_v5 = vsel %vm8568_vm14, %v6348_v26, %v2240_v24  ;;  %v7958_v12 = vld [vmem:[%s10031_s3 + $0x1f8] sm:$0xff]   ;;  %v4715_v32 = vsel %vm8235_vm9, %v4710_v39, %v9193_v35  ;;  %v7948_v35 = vld [vmem:[%s10031_s3 + $0xc8] sm:$0xff]  }
 0x137   : > { %7501 = vmatprep.subr.bf16.mxu0 %v7950_v37  ;;  %v9248_v53 = vsel %vm8568_vm14, %v2242_v58, %v2243_v22  ;;  %10068 = vst [vmem:[#allocation6_spill] sm:$0xff] %v9250_v7  ;;  %v4628_v24 = vld [vmem:[#allocation2 + $0x38] sm:$0x1]  ;;  %v4726_v60 = vshll.u32 %v4627_v38, 16  ;;  %v4730_v59 = vshrl.u32 %v4627_v38, 16  ;;  %v4741_v9 = vshrl.u32 %v4629_v16, 16 }
 0x138   : > { %10065 = vst [vmem:[#allocation4_spill] sm:$0xff] %v9224_v51  ;;  %10067 = vst [vmem:[#allocation5_spill] sm:$0xff] %v9248_v53  ;;  %v4744_v14 = vshll.u32 %v4629_v16, 16  ;;  %v4750_v26 = vshll.u32 %v4630_v15, 16  ;;  %v4754_v30 = vshrl.u32 %v4630_v15, 16  ;;  %v4768_v13 = vshll.u32 %v4632_v28, 16 }
 0x139   : > { %v9255_v39 = vcombine.low %v4681_v62, %v4691_v11  ;;  %v4774_v22 = vshll.u32 %v9250_v7, 16  ;;  %v7947_v45 = vld [vmem:[#allocation2 + $0x84] sm:$0xff]   ;;  %v9266_v38 = vcombine.low %v4705_v63, %v4715_v32  ;;  %v4736_v11 = vshll.u32 %v4628_v24, 16 }
 0x13a   : > { %7502 = vmatpush3.bf16.msra.mxu0 %v7950_v37  ;;  %v4719_v37 = vrot.slane %v4717_v50, 4  ;;  %v4778_v50 = vshrl.u32 %v9250_v7, 16  ;;  %v4631_v16 = vld [vmem:[#allocation2 + $0x44] sm:$0x1]  ;;  %v9270_v15 = vrot.slane %v4726_v60, 5  ;;  %v4743_v58 = vrot.slane %v4741_v9, 4 }
 0x13b   : > { %7503 = vmatprep.subr.bf16.mxu0 %v7954_v21  ;;  %v4746_v48 = vrot.slane %v4744_v14, 5  ;;  %v10070_v25 = vcombine.low %v9041_v55, %v9049_v57  ;;  %v9277_v63 = vrot.slane %v4750_v26, 5  ;;  %v4756_v32 = vrot.slane %v4754_v30, 4  ;;  %v9285_v60 = vld [vmem:[#allocation2 + $0x50] sm:$0x1] }
 0x13c   : > { %7472 = vmatmul.mubr.bf16.gmra.mrb[12].mxu0 %v7943_v54  ;;  %v9264_v54 = vld [vmem:[%s10031_s3 + $0x200] sm:$0xff]   ;;  %v4723_v62 = vor.u32 %v4722_v31, %v4719_v37  ;;  %v4770_v31 = vrot.slane %v4768_v13, 5  ;;  %v10071_v24 = vcombine.low %v9053_v44, %v9057_v40  ;;  %10072 = vst [vmem:[#allocation8_spill] sm:$0xff] %v9285_v60  ;;  %v4780_v9 = vrot.slane %v4778_v50, 4  ;;  %v8035_v13 = vld [vmem:[#allocation2 + $0x94] sm:$0xf] }
 0x13d   : > { %7248 = vmatmul.mubr.bf16.gmra.mrb[28].mxu1 %v10063_v42  ;;  %v4765_v42 = vshrl.u32 %v4632_v28, 16  ;;  %7475 = vmatprep.mubr.bf16.mxu0 %v7945_v34  ;;  %v7949_v34 = vld [vmem:[#allocation2 + $0x90] sm:$0xff]   ;;  %v4732_v28 = vrot.slane %v4730_v59, 4  ;;  %v9287_v59 = vrot.slane %v4774_v22, 5  ;;  %v9292_v14 = vrot.slane %v4736_v11, 5 }
 0x13e   : > { %7267 = vmatprep.mubr.bf16.mxu1 %v10066_v10  ;;  %7504 = vmatpush3.bf16.msra.mxu0 %v7954_v21  ;;  %v4635_v10 = vld [vmem:[#allocation2 + $0x54] sm:$0xf]  ;;  %v9279_v21 = vld [vmem:[#allocation2 + $0x90] sm:$0xe]  ;;  %v4798_v26 = vshll.u32 %v9272_v8, 16  ;;  %v4802_v44 = vshrl.u32 %v9272_v8, 16  ;;  %v4757_v50 = vor.u32 %v4756_v32, %v9277_v63 }
 0x13f   : > { %7505 = vmatprep.subr.bf16.mxu0 %v7958_v12  ;;  %v4767_v37 = vrot.slane %v4765_v42, 4  ;;  %v4789_v55 = vshrl.u32 %v4635_v10, 16  ;;  %v4792_v57 = vshll.u32 %v4635_v10, 16  ;;  %v9297_v40 = vrot.slane %v4723_v62, 4  ;;  %v2123_v11 = vld [vmem:[#allocation2 + $0x9c] sm:$0xe] }
 0x140   : > { %v4733_v30 = vor.u32 %v4732_v28, %v9270_v15  ;;  %v4747_v42 = vor.u32 %v4746_v48, %v4743_v58  ;;  %v2247_v22 = vrot.slane %v8035_v13, 5  ;;  %v4781_v62 = vor.u32 %v4780_v9, %v9287_v59  ;;  %v7956_v48 = vld [vmem:[%s10031_s3 + $0xd8] sm:$0xff]   ;;  %v8038_v8 = vld [vmem:[#allocation2 + $0xa4] sm:$0x1]  ;;  %v8039_v7 = vld [vmem:[#allocation2 + $0xac] sm:$0xf] }
 0x141   : > { %v4771_v43 = vor.u32 %v4770_v31, %v4767_v37  ;;  %v4791_v6 = vrot.slane %v4789_v55, 4  ;;  %v4794_v28 = vrot.slane %v4792_v57, 5  ;;  %v9307_v32 = vrot.slane %v4798_v26, 5  ;;  %v9309_v37 = vld [vmem:[#allocation2 + $0x5c] sm:$0x1] }
 0x142   : > { %7506 = vmatpush3.bf16.msra.mxu0 %v7958_v12  ;;  %v6349_v12 = vrot.slane %v9279_v21, 9  ;;  %v4804_v13 = vrot.slane %v4802_v44, 4  ;;  %v4748_v51 = vrot.slane %v4747_v42, 4  ;;  %v10073_v31 = vcombine.low %v9090_v19, %v9094_v61  ;;  %v7951_v9 = vld [vmem:[#allocation2 + $0x9c] sm:$0xff]   ;;  %v7953_v44 = vld [vmem:[#allocation2 + $0xa8] sm:$0xff]  }
 0x143   : > { %7539 = vmatprep.subr.bf16.mxu0 %v9264_v54  ;;  %v4758_v55 = vrot.slane %v4757_v50, 4  ;;  %v10074_v26 = vcombine.low %v9098_v20, %v9106_v27  ;;  %v4782_v42 = vrot.slane %v4781_v62, 4  ;;  %v2261_v53 = vrot.slane %v8039_v7, 5  ;;  %v7960_v19 = vld [vmem:[%s10031_s3 + $0xe0] sm:$0xff]   ;;  %v2125_v62 = vld [vmem:[#allocation2 + $0xb4] sm:$0xe] }
 0x144   : > { %7476 = vmatmul.mubr.bf16.gmra.mrb[16].mxu0 %v7947_v45  ;;  %v8037_v45 = vld [vmem:[#allocation2 + $0x98] sm:$0x1]  ;;  %v4729_v61 = vsel %vm8235_vm9, %v9297_v40, %v9270_v15  ;;  %v9326_v20 = vsel %vm8568_vm14, %v6349_v12, %v2247_v22  ;;  %v4805_v27 = vor.u32 %v4804_v13, %v9307_v32 }
 0x145   : > { %7268 = vmatmul.mubr.bf16.vlgmr.msra.gmra.mrb[0].mxu1 %v10070_v25  ;;  %v7952_v25 = vld [vmem:[%s10031_s3 + $0xd0] sm:$0xff]   ;;  %7479 = vmatprep.mubr.bf16.mxu0 %v7949_v34  ;;  %v2250_v21 = vrot.slane %v8037_v45, 5  ;;  %v2249_v34 = vrot.slane %v2247_v22, 4  ;;  %v2124_v45 = vld [vmem:[#allocation2 + $0xa8] sm:$0xe] }
 0x146   : > { %7300 = vmatpush3.bf16.msra.mxu1 %v9021_v29  ;;  %7271 = vmatprep.mubr.bf16.mxu1 %v10071_v24  ;;  %v4760_v29 = vshll.u32 %v4631_v16, 16  ;;  %v8036_v16 = vld [vmem:[#allocation2 + $0xa0] sm:$0xf]  ;;  %v4784_v24 = vshll.u32 %v9285_v60, 16  ;;  %v8040_v22 = vld [vmem:[#allocation2 + $0xb0] sm:$0x1] }
 0x147   : > { %7301 = vmatprep.subr.bf16.mxu1 %v7948_v35  ;;  %v2254_v10 = vrot.slane %v8036_v16, 5  ;;  %v4734_v16 = vrot.slane %v4733_v30, 4  ;;  %v4772_v30 = vrot.slane %v4771_v43, 4  ;;  %v9338_v7 = vsel %vm8568_vm14, %v2249_v34, %v2250_v21  ;;  %v9360_v34 = vld [vmem:[#allocation2 + $0x64] sm:$0xf] }
 0x148   : > { %v4762_v58 = vrot.slane %v4760_v29, 5  ;;  %v2257_v29 = vrot.slane %v8038_v8, 5  ;;  %v4786_v60 = vrot.slane %v4784_v24, 5  ;;  %v4753_v8 = vsel %vm8235_vm9, %v4748_v51, %v9277_v63  ;;  %v4638_v51 = vld [vmem:[#allocation2 + $0x60] sm:$0xf] }
 0x149   : > { %v2256_v57 = vrot.slane %v2254_v10, 4  ;;  %v4739_v43 = vsel %vm8235_vm9, %v4734_v16, %v9292_v14  ;;  %v6351_v14 = vrot.slane %v2124_v45, 9  ;;  %v2264_v50 = vrot.slane %v8040_v22, 5 }
 0x14a   : > { %7302 = vmatpush3.bf16.msra.mxu1 %v7948_v35  ;;  %v6350_v35 = vrot.slane %v2123_v11, 9  ;;  %v4795_v11 = vor.u32 %v4794_v28, %v4791_v6  ;;  %v4808_v6 = vshll.u32 %v9309_v37, 16  ;;  %v4777_v63 = vsel %vm8235_vm9, %v4772_v30, %v9287_v59  ;;  %v7962_v28 = vld [vmem:[%s10031_s3 + $0xe8] sm:$0xff]  }
 0x14b   : > { %7303 = vmatprep.subr.bf16.mxu1 %v7952_v25  ;;  %v9348_v40 = vsel %vm8568_vm14, %v2256_v57, %v2257_v29  ;;  %v4787_v12 = vsel %vm8235_vm9, %v4782_v42, %v4786_v60  ;;  %v2263_v24 = vrot.slane %v2261_v53, 4  ;;  %v4806_v21 = vrot.slane %v4805_v27, 4  ;;  %v7955_v57 = vld [vmem:[#allocation2 + $0xb4] sm:$0xff]   ;;  %v4641_v42 = vld [vmem:[#allocation2 + $0x6c] sm:$0xf] }
 0x14c   : > { %v9342_v15 = vsel %vm8568_vm14, %v6350_v35, %v2254_v10  ;;  %7480 = vmatmul.mubr.bf16.gmra.mrb[20].mxu0 %v7951_v9  ;;  %v4796_v10 = vrot.slane %v4795_v11, 4  ;;  %v4810_v13 = vrot.slane %v4808_v6, 5  ;;  %v9366_v35 = vld [vmem:[#allocation2 + $0x68] sm:$0x1]  ;;  %v4816_v9 = vshll.u32 %v4638_v51, 16 }
 0x14d   : > { %7272 = vmatmul.mubr.bf16.gmra.mrb[4].mxu1 %v10073_v31  ;;  %7483 = vmatprep.mubr.bf16.mxu0 %v7953_v44  ;;  %v4813_v31 = vshrl.u32 %v4638_v51, 16  ;;  %v9377_v44 = vsel %vm8568_vm14, %v6351_v14, %v2261_v53  ;;  %v6352_v30 = vrot.slane %v2125_v62, 9  ;;  %v9379_v11 = vld [vmem:[#allocation2 + $0x70] sm:$0xf]  ;;  %v10076_v45 = vcombine.low %v9147_v2, %v9161_v23  ;;  %v4644_v6 = vld [vmem:[#allocation2 + $0x78] sm:$0xf] }
 0x14e   : > { %7275 = vmatprep.mubr.bf16.mxu1 %v10074_v26  ;;  %7304 = vmatpush3.bf16.msra.mxu1 %v7952_v25  ;;  %v4763_v25 = vsel %vm8235_vm9, %v4758_v55, %v4762_v58  ;;  %v9358_v58 = vcombine.low %v4729_v61, %v4739_v43  ;;  %v10075_v55 = vcombine.low %v9123_v47, %v9131_v17  ;;  %v7957_v47 = vld [vmem:[#allocation2 + $0xc0] sm:$0xff]   ;;  %v4822_v53 = vshll.u32 %v9360_v34, 16  ;;  %v7964_v2 = vld [vmem:[%s10031_s3 + $0xf0] sm:$0xff]   ;;  %v8042_v43 = vld [vmem:[#allocation2 + $0xbc] sm:$0x1] }
 0x14f   : > { %7305 = vmatprep.subr.bf16.mxu1 %v7956_v48  ;;  %v9362_v59 = vcombine.low %v4753_v8, %v4763_v25  ;;  %v9373_v26 = vcombine.low %v4777_v63, %v4787_v12  ;;  %v4801_v17 = vsel %vm8235_vm9, %v4796_v10, %v9307_v32  ;;  %v9389_v61 = vsel %vm8568_vm14, %v2263_v24, %v2264_v50  ;;  %v9399_v25 = vld [vmem:[#allocation2 + $0x7c] sm:$0xf] }
 0x150   : > { %v4826_v27 = vshrl.u32 %v9360_v34, 16  ;;  %v4811_v23 = vsel %vm8235_vm9, %v4806_v21, %v4810_v13  ;;  %v2271_v32 = vrot.slane %v8042_v43, 5  ;;  %v4832_v8 = vshll.u32 %v9366_v35, 16  ;;  %10077 = vst [vmem:[#allocation9_spill] sm:$0xff] %v9399_v25  ;;  %v7966_v62 = vld [vmem:[%s10031_s3 + $0xf8] sm:$0xff]  }
 0x151   : > { %v9401_v14 = vrot.slane %v4813_v31, 4  ;;  %v9403_v22 = vrot.slane %v4816_v9, 5  ;;  %v4837_v50 = vshrl.u32 %v4641_v42, 16  ;;  %v4840_v51 = vshll.u32 %v4641_v42, 16  ;;  %v9428_v42 = vld [vmem:[#allocation2 + $0x74] sm:$0x1] }
 0x152   : > { %7306 = vmatpush3.bf16.msra.mxu1 %v7956_v48  ;;  %v8041_v48 = vld [vmem:[#allocation2 + $0xb8] sm:$0xf]  ;;  %v4846_v63 = vshll.u32 %v9379_v11, 16  ;;  %v4850_v12 = vshrl.u32 %v9379_v11, 16  ;;  %v4861_v10 = vshrl.u32 %v4644_v6, 16  ;;  %v4864_v24 = vshll.u32 %v4644_v6, 16 }
 0x153   : > { %7307 = vmatprep.subr.bf16.mxu1 %v7960_v19  ;;  %v2268_v16 = vrot.slane %v8041_v48, 5  ;;  %v9410_v21 = vrot.slane %v4822_v53, 5  ;;  %v9412_v13 = vrot.slane %v4826_v27, 4  ;;  %v4870_v48 = vshll.u32 %v9399_v25, 16  ;;  %v4650_v53 = vld [vmem:[#allocation2 + $0x90] sm:$0xf] }
 0x154   : > { %7484 = vmatmul.mubr.bf16.gmra.mrb[24].mxu0 %v7955_v57  ;;  %v4874_v31 = vshrl.u32 %v9399_v25, 16  ;;  %v9416_v9 = vcombine.low %v4801_v17, %v4811_v23  ;;  %v4819_v17 = vor.u32 %v9403_v22, %v9401_v14  ;;  %v9434_v27 = vrot.slane %v4832_v8, 5  ;;  %v9436_v43 = vld [vmem:[#allocation2 + $0x94] sm:$0xf]  ;;  %v9448_v14 = vld [vmem:[#allocation2 + $0x80] sm:$0x1] }
 0x155   : > { %7276 = vmatmul.mubr.bf16.gmra.mrb[8].mxu1 %v10075_v55  ;;  %7487 = vmatprep.mubr.bf16.mxu0 %v7957_v47  ;;  %v9430_v47 = vld [vmem:[#allocation2 + $0x88] sm:$0xf]  ;;  %v4839_v6 = vrot.slane %v4837_v50, 4  ;;  %v4842_v23 = vrot.slane %v4840_v51, 5  ;;  %10079 = vst [vmem:[#allocation11_spill] sm:$0xff] %v9436_v43  ;;  %v4863_v55 = vrot.slane %v4861_v10, 4  ;;  %v10081_v60 = vcombine.low %v9174_v3, %v9183_v52 }
 0x156   : > { %7279 = vmatprep.mubr.bf16.mxu1 %v10076_v45  ;;  %7308 = vmatpush3.bf16.msra.mxu1 %v7960_v19  ;;  %v2270_v19 = vrot.slane %v2268_v16, 4  ;;  %v4647_v45 = vld [vmem:[#allocation2 + $0x84] sm:$0xf]  ;;  %10078 = vst [vmem:[#allocation10_spill] sm:$0xff] %v9430_v47  ;;  %v4866_v29 = vrot.slane %v4864_v24, 5  ;;  %v4829_v8 = vor.u32 %v9412_v13, %v9410_v21  ;;  %10082 = vst [vmem:[#allocation12_spill] sm:$0xff] %v9448_v14 }
 0x157   : > { %7309 = vmatprep.subr.bf16.mxu1 %v7962_v28  ;;  %v9450_v22 = vrot.slane %v4870_v48, 5  ;;  %v4888_v50 = vshll.u32 %v4647_v45, 16  ;;  %v4894_v51 = vshll.u32 %v9430_v47, 16  ;;  %v4653_v10 = vld [vmem:[#allocation2 + $0x9c] sm:$0xf]  ;;  %v4856_v3 = vshll.u32 %v9428_v42, 16 }
 0x158   : > { %v9426_v57 = vsel %vm8568_vm14, %v2270_v19, %v2271_v32  ;;  %v9441_v19 = vrot.slane %v4846_v63, 5  ;;  %v4852_v32 = vrot.slane %v4850_v12, 4  ;;  %v4898_v63 = vshrl.u32 %v9430_v47, 16 }
 0x159   : > { %v4909_v12 = vshrl.u32 %v4650_v53, 16  ;;  %v4912_v52 = vshll.u32 %v4650_v53, 16  ;;  %v4843_v24 = vor.u32 %v4842_v23, %v4839_v6  ;;  %v4867_v48 = vor.u32 %v4866_v29, %v4863_v55 }
 0x15a   : > { %7310 = vmatpush3.bf16.msra.mxu1 %v7962_v28  ;;  %v9422_v28 = vsel %vm8568_vm14, %v6352_v30, %v2268_v16  ;;  %v10080_v16 = vcombine.low %v9151_v49, %v9170_v36  ;;  %v7959_v30 = vld [vmem:[#allocation2 + $0xcc] sm:$0xff]   ;;  %v4876_v49 = vrot.slane %v4874_v31, 4  ;;  %v4885_v36 = vshrl.u32 %v4647_v45, 16  ;;  %v354_v45 = vld [vmem:[#allocation2 + $0xd4] sm:$0x1] }
 0x15b   : > { %7311 = vmatprep.subr.bf16.mxu1 %v7964_v2  ;;  %v4853_v13 = vor.u32 %v4852_v32, %v9441_v19  ;;  %v4880_v31 = vshll.u32 %v9448_v14, 16  ;;  %v4933_v25 = vshrl.u32 %v4653_v10, 16  ;;  %v4936_v53 = vshll.u32 %v4653_v10, 16  ;;  %v9478_v14 = vld [vmem:[#allocation2 + $0x98] sm:$0x1] }
 0x15c   : > { %7488 = vmatmul.mubr.bf16.gmra.mrb[28].mxu0 %v7959_v30  ;;  %v4887_v47 = vrot.slane %v4885_v36, 4  ;;  %v4890_v6 = vrot.slane %v4888_v50, 5  ;;  %v9467_v29 = vrot.slane %v4894_v51, 5  ;;  %v4900_v55 = vrot.slane %v4898_v63, 4  ;;  %v9469_v30 = vld [vmem:[#allocation2 + $0x8c] sm:$0x1] }
 0x15d   : > { %7280 = vmatmul.mubr.bf16.gmra.mrb[12].mxu1 %v10080_v16  ;;  %7507 = vmatprep.mubr.bf16.mxu0 %v9255_v39  ;;  %v4877_v16 = vor.u32 %v4876_v49, %v9450_v22  ;;  %v4911_v23 = vrot.slane %v4909_v12, 4  ;;  %v4914_v39 = vrot.slane %v4912_v52, 5  ;;  %v355_v49 = vsel %vm8176_vm4, 0, %v354_v45 }
 0x15e   : > { %7283 = vmatprep.mubr.bf16.mxu1 %v10081_v60  ;;  %7312 = vmatpush3.bf16.msra.mxu1 %v7964_v2  ;;  %v4918_v60 = vshll.u32 %v9436_v43, 16  ;;  %v4922_v2 = vshrl.u32 %v9436_v43, 16  ;;  %v9464_v43 = vld [vmem:[%s10031_s3 + $0x100] sm:$0xff]   ;;  %v10084_v36 = vcombine.low %v9178_v4, %v9187_v41  ;;  %v4820_v10 = vrot.slane %v4819_v17, 4  ;;  %356 = vst [vmem:[#allocation2 + $0xd4] sm:$0x1] %v355_v49 }
 0x15f   : > { %7313 = vmatprep.subr.bf16.mxu1 %v7966_v62  ;;  %10083 = vst [vmem:[#allocation13_spill] sm:$0xff] %v9464_v43  ;;  %v4844_v50 = vrot.slane %v4843_v24, 4  ;;  %v4858_v51 = vrot.slane %v4856_v3, 5  ;;  %v10085_v63 = vcombine.low %v9220_v33, %v9234_v56  ;;  %v4854_v12 = vrot.slane %v4853_v13, 4  ;;  %v7963_v4 = vld [vmem:[%s10031_s3 + $0x208] sm:$0xff]  }
 0x160   : > { %v4924_v32 = vrot.slane %v4922_v2, 4  ;;  %v4868_v52 = vrot.slane %v4867_v48, 4  ;;  %v4935_v18 = vrot.slane %v4933_v25, 4  ;;  %v4938_v2 = vrot.slane %v4936_v53, 5 }
 0x161   : > { %v4882_v41 = vrot.slane %v4880_v31, 5  ;;  %v4891_v17 = vor.u32 %v4890_v6, %v4887_v47  ;;  %v4904_v3 = vshll.u32 %v9469_v30, 16  ;;  %v4878_v24 = vrot.slane %v4877_v16, 4  ;;  %v10086_v31 = vld [vmem:[#allocation3_spill] sm:$0xff]  ;;  %v4656_v6 = vld [vmem:[#allocation2 + $0xa8] sm:$0xf] }
 0x162   : > { %7314 = vmatpush3.bf16.msra.mxu1 %v7966_v62  ;;  %v9471_v62 = vrot.slane %v4918_v60, 5  ;;  %v9483_v60 = vld [vmem:[#allocation2 + $0xa0] sm:$0xf]  ;;  %v4915_v45 = vor.u32 %v4914_v39, %v4911_v23  ;;  %v4928_v56 = vshll.u32 %v9478_v14, 16  ;;  %v4825_v25 = vsel %vm8235_vm9, %v4820_v10, %v9410_v21 }
 0x163   : > { %7587 = vmatprep.subr.bf16.mxu1 %v9464_v43  ;;  %v4830_v43 = vrot.slane %v4829_v8, 4  ;;  %v4901_v8 = vor.u32 %v4900_v55, %v9467_v29  ;;  %v4942_v13 = vshll.u32 %v9483_v60, 16  ;;  %v4946_v48 = vshrl.u32 %v9483_v60, 16 }
 0x164   : > { %v4925_v33 = vor.u32 %v4924_v32, %v9471_v62  ;;  %7508 = vmatmul.mubr.bf16.vlgmr.msra.gmra.mrb[0].mxu0 %v9266_v38  ;;  %v10087_v16 = vor.u32 %v9016_v46, %v10086_v31  ;;  %v4849_v38 = vsel %vm8235_vm9, %v4844_v50, %v9441_v19  ;;  %v4859_v21 = vsel %vm8235_vm9, %v4854_v12, %v4858_v51  ;;  %v7965_v46 = vld [vmem:[%s10031_s3 + $0x210] sm:$0xff]   ;;  %v5378_v12 = vld [vmem:[#allocation2 + $0x48] sm:$0xe] }
 0x165   : > { %7284 = vmatmul.mubr.bf16.gmra.mrb[16].mxu1 %v10084_v36  ;;  %v4835_v47 = vsel %vm8235_vm9, %v4830_v43, %v9434_v27  ;;  %7540 = vmatpush3.bf16.msra.mxu0 %v9264_v54  ;;  %v9513_v27 = vld [vmem:[#allocation2 + $0xa4] sm:$0x1]  ;;  %v4939_v43 = vor.u32 %v4938_v2, %v4935_v18  ;;  %v4873_v54 = vsel %vm8235_vm9, %v4868_v52, %v9450_v22  ;;  %v9523_v55 = vrot.slane %v4901_v8, 4  ;;  %v10088_v36 = vld [vmem:[#allocation5_spill] sm:$0xff]  ;;  %v7967_v8 = vld [vmem:[%s10031_s3 + $0x218] sm:$0xff]  }
 0x166   : > { %7287 = vmatprep.mubr.bf16.mxu1 %v10085_v63  ;;  %v9504_v53 = vrot.slane %v10087_v16, 4  ;;  %7511 = vmatprep.mubr.bf16.mxu0 %v9358_v58  ;;  %v9521_v58 = vrot.slane %v4891_v17, 4  ;;  %v9525_v19 = vrot.slane %v4904_v3, 5  ;;  %v4883_v23 = vsel %vm8235_vm9, %v4878_v24, %v4882_v41  ;;  %v9552_v41 = vld [vmem:[#allocation2 + $0xac] sm:$0xf] }
 0x167   : > { %7541 = vmatprep.subr.bf16.mxu0 %v7963_v4  ;;  %v9529_v39 = vrot.slane %v4915_v45, 4  ;;  %v9531_v32 = vrot.slane %v4925_v33, 4  ;;  %v9533_v49 = vrot.slane %v4928_v56, 5  ;;  %v10089_v10 = vcombine.low %v9238_v5, %v10088_v36  ;;  %v9577_v33 = vld [vmem:[#allocation2 + $0xb0] sm:$0x1] }
 0x168   : > { %v9538_v22 = vrot.slane %v4942_v13, 5  ;;  %v9540_v50 = vrot.slane %v4946_v48, 4  ;;  %v4952_v51 = vshll.u32 %v9513_v27, 16  ;;  %v4957_v63 = vshrl.u32 %v4656_v6, 16  ;;  %v5379_v13 = vld [vmem:[#allocation2 + $0x54] sm:$0xe] }
 0x169   : > { %7542 = vmatpush3.bf16.msra.mxu0 %v7963_v4  ;;  %v10090_v52 = vcombine.low %v9326_v20, %v9338_v7  ;;  %v6384_v18 = vcombine.low %v9422_v28, %v9426_v57  ;;  %v9548_v2 = vcombine.low %v4825_v25, %v4835_v47  ;;  %v9550_v5 = vrot.slane %v4939_v43, 4  ;;  %v10091_v25 = vld [vmem:[#allocation6_spill] sm:$0xff]  ;;  %v5380_v43 = vld [vmem:[#allocation2 + $0x60] sm:$0xe] }
 0x16a   : > { %v4960_v17 = vshll.u32 %v4656_v6, 16  ;;  %7543 = vmatprep.subr.bf16.mxu0 %v7965_v46  ;;  %v9557_v4 = vcombine.low %v4849_v38, %v4859_v21  ;;  %v9559_v3 = vcombine.low %v4873_v54, %v4883_v23  ;;  %v4897_v20 = vsel %vm8235_vm9, %v9521_v58, %v9467_v29  ;;  %v9594_v23 = vld [vmem:[#allocation2 + $0xb4] sm:$0xf]  ;;  %v10098_v28 = vld [vmem:[#allocation12_spill] sm:$0xff] }
 0x16b   : > { %v4907_v7 = vsel %vm8235_vm9, %v9523_v55, %v9525_v19  ;;  %v6613_v56 = vrot.slane %v5378_v12, 9  ;;  %v5468_v47 = vrot.slane %v10091_v25, 5  ;;  %v4949_v48 = vor.u32 %v9540_v50, %v9538_v22 }
 0x16c   : > { %7512 = vmatmul.mubr.bf16.gmra.mrb[4].mxu0 %v9362_v59  ;;  %v9583_v16 = vrot.slane %v4952_v51, 5  ;;  %v9585_v38 = vrot.slane %v4957_v63, 4  ;;  %v4966_v21 = vshll.u32 %v9552_v41, 16  ;;  %v4962_v54 = vrot.slane %v4960_v17, 5  ;;  %v10093_v63 = vld [vmem:[#allocation7_spill] sm:$0xff] }
 0x16d   : > { %7288 = vmatmul.mubr.bf16.gmra.mrb[20].mxu1 %v10089_v10  ;;  %7515 = vmatprep.mubr.bf16.mxu0 %v9373_v26  ;;  %v4970_v59 = vshrl.u32 %v9552_v41, 16  ;;  %v9598_v36 = vsel %vm8568_vm14, %v6613_v56, %v5468_v47  ;;  %v7970_v26 = vld [vmem:[%s10031_s3 + $0x220] sm:$0xff]   ;;  %v6614_v51 = vrot.slane %v5379_v13, 9  ;;  %v5475_v12 = vrot.slane %v10093_v63, 5  ;;  %v5381_v56 = vld [vmem:[#allocation2 + $0x6c] sm:$0xe] }
 0x16e   : > { %7291 = vmatprep.mubr.bf16.mxu1 %v10090_v52  ;;  %7544 = vmatpush3.bf16.msra.mxu0 %v7965_v46  ;;  %v5470_v46 = vrot.slane %v5468_v47, 4  ;;  %v10092_v10 = vld [vmem:[#allocation8_spill] sm:$0xff]  ;;  %v4976_v52 = vshll.u32 %v9577_v33, 16  ;;  %v5478_v17 = vrot.slane %v9309_v37, 5  ;;  %v6615_v25 = vrot.slane %v5380_v43, 9  ;;  %v7973_v43 = vld [vmem:[%s10031_s3 + $0x228] sm:$0xff]  }
 0x16f   : > { %7545 = vmatprep.subr.bf16.mxu0 %v7967_v8  ;;  %v5471_v50 = vrot.slane %v10092_v10, 5  ;;  %v5482_v6 = vrot.slane %v9360_v34, 5  ;;  %v10094_v24 = vcombine.low %v9342_v15, %v9348_v40  ;;  %v4981_v45 = vshrl.u32 %v9594_v23, 16 }
 0x170   : > { %v9618_v13 = vsel %vm8568_vm14, %v6614_v51, %v5475_v12  ;;  %v5477_v10 = vrot.slane %v5475_v12, 4  ;;  %v10095_v37 = vcombine.low %v9377_v44, %v9389_v61  ;;  %v6616_v61 = vrot.slane %v5381_v56, 9  ;;  %v9642_v51 = vld [vmem:[#allocation2 + $0xb8] sm:$0xf] }
 0x171   : > { %v9614_v47 = vsel %vm8568_vm14, %v5470_v46, %v5471_v50  ;;  %v9627_v40 = vsel %vm8568_vm14, %v6615_v25, %v5482_v6  ;;  %v5484_v34 = vrot.slane %v5482_v6, 4  ;;  %v5492_v46 = vrot.slane %v9428_v42, 5  ;;  %v3008_v12 = vld [vmem:[#allocation2 + $0x78] sm:$0xf]  ;;  %v10097_v42 = vld [vmem:[#allocation9_spill] sm:$0xff] }
 0x172   : > { %7546 = vmatpush3.bf16.msra.mxu0 %v7967_v8  ;;  %v9635_v44 = vsel %vm8568_vm14, %v5477_v10, %v5478_v17  ;;  %v5489_v8 = vrot.slane %v9379_v11, 5  ;;  %v9639_v50 = vrot.slane %v4949_v48, 4  ;;  %v4963_v6 = vor.u32 %v4962_v54, %v9585_v38  ;;  %v7968_v17 = vld [vmem:[#allocation2 + $0xc] sm:$0xff]  }
 0x173   : > { %7547 = vmatprep.subr.bf16.mxu0 %v7970_v26  ;;  %v9651_v11 = vrot.slane %v4966_v21, 5  ;;  %v4972_v54 = vrot.slane %v4970_v59, 4  ;;  %v9660_v25 = vrot.slane %v4976_v52, 5  ;;  %v9662_v56 = vrot.slane %v4981_v45, 4  ;;  %v5382_v21 = vld [vmem:[#allocation2 + $0x78] sm:$0xe] }
 0x174   : > { %7516 = vmatmul.mubr.bf16.gmra.mrb[8].mxu0 %v9416_v9  ;;  %v9657_v48 = vsel %vm8568_vm14, %v6616_v61, %v5489_v8  ;;  %v5491_v38 = vrot.slane %v5489_v8, 4  ;;  %v4984_v9 = vshll.u32 %v9594_v23, 16  ;;  %v7976_v10 = vld [vmem:[%s10031_s3 + $0x230] sm:$0xff]   ;;  %v3249_v59 = vshll.u32 %v3008_v12, 16  ;;  %v9685_v61 = vld [vmem:[#allocation2 + $0xbc] sm:$0x1] }
 0x175   : > { %7292 = vmatmul.mubr.bf16.gmra.mrb[24].mxu1 %v10094_v24  ;;  %v5485_v24 = vrot.slane %v9366_v35, 5  ;;  %7519 = vmatprep.mubr.bf16.mxu0 %v9548_v2  ;;  %v3246_v2 = vshrl.u32 %v3008_v12, 16  ;;  %v4955_v45 = vsel %vm8235_vm9, %v9639_v50, %v9583_v16  ;;  %v9677_v23 = vrot.slane %v4963_v6, 4  ;;  %v10096_v12 = vld [vmem:[#allocation4_spill] sm:$0xff] }
 0x176   : > { %7295 = vmatprep.mubr.bf16.mxu1 %v10095_v37  ;;  %7548 = vmatpush3.bf16.msra.mxu0 %v7970_v26  ;;  %v4990_v37 = vshll.u32 %v9642_v51, 16  ;;  %v4994_v26 = vshrl.u32 %v9642_v51, 16  ;;  %v3268_v16 = vsel %vm8235_vm9, %v9504_v53, %v10096_v12  ;;  %v6617_v50 = vrot.slane %v5382_v21, 9  ;;  %v4662_v52 = vld [vmem:[#allocation2 + $0xc0] sm:$0xf]  ;;  %v10099_v21 = vld [vmem:[#allocation10_spill] sm:$0xff] }
 0x177   : > { %v9648_v63 = vsel %vm8568_vm14, %v5484_v34, %v5485_v24  ;;  %7549 = vmatprep.subr.bf16.mxu0 %v7973_v43  ;;  %v9671_v34 = vsel %vm8568_vm14, %v5491_v38, %v5492_v46  ;;  %v5383_v24 = vld [vmem:[#allocation2 + $0x84] sm:$0xe]  ;;  %v3248_v8 = vrot.slane %v3246_v2, 4  ;;  %v3251_v46 = vrot.slane %v3249_v59, 5  ;;  %v7979_v2 = vld [vmem:[%s10031_s3 + $0x238] sm:$0xff]  }
 0x178   : > { %v4973_v6 = vor.u32 %v4972_v54, %v9651_v11  ;;  %v4986_v38 = vrot.slane %v4984_v9, 5  ;;  %v5496_v35 = vrot.slane %v10097_v42, 5  ;;  %v5499_v57 = vrot.slane %v10098_v28, 5  ;;  %v7969_v28 = vld [vmem:[#allocation2 + $0x18] sm:$0xff]  }
 0x179   : > { %v3252_v59 = vor.u32 %v3251_v46, %v3248_v8  ;;  %v6618_v53 = vrot.slane %v5383_v24, 9  ;;  %v9701_v54 = vrot.slane %v4990_v37, 5  ;;  %v9703_v9 = vrot.slane %v4994_v26, 4  ;;  %v7971_v37 = vld [vmem:[#allocation2 + $0x24] sm:$0xff]  }
 0x17a   : > { %7550 = vmatpush3.bf16.msra.mxu0 %v7973_v43  ;;  %v5506_v43 = vrot.slane %v9469_v30, 5  ;;  %v9707_v42 = vsel %vm8568_vm14, %v6617_v50, %v5496_v35  ;;  %v5498_v12 = vrot.slane %v5496_v35, 4  ;;  %v5000_v15 = vshll.u32 %v9685_v61, 16 }
 0x17b   : > { %7551 = vmatprep.subr.bf16.mxu0 %v7976_v10  ;;  %v3253_v8 = vrot.slane %v3252_v59, 4  ;;  %v5005_v26 = vshrl.u32 %v4662_v52, 16  ;;  %v5008_v46 = vshll.u32 %v4662_v52, 16  ;;  %v4974_v52 = vrot.slane %v4973_v6, 4  ;;  %v10100_v6 = vld [vmem:[#allocation13_spill] sm:$0xff] }
 0x17c   : > { %7520 = vmatmul.mubr.bf16.gmra.mrb[12].mxu0 %v9557_v4  ;;  %v9719_v4 = vsel %vm8568_vm14, %v5498_v12, %v5499_v57  ;;  %v10103_v29 = vsel %vm8235_vm9, %v9550_v5, %v9538_v22  ;;  %v4969_v19 = vsel %vm8235_vm9, %v9677_v23, %v9651_v11  ;;  %v9773_v5 = vld [vmem:[#allocation2 + $0xd0] sm:$0xf]  ;;  %v4997_v23 = vor.u32 %v9703_v9, %v9701_v54 }
 0x17d   : > { %7296 = vmatmul.mubr.bf16.gmra.mrb[28].mxu1 %v6384_v18  ;;  %v9694_v18 = vld [vmem:[#allocation2 + $0xc4] sm:$0xf]  ;;  %7523 = vmatprep.mubr.bf16.mxu0 %v9559_v3  ;;  %v3258_v59 = vsel %vm8235_vm9, %v3253_v8, %v10086_v31  ;;  %v6649_v3 = vcombine.low %v9707_v42, %v9719_v4  ;;  %v6594_v31 = vcombine.low %v4897_v20, %v4907_v7  ;;  %v9766_v20 = vld [vmem:[#allocation2 + $0xc8] sm:$0x1]  ;;  %v5010_v7 = vrot.slane %v5008_v46, 5  ;;  %v7972_v12 = vld [vmem:[#allocation2 + $0x30] sm:$0xff]  }
 0x17e   : > { %7315 = vmatprep.mubr.bf16.mxu1 %v7968_v17  ;;  %v5503_v17 = vrot.slane %v10099_v21, 5  ;;  %7552 = vmatpush3.bf16.msra.mxu0 %v7976_v10  ;;  %v5014_v50 = vshll.u32 %v9694_v18, 16  ;;  %v5018_v35 = vshrl.u32 %v9694_v18, 16  ;;  %v9732_v21 = vcombine.low %v3258_v59, %v3268_v16  ;;  %v8045_v9 = vld [vmem:[%s10031_s3 + $0x110] sm:$0xff]  }
 0x17f   : > { %7553 = vmatprep.subr.bf16.mxu0 %v7979_v2  ;;  %v10102_v16 = vsel %vm8235_vm9, %v9529_v39, %v9471_v62  ;;  %v6596_v58 = vcombine.low %v10103_v29, %v4955_v45  ;;  %v8044_v62 = vld [vmem:[%s10031_s3 + $0x108] sm:$0xff]   ;;  %v5007_v39 = vrot.slane %v5005_v26, 4  ;;  %v4979_v11 = vsel %vm8235_vm9, %v4974_v52, %v9660_v25 }
 0x180   : > { %v9713_v24 = vsel %vm8568_vm14, %v6618_v53, %v5503_v17  ;;  %v5505_v30 = vrot.slane %v5503_v17, 4  ;;  %v4987_v53 = vor.u32 %v4986_v38, %v9662_v56  ;;  %v10101_v56 = vsel %vm8235_vm9, %v9531_v32, %v9533_v49  ;;  %v4665_v32 = vld [vmem:[#allocation2 + $0xcc] sm:$0xf]  ;;  %v5384_v49 = vld [vmem:[#allocation2 + $0x90] sm:$0xe] }
 0x181   : > { %v6595_v55 = vcombine.low %v10102_v16, %v10101_v56  ;;  %v9771_v38 = vrot.slane %v5014_v50, 5  ;;  %v5020_v22 = vrot.slane %v5018_v35, 4  ;;  %v9782_v17 = vrot.slane %v5000_v15, 5 }
 0x182   : > { %v9729_v10 = vsel %vm8568_vm14, %v5505_v30, %v5506_v43  ;;  %7554 = vmatpush3.bf16.msra.mxu0 %v7979_v2  ;;  %v9778_v45 = vrot.slane %v4987_v53, 4  ;;  %v5385_v43 = vld [vmem:[#allocation2 + $0x9c] sm:$0xe]  ;;  %v5032_v8 = vshll.u32 %v4665_v32, 16  ;;  %v6619_v30 = vrot.slane %v5384_v49, 9 }
 0x183   : > { %v6650_v57 = vcombine.low %v9713_v24, %v9729_v10  ;;  %v7974_v2 = vld [vmem:[#allocation2 + $0x3c] sm:$0xff]   ;;  %v5024_v25 = vshll.u32 %v9766_v20, 16  ;;  %v5038_v46 = vshll.u32 %v9773_v5, 16  ;;  %v5042_v50 = vshrl.u32 %v9773_v5, 16 }
 0x184   : > { %7524 = vmatmul.mubr.bf16.gmra.mrb[16].mxu0 %v6594_v31  ;;  %v5513_v15 = vrot.slane %v9478_v14, 5  ;;  %v5011_v35 = vor.u32 %v5010_v7, %v5007_v39  ;;  %v5021_v59 = vor.u32 %v5020_v22, %v9771_v38  ;;  %v6620_v53 = vrot.slane %v5385_v43, 9  ;;  %v9808_v22 = vld [vmem:[#allocation2 + $0xd4] sm:$0x1] }
 0x185   : > { %7316 = vmatmul.mubr.bf16.vlgmr.msra.gmra.mrb[0].mxu1 %v7969_v28  ;;  %v5029_v28 = vshrl.u32 %v4665_v32, 16  ;;  %7527 = vmatprep.mubr.bf16.mxu0 %v6595_v55  ;;  %v6597_v31 = vcombine.low %v4969_v19, %v4979_v11  ;;  %v5517_v56 = vrot.slane %v9483_v60, 5  ;;  %v5520_v16 = vrot.slane %v9513_v27, 5  ;;  %v8046_v60 = vld [vmem:[%s10031_s3 + $0x118] sm:$0xff]  }
 0x186   : > { %7595 = vmatpush3.bf16.msra.mxu1 %v10100_v6  ;;  %7319 = vmatprep.mubr.bf16.mxu1 %v7971_v37  ;;  %v10104_v37 = vld [vmem:[#allocation11_spill] sm:$0xff]  ;;  %v4998_v14 = vrot.slane %v4997_v23, 4  ;;  %v5034_v29 = vrot.slane %v5032_v8, 5  ;;  %v5026_v49 = vrot.slane %v5024_v25, 5  ;;  %v9803_v19 = vrot.slane %v5038_v46, 5 }
 0x187   : > { %7588 = vmatprep.subr.bf16.mxu1 %v8044_v62  ;;  %v5510_v26 = vrot.slane %v10104_v37, 5  ;;  %v5031_v55 = vrot.slane %v5029_v28, 4  ;;  %v5519_v39 = vrot.slane %v5517_v56, 4  ;;  %v5012_v27 = vrot.slane %v5011_v35, 4  ;;  %v5374_v25 = vld [vmem:[#allocation2 + $0x18] sm:$0xe] }
 0x188   : > { %v5022_v7 = vrot.slane %v5021_v59, 4  ;;  %v9814_v23 = vsel %vm8568_vm14, %v6620_v53, %v5517_v56  ;;  %v4993_v28 = vsel %vm8235_vm9, %v9778_v45, %v9701_v54  ;;  %v5003_v8 = vsel %vm8235_vm9, %v4998_v14, %v9782_v17  ;;  %v5386_v46 = vld [vmem:[#allocation2 + $0xa8] sm:$0xe]  ;;  %v8047_v17 = vld [vmem:[%s10031_s3 + $0x120] sm:$0xff]  }
 0x189   : > { %v5512_v52 = vrot.slane %v5510_v26, 4  ;;  %v9795_v6 = vsel %vm8568_vm14, %v6619_v30, %v5510_v26  ;;  %v9818_v43 = vsel %vm8568_vm14, %v5519_v39, %v5520_v16  ;;  %v5035_v30 = vor.u32 %v5034_v29, %v5031_v55  ;;  %v7977_v26 = vld [vmem:[#allocation2 + $0x54] sm:$0xff]   ;;  %v8049_v29 = vld [vmem:[#allocation2 + $0x20] sm:$0x1] }
 0x18a   : > { %7596 = vmatpush3.bf16.msra.mxu1 %v8044_v62  ;;  %v5044_v62 = vrot.slane %v5042_v50, 4  ;;  %v6652_v37 = vcombine.low %v9814_v23, %v9818_v43  ;;  %v5017_v54 = vsel %vm8235_vm9, %v5012_v27, %v9771_v38  ;;  %v5027_v45 = vsel %vm8235_vm9, %v5022_v7, %v5026_v49  ;;  %v8048_v50 = vld [vmem:[#allocation2 + $0x1c] sm:$0xf] }
 0x18b   : > { %7589 = vmatprep.subr.bf16.mxu1 %v8045_v9  ;;  %v9801_v32 = vsel %vm8568_vm14, %v5512_v52, %v5513_v15  ;;  %v5440_v15 = vrot.slane %v8048_v50, 5  ;;  %v5036_v35 = vrot.slane %v5035_v30, 4  ;;  %v6609_v59 = vrot.slane %v5374_v25, 9  ;;  %v8053_v50 = vld [vmem:[%s10031_s3 + $0x130] sm:$0xff]  }
 0x18c   : > { %v6651_v11 = vcombine.low %v9795_v6, %v9801_v32  ;;  %7528 = vmatmul.mubr.bf16.gmra.mrb[20].mxu0 %v6596_v58  ;;  %v5048_v58 = vshll.u32 %v9808_v22, 16  ;;  %v6621_v52 = vrot.slane %v5386_v46, 9  ;;  %v5524_v53 = vrot.slane %v9552_v41, 5  ;;  %v8072_v32 = vld [vmem:[#allocation2 + $0xc8] sm:$0x1] }
 0x18d   : > { %7320 = vmatmul.mubr.bf16.gmra.mrb[4].mxu1 %v7972_v12  ;;  %v7975_v12 = vld [vmem:[#allocation2 + $0x48] sm:$0xff]   ;;  %7531 = vmatprep.mubr.bf16.mxu0 %v6597_v31  ;;  %v5387_v31 = vld [vmem:[#allocation2 + $0xb4] sm:$0xe]  ;;  %v6599_v38 = vcombine.low %v5017_v54, %v5027_v45  ;;  %v5527_v14 = vrot.slane %v9577_v33, 5  ;;  %v5442_v55 = vrot.slane %v5440_v15, 4  ;;  %v5443_v49 = vrot.slane %v8049_v29, 5 }
 0x18e   : > { %7323 = vmatprep.mubr.bf16.mxu1 %v7974_v2  ;;  %7597 = vmatpush3.bf16.msra.mxu1 %v8045_v9  ;;  %v5045_v2 = vor.u32 %v5044_v62, %v9803_v19  ;;  %v6598_v9 = vcombine.low %v4993_v28, %v5003_v8  ;;  %v5050_v16 = vrot.slane %v5048_v58, 5  ;;  %v8050_v62 = vld [vmem:[%s10031_s3 + $0x128] sm:$0xff]   ;;  %v9846_v39 = vsel %vm8568_vm14, %v6621_v52, %v5524_v53  ;;  %v7978_v33 = vld [vmem:[#allocation2 + $0x60] sm:$0xff]   ;;  %v5376_v54 = vld [vmem:[#allocation2 + $0x30] sm:$0xe] }
 0x18f   : > { %7590 = vmatprep.subr.bf16.mxu1 %v8046_v60  ;;  %v5526_v41 = vrot.slane %v5524_v53, 4  ;;  %v5531_v27 = vrot.slane %v9642_v51, 5  ;;  %v5534_v7 = vrot.slane %v9685_v61, 5  ;;  %v8051_v28 = vld [vmem:[#allocation2 + $0x28] sm:$0xf]  ;;  %v5441_v25 = vsel %vm8568_vm14, %v6609_v59, %v5440_v15  ;;  %v8056_v29 = vld [vmem:[%s10031_s3 + $0x138] sm:$0xff]  }
 0x190   : > { %v5046_v56 = vrot.slane %v5045_v2, 4  ;;  %v5447_v8 = vrot.slane %v8051_v28, 5  ;;  %v7980_v2 = vld [vmem:[#allocation2 + $0x6c] sm:$0xff]   ;;  %v5375_v51 = vld [vmem:[#allocation2 + $0x24] sm:$0xe]  ;;  %v5444_v46 = vsel %vm8568_vm14, %v5442_v55, %v5443_v49 }
 0x191   : > { %v9855_v30 = vsel %vm8568_vm14, %v5526_v41, %v5527_v14  ;;  %v8052_v45 = vld [vmem:[#allocation2 + $0x34] sm:$0xf]  ;;  %v6610_v52 = vrot.slane %v5375_v51, 9  ;;  %v6641_v59 = vcombine.low %v5441_v25, %v5444_v46  ;;  %v8055_v14 = vld [vmem:[#allocation2 + $0x38] sm:$0x1] }
 0x192   : > { %7598 = vmatpush3.bf16.msra.mxu1 %v8046_v60  ;;  %v6622_v60 = vrot.slane %v5387_v31, 9  ;;  %v6653_v61 = vcombine.low %v9846_v39, %v9855_v30  ;;  %v5449_v53 = vrot.slane %v5447_v8, 4  ;;  %v8054_v31 = vld [vmem:[#allocation2 + $0x2c] sm:$0x1]  ;;  %v5457_v55 = vrot.slane %v8055_v14, 5  ;;  %v7981_v41 = vld [vmem:[#allocation2 + $0x78] sm:$0xff]  }
 0x193   : > { %7591 = vmatprep.subr.bf16.mxu1 %v8047_v17  ;;  %v5389_v49 = vld [vmem:[#allocation2 + $0xcc] sm:$0xe]  ;;  %v5377_v51 = vld [vmem:[#allocation2 + $0x3c] sm:$0xe]  ;;  %v8058_v46 = vld [vmem:[#allocation2 + $0x70] sm:$0xf] }
 0x194   : > { %7532 = vmatmul.mubr.bf16.gmra.mrb[24].mxu0 %v6598_v9  ;;  %v9863_v58 = vsel %vm8568_vm14, %v6622_v60, %v5531_v27  ;;  %v5448_v60 = vsel %vm8568_vm14, %v6610_v52, %v5447_v8  ;;  %v5545_v8 = vrot.slane %v9773_v5, 5  ;;  %v5548_v52 = vrot.slane %v9808_v22, 5 }
 0x195   : > { %7324 = vmatmul.mubr.bf16.gmra.mrb[8].mxu1 %v7975_v12  ;;  %v5041_v12 = vsel %vm8235_vm9, %v5036_v35, %v9803_v19  ;;  %7535 = vmatprep.mubr.bf16.mxu0 %v6599_v38  ;;  %v5533_v19 = vrot.slane %v5531_v27, 4  ;;  %v5450_v38 = vrot.slane %v8054_v31, 5 }
 0x196   : > { %7327 = vmatprep.mubr.bf16.mxu1 %v7977_v26  ;;  %7599 = vmatpush3.bf16.msra.mxu1 %v8047_v17  ;;  %v5051_v26 = vsel %vm8235_vm9, %v5046_v56, %v5050_v16  ;;  %v5454_v17 = vrot.slane %v8052_v45, 5  ;;  %v6611_v56 = vrot.slane %v5376_v54, 9  ;;  %v3231_v54 = vshll.u32 %v8058_v46, 16 }
 0x197   : > { %7592 = vmatprep.subr.bf16.mxu1 %v8050_v62  ;;  %v9874_v9 = vsel %vm8568_vm14, %v5533_v19, %v5534_v7  ;;  %v6600_v35 = vcombine.low %v5041_v12, %v5051_v26  ;;  %v5451_v27 = vsel %vm8568_vm14, %v5449_v53, %v5450_v38  ;;  %v7982_v7 = vld [vmem:[#allocation2 + $0x84] sm:$0xff]   ;;  %v8057_v12 = vld [vmem:[#allocation2 + $0x40] sm:$0xf]  ;;  %v6624_v26 = vrot.slane %v5389_v49, 9 }
 0x198   : > { %v6654_v15 = vcombine.low %v9863_v58, %v9874_v9  ;;  %v5456_v16 = vrot.slane %v5454_v17, 4  ;;  %v5461_v28 = vrot.slane %v8057_v12, 5  ;;  %v3235_v45 = vshrl.u32 %v8058_v46, 16  ;;  %v8059_v38 = vld [vmem:[#allocation2 + $0x44] sm:$0x1] }
 0x199   : > { %v6612_v53 = vrot.slane %v5377_v51, 9  ;;  %v8060_v12 = vld [vmem:[#allocation2 + $0x74] sm:$0x1] }
 0x19a   : > { %7600 = vmatpush3.bf16.msra.mxu1 %v8050_v62  ;;  %v3005_v62 = vld [vmem:[#allocation2 + $0x6c] sm:$0xf]  ;;  %v5463_v31 = vrot.slane %v5461_v28, 4 }
 0x19b   : > { %7593 = vmatprep.subr.bf16.mxu1 %v8053_v50  ;;  %v3222_v19 = vshrl.u32 %v3005_v62, 16  ;;  %v3225_v25 = vshll.u32 %v3005_v62, 16  ;;  %v7983_v62 = vld [vmem:[#allocation2 + $0x90] sm:$0xff]   ;;  %v5462_v22 = vsel %vm8568_vm14, %v6612_v53, %v5461_v28 }
 0x19c   : > { %7536 = vmatmul.mubr.bf16.gmra.mrb[28].mxu0 %v6600_v35  ;;  %v5547_v35 = vrot.slane %v5545_v8, 4 }
 0x19d   : > { %7328 = vmatmul.mubr.bf16.gmra.mrb[12].mxu1 %v7978_v33  ;;  %7555 = vmatprep.mubr.bf16.mxu0 %v6641_v59  ;;  %v5455_v33 = vsel %vm8568_vm14, %v6611_v56, %v5454_v17  ;;  %v9892_v17 = vsel %vm8568_vm14, %v6624_v26, %v5545_v8  ;;  %v5464_v56 = vrot.slane %v8059_v38, 5  ;;  %v3227_v5 = vrot.slane %v3225_v25, 5  ;;  %v8061_v25 = vld [vmem:[#allocation2 + $0x88] sm:$0xf] }
 0x19e   : > { %7331 = vmatprep.mubr.bf16.mxu1 %v7980_v2  ;;  %7601 = vmatpush3.bf16.msra.mxu1 %v8053_v50  ;;  %v5458_v2 = vsel %vm8568_vm14, %v5456_v16, %v5457_v55  ;;  %v6642_v50 = vcombine.low %v5448_v60, %v5451_v27  ;;  %v3224_v16 = vrot.slane %v3222_v19, 4  ;;  %v9897_v14 = vsel %vm8568_vm14, %v5547_v35, %v5548_v52  ;;  %v7984_v60 = vld [vmem:[#allocation2 + $0x9c] sm:$0xff]   ;;  %v3011_v27 = vld [vmem:[#allocation2 + $0x84] sm:$0xf]  ;;  %v7985_v35 = vld [vmem:[#allocation2 + $0xa8] sm:$0xff]  }
 0x19f   : > { %7594 = vmatprep.subr.bf16.mxu1 %v8056_v29  ;;  %v6643_v59 = vcombine.low %v5455_v33, %v5458_v2  ;;  %v3233_v55 = vrot.slane %v3231_v54, 5  ;;  %v6656_v49 = vcombine.low %v9892_v17, %v9897_v14  ;;  %v3241_v26 = vshll.u32 %v8060_v12, 16  ;;  %v7986_v52 = vld [vmem:[#allocation2 + $0xb4] sm:$0xff]   ;;  %v8064_v12 = vld [vmem:[#allocation2 + $0xa0] sm:$0xf] }
 0x1a0   : > { %v3270_v51 = vshrl.u32 %v3011_v27, 16  ;;  %v3273_v19 = vshll.u32 %v3011_v27, 16  ;;  %v3279_v8 = vshll.u32 %v8061_v25, 16  ;;  %v3283_v46 = vshrl.u32 %v8061_v25, 16  ;;  %v8063_v27 = vld [vmem:[#allocation2 + $0x94] sm:$0xf] }
 0x1a2   : > { %7602 = vmatpush3.bf16.msra.mxu1 %v8056_v29  ;;  %v3237_v29 = vrot.slane %v3235_v45, 4  ;;  %v3014_v45 = vld [vmem:[#allocation2 + $0x90] sm:$0xf]  ;;  %v3275_v53 = vrot.slane %v3273_v19, 5  ;;  %v9908_v38 = vrot.slane %v3279_v8, 5  ;;  %v7987_v8 = vld [vmem:[#allocation2 + $0xc0] sm:$0xff]  }
 0x1a4   : > { %7556 = vmatmul.mubr.bf16.vlgmr.msra.gmra.mrb[0].mxu0 %v6642_v50  ;;  %v3238_v33 = vor.u32 %v3237_v29, %v3233_v55  ;;  %v3243_v50 = vrot.slane %v3241_v26, 5  ;;  %v3017_v29 = vld [vmem:[#allocation2 + $0x9c] sm:$0xf]  ;;  %v3327_v26 = vshll.u32 %v8064_v12, 16 }
 0x1a5   : > { %7332 = vmatmul.mubr.bf16.gmra.mrb[16].mxu1 %v7981_v41  ;;  %7559 = vmatprep.mubr.bf16.mxu0 %v6643_v59  ;;  %v5465_v41 = vsel %vm8568_vm14, %v5463_v31, %v5464_v56  ;;  %v3272_v59 = vrot.slane %v3270_v51, 4  ;;  %v10105_v31 = vcombine.low %v9598_v36, %v9614_v47  ;;  %v3285_v56 = vrot.slane %v3283_v46, 4 }
 0x1a6   : > { %7335 = vmatprep.mubr.bf16.mxu1 %v7982_v7  ;;  %v3228_v7 = vor.u32 %v3227_v5, %v3224_v16  ;;  %v6644_v2 = vcombine.low %v5462_v22, %v5465_v41  ;;  %v3239_v28 = vrot.slane %v3238_v33, 4  ;;  %v3294_v16 = vshrl.u32 %v3014_v45, 16  ;;  %v8062_v41 = vld [vmem:[#allocation2 + $0x8c] sm:$0x1] }
 0x1a7   : > { %v3297_v5 = vshll.u32 %v3014_v45, 16  ;;  %v3307_v33 = vshrl.u32 %v8063_v27, 16  ;;  %v3318_v36 = vshrl.u32 %v3017_v29, 16  ;;  %v3321_v47 = vshll.u32 %v3017_v29, 16 }
 0x1a8   : > { %v3229_v54 = vrot.slane %v3228_v7, 4  ;;  %v3244_v22 = vsel %vm8235_vm9, %v3239_v28, %v3243_v50  ;;  %v3303_v7 = vshll.u32 %v8063_v27, 16  ;;  %v3276_v51 = vor.u32 %v3275_v53, %v3272_v59  ;;  %v3020_v59 = vld [vmem:[#allocation2 + $0xa8] sm:$0xf] }
 0x1a9   : > { %v3286_v19 = vor.u32 %v3285_v56, %v9908_v38  ;;  %v3296_v25 = vrot.slane %v3294_v16, 4  ;;  %v3309_v28 = vrot.slane %v3307_v33, 4  ;;  %v10106_v50 = vcombine.low %v9618_v13, %v9635_v44 }
 0x1aa   : > { %v9915_v45 = vrot.slane %v3303_v7, 5  ;;  %v9920_v29 = vrot.slane %v3327_v26, 5  ;;  %v10107_v53 = vcombine.low %v9627_v40, %v9648_v63  ;;  %v3277_v56 = vrot.slane %v3276_v51, 4  ;;  %v3023_v7 = vld [vmem:[#allocation2 + $0xb4] sm:$0xf] }
 0x1ab   : > { %v3287_v16 = vrot.slane %v3286_v19, 4  ;;  %v3342_v44 = vshrl.u32 %v3020_v59, 16  ;;  %v3345_v27 = vshll.u32 %v3020_v59, 16  ;;  %v3366_v19 = vshrl.u32 %v3023_v7, 16 }
 0x1ac   : > { %7560 = vmatmul.mubr.bf16.gmra.mrb[4].mxu0 %v6644_v2  ;;  %v3331_v2 = vshrl.u32 %v8064_v12, 16  ;;  %v3282_v63 = vsel %vm8235_vm9, %v3277_v56, %v9908_v38 }
 0x1ad   : > { %7336 = vmatmul.mubr.bf16.gmra.mrb[20].mxu1 %v7983_v62  ;;  %7563 = vmatprep.mubr.bf16.mxu0 %v10105_v31  ;;  %v3234_v62 = vsel %vm8235_vm9, %v3229_v54, %v3233_v55  ;;  %v3299_v55 = vrot.slane %v3297_v5, 5  ;;  %v3323_v31 = vrot.slane %v3321_v47, 5  ;;  %v8067_v47 = vld [vmem:[#allocation2 + $0xac] sm:$0xf] }
 0x1ae   : > { %7339 = vmatprep.mubr.bf16.mxu1 %v7984_v60  ;;  %v3289_v60 = vshll.u32 %v8062_v41, 16  ;;  %v6457_v46 = vcombine.low %v3234_v62, %v3244_v22  ;;  %v8065_v62 = vld [vmem:[#allocation2 + $0x98] sm:$0x1]  ;;  %v3310_v41 = vor.u32 %v3309_v28, %v9915_v45  ;;  %v3351_v12 = vshll.u32 %v8067_v47, 16 }
 0x1af   : > { %v3300_v5 = vor.u32 %v3299_v55, %v3296_v25  ;;  %v3313_v22 = vshll.u32 %v8065_v62, 16  ;;  %v3355_v40 = vshrl.u32 %v8067_v47, 16  ;;  %v3369_v25 = vshll.u32 %v3023_v7, 16  ;;  %v8068_v55 = vld [vmem:[#allocation2 + $0xb8] sm:$0xf] }
 0x1b0   : > { %v3291_v54 = vrot.slane %v3289_v60, 5  ;;  %v8066_v60 = vld [vmem:[#allocation2 + $0xa4] sm:$0x1]  ;;  %v3379_v28 = vshrl.u32 %v8068_v55, 16 }
 0x1b1   : > { %v3337_v13 = vshll.u32 %v8066_v60, 16  ;;  %v3315_v51 = vrot.slane %v3313_v22, 5  ;;  %v3357_v56 = vrot.slane %v3355_v40, 4  ;;  %v8071_v40 = vld [vmem:[#allocation2 + $0xbc] sm:$0x1] }
 0x1b2   : > { %v3292_v26 = vsel %vm8235_vm9, %v3287_v16, %v3291_v54  ;;  %v3368_v16 = vrot.slane %v3366_v19, 4  ;;  %v3381_v22 = vrot.slane %v3379_v28, 4 }
 0x1b3   : > { %v6459_v54 = vcombine.low %v3282_v63, %v3292_v26  ;;  %v3385_v63 = vshll.u32 %v8071_v40, 16 }
 0x1b4   : > { %7564 = vmatmul.mubr.bf16.gmra.mrb[8].mxu0 %v10106_v50  ;;  %v3311_v50 = vrot.slane %v3310_v41, 4  ;;  %v3026_v41 = vld [vmem:[#allocation2 + $0xc0] sm:$0xf] }
 0x1b5   : > { %7340 = vmatmul.mubr.bf16.gmra.mrb[24].mxu1 %v7985_v35  ;;  %v3320_v35 = vrot.slane %v3318_v36, 4  ;;  %7567 = vmatprep.mubr.bf16.mxu0 %v10107_v53  ;;  %v3353_v53 = vrot.slane %v3351_v12, 5  ;;  %v3393_v7 = vshll.u32 %v3026_v41, 16 }
 0x1b6   : > { %7343 = vmatprep.mubr.bf16.mxu1 %v7986_v52  ;;  %v3333_v52 = vrot.slane %v3331_v2, 4  ;;  %v3301_v2 = vrot.slane %v3300_v5, 4  ;;  %v3371_v5 = vrot.slane %v3369_v25, 5 }
 0x1b7   : > { %v3324_v33 = vor.u32 %v3323_v31, %v3320_v35  ;;  %v3339_v35 = vrot.slane %v3337_v13, 5  ;;  %v3344_v31 = vrot.slane %v3342_v44, 4  ;;  %v3358_v44 = vor.u32 %v3357_v56, %v3353_v53 }
 0x1b8   : > { %v3334_v36 = vor.u32 %v3333_v52, %v9920_v29  ;;  %v3347_v52 = vrot.slane %v3345_v27, 5  ;;  %v3306_v60 = vsel %vm8235_vm9, %v3301_v2, %v9915_v45  ;;  %v3390_v27 = vshrl.u32 %v3026_v41, 16  ;;  %v8070_v45 = vld [vmem:[#allocation2 + $0xc4] sm:$0xf] }
 0x1b9   : > { %v3325_v59 = vrot.slane %v3324_v33, 4  ;;  %v3399_v33 = vshll.u32 %v8070_v45, 16  ;;  %v3372_v47 = vor.u32 %v3371_v5, %v3368_v16  ;;  %v3359_v2 = vrot.slane %v3358_v44, 4 }
 0x1ba   : > { %v3335_v38 = vrot.slane %v3334_v36, 4  ;;  %v3403_v36 = vshrl.u32 %v8070_v45, 16  ;;  %v3392_v19 = vrot.slane %v3390_v27, 4  ;;  %v3395_v25 = vrot.slane %v3393_v7, 5 }
 0x1bb   : > { %v3330_v42 = vsel %vm8235_vm9, %v3325_v59, %v9920_v29  ;;  %v3373_v28 = vrot.slane %v3372_v47, 4  ;;  %v5541_v56 = vrot.slane %v9766_v20, 5 }
 0x1bc   : > { %v3340_v4 = vsel %vm8235_vm9, %v3335_v38, %v3339_v35  ;;  %v3387_v35 = vrot.slane %v3385_v63, 5 }
 0x1bd   : > { %7344 = vmatmul.mubr.bf16.gmra.mrb[28].mxu1 %v7987_v8  ;;  %v3375_v8 = vshll.u32 %v8068_v55, 16  ;;  %v6461_v29 = vcombine.low %v3330_v42, %v3340_v4  ;;  %v3401_v55 = vrot.slane %v3399_v33, 5 }
 0x1be   : > { %7379 = vmatprep.mubr.bf16.mxu1 %v6457_v46  ;;  %v10108_v46 = vcombine.low %v9657_v48, %v9671_v34  ;;  %v3316_v48 = vsel %vm8235_vm9, %v3311_v50, %v3315_v51  ;;  %v8069_v34 = vld [vmem:[#allocation2 + $0xb0] sm:$0x1] }
 0x1bf   : > { %v3377_v62 = vrot.slane %v3375_v8, 5  ;;  %v3361_v13 = vshll.u32 %v8069_v34, 16  ;;  %v3405_v8 = vrot.slane %v3403_v36, 4 }
 0x1c0   : > { %7568 = vmatmul.mubr.bf16.gmra.mrb[12].mxu0 %v10108_v46 }
 0x1c1   : > { %7571 = vmatprep.mubr.bf16.mxu0 %v6649_v3  ;;  %v3348_v3 = vor.u32 %v3347_v52, %v3344_v31  ;;  %v3382_v12 = vor.u32 %v3381_v22, %v3377_v62  ;;  %v3363_v51 = vrot.slane %v3361_v13, 5  ;;  %v5388_v31 = vld [vmem:[#allocation2 + $0xc0] sm:$0xe]  ;;  %v5538_v52 = vrot.slane %v9694_v18, 5 }
 0x1c2   : > { %v3406_v6 = vor.u32 %v3405_v8, %v3401_v55  ;;  %v6623_v46 = vrot.slane %v5388_v31, 9  ;;  %v3378_v59 = vsel %vm8235_vm9, %v3373_v28, %v3377_v62 }
 0x1c3   : > { %v3349_v26 = vrot.slane %v3348_v3, 4  ;;  %v3383_v50 = vrot.slane %v3382_v12, 4  ;;  %v3364_v10 = vsel %vm8235_vm9, %v3359_v2, %v3363_v51  ;;  %v5540_v18 = vrot.slane %v5538_v52, 4 }
 0x1c4   : > { %v3407_v5 = vrot.slane %v3406_v6, 4  ;;  %v5539_v62 = vsel %vm8568_vm14, %v6623_v46, %v5538_v52 }
 0x1c5   : > { %7380 = vmatmul.mubr.bf16.vlgmr.msra.gmra.mrb[16].mxu1 %v9732_v21  ;;  %v6460_v21 = vcombine.low %v3306_v60, %v3316_v48  ;;  %v3354_v24 = vsel %vm8235_vm9, %v3349_v26, %v3353_v53  ;;  %v3388_v38 = vsel %vm8235_vm9, %v3383_v50, %v3387_v35  ;;  %v5542_v41 = vsel %vm8568_vm14, %v5540_v18, %v5541_v56 }
 0x1c6   : > { %7383 = vmatprep.mubr.bf16.mxu1 %v6459_v54  ;;  %v6462_v53 = vcombine.low %v3354_v24, %v3364_v10  ;;  %v6463_v54 = vcombine.low %v3378_v59, %v3388_v38  ;;  %v6655_v43 = vcombine.low %v5539_v62, %v5542_v41 }
 0x1c8   : > { %7572 = vmatmul.mubr.bf16.gmra.mrb[16].mxu0 %v6650_v57  ;;  %v3396_v57 = vor.u32 %v3395_v25, %v3392_v19 }
 0x1c9   : > { %7575 = vmatprep.mubr.bf16.mxu0 %v6651_v11  ;;  %v3409_v11 = vshll.u32 %v8072_v32, 16 }
 0x1ca   : > { %v3397_v16 = vrot.slane %v3396_v57, 4 }
 0x1cb   : > { %v3411_v22 = vrot.slane %v3409_v11, 5 }
 0x1cc   : > { %v3402_v20 = vsel %vm8235_vm9, %v3397_v16, %v3401_v55 }
 0x1cd   : > { %7384 = vmatmul.mubr.bf16.gmra.mrb[20].mxu1 %v6460_v21  ;;  %v3412_v23 = vsel %vm8235_vm9, %v3407_v5, %v3411_v22 }
 0x1ce   : > { %7387 = vmatprep.mubr.bf16.mxu1 %v6461_v29 }
 0x1d0   : > { %7576 = vmatmul.mubr.bf16.gmra.mrb[20].mxu0 %v6652_v37  ;;  %v6464_v37 = vcombine.low %v3402_v20, %v3412_v23 }
 0x1d1   : > { %7579 = vmatprep.mubr.bf16.mxu0 %v6653_v61 }
 0x1d5   : > { %7388 = vmatmul.mubr.bf16.gmra.mrb[24].mxu1 %v6462_v53 }
 0x1d6   : > { %7391 = vmatprep.mubr.bf16.mxu1 %v6463_v54 }
 0x1d8   : > { %7580 = vmatmul.mubr.bf16.gmra.mrb[24].mxu0 %v6654_v15 }
 0x1d9   : > { %7583 = vmatprep.mubr.bf16.mxu0 %v6655_v43 }
 0x1dd   : > { %7392 = vmatmul.mubr.bf16.gmra.mrb[28].mxu1 %v6464_v37 }
 0x1e0   : > { %7584 = vmatmul.mubr.bf16.gmra.mrb[28].mxu0 %v6656_v49 }
 0x258   : > { %v7317_v1 = vpop.f32.mrb[0].mxu1 }
 0x259   : > { %v2822_v39 = vpop.f32.mrb[1].mxu1 }
 0x25a   : > { %v7318_v30 = vpop.f32.mrb[2].mxu1 }
 0x25b   : > { %v2825_v61 = vpop.f32.mrb[3].mxu1 }
 0x260   : > { %v7321_v60 = vpop.f32.mrb[4].mxu1 }
 0x261   : > { %v2838_v48 = vpop.f32.mrb[5].mxu1 }
 0x262   : > { %v7322_v0 = vpop.f32.mrb[6].mxu1 }
 0x263   : > { %v2841_v34 = vpop.f32.mrb[7].mxu1 }
 0x268   : > { %v7325_v13 = vpop.f32.mrb[8].mxu1 }
 0x269   : > { %v2854_v42 = vpop.f32.mrb[9].mxu1 }
 0x26a   : > { %v7326_v58 = vpop.f32.mrb[10].mxu1 }
 0x26b   : > { %v2857_v9 = vpop.f32.mrb[11].mxu1 }
 0x270   : > { %v9985_v15 = vpop.f32.mrb[12].mxu1 }
 0x271   : > { %v9987_v4 = vpop.f32.mrb[13].mxu1 }
 0x272   : > { %v9989_v3 = vpop.f32.mrb[14].mxu1 }
 0x273   : > { %v9991_v17 = vpop.f32.mrb[15].mxu1 }
 0x277   : > { %v7557_v14 = vpop.f32.mrb[0].mxu0 }
 0x278   : > { %v7603_v49 = vadd.f32 %v7557_v14, %v7317_v1  ;;  %v5713_v44 = vpop.f32.mrb[1].mxu0 }
 0x279   : > { %v7604_v27 = vadd.f32 %v5713_v44, %v2822_v39  ;;  %v7558_v7 = vpop.f32.mrb[2].mxu0 }
 0x27a   : > { %v7605_v45 = vadd.f32 %v7558_v7, %v7318_v30  ;;  %v5716_v33 = vpop.f32.mrb[3].mxu0  ;;  %v6071_v29 = vmul.f32 %v7603_v49, %v7603_v49 }
 0x27b   : > { %v7606_v36 = vadd.f32 %v5716_v33, %v2825_v61  ;;  %v6069_v12 = vmul.f32 %v7604_v27, %v7604_v27 }
 0x27c   : > { %v6837_v47 = vpack.c.bf16 %v7605_v45, %v7603_v49  ;;  %v6072_v55 = vmul.f32 %v7605_v45, %v7605_v45 }
 0x27d   : > { %v6832_v40 = vpack.c.bf16 %v7606_v36, %v7604_v27  ;;  %v6032_v63 = vadd.f32 %v7606_v36, %v7604_v27  ;;  %v6070_v21 = vmul.f32 %v7606_v36, %v7606_v36 }
 0x27e   : > { %6924 = vst [vmem:[%s9998_s26 + $0x8] sm:$0xff] %v6837_v47  }
 0x27f   : > { %6833 = vst [vmem:[%s9998_s26] sm:$0xff] %v6832_v40   ;;  %v6033_v26 = vadd.f32 %v7603_v49, %v6032_v63  ;;  %v6101_v2 = vadd.f32 %v6070_v21, %v6069_v12  ;;  %v7561_v51 = vpop.f32.mrb[4].mxu0 }
 0x280   : > { %v7607_v19 = vadd.f32 %v7561_v51, %v7321_v60  ;;  %v5729_v25 = vpop.f32.mrb[5].mxu0 }
 0x281   : > { %v6102_v8 = vadd.f32 %v6101_v2, %v6071_v29  ;;  %v7608_v28 = vadd.f32 %v5729_v25, %v2838_v48  ;;  %v6034_v50 = vadd.f32 %v7605_v45, %v6033_v26  ;;  %v7562_v35 = vpop.f32.mrb[6].mxu0 }
 0x282   : > { %v7609_v31 = vadd.f32 %v7562_v35, %v7322_v0  ;;  %v5732_v52 = vpop.f32.mrb[7].mxu0  ;;  %v6075_v18 = vmul.f32 %v7607_v19, %v7607_v19 }
 0x283   : > { %v6035_v24 = vadd.f32 %v7608_v28, %v6034_v50  ;;  %v6073_v10 = vmul.f32 %v7608_v28, %v7608_v28  ;;  %v6103_v57 = vadd.f32 %v6102_v8, %v6072_v55  ;;  %v7610_v6 = vadd.f32 %v5732_v52, %v2841_v34 }
 0x284   : > { %v6847_v32 = vpack.c.bf16 %v7609_v31, %v7607_v19  ;;  %v6076_v22 = vmul.f32 %v7609_v31, %v7609_v31 }
 0x285   : > { %v6104_v11 = vadd.f32 %v6103_v57, %v6073_v10  ;;  %v6842_v46 = vpack.c.bf16 %v7610_v6, %v7608_v28  ;;  %v6036_v59 = vadd.f32 %v7610_v6, %v6035_v24  ;;  %v6074_v38 = vmul.f32 %v7610_v6, %v7610_v6 }
 0x286   : > { %6926 = vst [vmem:[%s9998_s26 + $0x18] sm:$0xff] %v6847_v32  }
 0x287   : > { %6925 = vst [vmem:[%s9998_s26 + $0x10] sm:$0xff] %v6842_v46   ;;  %v6037_v56 = vadd.f32 %v7607_v19, %v6036_v59  ;;  %v6105_v53 = vadd.f32 %v6104_v11, %v6074_v38  ;;  %v7565_v54 = vpop.f32.mrb[8].mxu0 }
 0x288   : > { %v7611_v16 = vadd.f32 %v7565_v54, %v7325_v13  ;;  %v5745_v5 = vpop.f32.mrb[9].mxu0 }
 0x289   : > { %v6106_v62 = vadd.f32 %v6105_v53, %v6075_v18  ;;  %v7612_v41 = vadd.f32 %v5745_v5, %v2854_v42  ;;  %v6038_v20 = vadd.f32 %v7609_v31, %v6037_v56  ;;  %v7566_v23 = vpop.f32.mrb[10].mxu0 }
 0x28a   : > { %v7613_v43 = vadd.f32 %v7566_v23, %v7326_v58  ;;  %v5748_v37 = vpop.f32.mrb[11].mxu0  ;;  %v6079_v13 = vmul.f32 %v7611_v16, %v7611_v16 }
 0x28b   : > { %v6039_v1 = vadd.f32 %v7612_v41, %v6038_v20  ;;  %v6077_v39 = vmul.f32 %v7612_v41, %v7612_v41  ;;  %v6107_v30 = vadd.f32 %v6106_v62, %v6076_v22  ;;  %v7614_v61 = vadd.f32 %v5748_v37, %v2857_v9 }
 0x28c   : > { %v6857_v60 = vpack.c.bf16 %v7613_v43, %v7611_v16  ;;  %v6080_v58 = vmul.f32 %v7613_v43, %v7613_v43 }
 0x28d   : > { %v6108_v48 = vadd.f32 %v6107_v30, %v6077_v39  ;;  %v6852_v0 = vpack.c.bf16 %v7614_v61, %v7612_v41  ;;  %v6040_v34 = vadd.f32 %v7614_v61, %v6039_v1  ;;  %v6078_v14 = vmul.f32 %v7614_v61, %v7614_v61 }
 0x28e   : > { %6928 = vst [vmem:[%s9998_s26 + $0x28] sm:$0xff] %v6857_v60  }
 0x28f   : > { %6927 = vst [vmem:[%s9998_s26 + $0x20] sm:$0xff] %v6852_v0   ;;  %v6041_v49 = vadd.f32 %v7611_v16, %v6040_v34  ;;  %v6109_v44 = vadd.f32 %v6108_v48, %v6078_v14 }
 0x291   : > { %v6110_v45 = vadd.f32 %v6109_v44, %v6079_v13  ;;  %v6042_v36 = vadd.f32 %v7613_v43, %v6041_v49 }
 0x293   : > { %v7569_v42 = vpop.f32.mrb[12].mxu0  ;;  %v6111_v21 = vadd.f32 %v6110_v45, %v6080_v58 }
 0x294   : > { %v7615_v27 = vadd.f32 %v7569_v42, %v9985_v15  ;;  %v5761_v7 = vpop.f32.mrb[13].mxu0 }
 0x295   : > { %v7616_v33 = vadd.f32 %v5761_v7, %v9987_v4  ;;  %v7570_v9 = vpop.f32.mrb[14].mxu0 }
 0x296   : > { %v7617_v47 = vadd.f32 %v7570_v9, %v9989_v3  ;;  %v5764_v12 = vpop.f32.mrb[15].mxu0  ;;  %v6083_v28 = vmul.f32 %v7615_v27, %v7615_v27 }
 0x297   : > { %v6043_v40 = vadd.f32 %v7616_v33, %v6042_v36  ;;  %v6081_v63 = vmul.f32 %v7616_v33, %v7616_v33  ;;  %v7618_v29 = vadd.f32 %v5764_v12, %v9991_v17 }
 0x298   : > { %v7381_v26 = vpop.f32.mrb[16].mxu1  ;;  %v6867_v2 = vpack.c.bf16 %v7617_v47, %v7615_v27  ;;  %v6084_v24 = vmul.f32 %v7617_v47, %v7617_v47 }
 0x299   : > { %v3640_v15 = vpop.f32.mrb[17].mxu1  ;;  %v6112_v51 = vadd.f32 %v6111_v21, %v6081_v63  ;;  %v6862_v19 = vpack.c.bf16 %v7618_v29, %v7616_v33  ;;  %v6044_v25 = vadd.f32 %v7618_v29, %v6043_v40  ;;  %v6082_v55 = vmul.f32 %v7618_v29, %v7618_v29 }
 0x29a   : > { %v7382_v4 = vpop.f32.mrb[18].mxu1  ;;  %6930 = vst [vmem:[%s9998_s26 + $0x38] sm:$0xff] %v6867_v2  }
 0x29b   : > { %v3643_v8 = vpop.f32.mrb[19].mxu1  ;;  %6929 = vst [vmem:[%s9998_s26 + $0x30] sm:$0xff] %v6862_v19   ;;  %v6045_v3 = vadd.f32 %v7615_v27, %v6044_v25  ;;  %v6113_v50 = vadd.f32 %v6112_v51, %v6082_v55  ;;  %v7573_v35 = vpop.f32.mrb[16].mxu0 }
 0x29c   : > { %v7619_v31 = vadd.f32 %v7573_v35, %v7381_v26  ;;  %v5777_v52 = vpop.f32.mrb[17].mxu0 }
 0x29d   : > { %v6114_v10 = vadd.f32 %v6113_v50, %v6083_v28  ;;  %v7620_v17 = vadd.f32 %v5777_v52, %v3640_v15  ;;  %v6046_v57 = vadd.f32 %v7617_v47, %v6045_v3  ;;  %v7574_v6 = vpop.f32.mrb[18].mxu0 }
 0x29e   : > { %v7621_v32 = vadd.f32 %v7574_v6, %v7382_v4  ;;  %v5780_v11 = vpop.f32.mrb[19].mxu0  ;;  %v6087_v23 = vmul.f32 %v7619_v31, %v7619_v31 }
 0x29f   : > { %v6047_v46 = vadd.f32 %v7620_v17, %v6046_v57  ;;  %v6085_v59 = vmul.f32 %v7620_v17, %v7620_v17  ;;  %v6115_v38 = vadd.f32 %v6114_v10, %v6084_v24  ;;  %v7622_v18 = vadd.f32 %v5780_v11, %v3643_v8 }
 0x2a0   : > { %v7385_v56 = vpop.f32.mrb[20].mxu1  ;;  %v6877_v53 = vpack.c.bf16 %v7621_v32, %v7619_v31  ;;  %v6088_v61 = vmul.f32 %v7621_v32, %v7621_v32 }
 0x2a1   : > { %v3656_v54 = vpop.f32.mrb[21].mxu1  ;;  %v6116_v16 = vadd.f32 %v6115_v38, %v6085_v59  ;;  %v6872_v5 = vpack.c.bf16 %v7622_v18, %v7620_v17  ;;  %v6048_v22 = vadd.f32 %v7622_v18, %v6047_v46  ;;  %v6086_v62 = vmul.f32 %v7622_v18, %v7622_v18 }
 0x2a2   : > { %v7386_v41 = vpop.f32.mrb[22].mxu1  ;;  %6932 = vst [vmem:[%s9998_s26 + $0x48] sm:$0xff] %v6877_v53  }
 0x2a3   : > { %v3659_v20 = vpop.f32.mrb[23].mxu1  ;;  %6931 = vst [vmem:[%s9998_s26 + $0x40] sm:$0xff] %v6872_v5   ;;  %v6049_v43 = vadd.f32 %v7619_v31, %v6048_v22  ;;  %v6117_v37 = vadd.f32 %v6116_v16, %v6086_v62  ;;  %v7577_v1 = vpop.f32.mrb[20].mxu0 }
 0x2a4   : > { %v7623_v39 = vadd.f32 %v7577_v1, %v7385_v56  ;;  %v5793_v30 = vpop.f32.mrb[21].mxu0 }
 0x2a5   : > { %v6118_v60 = vadd.f32 %v6117_v37, %v6087_v23  ;;  %v7624_v48 = vadd.f32 %v5793_v30, %v3656_v54  ;;  %v6050_v0 = vadd.f32 %v7621_v32, %v6049_v43  ;;  %v7578_v34 = vpop.f32.mrb[22].mxu0 }
 0x2a6   : > { %v7625_v14 = vadd.f32 %v7578_v34, %v7386_v41  ;;  %v5796_v13 = vpop.f32.mrb[23].mxu0  ;;  %v6091_v63 = vmul.f32 %v7623_v39, %v7623_v39 }
 0x2a7   : > { %v6051_v49 = vadd.f32 %v7624_v48, %v6050_v0  ;;  %v6089_v44 = vmul.f32 %v7624_v48, %v7624_v48  ;;  %v6119_v42 = vadd.f32 %v6118_v60, %v6088_v61  ;;  %v7626_v27 = vadd.f32 %v5796_v13, %v3659_v20 }
 0x2a8   : > { %v7389_v7 = vpop.f32.mrb[24].mxu1  ;;  %v6887_v58 = vpack.c.bf16 %v7625_v14, %v7623_v39  ;;  %v6092_v51 = vmul.f32 %v7625_v14, %v7625_v14 }
 0x2a9   : > { %v3672_v45 = vpop.f32.mrb[25].mxu1  ;;  %v6120_v33 = vadd.f32 %v6119_v42, %v6089_v44  ;;  %v6882_v36 = vpack.c.bf16 %v7626_v27, %v7624_v48  ;;  %v6052_v9 = vadd.f32 %v7626_v27, %v6051_v49  ;;  %v6090_v47 = vmul.f32 %v7626_v27, %v7626_v27 }
 0x2aa   : > { %v7390_v12 = vpop.f32.mrb[26].mxu1  ;;  %6934 = vst [vmem:[%s9998_s26 + $0x58] sm:$0xff] %v6887_v58  }
 0x2ab   : > { %v3675_v40 = vpop.f32.mrb[27].mxu1  ;;  %6933 = vst [vmem:[%s9998_s26 + $0x50] sm:$0xff] %v6882_v36   ;;  %v6053_v21 = vadd.f32 %v7623_v39, %v6052_v9  ;;  %v6121_v29 = vadd.f32 %v6120_v33, %v6090_v47  ;;  %v7581_v26 = vpop.f32.mrb[24].mxu0 }
 0x2ac   : > { %v7627_v2 = vadd.f32 %v7581_v26, %v7389_v7  ;;  %v5809_v15 = vpop.f32.mrb[25].mxu0 }
 0x2ad   : > { %v6122_v19 = vadd.f32 %v6121_v29, %v6091_v63  ;;  %v7628_v25 = vadd.f32 %v5809_v15, %v3672_v45  ;;  %v6054_v55 = vadd.f32 %v7625_v14, %v6053_v21  ;;  %v7582_v4 = vpop.f32.mrb[26].mxu0 }
 0x2ae   : > { %v7629_v8 = vadd.f32 %v7582_v4, %v7390_v12  ;;  %v5812_v28 = vpop.f32.mrb[27].mxu0  ;;  %v6095_v59 = vmul.f32 %v7627_v2, %v7627_v2 }
 0x2af   : > { %v6055_v3 = vadd.f32 %v7628_v25, %v6054_v55  ;;  %v6093_v50 = vmul.f32 %v7628_v25, %v7628_v25  ;;  %v6123_v35 = vadd.f32 %v6122_v19, %v6092_v51  ;;  %v7630_v31 = vadd.f32 %v5812_v28, %v3675_v40 }
 0x2b0   : > { %v7393_v52 = vpop.f32.mrb[28].mxu1  ;;  %v6897_v24 = vpack.c.bf16 %v7629_v8, %v7627_v2  ;;  %v6096_v16 = vmul.f32 %v7629_v8, %v7629_v8 }
 0x2b1   : > { %v3688_v10 = vpop.f32.mrb[29].mxu1  ;;  %v6124_v17 = vadd.f32 %v6123_v35, %v6093_v50  ;;  %v6892_v57 = vpack.c.bf16 %v7630_v31, %v7628_v25  ;;  %v6056_v6 = vadd.f32 %v7630_v31, %v6055_v3  ;;  %v6094_v32 = vmul.f32 %v7630_v31, %v7630_v31 }
 0x2b2   : > { %v7394_v11 = vpop.f32.mrb[30].mxu1  ;;  %6936 = vst [vmem:[%s9998_s26 + $0x68] sm:$0xff] %v6897_v24  }
 0x2b3   : > { %v3691_v46 = vpop.f32.mrb[31].mxu1  ;;  %6935 = vst [vmem:[%s9998_s26 + $0x60] sm:$0xff] %v6892_v57   ;;  %v6057_v38 = vadd.f32 %v7627_v2, %v6056_v6  ;;  %v6125_v18 = vadd.f32 %v6124_v17, %v6094_v32  ;;  %v7585_v56 = vpop.f32.mrb[28].mxu0 }
 0x2b4   : > { %v7631_v53 = vadd.f32 %v7585_v56, %v7393_v52  ;;  %v5825_v54 = vpop.f32.mrb[29].mxu0 }
 0x2b5   : > { %v6126_v5 = vadd.f32 %v6125_v18, %v6095_v59  ;;  %v7632_v22 = vadd.f32 %v5825_v54, %v3688_v10  ;;  %v6058_v62 = vadd.f32 %v7629_v8, %v6057_v38  ;;  %v7586_v41 = vpop.f32.mrb[30].mxu0 }
 0x2b6   : > { %v7633_v20 = vadd.f32 %v7586_v41, %v7394_v11  ;;  %v5828_v23 = vpop.f32.mrb[31].mxu0  ;;  %v6099_v34 = vmul.f32 %v7631_v53, %v7631_v53 }
 0x2b7   : > { %v6059_v43 = vadd.f32 %v7632_v22, %v6058_v62  ;;  %v6097_v37 = vmul.f32 %v7632_v22, %v7632_v22  ;;  %v6127_v1 = vadd.f32 %v6126_v5, %v6096_v16  ;;  %v7634_v39 = vadd.f32 %v5828_v23, %v3691_v46 }
 0x2b8   : > { %v6907_v30 = vpack.c.bf16 %v7633_v20, %v7631_v53  ;;  %v6100_v49 = vmul.f32 %v7633_v20, %v7633_v20 }
 0x2b9   : > { %v6128_v61 = vadd.f32 %v6127_v1, %v6097_v37  ;;  %v6902_v60 = vpack.c.bf16 %v7634_v39, %v7632_v22  ;;  %v6060_v48 = vadd.f32 %v7634_v39, %v6059_v43  ;;  %v6098_v0 = vmul.f32 %v7634_v39, %v7634_v39 }
 0x2ba   : > { %6938 = vst [vmem:[%s9998_s26 + $0x78] sm:$0xff] %v6907_v30  }
 0x2bb   : > { %6937 = vst [vmem:[%s9998_s26 + $0x70] sm:$0xff] %v6902_v60   ;;  %v6061_v14 = vadd.f32 %v7631_v53, %v6060_v48  ;;  %v6129_v13 = vadd.f32 %v6128_v61, %v6098_v0 }
 0x2bd   : > { %v6062_v44 = vadd.f32 %v7633_v20, %v6061_v14  ;;  %v6130_v42 = vadd.f32 %v6129_v13, %v6099_v34 }
 0x2bf   : > { %v6063_v27 = vrot.slane %v6062_v44, 4  ;;  %v6131_v7 = vadd.f32 %v6130_v42, %v6100_v49 }
 0x2c1   : > { %v6064_v58 = vadd.f32 %v6063_v27, %v6062_v44  ;;  %v6132_v45 = vrot.slane %v6131_v7, 4 }
 0x2c3   : > { %v6065_v33 = vrot.slane %v6064_v58, 2  ;;  %v6133_v36 = vadd.f32 %v6132_v45, %v6131_v7 }
 0x2c5   : > { %v6066_v9 = vadd.f32 %v6065_v33, %v6064_v58  ;;  %v6134_v47 = vrot.slane %v6133_v36, 2 }
 0x2c7   : > { %v6067_v12 = vrot.slane %v6066_v9, 1  ;;  %v6135_v40 = vadd.f32 %v6134_v47, %v6133_v36 }
 0x2c9   : > { %v6136_v63 = vrot.slane %v6135_v40, 1  ;;  %v6068_v21 = vadd.f32 %v6067_v12, %v6066_v9 }
 0x2cb   : > { %v6137_v29 = vadd.f32 %v6136_v63, %v6135_v40 }
 0x2cd   : > { %v6139_v26 = vsel %vm244_vm0, %v6068_v21, %v6137_v29 }
 0x2ce   : > { %v6141_v2 = vsel %vm6140_vm15, %v6139_v26, 0.0 }
 0x2cf   : > { %6142 = vst [vmem:[%s235_s29] sm:$0xff] %v6141_v2 }
 0x2d0 PF: > { %s16_s18 = sadd.s32 1, %s8079_s18  }
 0x2d1   : > { %p13_p4 = scmp.ge.s32.totalorder %s16_s18, 4  }
 0x2d3   :  { %15 = sbr.rel (!%p13_p4) target bundleno = 1 (0x1), region = 89 }

// kernel: basic_block_forward.3
= control target key start
LH: loop header
LB: loop body
LE: loop exit
PB: predicated region body
PF: predicated region fallthrough
CT: control target
= control target key end

     0   :  { %s8724_s21 = smov 0   ;;  %s10737_s0 = inlined_call_operand.vmem [shape: f32[2,16,16,128], index: 0, kind: input, shape index: {}]   ;;  %s10738_s1 = inlined_call_operand.vmem [shape: bf16[9,128,128], index: 1, kind: input, shape index: {}]   ;;  %s10739_s2 = inlined_call_operand.vmem [shape: bf16[128,128], index: 2, kind: input, shape index: {}]   ;;  %s10740_s3 = inlined_call_operand.vmem [shape: bf16[2,16,16,128], index: 3, kind: output, shape index: {0}]   ;;  %s10741_s4 = inlined_call_operand.vmem [shape: f32[2,8,128], index: 4, kind: output, shape index: {1}]   ;;  %s10742_s5 = inlined_call_operand.vmem [shape: bf16[2,16,16,128], index: 5, kind: output, shape index: {2}]   ;;  %s10743_s6 = inlined_call_operand.vmem [shape: f32[2,8,128], index: 6, kind: output, shape index: {3}]  }
   0x1 LB: > { %s6694_s22 = sadd.s32 4294967295, %s8686_s21   ;;  %p6698_p0 = scmp.ge.s32.totalorder %s8686_s21, 1  ;;  %s8686_s21 = sphi %s8724_s21, %s17_s21  }
   0x2   : > { %p219_p1 = scmp.lt.s32.totalorder %s8686_s21, 3 }
   0x4   : > { %p220_p2 = pnand %p6698_p0, %p219_p1 }
   0x6   : > { %223 = sbr.rel (%p220_p2) target bundleno = 746 (0x2ea), region = 32 }
   0xd   : > { %v8479_v0 = vld [vmem:[%s10738_s1 + $0x40] sm:$0xff]   ;;  %v8688_v2 = vmov 0   ;;  %v8481_v3 = vld [vmem:[%s10738_s1 + $0x48] sm:$0xff]   ;;  %v8483_v5 = vld [vmem:[%s10738_s1 + $0x50] sm:$0xff]   ;;  %p262_p3 = scmp.lt.s32.totalorder %s6694_s22, 1  ;;  %vm293_vm0 = vcmask 1040384  }
   0xe   : > { %v8480_v1 = vld [vmem:[%s10738_s1 + $0x100] sm:$0xff]   ;;  %286 = vst [vmem:[#allocation2] sm:$0xf] %v8688_v2  ;;  %287 = vst [vmem:[#allocation2 + $0x4] sm:$0xf] %v8688_v2  ;;  %7734 = vmatprep.subr.bf16.mxu1 %v8479_v0  ;;  %v8482_v4 = vld [vmem:[%s10738_s1 + $0x108] sm:$0xff]  }
   0xf   : > { %288 = vst [vmem:[#allocation2 + $0x8] sm:$0x1] %v8688_v2  ;;  %290 = vst [vmem:[#allocation2 + $0xcc] sm:$0xf] %v8688_v2  ;;  %7926 = vmatprep.subr.bf16.mxu0 %v8480_v1  ;;  %7735 = vmatpush3.bf16.msra.mxu1 %v8479_v0  ;;  %v8484_v6 = vld [vmem:[%s10738_s1 + $0x110] sm:$0xff]   ;;  %v8485_v7 = vld [vmem:[%s10738_s1 + $0x58] sm:$0xff]  }
  0x10   : > { %291 = vst [vmem:[#allocation2 + $0xd0] sm:$0xf] %v8688_v2  ;;  %292 = vst [vmem:[#allocation2 + $0xd4] sm:$0x1] %v8688_v2  ;;  %7927 = vmatpush3.bf16.msra.mxu0 %v8480_v1  ;;  %7736 = vmatprep.subr.bf16.mxu1 %v8481_v3  ;;  %s10888_s22 = smov (!%p262_p3, %s6694_s22), 1  ;;  %v8486_v8 = vld [vmem:[%s10738_s1 + $0x118] sm:$0xff]  }
  0x11   : > { %7928 = vmatprep.subr.bf16.mxu0 %v8482_v4  ;;  %v8487_v9 = vld [vmem:[%s10738_s1 + $0x60] sm:$0xff]   ;;  %s7205_s17 = sshll.u32 %s10888_s22, 8  ;;  %v8489_v11 = vld [vmem:[%s10738_s1 + $0x68] sm:$0xff]   ;;  %vm294_vm1 = vsmask.f32 256  ;;  %vm857_vm4 = vcmask 1043456  }
  0x12   : > { %v8488_v10 = vld [vmem:[%s10738_s1 + $0x120] sm:$0xff]   ;;  %v8490_v12 = vld [vmem:[%s10738_s1 + $0x128] sm:$0xff]   ;;  %s8774_s28 = scalar_lea.vmem %s10737_s0, %s7205_s17  ;;  %vm350_vm2 = vsmask.f32 7938  ;;  %vm8778_vm3 = vmand %vm293_vm0, %vm294_vm1  ;;  %vm1035_vm6 = vsmask.f32 3328 }
  0x13   : > { %7737 = vmatpush3.bf16.msra.mxu1 %v8481_v3  ;;  %vm8786_vm5 = vmand %vm293_vm0, %vm350_vm2  ;;  %v406_v21 = vld [vmem:[%s8774_s28] sm:$0xff]  ;;  %v8491_v22 = vld [vmem:[%s10738_s1 + $0x70] sm:$0xff]   ;;  %vm1036_vm7 = vsmask.f32 7440  ;;  %vm534_vm8 = vsmask.f32 4368 }
  0x14   : > { %7929 = vmatpush3.bf16.msra.mxu0 %v8482_v4  ;;  %7738 = vmatprep.subr.bf16.mxu1 %v8483_v5  ;;  %v299_v24 = vld [vmem:[#allocation2 + $0xc] sm:$0x1]  ;;  %v355_v25 = vld [vmem:[#allocation2 + $0x14] sm:$0x1]  ;;  %v7208_v26 = vpack.c.bf16 %v406_v21, %v406_v21  ;;  %v8493_v36 = vld [vmem:[%s10738_s1 + $0x78] sm:$0xff]   ;;  %vm2065_vm12 = vcmask 1042432  }
  0x15   : > { %7930 = vmatprep.subr.bf16.mxu0 %v8484_v6  ;;  %v296_v13 = vld [vmem:[#allocation2] sm:$0x1]  ;;  %v972_v16 = vld [vmem:[#allocation2 + $0x4] sm:$0xf]  ;;  %v8492_v27 = vld [vmem:[%s10738_s1 + $0x130] sm:$0xff]   ;;  %v300_v30 = vsel %vm8778_vm3, 0, %v299_v24 }
  0x16   : > { %v352_v15 = vld [vmem:[#allocation2 + $0x8] sm:$0x1]  ;;  %v297_v17 = vsel %vm8778_vm3, 0, %v296_v13  ;;  %v1048_v19 = vshll.u32 %v972_v16, 16  ;;  %v1052_v20 = vshrl.u32 %v972_v16, 16  ;;  %v356_v31 = vsel %vm8786_vm5, 0, %v355_v25  ;;  %vm8821_vm9 = vmand %vm857_vm4, %vm350_vm2 }
  0x17   : > { %7739 = vmatpush3.bf16.msra.mxu1 %v8483_v5  ;;  %298 = vst [vmem:[#allocation2] sm:$0x1] %v297_v17  ;;  %v353_v23 = vsel %vm8786_vm5, 0, %v352_v15  ;;  %v407_v32 = vld [vmem:[%s8774_s28 + $0x8] sm:$0xff]  ;;  %301 = vst [vmem:[#allocation2 + $0xc] sm:$0x1] %v300_v30 }
  0x18   : > { %7931 = vmatpush3.bf16.msra.mxu0 %v8484_v6  ;;  %7740 = vmatprep.subr.bf16.mxu1 %v8485_v7  ;;  %354 = vst [vmem:[#allocation2 + $0x8] sm:$0x1] %v353_v23  ;;  %v8799_v28 = vrot.slane %v1048_v19, 5  ;;  %v1054_v29 = vrot.slane %v1052_v20, 4  ;;  %357 = vst [vmem:[#allocation2 + $0x14] sm:$0x1] %v356_v31  ;;  %v7209_v33 = vpack.c.bf16 %v407_v32, %v407_v32 }
  0x19   : > { %7932 = vmatprep.subr.bf16.mxu0 %v8486_v8  ;;  %v537_v34 = vshrl.u32 %v7208_v26, 16  ;;  %v540_v35 = vshll.u32 %v7208_v26, 16  ;;  %v302_v38 = vld [vmem:[#allocation2 + $0x18] sm:$0x1]  ;;  %v358_v44 = vld [vmem:[#allocation2 + $0x20] sm:$0x1]  ;;  %vm8830_vm10 = vmor %vm294_vm1, %vm534_vm8 }
  0x1a   : > { %v1055_v37 = vor.u32 %v1054_v29, %v8799_v28  ;;  %v8494_v39 = vld [vmem:[%s10738_s1 + $0x138] sm:$0xff]   ;;  %v545_v41 = vshrl.u32 %v7209_v33, 16  ;;  %v548_v42 = vshll.u32 %v7209_v33, 16  ;;  %v303_v43 = vsel %vm8778_vm3, 0, %v302_v38  ;;  %v408_v46 = vld [vmem:[%s8774_s28 + $0x10] sm:$0xff]  ;;  %v410_v52 = vld [vmem:[%s8774_s28 + $0x20] sm:$0xff] }
  0x1b   : > { %7741 = vmatpush3.bf16.msra.mxu1 %v8485_v7  ;;  %v539_v40 = vrot.slane %v537_v34, 7  ;;  %304 = vst [vmem:[#allocation2 + $0x18] sm:$0x1] %v303_v43  ;;  %v359_v45 = vsel %vm8786_vm5, 0, %v358_v44  ;;  %v409_v47 = vld [vmem:[%s8774_s28 + $0x18] sm:$0xff]  ;;  %v7210_v56 = vpack.c.bf16 %v408_v46, %v408_v46  ;;  %v8837_v0 = vld [vmem:[%s10738_s1 + $0x140] sm:$0xff]   ;;  %v7212_v7 = vpack.c.bf16 %v410_v52, %v410_v52  ;;  %vm8847_vm11 = vmor %vm1035_vm6, %vm1036_vm7 }
  0x1c   : > { %7933 = vmatpush3.bf16.msra.mxu0 %v8486_v8  ;;  %7742 = vmatprep.subr.bf16.mxu1 %v8487_v9  ;;  %v547_v50 = vrot.slane %v545_v41, 7  ;;  %360 = vst [vmem:[#allocation2 + $0x20] sm:$0x1] %v359_v45  ;;  %v8826_v54 = vrot.slane %v1055_v37, 4  ;;  %v7211_v57 = vpack.c.bf16 %v409_v47, %v409_v47  ;;  %v305_v58 = vld [vmem:[#allocation2 + $0x24] sm:$0x1] }
  0x1d   : > { %7934 = vmatprep.subr.bf16.mxu0 %v8488_v10  ;;  %v542_v48 = vor.u32 %v540_v35, %v539_v40  ;;  %v543_v49 = vrot.slane %v539_v40, 4  ;;  %v361_v1 = vld [vmem:[#allocation2 + $0x2c] sm:$0x1]  ;;  %v8843_v6 = vld [vmem:[%s10738_s1] sm:$0xff]   ;;  %v554_v17 = vshrl.u32 %v7210_v56, 16  ;;  %v557_v19 = vshll.u32 %v7210_v56, 16 }
  0x1e   : > { %v971_v53 = vld [vmem:[#allocation2] sm:$0xf]  ;;  %v550_v62 = vor.u32 %v548_v42, %v547_v50  ;;  %v552_v63 = vrot.slane %v547_v50, 4  ;;  %v411_v2 = vld [vmem:[%s8774_s28 + $0x28] sm:$0xff]  ;;  %v562_v21 = vshrl.u32 %v7211_v57, 16  ;;  %v306_v23 = vsel %vm8778_vm3, 0, %v305_v58 }
  0x1f   : > { %7743 = vmatpush3.bf16.msra.mxu1 %v8487_v9  ;;  %v1019_v59 = vld [vmem:[#allocation2 + $0x8] sm:$0x1]  ;;  %v1039_v60 = vshrl.u32 %v971_v53, 16  ;;  %v1042_v61 = vshll.u32 %v971_v53, 16  ;;  %v859_v4 = vld [vmem:[#allocation2 + $0xc] sm:$0xf]  ;;  %v7213_v8 = vpack.c.bf16 %v411_v2, %v411_v2 }
  0x20   : > { %7935 = vmatpush3.bf16.msra.mxu0 %v8488_v10  ;;  %7744 = vmatprep.subr.bf16.mxu1 %v8489_v11  ;;  %v1058_v3 = vshll.u32 %v1019_v59, 16  ;;  %v863_v5 = vld [vmem:[#allocation2 + $0x14] sm:$0x1]  ;;  %v860_v13 = vsel %vm8821_vm9, %v542_v48, %v859_v4  ;;  %v556_v25 = vrot.slane %v554_v17, 7  ;;  %307 = vst [vmem:[#allocation2 + $0x24] sm:$0x1] %v306_v23 }
  0x21   : > { %7936 = vmatprep.subr.bf16.mxu0 %v8490_v12  ;;  %v1041_v10 = vrot.slane %v1039_v60, 4  ;;  %861 = vst [vmem:[#allocation2 + $0xc] sm:$0xf] %v860_v13  ;;  %v864_v16 = vsel %vm8778_vm3, %v552_v63, %v863_v5  ;;  %v571_v29 = vshrl.u32 %v7212_v7, 16  ;;  %v564_v31 = vrot.slane %v562_v21, 7  ;;  %v412_v46 = vld [vmem:[%s8774_s28 + $0x30] sm:$0xff] }
  0x22   : > { %v1060_v15 = vrot.slane %v1058_v3, 5  ;;  %865 = vst [vmem:[#allocation2 + $0x14] sm:$0x1] %v864_v16  ;;  %v866_v26 = vld [vmem:[#allocation2 + $0x18] sm:$0xf]  ;;  %v574_v33 = vshll.u32 %v7212_v7, 16  ;;  %v559_v35 = vor.u32 %v557_v19, %v556_v25  ;;  %v8882_v2 = vpack.c.bf16 %v412_v46, %v412_v46 }
  0x23   : > { %7745 = vmatpush3.bf16.msra.mxu1 %v8489_v11  ;;  %v1044_v11 = vrot.slane %v1042_v61, 5  ;;  %v870_v32 = vld [vmem:[#allocation2 + $0x20] sm:$0x1]  ;;  %v579_v34 = vshrl.u32 %v7213_v8, 16  ;;  %v573_v37 = vrot.slane %v571_v29, 7  ;;  %v582_v38 = vshll.u32 %v7213_v8, 16 }
  0x24   : > { %7937 = vmatpush3.bf16.msra.mxu0 %v8490_v12  ;;  %7746 = vmatprep.subr.bf16.mxu1 %v8491_v22  ;;  %v551_v12 = vsel %vm8830_vm10, %v543_v49, %v550_v62  ;;  %v1061_v24 = vsel %vm8847_vm11, %v8826_v54, %v1060_v15  ;;  %v569_v41 = vrot.slane %v564_v31, 4  ;;  %v867_v44 = vsel %vm8821_vm9, %v559_v35, %v866_v26  ;;  %v413_v47 = vld [vmem:[%s8774_s28 + $0x38] sm:$0xff]  ;;  %v8498_v46 = vld [vmem:[%s10738_s1 + $0x8] sm:$0xff]   ;;  %s7206_s14 = sshll.u32 %s10888_s22, 7  ;;  %s6703_s23 = sshll.u32 %s10888_s22, 3 }
  0x25   : > { %7938 = vmatprep.subr.bf16.mxu0 %v8492_v27  ;;  %862 = vst [vmem:[#allocation2 + $0x10] sm:$0xf] %v551_v12  ;;  %v1045_v20 = vor.u32 %v1044_v11, %v1041_v10  ;;  %v8869_v42 = vrot.slane %v579_v34, 7  ;;  %v577_v45 = vrot.slane %v573_v37, 4  ;;  %868 = vst [vmem:[#allocation2 + $0x18] sm:$0xf] %v867_v44  ;;  %v576_v53 = vor.u32 %v574_v33, %v573_v37  ;;  %s10652_s17 = scalar_lea.vmem %s10742_s5, %s7206_s14  ;;  %s10663_s20 = scalar_lea.vmem %s10740_s3, %s7206_s14 }
  0x26   : > { %v8884_v3 = vpack.c.bf16 %v413_v47, %v413_v47  ;;  %vm2066_vm13 = vcmask 1046532   ;;  %vm6047_vm15 = vcmask 1041408   ;;  %s284_s26 = scalar_lea.vmem %s10743_s6, %s6703_s23  ;;  %s275_s29 = scalar_lea.vmem %s10741_s4, %s6703_s23 }
  0x27   : > { %7747 = vmatpush3.bf16.msra.mxu1 %v8491_v22  ;;  %v565_v22 = vshll.u32 %v7211_v57, 16  ;;  %v1046_v30 = vrot.slane %v1045_v20, 4  ;;  %v584_v54 = vor.u32 %v582_v38, %v8869_v42  ;;  %v873_v15 = vld [vmem:[#allocation2 + $0x24] sm:$0xf]  ;;  %vm9420_vm14 = vmor %vm2065_vm12, %vm2066_vm13 }
  0x28   : > { %7939 = vmatpush3.bf16.msra.mxu0 %v8492_v27  ;;  %7748 = vmatprep.subr.bf16.mxu1 %v8493_v36  ;;  %v362_v27 = vsel %vm8786_vm5, 0, %v361_v1  ;;  %v973_v48 = vld [vmem:[#allocation2 + $0xc] sm:$0xf] }
  0x29   : > { %7940 = vmatprep.subr.bf16.mxu0 %v8494_v39  ;;  %363 = vst [vmem:[#allocation2 + $0x2c] sm:$0x1] %v362_v27  ;;  %v567_v40 = vor.u32 %v565_v22, %v564_v31  ;;  %v2888_v50 = vld [vmem:[#allocation2 + $0xc] sm:$0xf]  ;;  %v1020_v56 = vld [vmem:[#allocation2 + $0x14] sm:$0x1]  ;;  %v585_v1 = vsel %vm8830_vm10, %v577_v45, %v584_v54 }
  0x2a   : > { %v1063_v57 = vshrl.u32 %v973_v48, 16  ;;  %v1066_v58 = vshll.u32 %v973_v48, 16  ;;  %v1082_v61 = vshll.u32 %v1020_v56, 16  ;;  %v2890_v63 = vld [vmem:[#allocation2 + $0x14] sm:$0x1]  ;;  %v2937_v11 = vshrl.u32 %v2888_v50, 16 }
  0x2b   : > { %7749 = vmatpush3.bf16.msra.mxu1 %v8493_v36  ;;  %v560_v36 = vrot.slane %v556_v25, 4  ;;  %876 = vst [vmem:[#allocation2 + $0x28] sm:$0xf] %v585_v1  ;;  %v2940_v12 = vshll.u32 %v2888_v50, 16  ;;  %v2956_v20 = vshll.u32 %v2890_v63, 16 }
  0x2c   : > { %7941 = vmatpush3.bf16.msra.mxu0 %v8494_v39  ;;  %7782 = vmatprep.subr.bf16.mxu1 %v8843_v6  ;;  %v1051_v39 = vsel %vm8847_vm11, %v1046_v30, %v8799_v28  ;;  %v974_v49 = vld [vmem:[#allocation2 + $0x10] sm:$0xf]  ;;  %v871_v28 = vsel %vm8778_vm3, %v569_v41, %v870_v32  ;;  %v1065_v4 = vrot.slane %v1063_v57, 4  ;;  %v1068_v5 = vrot.slane %v1066_v58, 5  ;;  %v2891_v30 = vld [vmem:[#allocation2 + $0x18] sm:$0xf] }
  0x2d   : > { %7974 = vmatprep.subr.bf16.mxu0 %v8837_v0  ;;  %v6755_v43 = vcombine.low %v1051_v39, %v1061_v24  ;;  %v568_v52 = vsel %vm8830_vm10, %v560_v36, %v567_v40  ;;  %v1072_v59 = vshll.u32 %v974_v49, 16  ;;  %v1076_v60 = vshrl.u32 %v974_v49, 16  ;;  %872 = vst [vmem:[#allocation2 + $0x20] sm:$0x1] %v871_v28  ;;  %v2889_v62 = vld [vmem:[#allocation2 + $0x10] sm:$0xf] }
  0x2e   : > { %869 = vst [vmem:[#allocation2 + $0x1c] sm:$0xf] %v568_v52  ;;  %v1084_v10 = vrot.slane %v1082_v61, 5  ;;  %v2946_v13 = vshll.u32 %v2889_v62, 16  ;;  %v1069_v16 = vor.u32 %v1068_v5, %v1065_v4  ;;  %v2950_v19 = vshrl.u32 %v2889_v62, 16 }
  0x2f   : > { %7750 = vmatprep.mubr.bf16.mxu1 %v6755_v43  ;;  %v1074_v7 = vrot.slane %v1072_v59, 5  ;;  %v1078_v8 = vrot.slane %v1076_v60, 4  ;;  %v2939_v21 = vrot.slane %v2937_v11, 4  ;;  %v2942_v22 = vrot.slane %v2940_v12, 5  ;;  %v975_v45 = vld [vmem:[#allocation2 + $0x18] sm:$0xf] }
  0x30   : > { %v2948_v23 = vrot.slane %v2946_v13, 5  ;;  %v586_v24 = vrot.slane %v8869_v42, 4  ;;  %v1070_v25 = vrot.slane %v1069_v16, 4  ;;  %v2952_v27 = vrot.slane %v2950_v19, 4  ;;  %v877_v52 = vld [vmem:[#allocation2 + $0x2c] sm:$0x1] }
  0x31   : > { %v1079_v17 = vor.u32 %v1078_v8, %v1074_v7  ;;  %v2958_v29 = vrot.slane %v2956_v20, 5  ;;  %v2943_v31 = vor.u32 %v2942_v22, %v2939_v21  ;;  %v2961_v34 = vshrl.u32 %v2891_v30, 16  ;;  %v8500_v8 = vld [vmem:[%s10738_s1 + $0x10] sm:$0xff]   ;;  %v2019_v14 = vld [vmem:[#allocation2 + $0x18] sm:$0xe] }
  0x32   : > { %v2964_v35 = vshll.u32 %v2891_v30, 16  ;;  %v874_v36 = vsel %vm8821_vm9, %v576_v53, %v873_v15  ;;  %v1075_v37 = vsel %vm8847_vm11, %v1070_v25, %v1074_v7  ;;  %v2953_v39 = vor.u32 %v2952_v27, %v2948_v23  ;;  %v978_v63 = vld [vmem:[#allocation2 + $0x28] sm:$0xf] }
  0x33   : > { %v1080_v26 = vrot.slane %v1079_v17, 4  ;;  %875 = vst [vmem:[#allocation2 + $0x24] sm:$0xf] %v874_v36  ;;  %v2944_v42 = vrot.slane %v2943_v31, 4  ;;  %v2963_v43 = vrot.slane %v2961_v34, 4  ;;  %v1087_v62 = vshrl.u32 %v975_v45, 16 }
  0x34   : > { %v8889_v33 = vld [vmem:[#allocation2 + $0x20] sm:$0x1]  ;;  %v2966_v44 = vrot.slane %v2964_v35, 5  ;;  %v2954_v47 = vrot.slane %v2953_v39, 4  ;;  %v1090_v7 = vshll.u32 %v975_v45, 16  ;;  %v878_v17 = vsel %vm8778_vm3, %v586_v24, %v877_v52 }
  0x35   : > { %v8887_v32 = vld [vmem:[#allocation2 + $0x1c] sm:$0xf]  ;;  %v1085_v38 = vsel %vm8847_vm11, %v1080_v26, %v1084_v10  ;;  %v2980_v50 = vshll.u32 %v8889_v33, 16  ;;  %v2949_v28 = vsel %vm8847_vm11, %v2944_v42, %v2948_v23  ;;  %v3718_v56 = vrot.slane %v8889_v33, 5  ;;  %v1021_v58 = vld [vmem:[#allocation2 + $0x20] sm:$0x1] }
  0x36   : > { %v2970_v40 = vshll.u32 %v8887_v32, 16  ;;  %v6756_v41 = vcombine.low %v1075_v37, %v1085_v38  ;;  %v2974_v49 = vshrl.u32 %v8887_v32, 16  ;;  %v2967_v53 = vor.u32 %v2966_v44, %v2963_v43  ;;  %v976_v57 = vld [vmem:[#allocation2 + $0x1c] sm:$0xf]  ;;  %879 = vst [vmem:[#allocation2 + $0x2c] sm:$0x1] %v878_v17 }
  0x37   : > { %v3715_v54 = vrot.slane %v8887_v32, 5  ;;  %v2959_v59 = vsel %vm8847_vm11, %v2954_v47, %v2958_v29  ;;  %v2982_v61 = vrot.slane %v2980_v50, 5  ;;  %v1089_v11 = vrot.slane %v1087_v62, 4  ;;  %v2895_v25 = vld [vmem:[#allocation2 + $0x28] sm:$0xf]  ;;  %v414_v47 = vld [vmem:[%s8774_s28 + $0x40] sm:$0xff] }
  0x38   : > { %v2972_v48 = vrot.slane %v2970_v40, 5  ;;  %7751 = vmatmul.mubr.bf16.vlgmr.msra.gmra.mrb[0].mxu1 %v6756_v41  ;;  %v2976_v60 = vrot.slane %v2974_v49, 4  ;;  %v8910_v1 = vcombine.low %v2949_v28, %v2959_v59  ;;  %v2968_v4 = vrot.slane %v2967_v53, 4  ;;  %v8497_v41 = vld [vmem:[%s10738_s1 + $0x148] sm:$0xff]   ;;  %v364_v59 = vld [vmem:[#allocation2 + $0x38] sm:$0x1] }
  0x39   : > { %7783 = vmatpush3.bf16.msra.mxu1 %v8843_v6  ;;  %v8914_v5 = vrot.slane %v3715_v54, 4  ;;  %v1096_v12 = vshll.u32 %v976_v57, 16  ;;  %v1100_v13 = vshrl.u32 %v976_v57, 16  ;;  %v1092_v15 = vrot.slane %v1090_v7, 5 }
  0x3a   : > { %7784 = vmatprep.subr.bf16.mxu1 %v8498_v46  ;;  %v2977_v10 = vor.u32 %v2976_v60, %v2972_v48  ;;  %7942 = vmatprep.mubr.bf16.mxu0 %v8910_v1  ;;  %v2973_v6 = vsel %vm8847_vm11, %v2968_v4, %v2972_v48  ;;  %v1106_v16 = vshll.u32 %v1021_v58, 16  ;;  %v977_v19 = vld [vmem:[#allocation2 + $0x24] sm:$0xf]  ;;  %v1120_v30 = vshll.u32 %v978_v63, 16  ;;  %v8499_v60 = vld [vmem:[%s10738_s1 + $0x150] sm:$0xff]  }
  0x3b   : > { %v1098_v21 = vrot.slane %v1096_v12, 5  ;;  %v1102_v22 = vrot.slane %v1100_v13, 4  ;;  %v1111_v23 = vshrl.u32 %v977_v19, 16  ;;  %v1093_v26 = vor.u32 %v1092_v15, %v1089_v11  ;;  %v2894_v31 = vld [vmem:[#allocation2 + $0x24] sm:$0xf] }
  0x3c   : > { %v2978_v20 = vrot.slane %v2977_v10, 4  ;;  %v1108_v27 = vrot.slane %v1106_v16, 5  ;;  %v1114_v29 = vshll.u32 %v977_v19, 16  ;;  %v1124_v36 = vshrl.u32 %v978_v63, 16  ;;  %v367_v15 = vld [vmem:[#allocation2 + $0x44] sm:$0x1] }
  0x3d   : > { %7785 = vmatpush3.bf16.msra.mxu1 %v8498_v46  ;;  %v1103_v35 = vor.u32 %v1102_v22, %v1098_v21  ;;  %v1113_v24 = vrot.slane %v1111_v23, 4  ;;  %v1094_v38 = vrot.slane %v1093_v26, 4  ;;  %v8928_v40 = vrot.slane %v1120_v30, 5  ;;  %v308_v46 = vld [vmem:[#allocation2 + $0x30] sm:$0x1] }
  0x3e   : > { %7786 = vmatprep.subr.bf16.mxu1 %v8500_v8  ;;  %v2983_v34 = vsel %vm8847_vm11, %v2978_v20, %v2982_v61  ;;  %v1116_v39 = vrot.slane %v1114_v29, 5  ;;  %v1126_v43 = vrot.slane %v1124_v36, 4  ;;  %v2985_v44 = vshrl.u32 %v2894_v31, 16  ;;  %v8502_v61 = vld [vmem:[%s10738_s1 + $0x18] sm:$0xff]   ;;  %v1022_v63 = vld [vmem:[#allocation2 + $0x2c] sm:$0x1] }
  0x3f   : > { %v8926_v37 = vcombine.low %v2973_v6, %v2983_v34  ;;  %v1104_v42 = vrot.slane %v1103_v35, 4  ;;  %v2988_v45 = vshll.u32 %v2894_v31, 16  ;;  %v1099_v48 = vsel %vm8847_vm11, %v1094_v38, %v1098_v21  ;;  %v311_v6 = vld [vmem:[#allocation2 + $0x3c] sm:$0x1]  ;;  %v415_v31 = vld [vmem:[%s8774_s28 + $0x48] sm:$0xff] }
  0x40   : > { %v1117_v49 = vor.u32 %v1116_v39, %v1113_v24  ;;  %v2994_v50 = vshll.u32 %v2895_v25, 16  ;;  %v2998_v52 = vshrl.u32 %v2895_v25, 16  ;;  %v1127_v53 = vor.u32 %v1126_v43, %v8928_v40  ;;  %v8501_v34 = vld [vmem:[%s10738_s1 + $0x158] sm:$0xff]  }
  0x41   : > { %7787 = vmatpush3.bf16.msra.mxu1 %v8500_v8  ;;  %7943 = vmatmul.mubr.bf16.vlgmr.msra.gmra.mrb[0].mxu0 %v8926_v37  ;;  %v1109_v28 = vsel %vm8847_vm11, %v1104_v42, %v1108_v27  ;;  %v2987_v57 = vrot.slane %v2985_v44, 4  ;;  %v2990_v58 = vrot.slane %v2988_v45, 5  ;;  %v8947_v8 = vpack.c.bf16 %v414_v47, %v414_v47  ;;  %v370_v47 = vld [vmem:[#allocation2 + $0x50] sm:$0x1] }
  0x42   : > { %7975 = vmatpush3.bf16.msra.mxu0 %v8837_v0  ;;  %v6757_v62 = vcombine.low %v1099_v48, %v1109_v28  ;;  %v1118_v4 = vrot.slane %v1117_v49, 4  ;;  %v2896_v0 = vld [vmem:[#allocation2 + $0x2c] sm:$0x1]  ;;  %v2996_v7 = vrot.slane %v2994_v50, 5  ;;  %v1128_v10 = vrot.slane %v1127_v53, 4  ;;  %7788 = vmatprep.subr.bf16.mxu1 %v8502_v61  ;;  %v416_v48 = vld [vmem:[%s8774_s28 + $0x50] sm:$0xff] }
  0x43   : > { %7976 = vmatprep.subr.bf16.mxu0 %v8497_v41  ;;  %v1130_v11 = vshll.u32 %v1022_v63, 16  ;;  %v2991_v12 = vor.u32 %v2990_v58, %v2987_v57  ;;  %v3000_v13 = vrot.slane %v2998_v52, 4  ;;  %v3004_v17 = vshll.u32 %v2896_v0, 16  ;;  %v417_v53 = vld [vmem:[%s8774_s28 + $0x58] sm:$0xff]  ;;  %v8503_v57 = vld [vmem:[%s10738_s1 + $0x160] sm:$0xff]  }
  0x44   : > { %7754 = vmatprep.mubr.bf16.mxu1 %v6757_v62  ;;  %v1123_v16 = vsel %vm8847_vm11, %v1118_v4, %v8928_v40  ;;  %v309_v19 = vsel %vm8778_vm3, 0, %v308_v46  ;;  %v365_v20 = vsel %vm8786_vm5, 0, %v364_v59  ;;  %v588_v25 = vshrl.u32 %v8882_v2, 16  ;;  %v418_v62 = vld [vmem:[%s8774_s28 + $0x60] sm:$0xff] }
  0x45   : > { %7789 = vmatpush3.bf16.msra.mxu1 %v8502_v61  ;;  %v1132_v21 = vrot.slane %v1130_v11, 5  ;;  %v2992_v22 = vrot.slane %v2991_v12, 4  ;;  %v3001_v23 = vor.u32 %v3000_v13, %v2996_v7  ;;  %310 = vst [vmem:[#allocation2 + $0x30] sm:$0x1] %v309_v19  ;;  %366 = vst [vmem:[#allocation2 + $0x38] sm:$0x1] %v365_v20  ;;  %v7217_v46 = vpack.c.bf16 %v415_v31, %v415_v31 }
  0x46   : > { %7977 = vmatpush3.bf16.msra.mxu0 %v8497_v41  ;;  %v3006_v26 = vrot.slane %v3004_v17, 5  ;;  %v591_v27 = vshll.u32 %v8882_v2, 16  ;;  %v596_v29 = vshrl.u32 %v8884_v3, 16  ;;  %v599_v30 = vshll.u32 %v8884_v3, 16  ;;  %v314_v2 = vld [vmem:[#allocation2 + $0x48] sm:$0x1] }
  0x47   : > { %7978 = vmatprep.subr.bf16.mxu0 %v8499_v60  ;;  %v1133_v35 = vsel %vm8847_vm11, %v1128_v10, %v1132_v21  ;;  %v2997_v24 = vsel %vm8847_vm11, %v2992_v22, %v2996_v7  ;;  %v3002_v36 = vrot.slane %v3001_v23, 4  ;;  %v590_v38 = vrot.slane %v588_v25, 7  ;;  %v8504_v3 = vld [vmem:[%s10738_s1 + $0x20] sm:$0xff]   ;;  %v419_v17 = vld [vmem:[%s8774_s28 + $0x68] sm:$0xff]  ;;  %v420_v31 = vld [vmem:[%s8774_s28 + $0x70] sm:$0xff] }
  0x48   : > { %v6758_v39 = vcombine.low %v1123_v16, %v1133_v35  ;;  %v598_v40 = vrot.slane %v596_v29, 7  ;;  %v312_v41 = vsel %vm8778_vm3, 0, %v311_v6  ;;  %v368_v42 = vsel %vm8786_vm5, 0, %v367_v15  ;;  %7790 = vmatprep.subr.bf16.mxu1 %v8504_v3  ;;  %v317_v15 = vld [vmem:[#allocation2 + $0x54] sm:$0x1]  ;;  %v8505_v23 = vld [vmem:[%s10738_s1 + $0x168] sm:$0xff]  }
  0x49   : > { %v3007_v43 = vsel %vm8847_vm11, %v3002_v36, %v3006_v26  ;;  %v593_v44 = vor.u32 %v591_v27, %v590_v38  ;;  %v594_v45 = vrot.slane %v590_v38, 4  ;;  %313 = vst [vmem:[#allocation2 + $0x3c] sm:$0x1] %v312_v41  ;;  %369 = vst [vmem:[#allocation2 + $0x44] sm:$0x1] %v368_v42  ;;  %v605_v28 = vshrl.u32 %v8947_v8, 16  ;;  %7791 = vmatpush3.bf16.msra.mxu1 %v8504_v3 }
  0x4a   : > { %7979 = vmatpush3.bf16.msra.mxu0 %v8499_v60  ;;  %7755 = vmatmul.mubr.bf16.gmra.mrb[4].mxu1 %v6758_v39  ;;  %v8978_v49 = vcombine.low %v2997_v24, %v3007_v43  ;;  %v601_v50 = vor.u32 %v599_v30, %v598_v40  ;;  %v603_v52 = vrot.slane %v598_v40, 4  ;;  %v608_v58 = vshll.u32 %v8947_v8, 16  ;;  %v373_v16 = vld [vmem:[#allocation2 + $0x5c] sm:$0x1]  ;;  %v8506_v25 = vld [vmem:[%s10738_s1 + $0x28] sm:$0xff]   ;;  %v422_v43 = vld [vmem:[%s8774_s28 + $0x80] sm:$0xff] }
  0x4b   : > { %7980 = vmatprep.subr.bf16.mxu0 %v8501_v34  ;;  %v613_v59 = vshrl.u32 %v7217_v46, 16  ;;  %v616_v61 = vshll.u32 %v7217_v46, 16  ;;  %v315_v60 = vsel %vm8778_vm3, 0, %v314_v2  ;;  %v607_v7 = vrot.slane %v605_v28, 7  ;;  %7792 = vmatprep.subr.bf16.mxu1 %v8506_v25  ;;  %v421_v42 = vld [vmem:[%s8774_s28 + $0x78] sm:$0xff] }
  0x4c   : > { %7946 = vmatprep.mubr.bf16.mxu0 %v8978_v49  ;;  %v602_v63 = vsel %vm8830_vm10, %v594_v45, %v601_v50  ;;  %v880_v4 = vld [vmem:[#allocation2 + $0x30] sm:$0xf]  ;;  %v884_v0 = vld [vmem:[#allocation2 + $0x38] sm:$0x1]  ;;  %316 = vst [vmem:[#allocation2 + $0x48] sm:$0x1] %v315_v60  ;;  %v7218_v10 = vpack.c.bf16 %v416_v48, %v416_v48  ;;  %v7219_v6 = vpack.c.bf16 %v417_v53, %v417_v53 }
  0x4d   : > { %v371_v8 = vsel %vm8786_vm5, 0, %v370_v47  ;;  %v881_v11 = vsel %vm8821_vm9, %v593_v44, %v880_v4  ;;  %883 = vst [vmem:[#allocation2 + $0x34] sm:$0xf] %v602_v63  ;;  %v885_v12 = vsel %vm8778_vm3, %v603_v52, %v884_v0  ;;  %v615_v13 = vrot.slane %v613_v59, 7  ;;  %7793 = vmatpush3.bf16.msra.mxu1 %v8506_v25  ;;  %v8507_v48 = vld [vmem:[%s10738_s1 + $0x170] sm:$0xff]  }
  0x4e   : > { %372 = vst [vmem:[#allocation2 + $0x50] sm:$0x1] %v371_v8  ;;  %7981 = vmatpush3.bf16.msra.mxu0 %v8501_v34  ;;  %882 = vst [vmem:[#allocation2 + $0x30] sm:$0xf] %v881_v11  ;;  %v610_v19 = vor.u32 %v608_v58, %v607_v7  ;;  %v611_v20 = vrot.slane %v607_v7, 4  ;;  %v622_v21 = vshrl.u32 %v7218_v10, 16  ;;  %v9008_v38 = vpack.c.bf16 %v418_v62, %v418_v62 }
  0x4f   : > { %886 = vst [vmem:[#allocation2 + $0x38] sm:$0x1] %v885_v12  ;;  %v625_v22 = vshll.u32 %v7218_v10, 16  ;;  %7982 = vmatprep.subr.bf16.mxu0 %v8503_v57  ;;  %v618_v26 = vor.u32 %v616_v61, %v615_v13  ;;  %v620_v27 = vrot.slane %v615_v13, 4  ;;  %v630_v29 = vshrl.u32 %v7219_v6, 16  ;;  %v423_v13 = vld [vmem:[%s8774_s28 + $0x88] sm:$0xff] }
  0x50   : > { %v633_v30 = vshll.u32 %v7219_v6, 16  ;;  %v887_v34 = vld [vmem:[#allocation2 + $0x3c] sm:$0xf]  ;;  %v891_v35 = vld [vmem:[#allocation2 + $0x44] sm:$0x1]  ;;  %v624_v24 = vrot.slane %v622_v21, 7  ;;  %v9010_v2 = vpack.c.bf16 %v419_v17, %v419_v17  ;;  %v9030_v62 = vpack.c.bf16 %v420_v31, %v420_v31 }
  0x51   : > { %v318_v36 = vsel %vm8778_vm3, 0, %v317_v15  ;;  %v619_v3 = vsel %vm8830_vm10, %v611_v20, %v618_v26  ;;  %v888_v39 = vsel %vm8821_vm9, %v610_v19, %v887_v34  ;;  %v892_v40 = vsel %vm8778_vm3, %v620_v27, %v891_v35 }
  0x52   : > { %v632_v41 = vrot.slane %v630_v29, 7  ;;  %319 = vst [vmem:[#allocation2 + $0x54] sm:$0x1] %v318_v36  ;;  %7983 = vmatpush3.bf16.msra.mxu0 %v8503_v57  ;;  %889 = vst [vmem:[#allocation2 + $0x3c] sm:$0xf] %v888_v39  ;;  %v627_v44 = vor.u32 %v625_v22, %v624_v24  ;;  %v628_v45 = vrot.slane %v624_v24, 4  ;;  %v9032_v63 = vpack.c.bf16 %v421_v42, %v421_v42 }
  0x53   : > { %890 = vst [vmem:[#allocation2 + $0x40] sm:$0xf] %v619_v3  ;;  %893 = vst [vmem:[#allocation2 + $0x44] sm:$0x1] %v892_v40  ;;  %v374_v46 = vsel %vm8786_vm5, 0, %v373_v16  ;;  %v639_v47 = vshrl.u32 %v9008_v38, 16  ;;  %7984 = vmatprep.subr.bf16.mxu0 %v8505_v23  ;;  %v9034_v4 = vpack.c.bf16 %v422_v43, %v422_v43  ;;  %v9041_v42 = vpack.c.bf16 %v423_v13, %v423_v13 }
  0x54   : > { %v635_v50 = vor.u32 %v633_v30, %v632_v41  ;;  %v637_v52 = vrot.slane %v632_v41, 4  ;;  %v894_v28 = vld [vmem:[#allocation2 + $0x48] sm:$0xf]  ;;  %375 = vst [vmem:[#allocation2 + $0x5c] sm:$0x1] %v374_v46  ;;  %v642_v53 = vshll.u32 %v9008_v38, 16 }
  0x55   : > { %v647_v57 = vshrl.u32 %v9010_v2, 16  ;;  %v2898_v58 = vld [vmem:[#allocation2 + $0x34] sm:$0xf]  ;;  %v895_v61 = vsel %vm8821_vm9, %v627_v44, %v894_v28  ;;  %v898_v60 = vld [vmem:[#allocation2 + $0x50] sm:$0x1] }
  0x56   : > { %v980_v59 = vld [vmem:[#allocation2 + $0x34] sm:$0xf]  ;;  %v2897_v0 = vld [vmem:[#allocation2 + $0x30] sm:$0xf]  ;;  %v2899_v7 = vld [vmem:[#allocation2 + $0x38] sm:$0x1]  ;;  %v636_v11 = vsel %vm8830_vm10, %v628_v45, %v635_v50  ;;  %v899_v12 = vsel %vm8778_vm3, %v637_v52, %v898_v60  ;;  %7985 = vmatpush3.bf16.msra.mxu0 %v8505_v23 }
  0x57   : > { %v3018_v8 = vshll.u32 %v2898_v58, 16  ;;  %v3022_v10 = vshrl.u32 %v2898_v58, 16  ;;  %896 = vst [vmem:[#allocation2 + $0x48] sm:$0xf] %v895_v61  ;;  %v3009_v6 = vshrl.u32 %v2897_v0, 16  ;;  %v3012_v15 = vshll.u32 %v2897_v0, 16  ;;  %7986 = vmatprep.subr.bf16.mxu0 %v8507_v48 }
  0x58   : > { %v3028_v16 = vshll.u32 %v2899_v7, 16  ;;  %v979_v17 = vld [vmem:[#allocation2 + $0x30] sm:$0xf]  ;;  %v1144_v19 = vshll.u32 %v980_v59, 16  ;;  %897 = vst [vmem:[#allocation2 + $0x4c] sm:$0xf] %v636_v11 }
  0x59   : > { %900 = vst [vmem:[#allocation2 + $0x50] sm:$0x1] %v899_v12  ;;  %v3020_v20 = vrot.slane %v3018_v8, 5  ;;  %v3024_v21 = vrot.slane %v3022_v10, 4  ;;  %v1023_v22 = vld [vmem:[#allocation2 + $0x38] sm:$0x1] }
  0x5a   : > { %v1135_v25 = vshrl.u32 %v979_v17, 16  ;;  %v1138_v26 = vshll.u32 %v979_v17, 16  ;;  %v3011_v27 = vrot.slane %v3009_v6, 4  ;;  %v3014_v29 = vrot.slane %v3012_v15, 5  ;;  %v981_v36 = vld [vmem:[#allocation2 + $0x3c] sm:$0xf]  ;;  %7987 = vmatpush3.bf16.msra.mxu0 %v8507_v48 }
  0x5b   : > { %v3030_v30 = vrot.slane %v3028_v16, 5  ;;  %v1146_v31 = vrot.slane %v1144_v19, 5  ;;  %v3025_v34 = vor.u32 %v3024_v21, %v3020_v20  ;;  %v1148_v24 = vshrl.u32 %v980_v59, 16  ;;  %v982_v40 = vld [vmem:[#allocation2 + $0x40] sm:$0xf]  ;;  %v8508_v52 = vld [vmem:[%s10738_s1 + $0x30] sm:$0xff]  }
  0x5c   : > { %v1137_v35 = vrot.slane %v1135_v25, 4  ;;  %v1140_v23 = vrot.slane %v1138_v26, 5  ;;  %v3015_v3 = vor.u32 %v3014_v29, %v3011_v27  ;;  %v1154_v39 = vshll.u32 %v1023_v22, 16  ;;  %v1024_v46 = vld [vmem:[#allocation2 + $0x44] sm:$0x1]  ;;  %7794 = vmatprep.subr.bf16.mxu1 %v8508_v52 }
  0x5d   : > { %v1159_v41 = vshrl.u32 %v981_v36, 16  ;;  %v3026_v43 = vrot.slane %v3025_v34, 4  ;;  %v1150_v45 = vrot.slane %v1148_v24, 4  ;;  %v1162_v50 = vshll.u32 %v981_v36, 16  ;;  %v2900_v8 = vld [vmem:[#allocation2 + $0x3c] sm:$0xf]  ;;  %7795 = vmatpush3.bf16.msra.mxu1 %v8508_v52 }
  0x5e   : > { %v1141_v44 = vor.u32 %v1140_v23, %v1137_v35  ;;  %v3016_v28 = vrot.slane %v3015_v3, 4  ;;  %v1156_v58 = vrot.slane %v1154_v39, 5  ;;  %v1168_v61 = vshll.u32 %v982_v40, 16  ;;  %v2901_v6 = vld [vmem:[#allocation2 + $0x40] sm:$0xf] }
  0x5f   : > { %v1161_v59 = vrot.slane %v1159_v41, 4  ;;  %v3031_v48 = vsel %vm8847_vm11, %v3026_v43, %v3030_v30  ;;  %v1151_v0 = vor.u32 %v1150_v45, %v1146_v31  ;;  %v1164_v7 = vrot.slane %v1162_v50, 5  ;;  %v2902_v25 = vld [vmem:[#allocation2 + $0x44] sm:$0x1]  ;;  %v2903_v35 = vld [vmem:[#allocation2 + $0x48] sm:$0xf] }
  0x60   : > { %v1142_v60 = vrot.slane %v1141_v44, 4  ;;  %v3021_v10 = vsel %vm8847_vm11, %v3016_v28, %v3020_v20  ;;  %v1170_v11 = vrot.slane %v1168_v61, 5  ;;  %v1172_v12 = vshrl.u32 %v982_v40, 16  ;;  %v2904_v3 = vld [vmem:[#allocation2 + $0x4c] sm:$0xf] }
  0x61   : > { %v1178_v13 = vshll.u32 %v1024_v46, 16  ;;  %v9050_v15 = vcombine.low %v3021_v10, %v3031_v48  ;;  %v1152_v17 = vrot.slane %v1151_v0, 4  ;;  %v1165_v19 = vor.u32 %v1164_v7, %v1161_v59  ;;  %v2905_v44 = vld [vmem:[#allocation2 + $0x50] sm:$0x1]  ;;  %v983_v28 = vld [vmem:[#allocation2 + $0x48] sm:$0xf] }
  0x62   : > { %v1147_v16 = vsel %vm8847_vm11, %v1142_v60, %v1146_v31  ;;  %v1174_v21 = vrot.slane %v1172_v12, 4  ;;  %v3033_v26 = vshrl.u32 %v2900_v8, 16  ;;  %v3036_v27 = vshll.u32 %v2900_v8, 16  ;;  %v984_v60 = vld [vmem:[#allocation2 + $0x4c] sm:$0xf] }
  0x63   : > { %10787 = vst [vmem:[#allocation3_spill] sm:$0xff] %v9050_v15  ;;  %v1180_v22 = vrot.slane %v1178_v13, 5  ;;  %7947 = vmatmul.mubr.bf16.gmra.mrb[4].mxu0 %v9050_v15  ;;  %v1157_v20 = vsel %vm8847_vm11, %v1152_v17, %v1156_v58  ;;  %v1166_v29 = vrot.slane %v1165_v19, 4  ;;  %v3042_v30 = vshll.u32 %v2901_v6, 16 }
  0x64   : > { %v3046_v34 = vshrl.u32 %v2901_v6, 16  ;;  %v6759_v23 = vcombine.low %v1147_v16, %v1157_v20  ;;  %v1175_v24 = vor.u32 %v1174_v21, %v1170_v11  ;;  %v3035_v36 = vrot.slane %v3033_v26, 4  ;;  %v1025_v21 = vld [vmem:[#allocation2 + $0x50] sm:$0x1] }
  0x65   : > { %v3038_v31 = vrot.slane %v3036_v27, 5  ;;  %v1171_v39 = vsel %vm8847_vm11, %v1166_v29, %v1170_v11  ;;  %v3044_v40 = vrot.slane %v3042_v30, 5  ;;  %v3052_v43 = vshll.u32 %v2902_v25, 16 }
  0x66   : > { %v3048_v41 = vrot.slane %v3046_v34, 4  ;;  %7758 = vmatprep.mubr.bf16.mxu1 %v6759_v23  ;;  %v1176_v45 = vrot.slane %v1175_v24, 4  ;;  %v3057_v50 = vshrl.u32 %v2903_v35, 16  ;;  %v3060_v52 = vshll.u32 %v2903_v35, 16 }
  0x67   : > { %v3039_v46 = vor.u32 %v3038_v31, %v3035_v36  ;;  %v3054_v59 = vrot.slane %v3052_v43, 5  ;;  %v3066_v61 = vshll.u32 %v2904_v3, 16  ;;  %v3070_v48 = vshrl.u32 %v2904_v3, 16  ;;  %v901_v3 = vld [vmem:[#allocation2 + $0x54] sm:$0xf] }
  0x68   : > { %v3049_v58 = vor.u32 %v3048_v41, %v3044_v40  ;;  %v1181_v0 = vsel %vm8847_vm11, %v1176_v45, %v1180_v22  ;;  %v3059_v8 = vrot.slane %v3057_v50, 4  ;;  %v3062_v10 = vrot.slane %v3060_v52, 5  ;;  %v8509_v41 = vld [vmem:[%s10738_s1 + $0x178] sm:$0xff]  }
  0x69   : > { %v3040_v7 = vrot.slane %v3039_v46, 4  ;;  %v6760_v11 = vcombine.low %v1171_v39, %v1181_v0  ;;  %v3068_v13 = vrot.slane %v3066_v61, 5  ;;  %v3072_v6 = vrot.slane %v3070_v48, 4  ;;  %v320_v39 = vld [vmem:[#allocation2 + $0x60] sm:$0x1]  ;;  %7988 = vmatprep.subr.bf16.mxu0 %v8509_v41 }
  0x6a   : > { %v3050_v12 = vrot.slane %v3049_v58, 4  ;;  %v3063_v17 = vor.u32 %v3062_v10, %v3059_v8  ;;  %v3076_v19 = vshll.u32 %v2905_v44, 16  ;;  %v1183_v25 = vshrl.u32 %v983_v28, 16  ;;  %v905_v50 = vld [vmem:[#allocation2 + $0x5c] sm:$0x1]  ;;  %7989 = vmatpush3.bf16.msra.mxu0 %v8509_v41 }
  0x6b   : > { %v3045_v16 = vsel %vm8847_vm11, %v3040_v7, %v3044_v40  ;;  %7759 = vmatmul.mubr.bf16.gmra.mrb[8].mxu1 %v6760_v11  ;;  %v3073_v27 = vor.u32 %v3072_v6, %v3068_v13  ;;  %v1186_v22 = vshll.u32 %v983_v28, 16  ;;  %v1192_v20 = vshll.u32 %v984_v60, 16  ;;  %v376_v40 = vld [vmem:[#allocation2 + $0x68] sm:$0x1]  ;;  %v379_v7 = vld [vmem:[#allocation2 + $0x74] sm:$0x1] }
  0x6c   : > { %v3055_v26 = vsel %vm8847_vm11, %v3050_v12, %v3054_v59  ;;  %v3064_v30 = vrot.slane %v3063_v17, 4  ;;  %v3078_v34 = vrot.slane %v3076_v19, 5  ;;  %v1185_v35 = vrot.slane %v1183_v25, 4  ;;  %v326_v19 = vld [vmem:[#allocation2 + $0x78] sm:$0x1] }
  0x6d   : > { %v9065_v29 = vcombine.low %v3045_v16, %v3055_v26  ;;  %v3074_v23 = vrot.slane %v3073_v27, 4  ;;  %v1188_v24 = vrot.slane %v1186_v22, 5  ;;  %v1194_v36 = vrot.slane %v1192_v20, 5 }
  0x6e   : > { %v1196_v31 = vshrl.u32 %v984_v60, 16  ;;  %v3069_v43 = vsel %vm8847_vm11, %v3064_v30, %v3068_v13  ;;  %v1202_v44 = vshll.u32 %v1025_v21, 16  ;;  %v641_v45 = vrot.slane %v639_v47, 7  ;;  %v323_v47 = vld [vmem:[#allocation2 + $0x6c] sm:$0x1] }
  0x6f   : > { %10788 = vst [vmem:[#allocation4_spill] sm:$0xff] %v9065_v29  ;;  %7950 = vmatprep.mubr.bf16.mxu0 %v9065_v29  ;;  %v649_v46 = vrot.slane %v647_v57, 7  ;;  %v3079_v52 = vsel %vm8847_vm11, %v3074_v23, %v3078_v34  ;;  %v1189_v28 = vor.u32 %v1188_v24, %v1185_v35  ;;  %v650_v59 = vshll.u32 %v9010_v2, 16  ;;  %v382_v21 = vld [vmem:[#allocation2 + $0x80] sm:$0x1]  ;;  %v424_v23 = vld [vmem:[%s8774_s28 + $0x90] sm:$0xff] }
  0x70   : > { %v1198_v58 = vrot.slane %v1196_v31, 4  ;;  %v9080_v61 = vcombine.low %v3069_v43, %v3079_v52  ;;  %v1204_v48 = vrot.slane %v1202_v44, 5  ;;  %v644_v60 = vor.u32 %v642_v53, %v641_v45 }
  0x71   : > { %v645_v0 = vrot.slane %v641_v45, 4  ;;  %v1190_v57 = vrot.slane %v1189_v28, 4  ;;  %v652_v10 = vor.u32 %v650_v59, %v649_v46  ;;  %v654_v11 = vrot.slane %v649_v46, 4  ;;  %v427_v45 = vld [vmem:[%s8774_s28 + $0xa8] sm:$0xff]  ;;  %v8513_v46 = vld [vmem:[%s10738_s1 + $0x180] sm:$0xff]  }
  0x72   : > { %10789 = vst [vmem:[#allocation5_spill] sm:$0xff] %v9080_v61  ;;  %v1199_v8 = vor.u32 %v1198_v58, %v1194_v36  ;;  %7951 = vmatmul.mubr.bf16.gmra.mrb[8].mxu0 %v9080_v61  ;;  %v902_v2 = vsel %vm8821_vm9, %v644_v60, %v901_v3  ;;  %v321_v12 = vsel %vm8778_vm3, 0, %v320_v39  ;;  %v377_v38 = vsel %vm8786_vm5, 0, %v376_v40  ;;  %v426_v3 = vld [vmem:[%s8774_s28 + $0xa0] sm:$0xff]  ;;  %v8510_v39 = vld [vmem:[%s10738_s1 + $0x38] sm:$0xff]   ;;  %8022 = vmatprep.subr.bf16.mxu0 %v8513_v46 }
  0x73   : > { %v656_v53 = vshrl.u32 %v9030_v62, 16  ;;  %v1195_v13 = vsel %vm8847_vm11, %v1190_v57, %v1194_v36  ;;  %v653_v16 = vsel %vm8830_vm10, %v645_v0, %v652_v10  ;;  %903 = vst [vmem:[#allocation2 + $0x54] sm:$0xf] %v902_v2  ;;  %v906_v17 = vsel %vm8778_vm3, %v654_v11, %v905_v50  ;;  %322 = vst [vmem:[#allocation2 + $0x60] sm:$0x1] %v321_v12 }
  0x74   : > { %v1200_v6 = vrot.slane %v1199_v8, 4  ;;  %378 = vst [vmem:[#allocation2 + $0x68] sm:$0x1] %v377_v38  ;;  %904 = vst [vmem:[#allocation2 + $0x58] sm:$0xf] %v653_v16  ;;  %v659_v26 = vshll.u32 %v9030_v62, 16  ;;  %7796 = vmatprep.subr.bf16.mxu1 %v8510_v39  ;;  %v9139_v8 = vpack.c.bf16 %v426_v3, %v426_v3  ;;  %v9141_v10 = vpack.c.bf16 %v427_v45, %v427_v45 }
  0x75   : > { %907 = vst [vmem:[#allocation2 + $0x5c] sm:$0x1] %v906_v17  ;;  %v658_v25 = vrot.slane %v656_v53, 7  ;;  %v664_v27 = vshrl.u32 %v9032_v63, 16  ;;  %v667_v22 = vshll.u32 %v9032_v63, 16  ;;  %v324_v30 = vsel %vm8778_vm3, 0, %v323_v47  ;;  %7797 = vmatpush3.bf16.msra.mxu1 %v8510_v39 }
  0x76   : > { %v1205_v20 = vsel %vm8847_vm11, %v1200_v6, %v1204_v48  ;;  %v380_v34 = vsel %vm8786_vm5, 0, %v379_v7  ;;  %v673_v35 = vshrl.u32 %v9034_v4, 16  ;;  %325 = vst [vmem:[#allocation2 + $0x6c] sm:$0x1] %v324_v30  ;;  %v425_v63 = vld [vmem:[%s8774_s28 + $0x98] sm:$0xff]  ;;  %v676_v41 = vshll.u32 %v9034_v4, 16 }
  0x77   : > { %v6761_v24 = vcombine.low %v1195_v13, %v1205_v20  ;;  %v661_v36 = vor.u32 %v659_v26, %v658_v25  ;;  %v662_v62 = vrot.slane %v658_v25, 4  ;;  %v9109_v31 = vrot.slane %v664_v27, 7  ;;  %381 = vst [vmem:[#allocation2 + $0x74] sm:$0x1] %v380_v34  ;;  %v428_v30 = vld [vmem:[%s8774_s28 + $0xb0] sm:$0xff] }
  0x78   : > { %v675_v40 = vrot.slane %v673_v35, 7  ;;  %v681_v43 = vshrl.u32 %v9041_v42, 16  ;;  %v684_v44 = vshll.u32 %v9041_v42, 16  ;;  %v327_v28 = vsel %vm8778_vm3, 0, %v326_v19 }
  0x79   : > { %7762 = vmatprep.mubr.bf16.mxu1 %v6761_v24  ;;  %v669_v50 = vor.u32 %v667_v22, %v9109_v31  ;;  %v671_v52 = vrot.slane %v9109_v31, 4  ;;  %v383_v4 = vsel %vm8786_vm5, 0, %v382_v21  ;;  %328 = vst [vmem:[#allocation2 + $0x78] sm:$0x1] %v327_v28  ;;  %v9133_v48 = vpack.c.bf16 %v424_v23, %v424_v23 }
  0x7a   : > { %v9129_v58 = vor.u32 %v676_v41, %v675_v40  ;;  %v679_v42 = vrot.slane %v675_v40, 4  ;;  %v9131_v59 = vrot.slane %v681_v43, 7  ;;  %384 = vst [vmem:[#allocation2 + $0x80] sm:$0x1] %v383_v4  ;;  %v985_v60 = vld [vmem:[#allocation2 + $0x54] sm:$0xf]  ;;  %v9137_v57 = vpack.c.bf16 %v425_v63, %v425_v63 }
  0x7b   : > { %v2906_v0 = vld [vmem:[#allocation2 + $0x54] sm:$0xf]  ;;  %v670_v47 = vsel %vm8830_vm10, %v662_v62, %v669_v50  ;;  %v908_v7 = vld [vmem:[#allocation2 + $0x60] sm:$0xf]  ;;  %v986_v11 = vld [vmem:[#allocation2 + $0x58] sm:$0xf] }
  0x7c   : > { %v1026_v2 = vld [vmem:[#allocation2 + $0x5c] sm:$0x1]  ;;  %v1207_v12 = vshrl.u32 %v985_v60, 16  ;;  %v1210_v38 = vshll.u32 %v985_v60, 16  ;;  %v909_v53 = vsel %vm8821_vm9, %v661_v36, %v908_v7  ;;  %911 = vst [vmem:[#allocation2 + $0x64] sm:$0xf] %v670_v47  ;;  %v686_v13 = vor.u32 %v684_v44, %v9131_v59 }
  0x7d   : > { %v1216_v6 = vshll.u32 %v986_v11, 16  ;;  %v1220_v16 = vshrl.u32 %v986_v11, 16  ;;  %v1226_v17 = vshll.u32 %v1026_v2, 16  ;;  %v2907_v19 = vld [vmem:[#allocation2 + $0x58] sm:$0xf]  ;;  %v3081_v21 = vshrl.u32 %v2906_v0, 16 }
  0x7e   : > { %910 = vst [vmem:[#allocation2 + $0x60] sm:$0xf] %v909_v53  ;;  %v1209_v25 = vrot.slane %v1207_v12, 4  ;;  %v1212_v26 = vrot.slane %v1210_v38, 5  ;;  %v2908_v27 = vld [vmem:[#allocation2 + $0x5c] sm:$0x1]  ;;  %v687_v45 = vsel %vm8830_vm10, %v679_v42, %v686_v13  ;;  %v9158_v11 = vpack.c.bf16 %v428_v30, %v428_v30 }
  0x7f   : > { %v3084_v22 = vshll.u32 %v2906_v0, 16  ;;  %v3090_v20 = vshll.u32 %v2907_v19, 16  ;;  %v1218_v34 = vrot.slane %v1216_v6, 5  ;;  %v1222_v35 = vrot.slane %v1220_v16, 4  ;;  %v912_v36 = vld [vmem:[#allocation2 + $0x68] sm:$0x1] }
  0x80   : > { %v1228_v23 = vrot.slane %v1226_v17, 5  ;;  %v3083_v24 = vrot.slane %v3081_v21, 4  ;;  %v1213_v62 = vor.u32 %v1212_v26, %v1209_v25  ;;  %v3094_v3 = vshrl.u32 %v2907_v19, 16  ;;  %v915_v39 = vld [vmem:[#allocation2 + $0x6c] sm:$0xf]  ;;  %v8514_v40 = vld [vmem:[%s10738_s1 + $0x80] sm:$0xff]  }
  0x81   : > { %v3086_v31 = vrot.slane %v3084_v22, 5  ;;  %v3092_v63 = vrot.slane %v3090_v20, 5  ;;  %v1223_v41 = vor.u32 %v1222_v35, %v1218_v34  ;;  %v3100_v43 = vshll.u32 %v2908_v27, 16  ;;  %918 = vst [vmem:[#allocation2 + $0x70] sm:$0xf] %v687_v45  ;;  %7830 = vmatprep.subr.bf16.mxu1 %v8514_v40 }
  0x82   : > { %v913_v44 = vsel %vm8778_vm3, %v671_v52, %v912_v36  ;;  %v1214_v46 = vrot.slane %v1213_v62, 4  ;;  %v3096_v28 = vrot.slane %v3094_v3, 4  ;;  %v688_v4 = vrot.slane %v9131_v59, 4 }
  0x83   : > { %v3087_v50 = vor.u32 %v3086_v31, %v3083_v24  ;;  %914 = vst [vmem:[#allocation2 + $0x68] sm:$0x1] %v913_v44  ;;  %v1224_v60 = vrot.slane %v1223_v41, 4  ;;  %v3102_v0 = vrot.slane %v3100_v43, 5  ;;  %v2910_v47 = vld [vmem:[#allocation2 + $0x64] sm:$0xf]  ;;  %v916_v7 = vsel %vm8821_vm9, %v9129_v58, %v915_v39 }
  0x84   : > { %v1219_v52 = vsel %vm8847_vm11, %v1214_v46, %v1218_v34  ;;  %v3097_v2 = vor.u32 %v3096_v28, %v3092_v63  ;;  %v3114_v38 = vshll.u32 %v2910_v47, 16  ;;  %917 = vst [vmem:[#allocation2 + $0x6c] sm:$0xf] %v916_v7  ;;  %v3118_v16 = vshrl.u32 %v2910_v47, 16  ;;  %v988_v17 = vld [vmem:[#allocation2 + $0x64] sm:$0xf] }
  0x85   : > { %v3088_v42 = vrot.slane %v3087_v50, 4  ;;  %v2909_v12 = vld [vmem:[#allocation2 + $0x60] sm:$0xf]  ;;  %v1229_v59 = vsel %vm8847_vm11, %v1224_v60, %v1228_v23  ;;  %v1240_v35 = vshll.u32 %v988_v17, 16  ;;  %v1244_v23 = vshrl.u32 %v988_v17, 16 }
  0x86   : > { %v987_v53 = vld [vmem:[#allocation2 + $0x60] sm:$0xf]  ;;  %v3105_v13 = vshrl.u32 %v2909_v12, 16  ;;  %v3108_v6 = vshll.u32 %v2909_v12, 16  ;;  %v6762_v19 = vcombine.low %v1219_v52, %v1229_v59  ;;  %v3098_v21 = vrot.slane %v3097_v2, 4 }
  0x87   : > { %v3093_v58 = vsel %vm8847_vm11, %v3088_v42, %v3092_v63  ;;  %v3116_v25 = vrot.slane %v3114_v38, 5  ;;  %v3120_v22 = vrot.slane %v3118_v16, 4  ;;  %v1231_v20 = vshrl.u32 %v987_v53, 16  ;;  %v919_v24 = vld [vmem:[#allocation2 + $0x74] sm:$0x1] }
  0x88   : > { %v3107_v26 = vrot.slane %v3105_v13, 4  ;;  %v3110_v27 = vrot.slane %v3108_v6, 5  ;;  %7763 = vmatmul.mubr.bf16.gmra.mrb[12].mxu1 %v6762_v19  ;;  %v3103_v30 = vsel %vm8847_vm11, %v3098_v21, %v3102_v0  ;;  %v1234_v34 = vshll.u32 %v987_v53, 16  ;;  %v990_v45 = vld [vmem:[#allocation2 + $0x70] sm:$0xf] }
  0x89   : > { %v9168_v36 = vcombine.low %v3093_v58, %v3103_v30  ;;  %v3121_v3 = vor.u32 %v3120_v22, %v3116_v25  ;;  %v1233_v39 = vrot.slane %v1231_v20, 4  ;;  %v1242_v43 = vrot.slane %v1240_v35, 5  ;;  %v2913_v13 = vld [vmem:[#allocation2 + $0x70] sm:$0xf]  ;;  %v429_v30 = vld [vmem:[%s8774_s28 + $0xb8] sm:$0xff] }
  0x8a   : > { %v2911_v62 = vld [vmem:[#allocation2 + $0x68] sm:$0x1]  ;;  %v3111_v31 = vor.u32 %v3110_v27, %v3107_v26  ;;  %v1236_v41 = vrot.slane %v1234_v34, 5  ;;  %v1246_v44 = vrot.slane %v1244_v23, 4  ;;  %v920_v60 = vsel %vm8778_vm3, %v688_v4, %v919_v24 }
  0x8b   : > { %10790 = vst [vmem:[#allocation6_spill] sm:$0xff] %v9168_v36  ;;  %v1027_v63 = vld [vmem:[#allocation2 + $0x68] sm:$0x1]  ;;  %v3124_v40 = vshll.u32 %v2911_v62, 16  ;;  %7954 = vmatprep.mubr.bf16.mxu0 %v9168_v36  ;;  %v3122_v50 = vrot.slane %v3121_v3, 4  ;;  %v1264_v59 = vshll.u32 %v990_v45, 16 }
  0x8c   : > { %v3112_v46 = vrot.slane %v3111_v31, 4  ;;  %v1250_v28 = vshll.u32 %v1027_v63, 16  ;;  %v989_v0 = vld [vmem:[#allocation2 + $0x6c] sm:$0xf]  ;;  %v1237_v7 = vor.u32 %v1236_v41, %v1233_v39  ;;  %v1247_v52 = vor.u32 %v1246_v44, %v1242_v43  ;;  %921 = vst [vmem:[#allocation2 + $0x74] sm:$0x1] %v920_v60 }
  0x8d   : > { %v3126_v47 = vrot.slane %v3124_v40, 5  ;;  %v1255_v42 = vshrl.u32 %v989_v0, 16  ;;  %v2912_v2 = vld [vmem:[#allocation2 + $0x6c] sm:$0xf]  ;;  %v1258_v53 = vshll.u32 %v989_v0, 16  ;;  %v1266_v21 = vrot.slane %v1264_v59, 5 }
  0x8e   : > { %v3117_v12 = vsel %vm8847_vm11, %v3112_v46, %v3116_v25  ;;  %v1252_v38 = vrot.slane %v1250_v28, 5  ;;  %v1238_v16 = vrot.slane %v1237_v7, 4  ;;  %v1248_v4 = vrot.slane %v1247_v52, 4  ;;  %v385_v7 = vld [vmem:[#allocation2 + $0x8c] sm:$0x1] }
  0x8f   : > { %v3127_v6 = vsel %vm8847_vm11, %v3122_v50, %v3126_v47  ;;  %v1257_v17 = vrot.slane %v1255_v42, 4  ;;  %v1260_v58 = vrot.slane %v1258_v53, 5  ;;  %v1268_v26 = vshrl.u32 %v990_v45, 16  ;;  %v329_v45 = vld [vmem:[#allocation2 + $0x84] sm:$0x1] }
  0x90   : > { %v9177_v19 = vcombine.low %v3117_v12, %v3127_v6  ;;  %v1243_v27 = vsel %vm8847_vm11, %v1238_v16, %v1242_v43  ;;  %v1253_v25 = vsel %vm8847_vm11, %v1248_v4, %v1252_v38  ;;  %v3129_v22 = vshrl.u32 %v2912_v2, 16  ;;  %v922_v47 = vld [vmem:[#allocation2 + $0x78] sm:$0xf] }
  0x91   : > { %v3132_v20 = vshll.u32 %v2912_v2, 16  ;;  %v6763_v34 = vcombine.low %v1243_v27, %v1253_v25  ;;  %v1261_v35 = vor.u32 %v1260_v58, %v1257_v17  ;;  %v1270_v23 = vrot.slane %v1268_v26, 4  ;;  %v332_v58 = vld [vmem:[#allocation2 + $0x90] sm:$0x1]  ;;  %v388_v26 = vld [vmem:[#allocation2 + $0x98] sm:$0x1] }
  0x92   : > { %10791 = vst [vmem:[#allocation7_spill] sm:$0xff] %v9177_v19  ;;  %7955 = vmatmul.mubr.bf16.gmra.mrb[12].mxu0 %v9177_v19  ;;  %v3138_v24 = vshll.u32 %v2913_v13, 16  ;;  %v3131_v62 = vrot.slane %v3129_v22, 4  ;;  %v3142_v3 = vshrl.u32 %v2913_v13, 16  ;;  %v690_v63 = vshrl.u32 %v9133_v48, 16 }
  0x93   : > { %v3134_v31 = vrot.slane %v3132_v20, 5  ;;  %7766 = vmatprep.mubr.bf16.mxu1 %v6763_v34  ;;  %v1028_v39 = vld [vmem:[#allocation2 + $0x74] sm:$0x1]  ;;  %v1262_v40 = vrot.slane %v1261_v35, 4  ;;  %v1271_v41 = vor.u32 %v1270_v23, %v1266_v21  ;;  %v9186_v46 = vpack.c.bf16 %v429_v30, %v429_v30 }
  0x94   : > { %v2914_v43 = vld [vmem:[#allocation2 + $0x74] sm:$0x1]  ;;  %v3140_v44 = vrot.slane %v3138_v24, 5  ;;  %v1274_v50 = vshll.u32 %v1028_v39, 16  ;;  %v3144_v60 = vrot.slane %v3142_v3, 4  ;;  %v692_v2 = vrot.slane %v690_v63, 7 }
  0x95   : > { %v3135_v28 = vor.u32 %v3134_v31, %v3131_v62  ;;  %v3148_v0 = vshll.u32 %v2914_v43, 16  ;;  %v1267_v52 = vsel %vm8847_vm11, %v1262_v40, %v1266_v21  ;;  %v1272_v42 = vrot.slane %v1271_v41, 4  ;;  %v335_v31 = vld [vmem:[#allocation2 + $0x9c] sm:$0x1]  ;;  %v391_v41 = vld [vmem:[#allocation2 + $0xa4] sm:$0x1] }
  0x96   : > { %v693_v12 = vshll.u32 %v9133_v48, 16  ;;  %v1276_v38 = vrot.slane %v1274_v50, 5  ;;  %v3145_v59 = vor.u32 %v3144_v60, %v3140_v44  ;;  %v696_v16 = vrot.slane %v692_v2, 4  ;;  %v926_v48 = vld [vmem:[#allocation2 + $0x80] sm:$0x1]  ;;  %v432_v60 = vld [vmem:[%s8774_s28 + $0xd0] sm:$0xff] }
  0x97   : > { %v3136_v53 = vrot.slane %v3135_v28, 4  ;;  %v3150_v13 = vrot.slane %v3148_v0, 5  ;;  %v698_v4 = vshrl.u32 %v9137_v57, 16  ;;  %v701_v17 = vshll.u32 %v9137_v57, 16  ;;  %v430_v43 = vld [vmem:[%s8774_s28 + $0xc0] sm:$0xff]  ;;  %v433_v0 = vld [vmem:[%s8774_s28 + $0xd8] sm:$0xff] }
  0x98   : > { %v695_v6 = vor.u32 %v693_v12, %v692_v2  ;;  %v1277_v27 = vsel %vm8847_vm11, %v1272_v42, %v1276_v38  ;;  %v3146_v25 = vrot.slane %v3145_v59, 4  ;;  %v330_v22 = vsel %vm8778_vm3, 0, %v329_v45 }
  0x99   : > { %v3141_v21 = vsel %vm8847_vm11, %v3136_v53, %v3140_v44  ;;  %v6764_v20 = vcombine.low %v1267_v52, %v1277_v27  ;;  %v700_v30 = vrot.slane %v698_v4, 7  ;;  %331 = vst [vmem:[#allocation2 + $0x84] sm:$0x1] %v330_v22  ;;  %v386_v57 = vsel %vm8786_vm5, 0, %v385_v7  ;;  %v431_v44 = vld [vmem:[%s8774_s28 + $0xc8] sm:$0xff] }
  0x9a   : > { %v923_v34 = vsel %vm8821_vm9, %v695_v6, %v922_v47  ;;  %v3151_v35 = vsel %vm8847_vm11, %v3146_v25, %v3150_v13  ;;  %387 = vst [vmem:[#allocation2 + $0x8c] sm:$0x1] %v386_v57  ;;  %v707_v23 = vshrl.u32 %v9139_v8, 16  ;;  %v710_v24 = vshll.u32 %v9139_v8, 16 }
  0x9b   : > { %924 = vst [vmem:[#allocation2 + $0x78] sm:$0xf] %v923_v34  ;;  %v715_v62 = vshrl.u32 %v9141_v10, 16  ;;  %7767 = vmatmul.mubr.bf16.gmra.mrb[16].mxu1 %v6764_v20  ;;  %v9208_v3 = vcombine.low %v3141_v21, %v3151_v35  ;;  %v703_v63 = vor.u32 %v701_v17, %v700_v30  ;;  %v705_v39 = vrot.slane %v700_v30, 4  ;;  %v434_v35 = vld [vmem:[%s8774_s28 + $0xe0] sm:$0xff] }
  0x9c   : > { %v718_v40 = vshll.u32 %v9141_v10, 16  ;;  %v709_v45 = vrot.slane %v707_v23, 7  ;;  %v333_v28 = vsel %vm8778_vm3, 0, %v332_v58  ;;  %v389_v8 = vsel %vm8786_vm5, 0, %v388_v26  ;;  %v435_v23 = vld [vmem:[%s8774_s28 + $0xe8] sm:$0xff] }
  0x9d   : > { %10792 = vst [vmem:[#allocation8_spill] sm:$0xff] %v9208_v3  ;;  %v717_v50 = vrot.slane %v715_v62, 7  ;;  %7958 = vmatprep.mubr.bf16.mxu0 %v9208_v3  ;;  %v704_v47 = vsel %vm8830_vm10, %v696_v16, %v703_v63  ;;  %v927_v10 = vsel %vm8778_vm3, %v705_v39, %v926_v48  ;;  %334 = vst [vmem:[#allocation2 + $0x90] sm:$0x1] %v333_v28  ;;  %v724_v7 = vshrl.u32 %v9158_v11, 16 }
  0x9e   : > { %390 = vst [vmem:[#allocation2 + $0x98] sm:$0x1] %v389_v8  ;;  %v727_v52 = vshll.u32 %v9158_v11, 16  ;;  %925 = vst [vmem:[#allocation2 + $0x7c] sm:$0xf] %v704_v47  ;;  %v712_v42 = vor.u32 %v710_v24, %v709_v45  ;;  %v713_v2 = vrot.slane %v709_v45, 4  ;;  %v9236_v17 = vpack.c.bf16 %v430_v43, %v430_v43 }
  0x9f   : > { %928 = vst [vmem:[#allocation2 + $0x80] sm:$0x1] %v927_v10  ;;  %v720_v12 = vor.u32 %v718_v40, %v717_v50  ;;  %v722_v38 = vrot.slane %v717_v50, 4  ;;  %v9226_v53 = vrot.slane %v724_v7, 7  ;;  %v732_v59 = vshrl.u32 %v9186_v46, 16 }
  0xa0   : > { %v735_v13 = vshll.u32 %v9186_v46, 16  ;;  %v336_v6 = vsel %vm8778_vm3, 0, %v335_v31  ;;  %v929_v4 = vld [vmem:[#allocation2 + $0x84] sm:$0xf]  ;;  %v392_v11 = vsel %vm8786_vm5, 0, %v391_v41  ;;  %v9238_v58 = vpack.c.bf16 %v431_v44, %v431_v44 }
  0xa1   : > { %v721_v16 = vsel %vm8830_vm10, %v713_v2, %v720_v12  ;;  %337 = vst [vmem:[#allocation2 + $0x9c] sm:$0x1] %v336_v6  ;;  %v930_v46 = vsel %vm8821_vm9, %v712_v42, %v929_v4  ;;  %v933_v21 = vld [vmem:[#allocation2 + $0x8c] sm:$0x1]  ;;  %v729_v25 = vor.u32 %v727_v52, %v9226_v53  ;;  %393 = vst [vmem:[#allocation2 + $0xa4] sm:$0x1] %v392_v11 }
  0xa2   : > { %v2915_v26 = vld [vmem:[#allocation2 + $0x78] sm:$0xf]  ;;  %932 = vst [vmem:[#allocation2 + $0x88] sm:$0xf] %v721_v16  ;;  %v9243_v48 = vpack.c.bf16 %v432_v60, %v432_v60  ;;  %v9245_v22 = vpack.c.bf16 %v433_v0, %v433_v0  ;;  %931 = vst [vmem:[#allocation2 + $0x84] sm:$0xf] %v930_v46  ;;  %v934_v24 = vsel %vm8778_vm3, %v722_v38, %v933_v21 }
  0xa3   : > { %v991_v27 = vld [vmem:[#allocation2 + $0x78] sm:$0xf]  ;;  %v3153_v20 = vshrl.u32 %v2915_v26, 16  ;;  %v3156_v30 = vshll.u32 %v2915_v26, 16  ;;  %v730_v62 = vrot.slane %v9226_v53, 4  ;;  %v9252_v31 = vrot.slane %v732_v59, 7 }
  0xa4   : > { %v1279_v34 = vshrl.u32 %v991_v27, 16  ;;  %v1282_v57 = vshll.u32 %v991_v27, 16  ;;  %v741_v63 = vshrl.u32 %v9236_v17, 16  ;;  %935 = vst [vmem:[#allocation2 + $0x8c] sm:$0x1] %v934_v24  ;;  %v9260_v0 = vpack.c.bf16 %v434_v35, %v434_v35 }
  0xa5   : > { %v3155_v39 = vrot.slane %v3153_v20, 4  ;;  %v3158_v40 = vrot.slane %v3156_v30, 5  ;;  %v936_v44 = vld [vmem:[#allocation2 + $0x90] sm:$0xf]  ;;  %v2916_v45 = vld [vmem:[#allocation2 + $0x7c] sm:$0xf]  ;;  %v9256_v8 = vor.u32 %v735_v13, %v9252_v31  ;;  %v9262_v47 = vpack.c.bf16 %v435_v23, %v435_v23 }
  0xa6   : > { %v1281_v41 = vrot.slane %v1279_v34, 4  ;;  %v1284_v43 = vrot.slane %v1282_v57, 5  ;;  %v2917_v50 = vld [vmem:[#allocation2 + $0x80] sm:$0x1]  ;;  %v992_v28 = vld [vmem:[#allocation2 + $0x7c] sm:$0xf]  ;;  %v937_v60 = vsel %vm8821_vm9, %v729_v25, %v936_v44 }
  0xa7   : > { %v3159_v10 = vor.u32 %v3158_v40, %v3155_v39  ;;  %v3162_v7 = vshll.u32 %v2916_v45, 16  ;;  %v3166_v52 = vshrl.u32 %v2916_v45, 16  ;;  %v3172_v42 = vshll.u32 %v2917_v50, 16  ;;  %v1029_v2 = vld [vmem:[#allocation2 + $0x80] sm:$0x1] }
  0xa8   : > { %938 = vst [vmem:[#allocation2 + $0x90] sm:$0xf] %v937_v60  ;;  %v1285_v12 = vor.u32 %v1284_v43, %v1281_v41  ;;  %v1288_v38 = vshll.u32 %v992_v28, 16  ;;  %v1292_v59 = vshrl.u32 %v992_v28, 16  ;;  %v1298_v6 = vshll.u32 %v1029_v2, 16 }
  0xa9   : > { %v3160_v16 = vrot.slane %v3159_v10, 4  ;;  %v3164_v13 = vrot.slane %v3162_v7, 5  ;;  %v3168_v4 = vrot.slane %v3166_v52, 4  ;;  %v3174_v11 = vrot.slane %v3172_v42, 5  ;;  %v994_v26 = vld [vmem:[#allocation2 + $0x88] sm:$0xf] }
  0xaa   : > { %v1286_v27 = vrot.slane %v1285_v12, 4  ;;  %v1290_v46 = vrot.slane %v1288_v38, 5  ;;  %v1294_v21 = vrot.slane %v1292_v59, 4  ;;  %v1300_v25 = vrot.slane %v1298_v6, 5  ;;  %v993_v20 = vld [vmem:[#allocation2 + $0x84] sm:$0xf] }
  0xab   : > { %v3165_v30 = vsel %vm8847_vm11, %v3160_v16, %v3164_v13  ;;  %v3169_v34 = vor.u32 %v3168_v4, %v3164_v13  ;;  %v1303_v57 = vshrl.u32 %v993_v20, 16  ;;  %v1306_v35 = vshll.u32 %v993_v20, 16  ;;  %v2918_v23 = vld [vmem:[#allocation2 + $0x84] sm:$0xf]  ;;  %v1030_v40 = vld [vmem:[#allocation2 + $0x8c] sm:$0x1] }
  0xac   : > { %v1291_v24 = vsel %vm8847_vm11, %v1286_v27, %v1290_v46  ;;  %v1295_v39 = vor.u32 %v1294_v21, %v1290_v46  ;;  %v1312_v41 = vshll.u32 %v994_v26, 16  ;;  %v1316_v43 = vshrl.u32 %v994_v26, 16  ;;  %v2919_v52 = vld [vmem:[#allocation2 + $0x88] sm:$0xf]  ;;  %v2920_v59 = vld [vmem:[#allocation2 + $0x8c] sm:$0x1] }
  0xad   : > { %v3170_v44 = vrot.slane %v3169_v34, 4  ;;  %v1305_v45 = vrot.slane %v1303_v57, 4  ;;  %v1308_v50 = vrot.slane %v1306_v35, 5  ;;  %v1322_v28 = vshll.u32 %v1030_v40, 16  ;;  %v940_v27 = vld [vmem:[#allocation2 + $0x98] sm:$0x1] }
  0xae   : > { %v1296_v60 = vrot.slane %v1295_v39, 4  ;;  %v1314_v10 = vrot.slane %v1312_v41, 5  ;;  %v1318_v7 = vrot.slane %v1316_v43, 4  ;;  %v3177_v42 = vshrl.u32 %v2918_v23, 16  ;;  %v4551_v29 = vld [vmem:[#allocation2 + $0x78] sm:$0xf] }
  0xaf   : > { %v3175_v2 = vsel %vm8847_vm11, %v3170_v44, %v3174_v11  ;;  %v1309_v12 = vor.u32 %v1308_v50, %v1305_v45  ;;  %v1324_v38 = vrot.slane %v1322_v28, 5  ;;  %v3180_v6 = vshll.u32 %v2918_v23, 16  ;;  %v2921_v46 = vld [vmem:[#allocation2 + $0x90] sm:$0xf] }
  0xb0   : > { %v9270_v16 = vcombine.low %v3165_v30, %v3175_v2  ;;  %v1301_v13 = vsel %vm8847_vm11, %v1296_v60, %v1300_v25  ;;  %v1319_v4 = vor.u32 %v1318_v7, %v1314_v10  ;;  %v3179_v26 = vrot.slane %v3177_v42, 4  ;;  %v995_v35 = vld [vmem:[#allocation2 + $0x90] sm:$0xf]  ;;  %v338_v60 = vld [vmem:[#allocation2 + $0xa8] sm:$0x1] }
  0xb1   : > { %v6765_v21 = vcombine.low %v1291_v24, %v1301_v13  ;;  %v1310_v20 = vrot.slane %v1309_v12, 4  ;;  %v3182_v34 = vrot.slane %v3180_v6, 5  ;;  %v3186_v57 = vshll.u32 %v2919_v52, 16 }
  0xb2   : > { %10793 = vst [vmem:[#allocation9_spill] sm:$0xff] %v9270_v16  ;;  %7959 = vmatmul.mubr.bf16.gmra.mrb[16].mxu0 %v9270_v16  ;;  %v1320_v11 = vrot.slane %v1319_v4, 4  ;;  %v3190_v39 = vshrl.u32 %v2919_v52, 16  ;;  %v3196_v40 = vshll.u32 %v2920_v59, 16  ;;  %v738_v25 = vsel %vm8830_vm10, %v730_v62, %v9256_v8 }
  0xb3   : > { %7770 = vmatprep.mubr.bf16.mxu1 %v6765_v21  ;;  %v1315_v30 = vsel %vm8847_vm11, %v1310_v20, %v1314_v10  ;;  %v3183_v23 = vor.u32 %v3182_v34, %v3179_v26  ;;  %v3188_v24 = vrot.slane %v3186_v57, 5  ;;  %v739_v41 = vrot.slane %v9252_v31, 4  ;;  %939 = vst [vmem:[#allocation2 + $0x94] sm:$0xf] %v738_v25  ;;  %v943_v20 = vld [vmem:[#allocation2 + $0x9c] sm:$0xf] }
  0xb4   : > { %v1325_v43 = vsel %vm8847_vm11, %v1320_v11, %v1324_v38  ;;  %v3192_v44 = vrot.slane %v3190_v39, 4  ;;  %v3198_v45 = vrot.slane %v3196_v40, 5  ;;  %v3201_v50 = vshrl.u32 %v2921_v46, 16  ;;  %v436_v34 = vld [vmem:[%s8774_s28 + $0xf0] sm:$0xff] }
  0xb5   : > { %v6766_v28 = vcombine.low %v1315_v30, %v1325_v43  ;;  %v3184_v53 = vrot.slane %v3183_v23, 4  ;;  %v941_v62 = vsel %vm8778_vm3, %v739_v41, %v940_v27  ;;  %v3204_v8 = vshll.u32 %v2921_v46, 16 }
  0xb6   : > { %v3193_v7 = vor.u32 %v3192_v44, %v3188_v24  ;;  %942 = vst [vmem:[#allocation2 + $0x98] sm:$0x1] %v941_v62  ;;  %v3203_v10 = vrot.slane %v3201_v50, 4  ;;  %v1327_v52 = vshrl.u32 %v995_v35, 16  ;;  %v1330_v31 = vshll.u32 %v995_v35, 16 }
  0xb7   : > { %7771 = vmatmul.mubr.bf16.gmra.mrb[20].mxu1 %v6766_v28  ;;  %v3189_v42 = vsel %vm8847_vm11, %v3184_v53, %v3188_v24  ;;  %v3206_v2 = vrot.slane %v3204_v8, 5  ;;  %v743_v12 = vrot.slane %v741_v63, 7  ;;  %v744_v38 = vshll.u32 %v9236_v17, 16  ;;  %v947_v44 = vld [vmem:[#allocation2 + $0xa4] sm:$0x1] }
  0xb8   : > { %v3194_v59 = vrot.slane %v3193_v7, 4  ;;  %v1329_v6 = vrot.slane %v1327_v52, 4  ;;  %v1332_v13 = vrot.slane %v1330_v31, 5  ;;  %v749_v4 = vshrl.u32 %v9238_v58, 16  ;;  %v394_v50 = vld [vmem:[#allocation2 + $0xb0] sm:$0x1] }
  0xb9   : > { %v3207_v26 = vor.u32 %v3206_v2, %v3203_v10  ;;  %v746_v27 = vor.u32 %v744_v38, %v743_v12  ;;  %v747_v46 = vrot.slane %v743_v12, 4  ;;  %v752_v21 = vshll.u32 %v9238_v58, 16 }
  0xba   : > { %v3199_v57 = vsel %vm8847_vm11, %v3194_v59, %v3198_v45  ;;  %v2922_v35 = vld [vmem:[#allocation2 + $0x94] sm:$0xf]  ;;  %v1333_v63 = vor.u32 %v1332_v13, %v1329_v6  ;;  %v751_v39 = vrot.slane %v749_v4, 7  ;;  %v339_v17 = vsel %vm8778_vm3, 0, %v338_v60 }
  0xbb   : > { %v996_v11 = vld [vmem:[#allocation2 + $0x94] sm:$0xf]  ;;  %v9299_v40 = vcombine.low %v3189_v42, %v3199_v57  ;;  %v3208_v25 = vrot.slane %v3207_v26, 4  ;;  %v3210_v30 = vshll.u32 %v2922_v35, 16  ;;  %v3214_v23 = vshrl.u32 %v2922_v35, 16 }
  0xbc   : > { %340 = vst [vmem:[#allocation2 + $0xa8] sm:$0x1] %v339_v17  ;;  %v1334_v24 = vrot.slane %v1333_v63, 4  ;;  %v1336_v58 = vshll.u32 %v996_v11, 16  ;;  %v1340_v41 = vshrl.u32 %v996_v11, 16  ;;  %v754_v43 = vor.u32 %v752_v21, %v751_v39 }
  0xbd   : > { %10794 = vst [vmem:[#allocation10_spill] sm:$0xff] %v9299_v40  ;;  %7962 = vmatprep.mubr.bf16.mxu0 %v9299_v40  ;;  %v2923_v45 = vld [vmem:[#allocation2 + $0x98] sm:$0x1]  ;;  %v3212_v28 = vrot.slane %v3210_v30, 5  ;;  %v3216_v53 = vrot.slane %v3214_v23, 4  ;;  %v944_v8 = vsel %vm8821_vm9, %v746_v27, %v943_v20  ;;  %v9304_v60 = vpack.c.bf16 %v436_v34, %v436_v34 }
  0xbe   : > { %v1031_v62 = vld [vmem:[#allocation2 + $0x98] sm:$0x1]  ;;  %v3220_v7 = vshll.u32 %v2923_v45, 16  ;;  %v1338_v10 = vrot.slane %v1336_v58, 5  ;;  %v1342_v52 = vrot.slane %v1340_v41, 4  ;;  %v755_v38 = vsel %vm8830_vm10, %v747_v46, %v754_v43 }
  0xbf   : > { %v1346_v31 = vshll.u32 %v1031_v62, 16  ;;  %945 = vst [vmem:[#allocation2 + $0x9c] sm:$0xf] %v944_v8  ;;  %v341_v42 = vld [vmem:[#allocation2 + $0xb4] sm:$0x1]  ;;  %v3213_v2 = vsel %vm8847_vm11, %v3208_v25, %v3212_v28  ;;  %v3217_v12 = vor.u32 %v3216_v53, %v3212_v28  ;;  %v756_v59 = vrot.slane %v751_v39, 4 }
  0xc0   : > { %v3222_v6 = vrot.slane %v3220_v7, 5  ;;  %v1339_v13 = vsel %vm8847_vm11, %v1334_v24, %v1338_v10  ;;  %v1343_v4 = vor.u32 %v1342_v52, %v1338_v10  ;;  %946 = vst [vmem:[#allocation2 + $0xa0] sm:$0xf] %v755_v38  ;;  %v397_v27 = vld [vmem:[#allocation2 + $0xbc] sm:$0x1]  ;;  %v395_v34 = vsel %vm8786_vm5, 0, %v394_v50 }
  0xc1   : > { %v1348_v26 = vrot.slane %v1346_v31, 5  ;;  %v3218_v21 = vrot.slane %v3217_v12, 4  ;;  %v948_v20 = vsel %vm8778_vm3, %v756_v59, %v947_v44  ;;  %v758_v57 = vshrl.u32 %v9243_v48, 16  ;;  %396 = vst [vmem:[#allocation2 + $0xb0] sm:$0x1] %v395_v34 }
  0xc2   : > { %v1344_v35 = vrot.slane %v1343_v4, 4  ;;  %949 = vst [vmem:[#allocation2 + $0xa4] sm:$0x1] %v948_v20  ;;  %v761_v46 = vshll.u32 %v9243_v48, 16  ;;  %v766_v11 = vshrl.u32 %v9245_v22, 16  ;;  %v769_v63 = vshll.u32 %v9245_v22, 16 }
  0xc3   : > { %v3223_v39 = vsel %vm8847_vm11, %v3218_v21, %v3222_v6  ;;  %v760_v17 = vrot.slane %v758_v57, 7  ;;  %v950_v25 = vld [vmem:[#allocation2 + $0xa8] sm:$0xf]  ;;  %v342_v30 = vsel %vm8778_vm3, 0, %v341_v42  ;;  %v398_v23 = vsel %vm8786_vm5, 0, %v397_v27 }
  0xc4   : > { %v9326_v24 = vcombine.low %v3213_v2, %v3223_v39  ;;  %v1349_v48 = vsel %vm8847_vm11, %v1344_v35, %v1348_v26  ;;  %v768_v58 = vrot.slane %v766_v11, 7  ;;  %343 = vst [vmem:[#allocation2 + $0xb4] sm:$0x1] %v342_v30  ;;  %399 = vst [vmem:[#allocation2 + $0xbc] sm:$0x1] %v398_v23  ;;  %v775_v22 = vshrl.u32 %v9260_v0, 16 }
  0xc5   : > { %v6767_v41 = vcombine.low %v1339_v13, %v1349_v48  ;;  %v763_v50 = vor.u32 %v761_v46, %v760_v17  ;;  %v764_v45 = vrot.slane %v760_v17, 4  ;;  %v778_v28 = vshll.u32 %v9260_v0, 16 }
  0xc6   : > { %10795 = vst [vmem:[#allocation11_spill] sm:$0xff] %v9326_v24  ;;  %v9331_v43 = vld [vmem:[#allocation2 + $0x9c] sm:$0xf]  ;;  %7963 = vmatmul.mubr.bf16.gmra.mrb[20].mxu0 %v9326_v24  ;;  %v771_v31 = vor.u32 %v769_v63, %v768_v58  ;;  %v773_v42 = vrot.slane %v768_v58, 4  ;;  %v9343_v12 = vrot.slane %v775_v22, 7 }
  0xc7   : > { %v2924_v44 = vld [vmem:[#allocation2 + $0x9c] sm:$0xf]  ;;  %v1351_v53 = vshrl.u32 %v9331_v43, 16  ;;  %v1354_v62 = vshll.u32 %v9331_v43, 16  ;;  %7774 = vmatprep.mubr.bf16.mxu1 %v6767_v41  ;;  %v9337_v10 = vld [vmem:[#allocation2 + $0xa0] sm:$0xf]  ;;  %v951_v2 = vsel %vm8821_vm9, %v763_v50, %v950_v25 }
  0xc8   : > { %v3225_v8 = vshrl.u32 %v2924_v44, 16  ;;  %v3228_v7 = vshll.u32 %v2924_v44, 16  ;;  %v9339_v52 = vld [vmem:[#allocation2 + $0xa0] sm:$0xf]  ;;  %v1360_v59 = vshll.u32 %v9337_v10, 16  ;;  %v1364_v6 = vshrl.u32 %v9337_v10, 16 }
  0xc9   : > { %v1353_v0 = vrot.slane %v1351_v53, 4  ;;  %v1356_v38 = vrot.slane %v1354_v62, 5  ;;  %952 = vst [vmem:[#allocation2 + $0xa8] sm:$0xf] %v951_v2  ;;  %v1032_v13 = vld [vmem:[#allocation2 + $0xa4] sm:$0x1]  ;;  %v772_v21 = vsel %vm8830_vm10, %v764_v45, %v771_v31  ;;  %v780_v20 = vor.u32 %v778_v28, %v9343_v12 }
  0xca   : > { %v9347_v4 = vld [vmem:[#allocation2 + $0xa4] sm:$0x1]  ;;  %v3227_v26 = vrot.slane %v3225_v8, 4  ;;  %v3230_v27 = vrot.slane %v3228_v7, 5  ;;  %v1362_v57 = vrot.slane %v1360_v59, 5  ;;  %v1366_v35 = vrot.slane %v1364_v6, 4 }
  0xcb   : > { %v1357_v34 = vor.u32 %v1356_v38, %v1353_v0  ;;  %v1370_v46 = vshll.u32 %v1032_v13, 16  ;;  %953 = vst [vmem:[#allocation2 + $0xac] sm:$0xf] %v772_v21  ;;  %v954_v11 = vld [vmem:[#allocation2 + $0xb0] sm:$0x1]  ;;  %v3234_v39 = vshll.u32 %v9339_v52, 16 }
  0xcc   : > { %v3231_v63 = vor.u32 %v3230_v27, %v3227_v26  ;;  %v3238_v17 = vshrl.u32 %v9339_v52, 16  ;;  %v3244_v25 = vshll.u32 %v9347_v4, 16  ;;  %v1367_v23 = vor.u32 %v1366_v35, %v1362_v57  ;;  %v957_v22 = vld [vmem:[#allocation2 + $0xb4] sm:$0xf]  ;;  %v437_v7 = vld [vmem:[%s8774_s28 + $0xf8] sm:$0xff] }
  0xcd   : > { %v1358_v30 = vrot.slane %v1357_v34, 4  ;;  %v1372_v48 = vrot.slane %v1370_v46, 5  ;;  %v955_v58 = vsel %vm8778_vm3, %v773_v42, %v954_v11  ;;  %v3236_v44 = vrot.slane %v3234_v39, 5  ;;  %v8565_v15 = vld [vmem:[#allocation2 + $0x9c] sm:$0xff]  }
  0xce   : > { %v3232_v41 = vrot.slane %v3231_v63, 4  ;;  %v3240_v50 = vrot.slane %v3238_v17, 4  ;;  %v3246_v45 = vrot.slane %v3244_v25, 5  ;;  %956 = vst [vmem:[#allocation2 + $0xb0] sm:$0x1] %v955_v58  ;;  %v1368_v53 = vrot.slane %v1367_v23, 4 }
  0xcf   : > { %v1363_v28 = vsel %vm8847_vm11, %v1358_v30, %v1362_v57  ;;  %v781_v62 = vrot.slane %v9343_v12, 4  ;;  %v783_v8 = vshrl.u32 %v9262_v47, 16  ;;  %v786_v38 = vshll.u32 %v9262_v47, 16  ;;  %v344_v17 = vld [vmem:[#allocation2 + $0xc0] sm:$0x1] }
  0xd0   : > { %v3237_v31 = vsel %vm8847_vm11, %v3232_v41, %v3236_v44  ;;  %v3241_v2 = vor.u32 %v3240_v50, %v3236_v44  ;;  %v2927_v42 = vld [vmem:[#allocation2 + $0xa8] sm:$0xf]  ;;  %v958_v59 = vsel %vm8821_vm9, %v780_v20, %v957_v22  ;;  %v1373_v6 = vsel %vm8847_vm11, %v1368_v53, %v1372_v48 }
  0xd1   : > { %v9364_v0 = vld [vmem:[#allocation2 + $0xa8] sm:$0xf]  ;;  %v3249_v13 = vshrl.u32 %v2927_v42, 16  ;;  %v3252_v26 = vshll.u32 %v2927_v42, 16  ;;  %959 = vst [vmem:[#allocation2 + $0xb4] sm:$0xf] %v958_v59  ;;  %v6768_v21 = vcombine.low %v1363_v28, %v1373_v6  ;;  %v9377_v47 = vpack.c.bf16 %v437_v7, %v437_v7 }
  0xd2   : > { %v1375_v27 = vshrl.u32 %v9364_v0, 16  ;;  %v3242_v34 = vrot.slane %v3241_v2, 4  ;;  %v9372_v57 = vld [vmem:[#allocation2 + $0xac] sm:$0xf]  ;;  %v1378_v46 = vshll.u32 %v9364_v0, 16  ;;  %v3795_v24 = vrot.slane %v9347_v4, 5 }
  0xd3   : > { %v9374_v35 = vld [vmem:[#allocation2 + $0xac] sm:$0xf]  ;;  %v3251_v11 = vrot.slane %v3249_v13, 4  ;;  %v3254_v20 = vrot.slane %v3252_v26, 5  ;;  %v3258_v63 = vshll.u32 %v9372_v57, 16  ;;  %v3262_v39 = vshrl.u32 %v9372_v57, 16  ;;  %7775 = vmatmul.mubr.bf16.gmra.mrb[24].mxu1 %v6768_v21 }
  0xd4   : > { %v3247_v25 = vsel %vm8847_vm11, %v3242_v34, %v3246_v45  ;;  %v1377_v30 = vrot.slane %v1375_v27, 4  ;;  %v1380_v23 = vrot.slane %v1378_v46, 5  ;;  %v1384_v48 = vshll.u32 %v9374_v35, 16  ;;  %v400_v46 = vld [vmem:[#allocation2 + $0xc8] sm:$0x1] }
  0xd5   : > { %v9384_v58 = vcombine.low %v3237_v31, %v3247_v25  ;;  %v9386_v22 = vld [vmem:[#allocation2 + $0xb0] sm:$0x1]  ;;  %v3255_v41 = vor.u32 %v3254_v20, %v3251_v11  ;;  %v3260_v44 = vrot.slane %v3258_v63, 5  ;;  %v3264_v50 = vrot.slane %v3262_v39, 4  ;;  %v961_v25 = vld [vmem:[#allocation2 + $0xbc] sm:$0x1] }
  0xd6   : > { %v1033_v28 = vld [vmem:[#allocation2 + $0xb0] sm:$0x1]  ;;  %v3268_v53 = vshll.u32 %v9386_v22, 16  ;;  %v1381_v7 = vor.u32 %v1380_v23, %v1377_v30  ;;  %v1386_v2 = vrot.slane %v1384_v48, 5  ;;  %v1388_v42 = vshrl.u32 %v9374_v35, 16 }
  0xd7   : > { %10796 = vst [vmem:[#allocation12_spill] sm:$0xff] %v9384_v58  ;;  %7966 = vmatprep.mubr.bf16.mxu0 %v9384_v58  ;;  %v3256_v45 = vrot.slane %v3255_v41, 4  ;;  %v3265_v59 = vor.u32 %v3264_v50, %v3260_v44  ;;  %v1394_v6 = vshll.u32 %v1033_v28, 16  ;;  %v785_v13 = vrot.slane %v783_v8, 7 }
  0xd8   : > { %v3270_v31 = vrot.slane %v3268_v53, 5  ;;  %v1382_v26 = vrot.slane %v1381_v7, 4  ;;  %v1390_v27 = vrot.slane %v1388_v42, 4  ;;  %v9391_v21 = vld [vmem:[#allocation2 + $0xb4] sm:$0xf]  ;;  %v345_v34 = vsel %vm8778_vm3, 0, %v344_v17 }
  0xd9   : > { %v3261_v11 = vsel %vm8847_vm11, %v3256_v45, %v3260_v44  ;;  %v3266_v20 = vrot.slane %v3265_v59, 4  ;;  %v1396_v63 = vrot.slane %v1394_v6, 5  ;;  %v788_v39 = vor.u32 %v786_v38, %v785_v13  ;;  %v2930_v30 = vld [vmem:[#allocation2 + $0xb4] sm:$0xf]  ;;  %346 = vst [vmem:[#allocation2 + $0xc0] sm:$0x1] %v345_v34 }
  0xda   : > { %v1387_v8 = vsel %vm8847_vm11, %v1382_v26, %v1386_v2  ;;  %v1391_v23 = vor.u32 %v1390_v27, %v1386_v2  ;;  %v790_v48 = vrot.slane %v785_v13, 4  ;;  %v1399_v41 = vshrl.u32 %v9391_v21, 16  ;;  %v3656_v40 = vld [vmem:[#allocation2 + $0xb4] sm:$0xe] }
  0xdb   : > { %v3271_v17 = vsel %vm8847_vm11, %v3266_v20, %v3270_v31  ;;  %v789_v44 = vsel %vm8830_vm10, %v781_v62, %v788_v39  ;;  %v1402_v38 = vshll.u32 %v9391_v21, 16  ;;  %v3273_v50 = vshrl.u32 %v2930_v30, 16 }
  0xdc   : > { %v9407_v28 = vcombine.low %v3261_v11, %v3271_v17  ;;  %v1392_v53 = vrot.slane %v1391_v23, 4  ;;  %960 = vst [vmem:[#allocation2 + $0xb8] sm:$0xf] %v789_v44  ;;  %v962_v7 = vsel %vm8778_vm3, %v790_v48, %v961_v25  ;;  %v1401_v2 = vrot.slane %v1399_v41, 4 }
  0xdd   : > { %963 = vst [vmem:[#allocation2 + $0xbc] sm:$0x1] %v962_v7  ;;  %v1404_v42 = vrot.slane %v1402_v38, 5  ;;  %v3275_v45 = vrot.slane %v3273_v50, 4  ;;  %v3276_v59 = vshll.u32 %v2930_v30, 16  ;;  %v401_v12 = vsel %vm8786_vm5, 0, %v400_v46 }
  0xde   : > { %10797 = vst [vmem:[#allocation13_spill] sm:$0xff] %v9407_v28  ;;  %7967 = vmatmul.mubr.bf16.gmra.mrb[24].mxu0 %v9407_v28  ;;  %v1397_v62 = vsel %vm8847_vm11, %v1392_v53, %v1396_v63  ;;  %402 = vst [vmem:[#allocation2 + $0xc8] sm:$0x1] %v401_v12  ;;  %v792_v6 = vshrl.u32 %v9304_v60, 16  ;;  %v795_v13 = vshll.u32 %v9304_v60, 16  ;;  %v800_v31 = vshrl.u32 %v9377_v47, 16 }
  0xdf   : > { %v6769_v26 = vcombine.low %v1387_v8, %v1397_v62  ;;  %v3278_v27 = vrot.slane %v3276_v59, 5  ;;  %v803_v34 = vshll.u32 %v9377_v47, 16  ;;  %v1405_v46 = vor.u32 %v1404_v42, %v1401_v2  ;;  %v3643_v62 = vld [vmem:[#allocation2 + $0x18] sm:$0xe] }
  0xe0   : > { %v794_v11 = vrot.slane %v792_v6, 7  ;;  %v802_v20 = vrot.slane %v800_v31, 7  ;;  %v964_v39 = vld [vmem:[#allocation2 + $0xc0] sm:$0xf]  ;;  %v9433_v41 = vsel %vm9420_vm14, %v8914_v5, %v3718_v56  ;;  %v3642_v31 = vld [vmem:[#allocation2 + $0xc] sm:$0xe] }
  0xe1   : > { %7778 = vmatprep.mubr.bf16.mxu1 %v6769_v26  ;;  %v3279_v47 = vor.u32 %v3278_v27, %v3275_v45  ;;  %v1406_v45 = vrot.slane %v1405_v46, 4  ;;  %v3792_v58 = vrot.slane %v9339_v52, 5  ;;  %v3799_v16 = vrot.slane %v9372_v57, 5  ;;  %v8525_v57 = vld [vmem:[%s10738_s1 + $0x198] sm:$0xff]  }
  0xe2   : > { %v797_v25 = vor.u32 %v795_v13, %v794_v11  ;;  %v798_v63 = vrot.slane %v794_v11, 4  ;;  %v805_v30 = vor.u32 %v803_v34, %v802_v20  ;;  %v807_v23 = vrot.slane %v802_v20, 4 }
  0xe3   : > { %v9424_v60 = vld [vmem:[#allocation2 + $0xb8] sm:$0xf]  ;;  %v3280_v6 = vrot.slane %v3279_v47, 4  ;;  %v6940_v20 = vrot.slane %v3643_v62, 9  ;;  %v3794_v4 = vrot.slane %v3792_v58, 4 }
  0xe4   : > { %v9426_v8 = vld [vmem:[#allocation2 + $0xb8] sm:$0xf]  ;;  %v1034_v17 = vld [vmem:[#allocation2 + $0xbc] sm:$0x1]  ;;  %v1408_v44 = vshll.u32 %v9424_v60, 16  ;;  %v1412_v38 = vshrl.u32 %v9424_v60, 16  ;;  %v806_v53 = vsel %vm8830_vm10, %v798_v63, %v805_v30  ;;  %v965_v7 = vsel %vm8821_vm9, %v797_v25, %v964_v39 }
  0xe5   : > { %v9437_v50 = vld [vmem:[#allocation2 + $0xbc] sm:$0x1]  ;;  %v1418_v2 = vshll.u32 %v1034_v17, 16  ;;  %v3282_v33 = vshll.u32 %v9426_v8, 16  ;;  %v3286_v42 = vshrl.u32 %v9426_v8, 16  ;;  %v9456_v47 = vsel %vm9420_vm14, %v6940_v20, %v3715_v54 }
  0xe6   : > { %v3292_v56 = vshll.u32 %v9437_v50, 16  ;;  %966 = vst [vmem:[#allocation2 + $0xc0] sm:$0xf] %v965_v7  ;;  %967 = vst [vmem:[#allocation2 + $0xc4] sm:$0xf] %v806_v53  ;;  %v1410_v59 = vrot.slane %v1408_v44, 5 }
  0xe7   : > { %v968_v5 = vld [vmem:[#allocation2 + $0xc8] sm:$0x1]  ;;  %v1414_v12 = vrot.slane %v1412_v38, 4  ;;  %v3284_v51 = vrot.slane %v3282_v33, 5  ;;  %v3288_v13 = vrot.slane %v3286_v42, 4  ;;  %v1420_v27 = vrot.slane %v1418_v2, 5 }
  0xe8   : > { %v969_v55 = vsel %vm8778_vm3, %v807_v23, %v968_v5  ;;  %v3294_v11 = vrot.slane %v3292_v56, 5  ;;  %v1411_v39 = vsel %vm8847_vm11, %v1406_v45, %v1410_v59  ;;  %v8607_v25 = vld [vmem:[#allocation2 + $0x10] sm:$0xf]  ;;  %v9462_v53 = vld [vmem:[#allocation2 + $0x4] sm:$0xf]  ;;  %v6939_v33 = vrot.slane %v3642_v31, 9 }
  0xe9   : > { %970 = vst [vmem:[#allocation2 + $0xc8] sm:$0x1] %v969_v55  ;;  %v1415_v26 = vor.u32 %v1414_v12, %v1410_v59  ;;  %v3289_v34 = vor.u32 %v3288_v13, %v3284_v51  ;;  %v3708_v63 = vrot.slane %v8607_v25, 5  ;;  %v3285_v30 = vsel %vm8847_vm11, %v3280_v6, %v3284_v51  ;;  %v8609_v7 = vld [vmem:[#allocation2] sm:$0xf] }
  0xea   : > { %v6779_v2 = vcombine.low %v8609_v7, %v9462_v53  ;;  %v8610_v31 = vld [vmem:[#allocation2 + $0x14] sm:$0x1]  ;;  %v9477_v25 = vld [vmem:[#allocation2 + $0x10] sm:$0xf]  ;;  %v3644_v7 = vld [vmem:[#allocation2 + $0x24] sm:$0xe] }
  0xeb   : > { %v1416_v46 = vrot.slane %v1415_v26, 4  ;;  %v3290_v23 = vrot.slane %v3289_v34, 4  ;;  %v3710_v62 = vrot.slane %v3708_v63, 4  ;;  %v3711_v26 = vrot.slane %v8610_v31, 5  ;;  %v3645_v31 = vld [vmem:[#allocation2 + $0x30] sm:$0xe] }
  0xec   : > { %v8625_v42 = vld [vmem:[#allocation2 + $0x44] sm:$0x1] }
  0xed   : > { %v1421_v17 = vsel %vm8847_vm11, %v1416_v46, %v1420_v27  ;;  %v2933_v44 = vld [vmem:[#allocation2 + $0xc0] sm:$0xf]  ;;  %v9460_v38 = vld [vmem:[#allocation2 + $0xc4] sm:$0xf]  ;;  %v3295_v54 = vsel %vm8847_vm11, %v3290_v23, %v3294_v11  ;;  %v8611_v46 = vld [vmem:[#allocation2 + $0xc] sm:$0xf] }
  0xee   : > { %v6770_v32 = vcombine.low %v1411_v39, %v1421_v17  ;;  %v3297_v56 = vshrl.u32 %v2933_v44, 16  ;;  %v3300_v5 = vshll.u32 %v2933_v44, 16  ;;  %v9469_v45 = vcombine.low %v3285_v30, %v3295_v54 }
  0xef   : > { %v3306_v12 = vshll.u32 %v9460_v38, 16  ;;  %v3310_v55 = vshrl.u32 %v9460_v38, 16  ;;  %v6780_v30 = vcombine.low %v8611_v46, %v9477_v25  ;;  %v3709_v17 = vsel %vm9420_vm14, %v6939_v33, %v3708_v63  ;;  %v8619_v46 = vld [vmem:[#allocation2 + $0x40] sm:$0xf] }
  0xf0   : > { %10800 = vst [vmem:[#allocation14_spill] sm:$0xff] %v9469_v45  ;;  %v9471_v59 = vld [vmem:[#allocation2 + $0xc8] sm:$0x1]  ;;  %7779 = vmatmul.mubr.bf16.gmra.mrb[28].mxu1 %v6770_v32  ;;  %v3299_v6 = vrot.slane %v3297_v56, 4  ;;  %v3302_v51 = vrot.slane %v3300_v5, 5  ;;  %7970 = vmatprep.mubr.bf16.mxu0 %v9469_v45  ;;  %v3712_v44 = vsel %vm9420_vm14, %v3710_v62, %v3711_v26  ;;  %v6941_v62 = vrot.slane %v3644_v7, 9 }
  0xf1   : > { %v3316_v13 = vshll.u32 %v9471_v59, 16  ;;  %v3308_v27 = vrot.slane %v3306_v12, 5  ;;  %v3312_v34 = vrot.slane %v3310_v55, 4  ;;  %7798 = vmatprep.mubr.bf16.mxu1 %v6779_v2  ;;  %v8613_v32 = vld [vmem:[#allocation2 + $0x28] sm:$0xf]  ;;  %v6971_v33 = vcombine.low %v3709_v17, %v3712_v44  ;;  %v8522_v17 = vld [vmem:[%s10738_s1 + $0x90] sm:$0xff]  }
  0xf2   : > { %v3303_v11 = vor.u32 %v3302_v51, %v3299_v6  ;;  %v3722_v54 = vrot.slane %v8613_v32, 5  ;;  %v8614_v2 = vld [vmem:[#allocation2 + $0x18] sm:$0xf]  ;;  %v9484_v5 = vld [vmem:[#allocation2 + $0x1c] sm:$0xf]  ;;  %v8518_v6 = vld [vmem:[%s10738_s1 + $0x88] sm:$0xff]  }
  0xf3   : > { %v3313_v20 = vor.u32 %v3312_v34, %v3308_v27  ;;  %v3318_v39 = vrot.slane %v3316_v13, 5  ;;  %v6781_v12 = vcombine.low %v8614_v2, %v9484_v5  ;;  %v8616_v51 = vld [vmem:[#allocation2 + $0x2c] sm:$0x1]  ;;  %v8621_v44 = vld [vmem:[#allocation2 + $0x24] sm:$0xf]  ;;  %v6942_v2 = vrot.slane %v3645_v31, 9 }
  0xf4   : > { %v3304_v23 = vrot.slane %v3303_v11, 4  ;;  %v3725_v13 = vrot.slane %v8616_v51, 5  ;;  %v3724_v34 = vrot.slane %v3722_v54, 4  ;;  %v8617_v11 = vld [vmem:[#allocation2 + $0x34] sm:$0xf]  ;;  %v3723_v32 = vsel %vm9420_vm14, %v6941_v62, %v3722_v54  ;;  %v8534_v45 = vld [vmem:[%s10738_s1 + $0xa8] sm:$0xff]  }
  0xf5   : > { %v3314_v56 = vrot.slane %v3313_v20, 4  ;;  %v3729_v20 = vrot.slane %v8617_v11, 5  ;;  %v9510_v51 = vld [vmem:[#allocation2 + $0x48] sm:$0xe]  ;;  %v9512_v11 = vld [vmem:[#allocation2 + $0x34] sm:$0xf] }
  0xf6   : > { %v3309_v55 = vsel %vm8847_vm11, %v3304_v23, %v3308_v27  ;;  %v8618_v27 = vld [vmem:[%s10738_s1 + $0x80] sm:$0xff]   ;;  %v3736_v23 = vrot.slane %v8619_v46, 5  ;;  %v8626_v54 = vld [vmem:[#allocation2 + $0x4c] sm:$0xf] }
  0xf7   : > { %v3319_v63 = vsel %vm8847_vm11, %v3314_v56, %v3318_v39  ;;  %v3646_v39 = vld [vmem:[#allocation2 + $0x3c] sm:$0xe]  ;;  %v3726_v56 = vsel %vm9420_vm14, %v3724_v34, %v3725_v13  ;;  %v3743_v62 = vrot.slane %v8626_v54, 5  ;;  %v9523_v34 = vsel %vm9420_vm14, %v6942_v2, %v3729_v20  ;;  %v3655_v54 = vld [vmem:[#allocation2 + $0xa8] sm:$0xe] }
  0xf8   : > { %v9494_v26 = vcombine.low %v3309_v55, %v3319_v63  ;;  %7799 = vmatmul.mubr.bf16.vlgmr.msra.gmra.mrb[0].mxu1 %v6780_v30  ;;  %v9503_v30 = vld [vmem:[#allocation2 + $0x28] sm:$0xf]  ;;  %v8622_v55 = vld [vmem:[#allocation2 + $0x38] sm:$0x1]  ;;  %v6943_v46 = vrot.slane %v3646_v39, 9  ;;  %v6973_v31 = vcombine.low %v3723_v32, %v3726_v56  ;;  %v10802_v2 = vcombine.low %v9456_v47, %v9433_v41 }
  0xf9   : > { %7831 = vmatpush3.bf16.msra.mxu1 %v8618_v27  ;;  %7802 = vmatprep.mubr.bf16.mxu1 %v6781_v12  ;;  %v6782_v7 = vcombine.low %v8621_v44, %v9503_v30  ;;  %v3731_v12 = vrot.slane %v3729_v20, 4  ;;  %v3732_v63 = vrot.slane %v8622_v55, 5  ;;  %v3738_v44 = vrot.slane %v3736_v23, 4  ;;  %v8526_v13 = vld [vmem:[%s10738_s1 + $0x98] sm:$0xff]   ;;  %v3648_v39 = vld [vmem:[#allocation2 + $0x54] sm:$0xe] }
  0xfa   : > { %10801 = vst [vmem:[#allocation15_spill] sm:$0xff] %v9494_v26  ;;  %7971 = vmatmul.mubr.bf16.gmra.mrb[28].mxu0 %v9494_v26  ;;  %7832 = vmatprep.subr.bf16.mxu1 %v8518_v6  ;;  %v3739_v26 = vrot.slane %v8625_v42, 5  ;;  %v9531_v55 = vsel %vm9420_vm14, %v6943_v46, %v3736_v23  ;;  %v8530_v20 = vld [vmem:[%s10738_s1 + $0xa0] sm:$0xff]   ;;  %v3654_v56 = vld [vmem:[#allocation2 + $0x9c] sm:$0xe] }
  0xfb   : > { %7990 = vmatprep.mubr.bf16.mxu0 %v6971_v33  ;;  %v8624_v33 = vld [vmem:[#allocation2 + $0x30] sm:$0xf]  ;;  %v9527_v42 = vsel %vm9420_vm14, %v3731_v12, %v3732_v63  ;;  %v3745_v12 = vrot.slane %v3743_v62, 4  ;;  %v8631_v41 = vld [vmem:[#allocation2 + $0x48] sm:$0xf]  ;;  %v6951_v28 = vrot.slane %v3654_v56, 9 }
  0xfc   : > { %v6783_v27 = vcombine.low %v8624_v33, %v9512_v11  ;;  %v9535_v32 = vsel %vm9420_vm14, %v3738_v44, %v3739_v26  ;;  %v8627_v63 = vld [vmem:[#allocation2 + $0x50] sm:$0x1]  ;;  %v8628_v26 = vld [vmem:[%s10738_s1 + $0x180] sm:$0xff]   ;;  %v9552_v47 = vld [vmem:[#allocation2 + $0x4c] sm:$0xf]  ;;  %v6945_v44 = vrot.slane %v3648_v39, 9 }
  0xfd   : > { %7833 = vmatpush3.bf16.msra.mxu1 %v8518_v6  ;;  %v8517_v6 = vld [vmem:[%s10738_s1 + $0x188] sm:$0xff]   ;;  %v3746_v23 = vrot.slane %v8627_v63, 5  ;;  %v9549_v33 = vld [vmem:[#allocation2 + $0x40] sm:$0xf]  ;;  %v6785_v46 = vcombine.low %v8631_v41, %v9552_v47  ;;  %v8636_v41 = vld [vmem:[#allocation2 + $0x5c] sm:$0x1]  ;;  %v9589_v52 = vsel %vm9420_vm14, %v6951_v28, %v3792_v58 }
  0xfe   : > { %7834 = vmatprep.subr.bf16.mxu1 %v8522_v17  ;;  %v3753_v39 = vrot.slane %v8636_v41, 5  ;;  %v6952_v63 = vrot.slane %v3655_v54, 9  ;;  %v3649_v58 = vld [vmem:[#allocation2 + $0x60] sm:$0xe]  ;;  %v3809_v54 = vrot.slane %v9437_v50, 5 }
  0xff   : > { %v9580_v41 = vsel %vm9420_vm14, %v3745_v12, %v3746_v23  ;;  %v3801_v12 = vrot.slane %v3799_v16, 4  ;;  %v8538_v23 = vld [vmem:[%s10738_s1 + $0xb0] sm:$0xff]  }
 0x100   : > { %7803 = vmatmul.mubr.bf16.gmra.mrb[4].mxu1 %v6782_v7  ;;  %v6944_v7 = vrot.slane %v9510_v51, 9  ;;  %v8629_v51 = vld [vmem:[#allocation2 + $0x3c] sm:$0xf] }
 0x101   : > { %7806 = vmatprep.mubr.bf16.mxu1 %v6783_v27  ;;  %7835 = vmatpush3.bf16.msra.mxu1 %v8522_v17  ;;  %v6974_v17 = vcombine.low %v9523_v34, %v9527_v42  ;;  %v6784_v27 = vcombine.low %v8629_v51, %v9549_v33  ;;  %v9560_v34 = vld [vmem:[#allocation2 + $0x54] sm:$0xf]  ;;  %v9562_v42 = vld [vmem:[#allocation2 + $0x58] sm:$0xf] }
 0x102   : > { %7991 = vmatmul.mubr.bf16.vlgmr.msra.gmra.mrb[0].mxu0 %v10802_v2  ;;  %7836 = vmatprep.subr.bf16.mxu1 %v8526_v13  ;;  %v6975_v2 = vcombine.low %v9531_v55, %v9535_v32  ;;  %v9569_v55 = vld [vmem:[#allocation2 + $0x64] sm:$0xf] }
 0x103   : > { %8023 = vmatpush3.bf16.msra.mxu0 %v8628_v26  ;;  %7994 = vmatprep.mubr.bf16.mxu0 %v6973_v31  ;;  %v8521_v31 = vld [vmem:[%s10738_s1 + $0x190] sm:$0xff]   ;;  %v8635_v26 = vld [vmem:[#allocation2 + $0x58] sm:$0xf]  ;;  %v3757_v32 = vrot.slane %v9569_v55, 5 }
 0x104   : > { %8024 = vmatprep.subr.bf16.mxu0 %v8517_v6  ;;  %v3750_v51 = vrot.slane %v8635_v26, 5  ;;  %v9576_v26 = vsel %vm9420_vm14, %v6944_v7, %v3743_v62  ;;  %v3802_v62 = vrot.slane %v9386_v22, 5  ;;  %v3657_v7 = vld [vmem:[#allocation2 + $0xc0] sm:$0xe]  ;;  %v9603_v22 = vsel %vm9420_vm14, %v3794_v4, %v3795_v24 }
 0x105   : > { %7837 = vmatpush3.bf16.msra.mxu1 %v8526_v13  ;;  %v6954_v24 = vrot.slane %v3657_v7, 9  ;;  %v9633_v7 = vld [vmem:[#allocation2 + $0x64] sm:$0xf] }
 0x106   : > { %7838 = vmatprep.subr.bf16.mxu1 %v8530_v20  ;;  %v9585_v13 = vsel %vm9420_vm14, %v6945_v44, %v3750_v51  ;;  %v3752_v56 = vrot.slane %v3750_v51, 4  ;;  %v3806_v44 = vrot.slane %v9426_v8, 5  ;;  %v8638_v51 = vld [vmem:[#allocation2 + $0x70] sm:$0xf] }
 0x107   : > { %8025 = vmatpush3.bf16.msra.mxu0 %v8517_v6  ;;  %v9597_v6 = vsel %vm9420_vm14, %v6952_v63, %v3799_v16  ;;  %v6983_v16 = vcombine.low %v9589_v52, %v9603_v22  ;;  %v3764_v4 = vrot.slane %v8638_v51, 5  ;;  %v2098_v52 = vrot.slane %v9512_v11, 5  ;;  %v8660_v11 = vld [vmem:[#allocation2 + $0x2c] sm:$0x1] }
 0x108   : > { %7807 = vmatmul.mubr.bf16.gmra.mrb[8].mxu1 %v6784_v27  ;;  %8026 = vmatprep.subr.bf16.mxu0 %v8521_v31  ;;  %v6953_v27 = vrot.slane %v3656_v40, 9  ;;  %v3808_v50 = vrot.slane %v3806_v44, 4  ;;  %v3754_v63 = vsel %vm9420_vm14, %v3752_v56, %v3753_v39  ;;  %v6976_v56 = vcombine.low %v9576_v26, %v9580_v41  ;;  %v8650_v40 = vld [vmem:[#allocation2 + $0x8c] sm:$0x1] }
 0x109   : > { %7810 = vmatprep.mubr.bf16.mxu1 %v6785_v46  ;;  %7839 = vmatpush3.bf16.msra.mxu1 %v8530_v20  ;;  %v9614_v20 = vsel %vm9420_vm14, %v3801_v12, %v3802_v62  ;;  %v3813_v46 = vrot.slane %v9460_v38, 5  ;;  %v8529_v38 = vld [vmem:[%s10738_s1 + $0x1a0] sm:$0xff]   ;;  %v3650_v12 = vld [vmem:[#allocation2 + $0x6c] sm:$0xe]  ;;  %v3766_v51 = vrot.slane %v3764_v4, 4  ;;  %v3781_v28 = vrot.slane %v8650_v40, 5 }
 0x10a   : > { %7995 = vmatmul.mubr.bf16.gmra.mrb[4].mxu0 %v6974_v17  ;;  %7840 = vmatprep.subr.bf16.mxu1 %v8534_v45  ;;  %v9621_v8 = vsel %vm9420_vm14, %v6953_v27, %v3806_v44  ;;  %v3816_v17 = vrot.slane %v9471_v59, 5  ;;  %v8639_v62 = vld [vmem:[#allocation2 + $0x60] sm:$0xf]  ;;  %v9638_v39 = vsel %vm9420_vm14, %v3808_v50, %v3809_v54  ;;  %v6946_v27 = vrot.slane %v3649_v58, 9  ;;  %v8641_v50 = vld [vmem:[#allocation2 + $0x68] sm:$0x1] }
 0x10b   : > { %7998 = vmatprep.mubr.bf16.mxu0 %v6975_v2  ;;  %8027 = vmatpush3.bf16.msra.mxu0 %v8521_v31  ;;  %v9631_v2 = vsel %vm9420_vm14, %v6954_v24, %v3813_v46  ;;  %v3815_v31 = vrot.slane %v3813_v46, 4  ;;  %v6787_v59 = vcombine.low %v8639_v62, %v9633_v7  ;;  %v6977_v46 = vcombine.low %v9585_v13, %v3754_v63  ;;  %v8533_v13 = vld [vmem:[%s10738_s1 + $0x1a8] sm:$0xff]   ;;  %v8653_v40 = vld [vmem:[#allocation2 + $0x84] sm:$0xf] }
 0x10c   : > { %8028 = vmatprep.subr.bf16.mxu0 %v8525_v57  ;;  %v3759_v54 = vrot.slane %v3757_v32, 4  ;;  %v3760_v26 = vrot.slane %v8641_v50, 5  ;;  %v10803_v58 = vcombine.low %v9560_v34, %v9562_v42  ;;  %v3758_v34 = vsel %vm9420_vm14, %v6946_v27, %v3757_v32  ;;  %v8643_v50 = vld [vmem:[#allocation2 + $0x7c] sm:$0xf]  ;;  %v8537_v27 = vld [vmem:[%s10738_s1 + $0x1b0] sm:$0xff]  }
 0x10d   : > { %7841 = vmatpush3.bf16.msra.mxu1 %v8534_v45  ;;  %v9646_v24 = vsel %vm9420_vm14, %v3815_v31, %v3816_v17  ;;  %v8542_v45 = vld [vmem:[%s10738_s1 + $0xb8] sm:$0xff]   ;;  %v6947_v17 = vrot.slane %v3650_v12, 9  ;;  %v8642_v31 = vld [vmem:[#allocation2 + $0x74] sm:$0x1] }
 0x10e   : > { %7842 = vmatprep.subr.bf16.mxu1 %v8538_v23  ;;  %v3767_v62 = vrot.slane %v8642_v31, 5  ;;  %v3761_v63 = vsel %vm9420_vm14, %v3759_v54, %v3760_v26  ;;  %v3651_v12 = vld [vmem:[#allocation2 + $0x78] sm:$0xe]  ;;  %v8646_v31 = vld [vmem:[#allocation2 + $0x88] sm:$0xf] }
 0x10f   : > { %8029 = vmatpush3.bf16.msra.mxu0 %v8525_v57  ;;  %v9665_v57 = vld [vmem:[%s10738_s1 + $0xc0] sm:$0xff]   ;;  %v3778_v32 = vrot.slane %v8646_v31, 5  ;;  %v8647_v54 = vld [vmem:[#allocation2 + $0x78] sm:$0xf] }
 0x110   : > { %7811 = vmatmul.mubr.bf16.gmra.mrb[12].mxu1 %v10803_v58  ;;  %8030 = vmatprep.subr.bf16.mxu0 %v8529_v38  ;;  %v3768_v55 = vsel %vm9420_vm14, %v3766_v51, %v3767_v62  ;;  %v8649_v62 = vld [vmem:[#allocation2 + $0x80] sm:$0x1] }
 0x111   : > { %7814 = vmatprep.mubr.bf16.mxu1 %v6787_v59  ;;  %7843 = vmatpush3.bf16.msra.mxu1 %v8538_v23  ;;  %v3771_v59 = vrot.slane %v8643_v50, 5  ;;  %v9673_v23 = vld [vmem:[#allocation2 + $0x70] sm:$0xf]  ;;  %v3652_v50 = vld [vmem:[#allocation2 + $0x84] sm:$0xe]  ;;  %v3774_v31 = vrot.slane %v8649_v62, 5 }
 0x112   : > { %7999 = vmatmul.mubr.bf16.gmra.mrb[8].mxu0 %v6976_v56  ;;  %7844 = vmatprep.subr.bf16.mxu1 %v8542_v45  ;;  %v8645_v56 = vld [vmem:[#allocation2 + $0x6c] sm:$0xf]  ;;  %v6949_v41 = vrot.slane %v3652_v50, 9  ;;  %v3780_v44 = vrot.slane %v3778_v32, 4  ;;  %v8654_v50 = vld [vmem:[#allocation2 + $0x90] sm:$0xf] }
 0x113   : > { %8002 = vmatprep.mubr.bf16.mxu0 %v6977_v46  ;;  %8031 = vmatpush3.bf16.msra.mxu0 %v8529_v38  ;;  %v6788_v58 = vcombine.low %v8645_v56, %v9673_v23  ;;  %v3765_v46 = vsel %vm9420_vm14, %v6947_v17, %v3764_v4  ;;  %v9683_v38 = vld [vmem:[#allocation2 + $0x7c] sm:$0xf]  ;;  %v6978_v56 = vcombine.low %v3758_v34, %v3761_v63  ;;  %v6948_v17 = vrot.slane %v3651_v12, 9  ;;  %v8651_v63 = vld [vmem:[#allocation2 + $0x94] sm:$0xf] }
 0x114   : > { %8032 = vmatprep.subr.bf16.mxu0 %v8533_v13  ;;  %v6789_v26 = vcombine.low %v8647_v54, %v9683_v38  ;;  %v6979_v4 = vcombine.low %v3765_v46, %v3768_v55  ;;  %v3773_v51 = vrot.slane %v3771_v59, 4  ;;  %v8541_v54 = vld [vmem:[%s10738_s1 + $0x1b8] sm:$0xff]   ;;  %v3785_v12 = vrot.slane %v8651_v63, 5 }
 0x115   : > { %7845 = vmatpush3.bf16.msra.mxu1 %v8542_v45  ;;  %v3653_v45 = vld [vmem:[#allocation2 + $0x90] sm:$0xe]  ;;  %v3772_v34 = vsel %vm9420_vm14, %v6948_v17, %v3771_v59  ;;  %v3779_v55 = vsel %vm9420_vm14, %v6949_v41, %v3778_v32  ;;  %v9704_v59 = vld [vmem:[%s10738_s1 + $0x1c0] sm:$0xff]   ;;  %v6793_v63 = vcombine.low %v9364_v0, %v9374_v35  ;;  %v2018_v0 = vld [vmem:[#allocation2 + $0xc] sm:$0xe]  ;;  %v2084_v35 = vrot.slane %v9484_v5, 5 }
 0x116   : > { %7878 = vmatprep.subr.bf16.mxu1 %v9665_v57  ;;  %v3787_v62 = vrot.slane %v3785_v12, 4  ;;  %v10804_v5 = vcombine.low %v9391_v21, %v9424_v60 }
 0x117   : > { %8033 = vmatpush3.bf16.msra.mxu0 %v8533_v13  ;;  %v3775_v13 = vsel %vm9420_vm14, %v3773_v51, %v3774_v31  ;;  %v6950_v51 = vrot.slane %v3653_v45, 9  ;;  %v8656_v31 = vld [vmem:[#allocation2 + $0x98] sm:$0x1]  ;;  %v6792_v45 = vcombine.low %v9331_v43, %v9337_v10 }
 0x118   : > { %7815 = vmatmul.mubr.bf16.gmra.mrb[16].mxu1 %v6788_v58  ;;  %8034 = vmatprep.subr.bf16.mxu0 %v8537_v27  ;;  %v9694_v58 = vld [vmem:[#allocation2 + $0x88] sm:$0xf]  ;;  %v3788_v41 = vrot.slane %v8656_v31, 5  ;;  %v2086_v31 = vrot.slane %v2084_v35, 4 }
 0x119   : > { %7818 = vmatprep.mubr.bf16.mxu1 %v6789_v26  ;;  %v6790_v46 = vcombine.low %v8653_v40, %v9694_v58  ;;  %v3782_v26 = vsel %vm9420_vm14, %v3780_v44, %v3781_v28  ;;  %v2070_v28 = vrot.slane %v9462_v53, 5  ;;  %v3786_v44 = vsel %vm9420_vm14, %v6950_v51, %v3785_v12  ;;  %v347_v40 = vld [vmem:[#allocation2 + $0xcc] sm:$0x1]  ;;  %v2020_v51 = vld [vmem:[#allocation2 + $0x24] sm:$0xe] }
 0x11a   : > { %8003 = vmatmul.mubr.bf16.gmra.mrb[12].mxu0 %v6978_v56  ;;  %v9706_v56 = vld [vmem:[#allocation2 + $0x94] sm:$0xf]  ;;  %v6981_v17 = vcombine.low %v3779_v55, %v3782_v26  ;;  %v3789_v32 = vsel %vm9420_vm14, %v3787_v62, %v3788_v41  ;;  %v348_v12 = vsel %vm8778_vm3, 0, %v347_v40  ;;  %v2077_v26 = vrot.slane %v9477_v25, 5  ;;  %v8659_v41 = vld [vmem:[#allocation2 + $0x20] sm:$0x1] }
 0x11b   : > { %8006 = vmatprep.mubr.bf16.mxu0 %v6979_v4  ;;  %8035 = vmatpush3.bf16.msra.mxu0 %v8537_v27  ;;  %v6791_v27 = vcombine.low %v8654_v50, %v9706_v56  ;;  %v6980_v4 = vcombine.low %v3772_v34, %v3775_v13  ;;  %v2017_v34 = vld [vmem:[#allocation2] sm:$0xe]  ;;  %v8657_v13 = vld [vmem:[#allocation2 + $0x8] sm:$0x1]  ;;  %v2072_v53 = vrot.slane %v2070_v28, 4  ;;  %v6804_v25 = vrot.slane %v2018_v0, 9 }
 0x11c   : > { %8036 = vmatprep.subr.bf16.mxu0 %v8541_v54  ;;  %v6803_v55 = vrot.slane %v2017_v34, 9  ;;  %349 = vst [vmem:[#allocation2 + $0xcc] sm:$0x1] %v348_v12  ;;  %v8658_v50 = vld [vmem:[#allocation2 + $0x14] sm:$0x1]  ;;  %v6805_v62 = vrot.slane %v2019_v14, 9 }
 0x11d   : > { %v2078_v22 = vsel %vm9420_vm14, %v6804_v25, %v2077_v26  ;;  %v6806_v34 = vrot.slane %v2020_v51, 9  ;;  %v2105_v40 = vrot.slane %v9549_v33, 5  ;;  %v8550_v33 = vld [vmem:[%s10738_s1 + $0xc8] sm:$0xff]  }
 0x11e   : > { %v2071_v43 = vsel %vm9420_vm14, %v6803_v55, %v2070_v28  ;;  %v2087_v28 = vrot.slane %v8659_v41, 5  ;;  %v2100_v55 = vrot.slane %v2098_v52, 4 }
 0x11f   : > { %8037 = vmatpush3.bf16.msra.mxu0 %v8541_v54  ;;  %v2073_v54 = vrot.slane %v8657_v13, 5  ;;  %v2094_v13 = vrot.slane %v8660_v11, 5  ;;  %v8665_v11 = vld [vmem:[#allocation2 + $0x68] sm:$0x1] }
 0x120   : > { %7819 = vmatmul.mubr.bf16.gmra.mrb[20].mxu1 %v6790_v46  ;;  %8070 = vmatprep.subr.bf16.mxu0 %v9704_v59  ;;  %v6982_v46 = vcombine.low %v3786_v44, %v3789_v32  ;;  %v2091_v44 = vrot.slane %v9503_v30, 5  ;;  %v2021_v32 = vld [vmem:[#allocation2 + $0x30] sm:$0xe]  ;;  %v2085_v30 = vsel %vm9420_vm14, %v6805_v62, %v2084_v35  ;;  %v2088_v21 = vsel %vm9420_vm14, %v2086_v31, %v2087_v28  ;;  %v8543_v35 = vld [vmem:[#allocation2 + $0x18] sm:$0xff]  }
 0x121   : > { %7822 = vmatprep.mubr.bf16.mxu1 %v6791_v27  ;;  %v2074_v10 = vsel %vm9420_vm14, %v2072_v53, %v2073_v54  ;;  %v2080_v27 = vrot.slane %v8658_v50, 5  ;;  %v10806_v54 = vcombine.low %v9621_v8, %v9638_v39  ;;  %v2022_v53 = vld [vmem:[#allocation2 + $0x3c] sm:$0xe]  ;;  %v6837_v12 = vcombine.low %v2085_v30, %v2088_v21  ;;  %v2024_v39 = vld [vmem:[#allocation2 + $0x54] sm:$0xe]  ;;  %v8545_v21 = vld [vmem:[#allocation2 + $0x24] sm:$0xff]  }
 0x122   : > { %8007 = vmatmul.mubr.bf16.gmra.mrb[16].mxu0 %v6980_v4  ;;  %v6835_v4 = vcombine.low %v2071_v43, %v2074_v10  ;;  %v2093_v60 = vrot.slane %v2091_v44, 4  ;;  %v2112_v43 = vrot.slane %v9552_v47, 5  ;;  %v2119_v10 = vrot.slane %v9562_v42, 5  ;;  %v8662_v47 = vld [vmem:[#allocation2 + $0x44] sm:$0x1] }
 0x123   : > { %8010 = vmatprep.mubr.bf16.mxu0 %v6981_v17  ;;  %v2079_v17 = vrot.slane %v2077_v26, 4  ;;  %v2023_v26 = vld [vmem:[#allocation2 + $0x48] sm:$0xe]  ;;  %v2092_v0 = vsel %vm9420_vm14, %v6806_v34, %v2091_v44  ;;  %v6808_v50 = vrot.slane %v2022_v53, 9  ;;  %v2126_v62 = vrot.slane %v9633_v7, 5 }
 0x124   : > { %v2095_v8 = vsel %vm9420_vm14, %v2093_v60, %v2094_v13  ;;  %v6809_v25 = vrot.slane %v2023_v26, 9  ;;  %v2114_v31 = vrot.slane %v2112_v43, 4  ;;  %v6810_v41 = vrot.slane %v2024_v39, 9  ;;  %v8664_v44 = vld [vmem:[#allocation2 + $0x5c] sm:$0x1] }
 0x125   : > { %v2121_v28 = vrot.slane %v2119_v10, 4  ;;  %v2133_v7 = vrot.slane %v9673_v23, 5  ;;  %v9774_v34 = vsel %vm9420_vm14, %v6808_v50, %v2105_v40  ;;  %v2027_v30 = vld [vmem:[#allocation2 + $0x78] sm:$0xe]  ;;  %v2128_v60 = vrot.slane %v2126_v62, 4  ;;  %v8562_v50 = vld [vmem:[%s10738_s1 + $0xe0] sm:$0xff]  }
 0x126   : > { %v2129_v13 = vrot.slane %v8665_v11, 5  ;;  %v9782_v23 = vsel %vm9420_vm14, %v6809_v25, %v2112_v43  ;;  %v8666_v53 = vld [vmem:[#allocation2 + $0x74] sm:$0x1]  ;;  %v2140_v26 = vrot.slane %v9683_v38, 5 }
 0x127   : > { %v8547_v43 = vld [vmem:[#allocation2 + $0x30] sm:$0xff]  }
 0x128   : > { %7823 = vmatmul.mubr.bf16.gmra.mrb[24].mxu1 %v6792_v45  ;;  %v10805_v45 = vcombine.low %v9597_v6, %v9614_v20  ;;  %v8661_v6 = vld [vmem:[#allocation2 + $0x38] sm:$0x1]  ;;  %v9810_v39 = vsel %vm9420_vm14, %v2128_v60, %v2129_v13  ;;  %v8566_v13 = vld [vmem:[%s10738_s1 + $0xe8] sm:$0xff]  }
 0x129   : > { %7826 = vmatprep.mubr.bf16.mxu1 %v6793_v63  ;;  %v6807_v63 = vrot.slane %v2021_v32, 9  ;;  %v2101_v20 = vrot.slane %v8661_v6, 5  ;;  %v2025_v32 = vld [vmem:[#allocation2 + $0x60] sm:$0xe] }
 0x12a   : > { %8011 = vmatmul.mubr.bf16.gmra.mrb[20].mxu0 %v6982_v46 }
 0x12b   : > { %8014 = vmatprep.mubr.bf16.mxu0 %v6983_v16  ;;  %v2081_v16 = vsel %vm9420_vm14, %v2079_v17, %v2080_v27  ;;  %v2099_v14 = vsel %vm9420_vm14, %v6807_v63, %v2098_v52  ;;  %v2107_v27 = vrot.slane %v2105_v40, 4  ;;  %v2102_v42 = vsel %vm9420_vm14, %v2100_v55, %v2101_v20  ;;  %v8663_v17 = vld [vmem:[#allocation2 + $0x50] sm:$0x1]  ;;  %v2028_v55 = vld [vmem:[#allocation2 + $0x84] sm:$0xe] }
 0x12c   : > { %v6836_v46 = vcombine.low %v2078_v22, %v2081_v16  ;;  %v2115_v51 = vrot.slane %v8663_v17, 5  ;;  %v10807_v52 = vcombine.low %v9631_v2, %v9646_v24  ;;  %v8554_v22 = vld [vmem:[%s10738_s1 + $0xd0] sm:$0xff]   ;;  %v6839_v16 = vcombine.low %v2099_v14, %v2102_v42 }
 0x12d   : > { %v6811_v24 = vrot.slane %v2025_v32, 9  ;;  %v9790_v63 = vsel %vm9420_vm14, %v6810_v41, %v2119_v10  ;;  %v2135_v20 = vrot.slane %v2133_v7, 4  ;;  %v2147_v10 = vrot.slane %v9694_v58, 5 }
 0x12e   : > { %v2142_v17 = vrot.slane %v2140_v26, 4 }
 0x130   : > { %7827 = vmatmul.mubr.bf16.gmra.mrb[28].mxu1 %v10804_v5  ;;  %v2122_v5 = vrot.slane %v8664_v44, 5  ;;  %v2149_v44 = vrot.slane %v2147_v10, 4 }
 0x131   : > { %7846 = vmatprep.mubr.bf16.mxu1 %v6835_v4  ;;  %v2108_v4 = vrot.slane %v8662_v47, 5  ;;  %v4528_v47 = vld [vmem:[#allocation2 + $0x1c] sm:$0xf] }
 0x132   : > { %8015 = vmatmul.mubr.bf16.gmra.mrb[24].mxu0 %v10805_v45  ;;  %v2026_v45 = vld [vmem:[#allocation2 + $0x6c] sm:$0xe]  ;;  %v9794_v40 = vsel %vm9420_vm14, %v2121_v28, %v2122_v5  ;;  %v8668_v5 = vld [vmem:[#allocation2 + $0x8c] sm:$0x1] }
 0x133   : > { %8018 = vmatprep.mubr.bf16.mxu0 %v10806_v54  ;;  %v9778_v2 = vsel %vm9420_vm14, %v2107_v27, %v2108_v4  ;;  %v9786_v54 = vsel %vm9420_vm14, %v2114_v31, %v2115_v51  ;;  %v6812_v6 = vrot.slane %v2026_v45, 9  ;;  %v6842_v14 = vcombine.low %v9790_v63, %v9794_v40  ;;  %v9824_v4 = vld [vmem:[%s10738_s1 + $0x1d0] sm:$0xff]   ;;  %v8667_v51 = vld [vmem:[#allocation2 + $0x80] sm:$0x1]  ;;  %v4530_v31 = vld [vmem:[#allocation2 + $0x24] sm:$0xf] }
 0x134   : > { %v6840_v38 = vcombine.low %v9774_v34, %v9778_v2  ;;  %v6841_v58 = vcombine.low %v9782_v23, %v9786_v54  ;;  %v6814_v27 = vrot.slane %v2028_v55, 9  ;;  %v2150_v32 = vrot.slane %v8668_v5, 5  ;;  %v8556_v55 = vld [vmem:[%s10738_s1 + $0x1d8] sm:$0xff]   ;;  %v4548_v63 = vld [vmem:[#allocation2 + $0x6c] sm:$0xf] }
 0x135   : > { %v9828_v42 = vsel %vm9420_vm14, %v6812_v6, %v2133_v7  ;;  %v8549_v7 = vld [vmem:[#allocation2 + $0x3c] sm:$0xff]   ;;  %v4585_v45 = vshll.u32 %v4528_v47, 16  ;;  %v4603_v60 = vshll.u32 %v4530_v31, 16  ;;  %v2154_v23 = vrot.slane %v9706_v56, 5 }
 0x136   : > { %v9845_v2 = vsel %vm9420_vm14, %v6814_v27, %v2147_v10  ;;  %v9860_v6 = vsel %vm9420_vm14, %v2149_v44, %v2150_v32  ;;  %v8670_v27 = vld [vmem:[#allocation2 + $0xa0] sm:$0xf]  ;;  %v4533_v32 = vld [vmem:[#allocation2 + $0x30] sm:$0xf] }
 0x137   : > { %v9865_v10 = vrot.slane %v4585_v45, 5  ;;  %v2156_v44 = vrot.slane %v2154_v23, 4  ;;  %v10808_v3 = vcombine.low %v9845_v2, %v9860_v6 }
 0x138   : > { %7847 = vmatmul.mubr.bf16.vlgmr.msra.gmra.mrb[0].mxu1 %v6836_v46  ;;  %v8558_v46 = vld [vmem:[%s10738_s1 + $0xd8] sm:$0xff]  }
 0x139   : > { %7879 = vmatpush3.bf16.msra.mxu1 %v9665_v57  ;;  %7850 = vmatprep.mubr.bf16.mxu1 %v6837_v12  ;;  %v6838_v57 = vcombine.low %v2092_v0, %v2095_v8  ;;  %v2136_v12 = vrot.slane %v8666_v53, 5  ;;  %v6813_v0 = vrot.slane %v2027_v30, 9  ;;  %v8548_v8 = vld [vmem:[%s10738_s1 + $0x1c8] sm:$0xff]   ;;  %v8669_v53 = vld [vmem:[#allocation2 + $0x98] sm:$0x1] }
 0x13a   : > { %8019 = vmatmul.mubr.bf16.gmra.mrb[28].mxu0 %v10807_v52  ;;  %7880 = vmatprep.subr.bf16.mxu1 %v8550_v33  ;;  %v2029_v52 = vld [vmem:[#allocation2 + $0x90] sm:$0xe]  ;;  %v8551_v30 = vld [vmem:[#allocation2 + $0x48] sm:$0xff]  }
 0x13b   : > { %8038 = vmatprep.mubr.bf16.mxu0 %v8543_v35  ;;  %v4527_v35 = vld [vmem:[#allocation2 + $0x18] sm:$0xf]  ;;  %v9832_v25 = vsel %vm9420_vm14, %v2135_v20, %v2136_v12  ;;  %v9839_v28 = vsel %vm9420_vm14, %v6813_v0, %v2140_v26  ;;  %v6815_v20 = vrot.slane %v2029_v52, 9  ;;  %v2157_v12 = vrot.slane %v8669_v53, 5 }
 0x13c   : > { %v4579_v34 = vshll.u32 %v4527_v35, 16 }
 0x13d   : > { %7881 = vmatpush3.bf16.msra.mxu1 %v8550_v33  ;;  %v9806_v33 = vsel %vm9420_vm14, %v6811_v24, %v2126_v62  ;;  %v2143_v62 = vrot.slane %v8667_v51, 5  ;;  %v4600_v24 = vshrl.u32 %v4530_v31, 16  ;;  %v9871_v51 = vld [vmem:[#allocation2 + $0x2c] sm:$0x1]  ;;  %v9883_v52 = vsel %vm9420_vm14, %v6815_v20, %v2154_v23 }
 0x13e   : > { %7882 = vmatprep.subr.bf16.mxu1 %v8554_v22  ;;  %v6843_v41 = vcombine.low %v9806_v33, %v9810_v39  ;;  %v4581_v0 = vrot.slane %v4579_v34, 5  ;;  %v8673_v34 = vld [vmem:[#allocation2 + $0xb8] sm:$0xf] }
 0x13f   : > { %v9849_v11 = vsel %vm9420_vm14, %v2142_v17, %v2143_v62  ;;  %v9869_v17 = vld [vmem:[#allocation2 + $0xa8] sm:$0xe]  ;;  %v4602_v62 = vrot.slane %v4600_v24, 4  ;;  %v2175_v45 = vrot.slane %v8673_v34, 5  ;;  %v9923_v33 = vld [vmem:[#allocation2 + $0x38] sm:$0x1] }
 0x140   : > { %7851 = vmatmul.mubr.bf16.gmra.mrb[4].mxu1 %v6838_v57  ;;  %v2030_v57 = vld [vmem:[#allocation2 + $0x9c] sm:$0xe] }
 0x141   : > { %7854 = vmatprep.mubr.bf16.mxu1 %v6839_v16  ;;  %7883 = vmatpush3.bf16.msra.mxu1 %v8554_v22  ;;  %v4531_v22 = vld [vmem:[#allocation2 + $0x28] sm:$0xf]  ;;  %v4576_v16 = vshrl.u32 %v4527_v35, 16  ;;  %v6816_v26 = vrot.slane %v2030_v57, 9  ;;  %v6845_v35 = vcombine.low %v9839_v28, %v9849_v11  ;;  %v8672_v57 = vld [vmem:[#allocation2 + $0xac] sm:$0xf] }
 0x142   : > { %8039 = vmatmul.mubr.bf16.vlgmr.msra.gmra.mrb[0].mxu0 %v8545_v21  ;;  %7884 = vmatprep.subr.bf16.mxu1 %v8558_v46  ;;  %v6844_v21 = vcombine.low %v9828_v42, %v9832_v25  ;;  %v4609_v54 = vshll.u32 %v4531_v22, 16 }
 0x143   : > { %8071 = vmatpush3.bf16.msra.mxu0 %v9704_v59  ;;  %8042 = vmatprep.mubr.bf16.mxu0 %v8547_v43  ;;  %v4589_v59 = vshrl.u32 %v4528_v47, 16  ;;  %v9862_v43 = vld [vmem:[#allocation2 + $0x20] sm:$0x1]  ;;  %v4578_v56 = vrot.slane %v4576_v16, 4  ;;  %v2161_v47 = vrot.slane %v8670_v27, 5  ;;  %v2168_v16 = vrot.slane %v8672_v57, 5 }
 0x144   : > { %8072 = vmatprep.subr.bf16.mxu0 %v8548_v8  ;;  %v4595_v23 = vshll.u32 %v9862_v43, 16  ;;  %v4624_v27 = vshrl.u32 %v4533_v32, 16  ;;  %v8564_v57 = vld [vmem:[%s10738_s1 + $0x1e8] sm:$0xff]   ;;  %v8574_v43 = vld [vmem:[%s10738_s1 + $0xf8] sm:$0xff]  }
 0x145   : > { %7885 = vmatpush3.bf16.msra.mxu1 %v8558_v46  ;;  %v4613_v46 = vshrl.u32 %v4531_v22, 16  ;;  %v8671_v22 = vld [vmem:[#allocation2 + $0xa4] sm:$0x1]  ;;  %v4582_v24 = vor.u32 %v4581_v0, %v4578_v56  ;;  %v2163_v20 = vrot.slane %v2161_v47, 4  ;;  %v6817_v56 = vrot.slane %v9869_v17, 9 }
 0x146   : > { %7886 = vmatprep.subr.bf16.mxu1 %v8562_v50  ;;  %v4619_v0 = vshll.u32 %v9871_v51, 16  ;;  %v8675_v17 = vld [vmem:[#allocation2 + $0xbc] sm:$0x1]  ;;  %v4626_v51 = vrot.slane %v4624_v27, 4 }
 0x147   : > { %8073 = vmatpush3.bf16.msra.mxu0 %v8548_v8  ;;  %v4591_v8 = vrot.slane %v4589_v59, 4  ;;  %v4615_v5 = vrot.slane %v4613_v46, 4  ;;  %v8560_v59 = vld [vmem:[%s10738_s1 + $0x1e0] sm:$0xff]   ;;  %v4583_v34 = vrot.slane %v4582_v24, 4 }
 0x148   : > { %7855 = vmatmul.mubr.bf16.gmra.mrb[8].mxu1 %v6840_v38  ;;  %8074 = vmatprep.subr.bf16.mxu0 %v9824_v4  ;;  %v4605_v38 = vrot.slane %v4603_v60, 5  ;;  %v8555_v46 = vld [vmem:[#allocation2 + $0x60] sm:$0xff]  }
 0x149   : > { %7858 = vmatprep.mubr.bf16.mxu1 %v6841_v58  ;;  %7887 = vmatpush3.bf16.msra.mxu1 %v8562_v50  ;;  %v8570_v58 = vld [vmem:[%s10738_s1 + $0xf0] sm:$0xff]   ;;  %v9878_v50 = vrot.slane %v4609_v54, 5  ;;  %v4592_v60 = vor.u32 %v4591_v8, %v9865_v10  ;;  %v9921_v24 = vld [vmem:[%s10739_s2] sm:$0xff]  }
 0x14a   : > { %8043 = vmatmul.mubr.bf16.gmra.mrb[4].mxu0 %v8549_v7  ;;  %7888 = vmatprep.subr.bf16.mxu1 %v8566_v13  ;;  %v2164_v7 = vrot.slane %v8671_v22, 5  ;;  %v8553_v54 = vld [vmem:[#allocation2 + $0x54] sm:$0xff]   ;;  %v4606_v53 = vor.u32 %v4605_v38, %v4602_v62  ;;  %v4627_v22 = vshll.u32 %v4533_v32, 16  ;;  %v8674_v62 = vld [vmem:[#allocation2 + $0xb0] sm:$0x1] }
 0x14b   : > { %8046 = vmatprep.mubr.bf16.mxu0 %v8551_v30  ;;  %8075 = vmatpush3.bf16.msra.mxu0 %v9824_v4  ;;  %v9890_v30 = vsel %vm9420_vm14, %v6816_v26, %v2161_v47  ;;  %v2032_v4 = vld [vmem:[#allocation2 + $0xb4] sm:$0xe]  ;;  %v9899_v26 = vsel %vm9420_vm14, %v2156_v44, %v2157_v12  ;;  %v2170_v47 = vrot.slane %v2168_v16, 4  ;;  %v2171_v38 = vrot.slane %v8674_v62, 5 }
 0x14c   : > { %8076 = vmatprep.subr.bf16.mxu0 %v8556_v55  ;;  %v9907_v8 = vld [vmem:[#allocation2 + $0x34] sm:$0xf]  ;;  %v6818_v32 = vrot.slane %v2032_v4, 9  ;;  %v2177_v12 = vrot.slane %v2175_v45, 4  ;;  %v2178_v44 = vrot.slane %v8675_v17, 5  ;;  %v4593_v31 = vrot.slane %v4592_v60, 4 }
 0x14d   : > { %7889 = vmatpush3.bf16.msra.mxu1 %v8566_v13  ;;  %v4616_v13 = vor.u32 %v4615_v5, %v9878_v50  ;;  %v4597_v5 = vrot.slane %v4595_v23, 5  ;;  %v4629_v62 = vrot.slane %v4627_v22, 5  ;;  %v4633_v4 = vshll.u32 %v9907_v8, 16  ;;  %v4536_v23 = vld [vmem:[#allocation2 + $0x3c] sm:$0xf] }
 0x14e   : > { %7890 = vmatprep.subr.bf16.mxu1 %v8570_v58  ;;  %v4637_v39 = vshrl.u32 %v9907_v8, 16  ;;  %v9936_v60 = vsel %vm9420_vm14, %v6818_v32, %v2175_v45 }
 0x14f   : > { %8077 = vmatpush3.bf16.msra.mxu0 %v8556_v55  ;;  %v4607_v55 = vrot.slane %v4606_v53, 4  ;;  %v4617_v40 = vrot.slane %v4616_v13, 4  ;;  %v4598_v45 = vsel %vm8847_vm11, %v4593_v31, %v4597_v5  ;;  %v4630_v27 = vor.u32 %v4629_v62, %v4626_v51  ;;  %v9962_v13 = vld [vmem:[#allocation2 + $0x4c] sm:$0xf]  ;;  %v9992_v62 = vld [vmem:[#allocation2 + $0x44] sm:$0x1] }
 0x150   : > { %7859 = vmatmul.mubr.bf16.gmra.mrb[12].mxu1 %v6842_v14  ;;  %8078 = vmatprep.subr.bf16.mxu0 %v8560_v59  ;;  %v4621_v14 = vrot.slane %v4619_v0, 5  ;;  %v9959_v22 = vrot.slane %v4633_v4, 5  ;;  %v8557_v0 = vld [vmem:[#allocation2 + $0x6c] sm:$0xff]   ;;  %v4639_v31 = vrot.slane %v4637_v39, 4  ;;  %v4681_v5 = vshll.u32 %v9962_v13, 16 }
 0x151   : > { %7862 = vmatprep.mubr.bf16.mxu1 %v6843_v41  ;;  %7891 = vmatpush3.bf16.msra.mxu1 %v8570_v58  ;;  %v9928_v41 = vsel %vm9420_vm14, %v2163_v20, %v2164_v7  ;;  %v9932_v58 = vsel %vm9420_vm14, %v6817_v56, %v2168_v16  ;;  %v9947_v7 = vsel %vm9420_vm14, %v2177_v12, %v2178_v44  ;;  %v4539_v20 = vld [vmem:[#allocation2 + $0x48] sm:$0xf]  ;;  %v4643_v56 = vshll.u32 %v9923_v33, 16  ;;  %v4542_v4 = vld [vmem:[#allocation2 + $0x54] sm:$0xf] }
 0x152   : > { %8047 = vmatmul.mubr.bf16.gmra.mrb[8].mxu0 %v8553_v54  ;;  %7892 = vmatprep.subr.bf16.mxu1 %v8574_v43  ;;  %v8568_v54 = vld [vmem:[%s10738_s1 + $0x1f0] sm:$0xff]   ;;  %v4588_v16 = vsel %vm8847_vm11, %v4583_v34, %v9865_v10  ;;  %v4612_v53 = vsel %vm8847_vm11, %v4607_v55, %v9878_v50  ;;  %v4622_v10 = vsel %vm8847_vm11, %v4617_v40, %v4621_v14  ;;  %v4672_v12 = vshrl.u32 %v4539_v20, 16  ;;  %v9994_v40 = vld [vmem:[#allocation2 + $0x58] sm:$0xf]  ;;  %v4545_v39 = vld [vmem:[#allocation2 + $0x60] sm:$0xf] }
 0x153   : > { %8050 = vmatprep.mubr.bf16.mxu0 %v8555_v46  ;;  %8079 = vmatpush3.bf16.msra.mxu0 %v8560_v59  ;;  %v9943_v59 = vsel %vm9420_vm14, %v2170_v47, %v2171_v38  ;;  %v9954_v46 = vld [vmem:[#allocation2 + $0x40] sm:$0xf]  ;;  %v4648_v47 = vshrl.u32 %v4536_v23, 16  ;;  %v8559_v38 = vld [vmem:[#allocation2 + $0x78] sm:$0xff]   ;;  %v4675_v17 = vshll.u32 %v4539_v20, 16  ;;  %v4685_v55 = vshrl.u32 %v9962_v13, 16 }
 0x154   : > { %8080 = vmatprep.subr.bf16.mxu0 %v8564_v57  ;;  %v4657_v50 = vshll.u32 %v9954_v46, 16  ;;  %v4661_v32 = vshrl.u32 %v9954_v46, 16  ;;  %v9986_v25 = vcombine.low %v4588_v16, %v4598_v45  ;;  %v9990_v51 = vrot.slane %v4643_v56, 5 }
 0x155   : > { %7893 = vmatpush3.bf16.msra.mxu1 %v8574_v43  ;;  %v4651_v43 = vshll.u32 %v4536_v23, 16  ;;  %v9996_v14 = vrot.slane %v4630_v27, 4  ;;  %v4640_v28 = vor.u32 %v4639_v31, %v9959_v22  ;;  %v4650_v11 = vrot.slane %v4648_v47, 4  ;;  %v10006_v27 = vld [vmem:[%s10738_s1 + $0x200] sm:$0xff]   ;;  %v10010_v47 = vld [vmem:[#allocation2 + $0x50] sm:$0x1] }
 0x156   : > { %8166 = vmatprep.subr.bf16.mxu1 %v9921_v24  ;;  %v9999_v23 = vrot.slane %v4657_v50, 5  ;;  %v4663_v16 = vrot.slane %v4661_v32, 4  ;;  %v4674_v45 = vrot.slane %v4672_v12, 4  ;;  %v4677_v20 = vrot.slane %v4675_v17, 5  ;;  %v8561_v32 = vld [vmem:[#allocation2 + $0x84] sm:$0xff]  }
 0x157   : > { %8081 = vmatpush3.bf16.msra.mxu0 %v8564_v57  ;;  %v8572_v57 = vld [vmem:[%s10738_s1 + $0x1f8] sm:$0xff]   ;;  %v10008_v56 = vrot.slane %v4681_v5, 5  ;;  %v4699_v31 = vshll.u32 %v4542_v4, 16  ;;  %v4723_v50 = vshll.u32 %v4545_v39, 16  ;;  %v4667_v17 = vshll.u32 %v9992_v62, 16 }
 0x158   : > { %7863 = vmatmul.mubr.bf16.gmra.mrb[16].mxu1 %v6844_v21  ;;  %8082 = vmatprep.subr.bf16.mxu0 %v8568_v54  ;;  %v9988_v21 = vcombine.low %v4612_v53, %v4622_v10  ;;  %v10001_v53 = vld [vmem:[#allocation2 + $0x64] sm:$0xf]  ;;  %v4696_v10 = vshrl.u32 %v4542_v4, 16  ;;  %v8563_v4 = vld [vmem:[#allocation2 + $0x90] sm:$0xff]   ;;  %v10021_v42 = vrot.slane %v4640_v28, 4  ;;  %v4664_v44 = vor.u32 %v4663_v16, %v9999_v23 }
 0x159   : > { %7866 = vmatprep.mubr.bf16.mxu1 %v6845_v35  ;;  %v4653_v35 = vrot.slane %v4651_v43, 5  ;;  %v4709_v43 = vshrl.u32 %v9994_v40, 16  ;;  %v4729_v5 = vshll.u32 %v10001_v53, 16  ;;  %v4691_v19 = vshll.u32 %v10010_v47, 16  ;;  %v10033_v28 = vld [vmem:[#allocation2 + $0x5c] sm:$0x1] }
 0x15a   : > { %8051 = vmatmul.mubr.bf16.gmra.mrb[12].mxu0 %v8557_v0  ;;  %v4687_v0 = vrot.slane %v4685_v55, 4  ;;  %v4733_v55 = vshrl.u32 %v10001_v53, 16  ;;  %v4698_v36 = vrot.slane %v4696_v10, 4  ;;  %v4701_v61 = vrot.slane %v4699_v31, 5 }
 0x15b   : > { %8054 = vmatprep.mubr.bf16.mxu0 %v8559_v38  ;;  %8083 = vmatpush3.bf16.msra.mxu0 %v8568_v54  ;;  %v4705_v54 = vshll.u32 %v9994_v40, 16  ;;  %v4720_v38 = vshrl.u32 %v4545_v39, 16  ;;  %v4654_v34 = vor.u32 %v4653_v35, %v4650_v11  ;;  %v4678_v39 = vor.u32 %v4677_v20, %v4674_v45 }
 0x15c   : > { %8084 = vmatprep.subr.bf16.mxu0 %v8572_v57  ;;  %v4688_v12 = vor.u32 %v4687_v0, %v10008_v56  ;;  %v4711_v35 = vrot.slane %v4709_v43, 4  ;;  %v4725_v2 = vrot.slane %v4723_v50, 5  ;;  %v10039_v6 = vrot.slane %v4729_v5, 5  ;;  %v10046_v5 = vld [vmem:[#allocation2 + $0x70] sm:$0xf] }
 0x15d   : > { %v10035_v11 = vrot.slane %v4705_v54, 5  ;;  %v4722_v16 = vrot.slane %v4720_v38, 4  ;;  %v4735_v45 = vrot.slane %v4733_v55, 4  ;;  %v4744_v20 = vshrl.u32 %v4548_v63, 16  ;;  %v403_v54 = vld [vmem:[#allocation2 + $0xd4] sm:$0x1] }
 0x15e   : > { %v4747_v0 = vshll.u32 %v4548_v63, 16  ;;  %v4665_v10 = vrot.slane %v4664_v44, 4  ;;  %v4669_v31 = vrot.slane %v4667_v17, 5  ;;  %v4679_v43 = vrot.slane %v4678_v39, 4 }
 0x15f   : > { %8085 = vmatpush3.bf16.msra.mxu0 %v8572_v57  ;;  %v10809_v57 = vcombine.low %v9883_v52, %v9899_v26  ;;  %v4646_v52 = vsel %vm8847_vm11, %v10021_v42, %v9990_v51  ;;  %v4655_v26 = vrot.slane %v4654_v34, 4  ;;  %v4689_v38 = vrot.slane %v4688_v12, 4 }
 0x160   : > { %7867 = vmatmul.mubr.bf16.gmra.mrb[20].mxu1 %v10808_v3  ;;  %8118 = vmatprep.subr.bf16.mxu0 %v10006_v27  ;;  %v10037_v3 = vld [vmem:[#allocation2 + $0x68] sm:$0x1]  ;;  %v4693_v50 = vrot.slane %v4691_v19, 5  ;;  %v4702_v55 = vor.u32 %v4701_v61, %v4698_v36  ;;  %v4712_v63 = vor.u32 %v4711_v35, %v10035_v11  ;;  %v4736_v34 = vor.u32 %v4735_v45, %v10039_v6 }
 0x161   : > { %7870 = vmatprep.mubr.bf16.mxu1 %v10809_v57  ;;  %v4739_v57 = vshll.u32 %v10037_v3, 16  ;;  %v4746_v44 = vrot.slane %v4744_v20, 4  ;;  %v4749_v42 = vrot.slane %v4747_v0, 5  ;;  %v404_v51 = vsel %vm8786_vm5, 0, %v403_v54  ;;  %v8567_v19 = vld [vmem:[#allocation2 + $0xa8] sm:$0xff]  }
 0x162   : > { %8055 = vmatmul.mubr.bf16.gmra.mrb[16].mxu0 %v8561_v32  ;;  %v4715_v32 = vshll.u32 %v10033_v28, 16  ;;  %v4660_v12 = vsel %vm8847_vm11, %v4655_v26, %v9999_v23  ;;  %v4670_v61 = vsel %vm8847_vm11, %v4665_v10, %v4669_v31  ;;  %v4753_v36 = vshll.u32 %v10046_v5, 16  ;;  %405 = vst [vmem:[#allocation2 + $0xd4] sm:$0x1] %v404_v51  ;;  %v10068_v23 = vld [vmem:[#allocation2 + $0x74] sm:$0x1] }
 0x163   : > { %8058 = vmatprep.mubr.bf16.mxu0 %v8563_v4  ;;  %v4726_v4 = vor.u32 %v4725_v2, %v4722_v16  ;;  %v4757_v17 = vshrl.u32 %v10046_v5, 16  ;;  %v10810_v39 = vcombine.low %v9890_v30, %v9928_v41  ;;  %v4684_v18 = vsel %vm8847_vm11, %v4679_v43, %v10008_v56  ;;  %v10070_v16 = vld [vmem:[#allocation2 + $0x7c] sm:$0xf] }
 0x164   : > { %v4694_v35 = vsel %vm8847_vm11, %v4689_v38, %v4693_v50  ;;  %v4768_v2 = vshrl.u32 %v4551_v29, 16  ;;  %v4771_v45 = vshll.u32 %v4551_v29, 16  ;;  %v10811_v20 = vcombine.low %v9932_v58, %v9943_v59  ;;  %v5283_v38 = vld [vmem:[#allocation2 + $0x30] sm:$0xe] }
 0x165   : > { %v10075_v0 = vrot.slane %v4702_v55, 4  ;;  %v10077_v30 = vrot.slane %v4712_v63, 4  ;;  %v10079_v41 = vrot.slane %v4715_v32, 5  ;;  %v10081_v56 = vrot.slane %v4726_v4, 4  ;;  %v10108_v32 = vld [vmem:[#allocation2 + $0x84] sm:$0xf] }
 0x166   : > { %v10812_v26 = vsel %vm8847_vm11, %v9996_v14, %v9959_v22  ;;  %v10090_v29 = vrot.slane %v4736_v34, 4  ;;  %v10092_v58 = vrot.slane %v4739_v57, 5  ;;  %v4750_v59 = vor.u32 %v4749_v42, %v4746_v44  ;;  %v8575_v55 = vld [vmem:[#allocation2 + $0xc] sm:$0xff]   ;;  %v8569_v44 = vld [vmem:[#allocation2 + $0xb4] sm:$0xff]  }
 0x167   : > { %v10088_v10 = vcombine.low %v10812_v26, %v4646_v52  ;;  %v10094_v31 = vrot.slane %v4753_v36, 5  ;;  %v10096_v54 = vrot.slane %v4757_v17, 4  ;;  %v4763_v43 = vshll.u32 %v10068_v23, 16  ;;  %v8571_v36 = vld [vmem:[#allocation2 + $0xc0] sm:$0xff]   ;;  %v5286_v42 = vld [vmem:[#allocation2 + $0x54] sm:$0xe] }
 0x168   : > { %7871 = vmatmul.mubr.bf16.gmra.mrb[24].mxu1 %v10810_v39  ;;  %v10100_v50 = vcombine.low %v4660_v12, %v4670_v61  ;;  %v10102_v22 = vcombine.low %v4684_v18, %v4694_v35  ;;  %v10104_v14 = vrot.slane %v4768_v2, 4  ;;  %v10106_v52 = vrot.slane %v4771_v45, 5  ;;  %v5284_v61 = vld [vmem:[#allocation2 + $0x3c] sm:$0xe]  ;;  %v5285_v2 = vld [vmem:[#allocation2 + $0x48] sm:$0xe] }
 0x169   : > { %7874 = vmatprep.mubr.bf16.mxu1 %v10811_v20  ;;  %v4781_v34 = vshrl.u32 %v10070_v16, 16  ;;  %v10127_v51 = vrot.slane %v4750_v59, 4  ;;  %v5361_v12 = vrot.slane %v9907_v8, 5  ;;  %v10132_v39 = vrot.slane %v4763_v43, 5  ;;  %v10142_v8 = vld [vmem:[#allocation2 + $0x88] sm:$0xf] }
 0x16a   : > { %8059 = vmatmul.mubr.bf16.gmra.mrb[20].mxu0 %v8565_v15  ;;  %v4777_v15 = vshll.u32 %v10070_v16, 16  ;;  %v4792_v35 = vshrl.u32 %v10108_v32, 16  ;;  %v10813_v45 = vcombine.low %v9936_v60, %v9947_v7  ;;  %v5364_v43 = vrot.slane %v9923_v33, 5  ;;  %v5288_v20 = vld [vmem:[#allocation2 + $0x6c] sm:$0xe] }
 0x16b   : > { %8062 = vmatprep.mubr.bf16.mxu0 %v8567_v19  ;;  %v7077_v19 = vrot.slane %v5283_v38, 9  ;;  %v5363_v59 = vrot.slane %v5361_v12, 4  ;;  %v7078_v57 = vrot.slane %v5284_v61, 9  ;;  %v5368_v60 = vrot.slane %v9954_v46, 5  ;;  %v8576_v61 = vld [vmem:[#allocation2 + $0x18] sm:$0xff]   ;;  %v8573_v17 = vld [vmem:[#allocation2 + $0xcc] sm:$0xff]  }
 0x16c   : > { %v10134_v18 = vrot.slane %v4777_v15, 5  ;;  %v10149_v15 = vrot.slane %v4781_v34, 4  ;;  %v10159_v33 = vrot.slane %v4792_v35, 4  ;;  %v7080_v46 = vrot.slane %v5286_v42, 9  ;;  %v8583_v38 = vld [vmem:[#allocation2 + $0x3c] sm:$0xff]  }
 0x16d   : > { %v10146_v26 = vsel %vm9420_vm14, %v7077_v19, %v5361_v12  ;;  %v10155_v7 = vsel %vm9420_vm14, %v5363_v59, %v5364_v43  ;;  %v7079_v19 = vrot.slane %v5285_v2, 9  ;;  %v5375_v12 = vrot.slane %v9962_v13, 5  ;;  %v8579_v59 = vld [vmem:[#allocation2 + $0x24] sm:$0xff]  }
 0x16e   : > { %10814 = vst [vmem:[#allocation16_spill] sm:$0xff] %v10146_v26  ;;  %10815 = vst [vmem:[#allocation17_spill] sm:$0xff] %v10155_v7  ;;  %v10170_v13 = vsel %vm9420_vm14, %v7078_v57, %v5368_v60  ;;  %v5378_v43 = vrot.slane %v10010_v47, 5  ;;  %v5382_v63 = vrot.slane %v9994_v40, 5  ;;  %v5385_v4 = vrot.slane %v10033_v28, 5 }
 0x16f   : > { %10816 = vst [vmem:[#allocation18_spill] sm:$0xff] %v10170_v13  ;;  %v10174_v35 = vsel %vm9420_vm14, %v7079_v19, %v5375_v12  ;;  %v5377_v2 = vrot.slane %v5375_v12, 4  ;;  %v5392_v19 = vrot.slane %v10037_v3, 5  ;;  %v7082_v12 = vrot.slane %v5288_v20, 9  ;;  %v10213_v20 = vld [vmem:[#allocation2 + $0x8c] sm:$0x1] }
 0x170   : > { %7875 = vmatmul.mubr.bf16.gmra.mrb[28].mxu1 %v10813_v45  ;;  %v5371_v45 = vrot.slane %v9992_v62, 5  ;;  %v8582_v62 = vld [vmem:[%s10739_s2 + $0x8] sm:$0xff]   ;;  %10817 = vst [vmem:[#allocation19_spill] sm:$0xff] %v10174_v35  ;;  %v10193_v28 = vsel %vm9420_vm14, %v7080_v46, %v5382_v63  ;;  %v5384_v42 = vrot.slane %v5382_v63, 4  ;;  %v8586_v46 = vld [vmem:[%s10739_s2 + $0x10] sm:$0xff]  }
 0x171   : > { %7894 = vmatprep.mubr.bf16.mxu1 %v8575_v55  ;;  %v5289_v55 = vld [vmem:[#allocation2 + $0x78] sm:$0xe]  ;;  %v10189_v40 = vsel %vm9420_vm14, %v5377_v2, %v5378_v43  ;;  %10820 = vst [vmem:[#allocation22_spill] sm:$0xff] %v10193_v28  ;;  %v5399_v2 = vrot.slane %v10068_v23, 5  ;;  %v10226_v23 = vld [vmem:[#allocation2 + $0x98] sm:$0x1] }
 0x172   : > { %8063 = vmatmul.mubr.bf16.gmra.mrb[24].mxu0 %v8569_v44  ;;  %v5287_v44 = vld [vmem:[#allocation2 + $0x60] sm:$0xe]  ;;  %10819 = vst [vmem:[#allocation21_spill] sm:$0xff] %v10189_v40  ;;  %v10209_v63 = vsel %vm9420_vm14, %v5384_v42, %v5385_v4  ;;  %v7083_v43 = vrot.slane %v5289_v55, 9  ;;  %v5292_v47 = vld [vmem:[#allocation2 + $0x9c] sm:$0xe] }
 0x173   : > { %8066 = vmatprep.mubr.bf16.mxu0 %v8571_v36  ;;  %v5370_v36 = vrot.slane %v5368_v60, 4  ;;  %v7081_v57 = vrot.slane %v5287_v44, 9  ;;  %v5389_v60 = vrot.slane %v10001_v53, 5  ;;  %v5290_v44 = vld [vmem:[#allocation2 + $0x84] sm:$0xe]  ;;  %10822 = vst [vmem:[#allocation24_spill] sm:$0xff] %v10209_v63 }
 0x174   : > { %v7084_v42 = vrot.slane %v5290_v44, 9  ;;  %v10270_v40 = vld [vmem:[#allocation2 + $0xb0] sm:$0x1] }
 0x175   : > { %v10181_v34 = vsel %vm9420_vm14, %v5370_v36, %v5371_v45  ;;  %v10199_v53 = vsel %vm9420_vm14, %v7081_v57, %v5389_v60  ;;  %v5391_v3 = vrot.slane %v5389_v60, 4  ;;  %v10205_v36 = vld [vmem:[#allocation2 + $0x80] sm:$0x1]  ;;  %v5403_v57 = vrot.slane %v10070_v16, 5  ;;  %v5291_v60 = vld [vmem:[#allocation2 + $0x90] sm:$0xe] }
 0x176   : > { %10818 = vst [vmem:[#allocation20_spill] sm:$0xff] %v10181_v34  ;;  %10821 = vst [vmem:[#allocation23_spill] sm:$0xff] %v10199_v53  ;;  %v5406_v4 = vrot.slane %v10205_v36, 5  ;;  %v5413_v45 = vrot.slane %v10213_v20, 5  ;;  %v7085_v44 = vrot.slane %v5291_v60, 9  ;;  %v7086_v60 = vrot.slane %v5292_v47, 9 }
 0x177   : > { %v10236_v16 = vsel %vm9420_vm14, %v7083_v43, %v5403_v57  ;;  %v5420_v43 = vrot.slane %v10226_v23, 5  ;;  %v10256_v53 = vld [vmem:[#allocation2 + $0xa4] sm:$0x1]  ;;  %v10291_v47 = vld [vmem:[#allocation2 + $0xbc] sm:$0x1] }
 0x178   : > { %7895 = vmatmul.mubr.bf16.vlgmr.msra.gmra.mrb[0].mxu1 %v8576_v61  ;;  %v5396_v61 = vrot.slane %v10046_v5, 5  ;;  %v10224_v5 = vld [vmem:[#allocation2 + $0x94] sm:$0xf]  ;;  %10825 = vst [vmem:[#allocation27_spill] sm:$0xff] %v10236_v16  ;;  %v5441_v16 = vrot.slane %v10291_v47, 5  ;;  %v10853_v48 = vld [vmem:[#allocation19_spill] sm:$0xff] }
 0x179   : > { %8167 = vmatpush3.bf16.msra.mxu1 %v9921_v24  ;;  %7898 = vmatprep.mubr.bf16.mxu1 %v8579_v59  ;;  %v10219_v59 = vsel %vm9420_vm14, %v5391_v3, %v5392_v19  ;;  %v8580_v3 = vld [vmem:[#allocation2 + $0x30] sm:$0xff]   ;;  %v5405_v24 = vrot.slane %v5403_v57, 4  ;;  %v10251_v57 = vld [vmem:[%s10738_s1 + $0x208] sm:$0xff]  }
 0x17a   : > { %8067 = vmatmul.mubr.bf16.gmra.mrb[28].mxu0 %v8573_v17  ;;  %8168 = vmatprep.subr.bf16.mxu1 %v8582_v62  ;;  %10823 = vst [vmem:[#allocation25_spill] sm:$0xff] %v10219_v59  ;;  %v10232_v55 = vsel %vm9420_vm14, %v7082_v12, %v5396_v61  ;;  %v5398_v19 = vrot.slane %v5396_v61, 4  ;;  %v10240_v17 = vld [vmem:[#allocation2 + $0xa0] sm:$0xf]  ;;  %v5417_v61 = vrot.slane %v10224_v5, 5 }
 0x17b   : > { %8086 = vmatprep.mubr.bf16.mxu0 %v9986_v25  ;;  %10824 = vst [vmem:[#allocation26_spill] sm:$0xff] %v10232_v55  ;;  %v5410_v25 = vrot.slane %v10142_v8, 5  ;;  %v5293_v59 = vld [vmem:[#allocation2 + $0xa8] sm:$0xe] }
 0x17c   : > { %v10244_v12 = vsel %vm9420_vm14, %v5398_v19, %v5399_v2  ;;  %v10258_v2 = vld [vmem:[#allocation2 + $0xac] sm:$0xf]  ;;  %v10264_v19 = vsel %vm9420_vm14, %v5405_v24, %v5406_v4  ;;  %v10276_v34 = vsel %vm9420_vm14, %v7085_v44, %v5417_v61  ;;  %v5419_v13 = vrot.slane %v5417_v61, 4  ;;  %v10281_v24 = vld [vmem:[%s10739_s2 + $0x20] sm:$0xff]   ;;  %v10283_v4 = vld [vmem:[#allocation2 + $0xb8] sm:$0xf] }
 0x17d   : > { %8169 = vmatpush3.bf16.msra.mxu1 %v8582_v62  ;;  %10826 = vst [vmem:[#allocation28_spill] sm:$0xff] %v10244_v12  ;;  %v8590_v62 = vld [vmem:[%s10739_s2 + $0x18] sm:$0xff]   ;;  %10827 = vst [vmem:[#allocation29_spill] sm:$0xff] %v10264_v19  ;;  %v10268_v63 = vsel %vm9420_vm14, %v7084_v42, %v5410_v25  ;;  %v5412_v28 = vrot.slane %v5410_v25, 4  ;;  %v5294_v12 = vld [vmem:[#allocation2 + $0xb4] sm:$0xe] }
 0x17e   : > { %8170 = vmatprep.subr.bf16.mxu1 %v8586_v46  ;;  %10828 = vst [vmem:[#allocation30_spill] sm:$0xff] %v10268_v63  ;;  %10829 = vst [vmem:[#allocation31_spill] sm:$0xff] %v10276_v34  ;;  %v5424_v25 = vrot.slane %v10240_v17, 5  ;;  %v5427_v44 = vrot.slane %v10256_v53, 5  ;;  %v7087_v35 = vrot.slane %v5293_v59, 9  ;;  %v10297_v61 = vsel %vm9420_vm14, %v5419_v13, %v5420_v43 }
 0x17f   : > { %v10287_v42 = vsel %vm9420_vm14, %v5412_v28, %v5413_v45  ;;  %10831 = vst [vmem:[#allocation33_spill] sm:$0xff] %v10297_v61  ;;  %v5431_v19 = vrot.slane %v10258_v2, 5  ;;  %v5434_v28 = vrot.slane %v10270_v40, 5  ;;  %v5295_v45 = vld [vmem:[#allocation2 + $0xc0] sm:$0xe]  ;;  %v7088_v43 = vrot.slane %v5294_v12, 9 }
 0x180   : > { %7899 = vmatmul.mubr.bf16.gmra.mrb[4].mxu1 %v8580_v3  ;;  %10830 = vst [vmem:[#allocation32_spill] sm:$0xff] %v10287_v42  ;;  %v10302_v59 = vld [vmem:[#allocation2 + $0xc4] sm:$0xf]  ;;  %v10310_v3 = vsel %vm9420_vm14, %v7086_v60, %v5424_v25  ;;  %v5426_v13 = vrot.slane %v5424_v25, 4  ;;  %v5438_v63 = vrot.slane %v10283_v4, 5  ;;  %v8584_v60 = vld [vmem:[#allocation2 + $0x48] sm:$0xff]  }
 0x181   : > { %7902 = vmatprep.mubr.bf16.mxu1 %v8583_v38  ;;  %8171 = vmatpush3.bf16.msra.mxu1 %v8586_v46  ;;  %v10304_v38 = vld [vmem:[#allocation2 + $0xc8] sm:$0x1]  ;;  %10832 = vst [vmem:[#allocation34_spill] sm:$0xff] %v10310_v3  ;;  %v5433_v42 = vrot.slane %v5431_v19, 4  ;;  %v5296_v46 = vld [vmem:[#allocation2 + $0xcc] sm:$0xe] }
 0x182   : > { %8087 = vmatmul.mubr.bf16.vlgmr.msra.gmra.mrb[0].mxu0 %v9988_v21  ;;  %8172 = vmatprep.subr.bf16.mxu1 %v8590_v62  ;;  %v10316_v21 = vsel %vm9420_vm14, %v7087_v35, %v5431_v19  ;;  %v8585_v12 = vld [vmem:[%s10738_s1 + $0x210] sm:$0xff]   ;;  %v5445_v35 = vrot.slane %v10302_v59, 5  ;;  %v5448_v19 = vrot.slane %v10304_v38, 5  ;;  %v8598_v61 = vld [vmem:[%s10739_s2 + $0x28] sm:$0xff]  }
 0x183   : > { %8119 = vmatpush3.bf16.msra.mxu0 %v10006_v27  ;;  %8090 = vmatprep.mubr.bf16.mxu0 %v10088_v10  ;;  %v10326_v27 = vsel %vm9420_vm14, %v5426_v13, %v5427_v44  ;;  %v7089_v10 = vrot.slane %v5295_v45, 9  ;;  %v8587_v25 = vld [vmem:[#allocation2 + $0x54] sm:$0xff]   ;;  %v10337_v55 = vsel %vm9420_vm14, %v5433_v42, %v5434_v28  ;;  %v10341_v44 = vsel %vm9420_vm14, %v7088_v43, %v5438_v63  ;;  %v10344_v13 = vld [vmem:[#allocation2 + $0xd0] sm:$0xf] }
 0x184   : > { %8120 = vmatprep.subr.bf16.mxu0 %v10251_v57  ;;  %10833 = vst [vmem:[#allocation35_spill] sm:$0xff] %v10326_v27  ;;  %v5440_v45 = vrot.slane %v5438_v63, 4  ;;  %v5447_v42 = vrot.slane %v5445_v35, 4  ;;  %v7090_v28 = vrot.slane %v5296_v46, 9  ;;  %v10834_v43 = vshll.u32 %v10108_v32, 16  ;;  %v8589_v46 = vld [vmem:[%s10738_s1 + $0x218] sm:$0xff]  }
 0x185   : > { %8173 = vmatpush3.bf16.msra.mxu1 %v8590_v62  ;;  %v10346_v62 = vld [vmem:[#allocation2 + $0xd4] sm:$0x1]  ;;  %v10352_v34 = vsel %vm9420_vm14, %v7089_v10, %v5445_v35  ;;  %v4557_v27 = vld [vmem:[#allocation2 + $0x90] sm:$0xf]  ;;  %v5452_v26 = vrot.slane %v10344_v13, 5  ;;  %v10836_v32 = vshrl.u32 %v10142_v8, 16 }
 0x186   : > { %8174 = vmatprep.subr.bf16.mxu1 %v10281_v24  ;;  %v4797_v63 = vrot.slane %v10834_v43, 5  ;;  %v10359_v3 = vsel %vm9420_vm14, %v5440_v45, %v5441_v16  ;;  %v5455_v7 = vrot.slane %v10346_v62, 5  ;;  %v10376_v45 = vsel %vm9420_vm14, %v5447_v42, %v5448_v19 }
 0x187   : > { %8121 = vmatpush3.bf16.msra.mxu0 %v10251_v57  ;;  %v10835_v57 = vshll.u32 %v10142_v8, 16  ;;  %v4807_v35 = vrot.slane %v10836_v32, 4  ;;  %v7120_v16 = vcombine.low %v10341_v44, %v10359_v3  ;;  %v10388_v8 = vsel %vm9420_vm14, %v7090_v28, %v5452_v26 }
 0x188   : > { %7903 = vmatmul.mubr.bf16.gmra.mrb[8].mxu1 %v8584_v60  ;;  %8122 = vmatprep.subr.bf16.mxu0 %v8585_v12  ;;  %v10837_v60 = vor.u32 %v10096_v54, %v10094_v31  ;;  %v5454_v32 = vrot.slane %v5452_v26, 4  ;;  %v4784_v19 = vor.u32 %v10149_v15, %v10134_v18  ;;  %v4816_v54 = vshrl.u32 %v4557_v27, 16 }
 0x189   : > { %v10368_v10 = vrot.slane %v10835_v57, 5  ;;  %7906 = vmatprep.mubr.bf16.mxu1 %v8587_v25  ;;  %8175 = vmatpush3.bf16.msra.mxu1 %v10281_v24  ;;  %v7121_v57 = vcombine.low %v10352_v34, %v10376_v45  ;;  %v4787_v25 = vshll.u32 %v10205_v36, 16  ;;  %v4819_v42 = vshll.u32 %v4557_v27, 16  ;;  %v8602_v24 = vld [vmem:[%s10739_s2 + $0x30] sm:$0xff]   ;;  %v8588_v27 = vld [vmem:[#allocation2 + $0x60] sm:$0xff]  }
 0x18a   : > { %v10381_v43 = vrot.slane %v10837_v60, 4  ;;  %8091 = vmatmul.mubr.bf16.gmra.mrb[4].mxu0 %v10100_v50  ;;  %8176 = vmatprep.subr.bf16.mxu1 %v8598_v61  ;;  %v10838_v26 = vor.u32 %v10106_v52, %v10104_v14  ;;  %v4825_v50 = vshll.u32 %v10224_v5, 16  ;;  %v4829_v15 = vshrl.u32 %v10224_v5, 16  ;;  %v4560_v60 = vld [vmem:[#allocation2 + $0x9c] sm:$0xf] }
 0x18b   : > { %8094 = vmatprep.mubr.bf16.mxu0 %v10102_v22  ;;  %8123 = vmatpush3.bf16.msra.mxu0 %v8585_v12  ;;  %v10407_v36 = vsel %vm9420_vm14, %v5454_v32, %v5455_v7  ;;  %v8593_v22 = vld [vmem:[%s10738_s1 + $0x220] sm:$0xff]   ;;  %v4798_v12 = vor.u32 %v4797_v63, %v10159_v33  ;;  %v4808_v14 = vor.u32 %v4807_v35, %v10368_v10  ;;  %v4811_v52 = vshll.u32 %v10213_v20, 16  ;;  %v4563_v35 = vld [vmem:[#allocation2 + $0xa8] sm:$0xf] }
 0x18c   : > { %v10401_v28 = vrot.slane %v10838_v26, 4  ;;  %8124 = vmatprep.subr.bf16.mxu0 %v8589_v46  ;;  %v7122_v5 = vcombine.low %v10388_v8, %v10407_v36  ;;  %v10839_v7 = vsel %vm8847_vm11, %v10077_v30, %v10079_v41  ;;  %v10840_v32 = vsel %vm8847_vm11, %v10075_v0, %v10035_v11  ;;  %v8591_v0 = vld [vmem:[#allocation2 + $0x6c] sm:$0xff]   ;;  %v8606_v41 = vld [vmem:[%s10739_s2 + $0x38] sm:$0xff]  }
 0x18d   : > { %v7056_v26 = vcombine.low %v10840_v32, %v10839_v7  ;;  %v10841_v33 = vsel %vm8847_vm11, %v10090_v29, %v10092_v58  ;;  %v10842_v20 = vsel %vm8847_vm11, %v10081_v56, %v10039_v6  ;;  %v4756_v30 = vsel %vm8847_vm11, %v10127_v51, %v10094_v31  ;;  %8177 = vmatpush3.bf16.msra.mxu1 %v8598_v61 }
 0x18e   : > { %v7057_v63 = vcombine.low %v10842_v20, %v10841_v33  ;;  %v4766_v11 = vsel %vm8847_vm11, %v10381_v43, %v10132_v39  ;;  %v4785_v29 = vrot.slane %v4784_v19, 4  ;;  %v4789_v58 = vrot.slane %v4787_v25, 5  ;;  %8178 = vmatprep.subr.bf16.mxu1 %v8602_v24  ;;  %v8597_v25 = vld [vmem:[%s10738_s1 + $0x228] sm:$0xff]  }
 0x18f   : > { %v4818_v6 = vrot.slane %v4816_v54, 4  ;;  %v4821_v56 = vrot.slane %v4819_v42, 5  ;;  %8125 = vmatpush3.bf16.msra.mxu0 %v8589_v46  ;;  %v10448_v7 = vrot.slane %v4825_v50, 5  ;;  %v4831_v31 = vrot.slane %v4829_v15, 4 }
 0x190   : > { %v4840_v51 = vshrl.u32 %v4560_v60, 16  ;;  %v4843_v32 = vshll.u32 %v4560_v60, 16  ;;  %7907 = vmatmul.mubr.bf16.gmra.mrb[12].mxu1 %v8588_v27  ;;  %v4780_v39 = vsel %vm8847_vm11, %v10401_v28, %v10134_v18  ;;  %8126 = vmatprep.subr.bf16.mxu0 %v8593_v22  ;;  %v4799_v61 = vrot.slane %v4798_v12, 4 }
 0x191   : > { %v4809_v43 = vrot.slane %v4808_v14, 4  ;;  %v4813_v19 = vrot.slane %v4811_v52, 5  ;;  %7910 = vmatprep.mubr.bf16.mxu1 %v8591_v0  ;;  %v4849_v46 = vshll.u32 %v10240_v17, 16  ;;  %v4853_v54 = vshrl.u32 %v10240_v17, 16  ;;  %8179 = vmatpush3.bf16.msra.mxu1 %v8602_v24  ;;  %v8592_v24 = vld [vmem:[#allocation2 + $0x78] sm:$0xff]  }
 0x192   : > { %v4864_v42 = vshrl.u32 %v4563_v35, 16  ;;  %v4867_v50 = vshll.u32 %v4563_v35, 16  ;;  %8095 = vmatmul.mubr.bf16.gmra.mrb[8].mxu0 %v7056_v26  ;;  %v4790_v18 = vsel %vm8847_vm11, %v4785_v29, %v4789_v58  ;;  %v4835_v28 = vshll.u32 %v10226_v23, 16  ;;  %8180 = vmatprep.subr.bf16.mxu1 %v8606_v41  ;;  %v4566_v58 = vld [vmem:[#allocation2 + $0xb4] sm:$0xf] }
 0x193   : > { %v4873_v15 = vshll.u32 %v10258_v2, 16  ;;  %v4877_v27 = vshrl.u32 %v10258_v2, 16  ;;  %8098 = vmatprep.mubr.bf16.mxu0 %v7057_v63  ;;  %8127 = vmatpush3.bf16.msra.mxu0 %v8593_v22  ;;  %v4822_v12 = vor.u32 %v4821_v56, %v4818_v6  ;;  %v4832_v14 = vor.u32 %v4831_v31, %v10448_v7  ;;  %v8601_v2 = vld [vmem:[%s10738_s1 + $0x230] sm:$0xff]   ;;  %v8595_v22 = vld [vmem:[#allocation2 + $0x84] sm:$0xff]  }
 0x194   : > { %v4842_v17 = vrot.slane %v4840_v51, 4  ;;  %v4845_v52 = vrot.slane %v4843_v32, 5  ;;  %v7058_v60 = vcombine.low %v4756_v30, %v4766_v11  ;;  %v4804_v26 = vsel %vm8847_vm11, %v4799_v61, %v10368_v10  ;;  %8128 = vmatprep.subr.bf16.mxu0 %v8597_v25  ;;  %v8605_v32 = vld [vmem:[%s10738_s1 + $0x238] sm:$0xff]  }
 0x195   : > { %v4814_v23 = vsel %vm8847_vm11, %v4809_v43, %v4813_v19  ;;  %v10473_v33 = vrot.slane %v4849_v46, 5  ;;  %v4855_v20 = vrot.slane %v4853_v54, 4  ;;  %v4866_v63 = vrot.slane %v4864_v42, 4  ;;  %8181 = vmatpush3.bf16.msra.mxu1 %v8606_v41  ;;  %v4569_v19 = vld [vmem:[#allocation2 + $0xc0] sm:$0xf] }
 0x196   : > { %v4869_v0 = vrot.slane %v4867_v50, 5  ;;  %v7059_v30 = vcombine.low %v4780_v39, %v4790_v18  ;;  %v4837_v11 = vrot.slane %v4835_v28, 5  ;;  %v10475_v29 = vrot.slane %v4873_v15, 5  ;;  %v8596_v28 = vld [vmem:[#allocation2 + $0x90] sm:$0xff]  }
 0x197   : > { %v4879_v10 = vrot.slane %v4877_v27, 4  ;;  %v4823_v6 = vrot.slane %v4822_v12, 4  ;;  %v4833_v56 = vrot.slane %v4832_v14, 4  ;;  %v4846_v35 = vor.u32 %v4845_v52, %v4842_v17  ;;  %8129 = vmatpush3.bf16.msra.mxu0 %v8597_v25  ;;  %v8599_v17 = vld [vmem:[#allocation2 + $0x9c] sm:$0xff]  }
 0x198   : > { %v4859_v31 = vshll.u32 %v10256_v53, 16  ;;  %7911 = vmatmul.mubr.bf16.gmra.mrb[16].mxu1 %v8592_v24  ;;  %v7060_v51 = vcombine.low %v4804_v26, %v4814_v23  ;;  %8130 = vmatprep.subr.bf16.mxu0 %v8601_v2  ;;  %v4856_v41 = vor.u32 %v4855_v20, %v10473_v33  ;;  %v4870_v39 = vor.u32 %v4869_v0, %v4866_v63 }
 0x199   : > { %7914 = vmatprep.mubr.bf16.mxu1 %v8595_v22  ;;  %v4883_v61 = vshll.u32 %v10270_v40, 16  ;;  %v4888_v43 = vshrl.u32 %v4566_v58, 16  ;;  %v4880_v46 = vor.u32 %v4879_v10, %v10475_v29  ;;  %v4891_v53 = vshll.u32 %v4566_v58, 16 }
 0x19a   : > { %8099 = vmatmul.mubr.bf16.gmra.mrb[12].mxu0 %v7058_v60  ;;  %v4897_v25 = vshll.u32 %v10283_v4, 16  ;;  %v4901_v54 = vshrl.u32 %v10283_v4, 16  ;;  %v4828_v42 = vsel %vm8847_vm11, %v4823_v6, %v10448_v7  ;;  %v4838_v50 = vsel %vm8847_vm11, %v4833_v56, %v4837_v11  ;;  %v4572_v11 = vld [vmem:[#allocation2 + $0xcc] sm:$0xf] }
 0x19b   : > { %8102 = vmatprep.mubr.bf16.mxu0 %v7059_v30  ;;  %v4847_v18 = vrot.slane %v4846_v35, 4  ;;  %v4861_v40 = vrot.slane %v4859_v31, 5  ;;  %8131 = vmatpush3.bf16.msra.mxu0 %v8601_v2  ;;  %v4912_v15 = vshrl.u32 %v4569_v19, 16  ;;  %v4915_v27 = vshll.u32 %v4569_v19, 16 }
 0x19c   : > { %v4921_v12 = vshll.u32 %v10302_v59, 16  ;;  %v4925_v14 = vshrl.u32 %v10302_v59, 16  ;;  %8132 = vmatprep.subr.bf16.mxu0 %v8605_v32  ;;  %v4857_v4 = vrot.slane %v4856_v41, 4  ;;  %v4871_v52 = vrot.slane %v4870_v39, 4 }
 0x19d   : > { %v4885_v60 = vrot.slane %v4883_v61, 5  ;;  %v4890_v24 = vrot.slane %v4888_v43, 4  ;;  %v4881_v7 = vrot.slane %v4880_v46, 4  ;;  %v4893_v26 = vrot.slane %v4891_v53, 5  ;;  %v8600_v61 = vld [vmem:[#allocation2 + $0xa8] sm:$0xff]   ;;  %v8603_v46 = vld [vmem:[#allocation2 + $0xb4] sm:$0xff]  }
 0x19e   : > { %v4899_v23 = vrot.slane %v4897_v25, 5  ;;  %v4903_v22 = vrot.slane %v4901_v54, 4  ;;  %v7061_v20 = vcombine.low %v4828_v42, %v4838_v50  ;;  %v4914_v2 = vrot.slane %v4912_v15, 4 }
 0x19f   : > { %8133 = vmatpush3.bf16.msra.mxu0 %v8605_v32  ;;  %v4917_v63 = vrot.slane %v4915_v27, 5  ;;  %v4923_v0 = vrot.slane %v4921_v12, 5  ;;  %v4927_v30 = vrot.slane %v4925_v14, 4  ;;  %v4852_v59 = vsel %vm8847_vm11, %v4847_v18, %v10473_v33 }
 0x1a0   : > { %7915 = vmatmul.mubr.bf16.gmra.mrb[20].mxu1 %v8596_v28  ;;  %v4862_v10 = vsel %vm8847_vm11, %v4857_v4, %v4861_v40  ;;  %v4876_v58 = vsel %vm8847_vm11, %v4871_v52, %v10475_v29  ;;  %v4886_v6 = vsel %vm8847_vm11, %v4881_v7, %v4885_v60  ;;  %v4894_v56 = vor.u32 %v4893_v26, %v4890_v24  ;;  %v8676_v24 = vld [vmem:[#allocation2 + $0x1c] sm:$0xf]  ;;  %v5281_v26 = vld [vmem:[#allocation2 + $0x18] sm:$0xe] }
 0x1a1   : > { %7918 = vmatprep.mubr.bf16.mxu1 %v8599_v17  ;;  %v4904_v35 = vor.u32 %v4903_v22, %v4899_v23  ;;  %v4907_v31 = vshll.u32 %v10291_v47, 16  ;;  %v4936_v32 = vshrl.u32 %v4572_v11, 16  ;;  %v4939_v41 = vshll.u32 %v4572_v11, 16  ;;  %v8604_v17 = vld [vmem:[#allocation2 + $0xc0] sm:$0xff]  }
 0x1a2   : > { %8103 = vmatmul.mubr.bf16.gmra.mrb[16].mxu0 %v7060_v51  ;;  %v4945_v33 = vshll.u32 %v10344_v13, 16  ;;  %v4949_v39 = vshrl.u32 %v10344_v13, 16  ;;  %v4918_v43 = vor.u32 %v4917_v63, %v4914_v2  ;;  %v4928_v19 = vor.u32 %v4927_v30, %v4923_v0 }
 0x1a3   : > { %8106 = vmatprep.mubr.bf16.mxu0 %v7061_v20  ;;  %v4931_v29 = vshll.u32 %v10304_v38, 16  ;;  %v7062_v51 = vcombine.low %v4852_v59, %v4862_v10  ;;  %v7063_v53 = vcombine.low %v4876_v58, %v4886_v6  ;;  %v4895_v25 = vrot.slane %v4894_v56, 4  ;;  %v8677_v59 = vld [vmem:[#allocation2 + $0x20] sm:$0x1]  ;;  %v8678_v58 = vld [vmem:[#allocation2 + $0x28] sm:$0xf] }
 0x1a4   : > { %v4905_v54 = vrot.slane %v4904_v35, 4  ;;  %v4909_v42 = vrot.slane %v4907_v31, 5  ;;  %v4938_v50 = vrot.slane %v4936_v32, 4  ;;  %v4941_v47 = vrot.slane %v4939_v41, 5  ;;  %v5282_v31 = vld [vmem:[#allocation2 + $0x24] sm:$0xe] }
 0x1a5   : > { %v4947_v18 = vrot.slane %v4945_v33, 5  ;;  %v4951_v40 = vrot.slane %v4949_v39, 4  ;;  %v4919_v28 = vrot.slane %v4918_v43, 4  ;;  %v4929_v15 = vrot.slane %v4928_v19, 4  ;;  %v8679_v39 = vld [vmem:[#allocation2 + $0x2c] sm:$0x1] }
 0x1a6   : > { %v4933_v27 = vrot.slane %v4931_v29, 5  ;;  %v4900_v13 = vsel %vm8847_vm11, %v4895_v25, %v4899_v23  ;;  %v4910_v38 = vsel %vm8847_vm11, %v4905_v54, %v4909_v42  ;;  %v4942_v12 = vor.u32 %v4941_v47, %v4938_v50  ;;  %v10843_v29 = vld [vmem:[#allocation3_spill] sm:$0xff]  ;;  %v10850_v54 = vld [vmem:[#allocation18_spill] sm:$0xff]  ;;  %v10851_v42 = vld [vmem:[#allocation20_spill] sm:$0xff] }
 0x1a7   : > { %v4952_v14 = vor.u32 %v4951_v40, %v4947_v18  ;;  %v4955_v4 = vshll.u32 %v10346_v62, 16  ;;  %v4924_v52 = vsel %vm8847_vm11, %v4919_v28, %v4923_v0  ;;  %v5347_v7 = vrot.slane %v8676_v24, 5  ;;  %v10854_v47 = vld [vmem:[#allocation21_spill] sm:$0xff]  ;;  %v10856_v40 = vld [vmem:[#allocation7_spill] sm:$0xff]  ;;  %v10857_v28 = vld [vmem:[#allocation8_spill] sm:$0xff] }
 0x1a8   : > { %7919 = vmatmul.mubr.bf16.gmra.mrb[24].mxu1 %v8600_v61  ;;  %v4934_v60 = vsel %vm8847_vm11, %v4929_v15, %v4933_v27  ;;  %v7064_v22 = vcombine.low %v4900_v13, %v4910_v38  ;;  %v4943_v20 = vrot.slane %v4942_v12, 4  ;;  %v7075_v30 = vrot.slane %v5281_v26, 9  ;;  %v10858_v15 = vld [vmem:[#allocation22_spill] sm:$0xff]  ;;  %v10859_v27 = vld [vmem:[#allocation24_spill] sm:$0xff]  ;;  %v10861_v38 = vld [vmem:[#allocation23_spill] sm:$0xff] }
 0x1a9   : > { %7922 = vmatprep.mubr.bf16.mxu1 %v8603_v46  ;;  %v7065_v23 = vcombine.low %v4924_v52, %v4934_v60  ;;  %v4953_v2 = vrot.slane %v4952_v14, 4  ;;  %v4957_v63 = vrot.slane %v4955_v4, 5  ;;  %v5349_v11 = vrot.slane %v5347_v7, 4  ;;  %v10845_v46 = vld [vmem:[#allocation16_spill] sm:$0xff]  ;;  %v10862_v12 = vld [vmem:[#allocation25_spill] sm:$0xff]  ;;  %v10866_v52 = vld [vmem:[#allocation26_spill] sm:$0xff] }
 0x1aa   : > { %8107 = vmatmul.mubr.bf16.gmra.mrb[20].mxu0 %v7062_v51  ;;  %v5350_v62 = vrot.slane %v8677_v59, 5  ;;  %v4948_v0 = vsel %vm8847_vm11, %v4943_v20, %v4947_v18  ;;  %v5354_v6 = vrot.slane %v8678_v58, 5  ;;  %v5348_v56 = vsel %vm9420_vm14, %v7075_v30, %v5347_v7  ;;  %v10844_v51 = vld [vmem:[#allocation4_spill] sm:$0xff]  ;;  %v10864_v4 = vld [vmem:[#allocation9_spill] sm:$0xff]  ;;  %v10869_v7 = vld [vmem:[#allocation27_spill] sm:$0xff] }
 0x1ab   : > { %8110 = vmatprep.mubr.bf16.mxu0 %v7063_v53  ;;  %v4958_v10 = vsel %vm8847_vm11, %v4953_v2, %v4957_v63  ;;  %v5357_v61 = vrot.slane %v8679_v39, 5  ;;  %v10846_v53 = vld [vmem:[#allocation17_spill] sm:$0xff]  ;;  %v10852_v50 = vcombine.low %v10850_v54, %v10851_v42  ;;  %v10855_v18 = vcombine.low %v10853_v48, %v10854_v47  ;;  %v10867_v60 = vld [vmem:[#allocation28_spill] sm:$0xff]  ;;  %v10874_v2 = vld [vmem:[#allocation30_spill] sm:$0xff] }
 0x1ac   : > { %v5351_v35 = vsel %vm9420_vm14, %v5349_v11, %v5350_v62  ;;  %v7066_v32 = vcombine.low %v4948_v0, %v4958_v10  ;;  %v5356_v33 = vrot.slane %v5354_v6, 4  ;;  %v10847_v25 = vcombine.low %v10845_v46, %v10846_v53  ;;  %v10870_v26 = vld [vmem:[#allocation29_spill] sm:$0xff]  ;;  %v10873_v20 = vld [vmem:[#allocation12_spill] sm:$0xff]  ;;  %v10877_v11 = vld [vmem:[#allocation31_spill] sm:$0xff] }
 0x1ad   : > { %v7107_v41 = vcombine.low %v5348_v56, %v5351_v35  ;;  %v10860_v13 = vcombine.low %v10858_v15, %v10859_v27  ;;  %v10863_v14 = vcombine.low %v10861_v38, %v10862_v12  ;;  %v10868_v24 = vcombine.low %v10866_v52, %v10867_v60  ;;  %v10875_v63 = vld [vmem:[#allocation32_spill] sm:$0xff]  ;;  %v10878_v59 = vld [vmem:[#allocation33_spill] sm:$0xff]  ;;  %v10881_v10 = vld [vmem:[#allocation14_spill] sm:$0xff] }
 0x1ae   : > { %v5358_v43 = vsel %vm9420_vm14, %v5356_v33, %v5357_v61  ;;  %v10876_v30 = vcombine.low %v10874_v2, %v10875_v63  ;;  %v10879_v62 = vcombine.low %v10877_v11, %v10878_v59  ;;  %v10880_v0 = vld [vmem:[#allocation13_spill] sm:$0xff]  ;;  %v10882_v58 = vld [vmem:[#allocation34_spill] sm:$0xff]  ;;  %v10885_v35 = vcombine.low %v10316_v21, %v10337_v55 }
 0x1b0   : > { %7923 = vmatmul.mubr.bf16.gmra.mrb[28].mxu1 %v8604_v17  ;;  %v10865_v17 = vld [vmem:[#allocation10_spill] sm:$0xff] }
 0x1b1   : > { %8182 = vmatprep.mubr.bf16.mxu1 %v8910_v1  ;;  %v7076_v1 = vrot.slane %v5282_v31, 9  ;;  %v10886_v31 = vld [vmem:[#allocation15_spill] sm:$0xff] }
 0x1b2   : > { %8111 = vmatmul.mubr.bf16.gmra.mrb[24].mxu0 %v7064_v22  ;;  %v10871_v22 = vcombine.low %v10869_v7, %v10870_v26 }
 0x1b3   : > { %8114 = vmatprep.mubr.bf16.mxu0 %v7065_v23  ;;  %v5355_v9 = vsel %vm9420_vm14, %v7076_v1, %v5354_v6  ;;  %v10872_v23 = vld [vmem:[#allocation11_spill] sm:$0xff] }
 0x1b4   : > { %v7108_v19 = vcombine.low %v5355_v9, %v5358_v43  ;;  %v10883_v6 = vld [vmem:[#allocation35_spill] sm:$0xff] }
 0x1b5   : > { %v10884_v56 = vcombine.low %v10882_v58, %v10883_v6 }
 0x1b8   : > { %8183 = vmatmul.mubr.bf16.vlgmr.msra.gmra.mrb[32].mxu1 %v8926_v37  ;;  %v10848_v37 = vld [vmem:[#allocation5_spill] sm:$0xff] }
 0x1b9   : > { %8186 = vmatprep.mubr.bf16.mxu1 %v8978_v49  ;;  %v10849_v49 = vld [vmem:[#allocation6_spill] sm:$0xff] }
 0x1ba   : > { %8115 = vmatmul.mubr.bf16.gmra.mrb[28].mxu0 %v7066_v32 }
 0x1bb   : > { %8134 = vmatprep.mubr.bf16.mxu0 %v7107_v41 }
 0x1c0   : > { %8187 = vmatmul.mubr.bf16.gmra.mrb[36].mxu1 %v10843_v29 }
 0x1c1   : > { %8190 = vmatprep.mubr.bf16.mxu1 %v10844_v51 }
 0x1c2   : > { %8135 = vmatmul.mubr.bf16.vlgmr.msra.gmra.mrb[0].mxu0 %v7108_v19 }
 0x1c3   : > { %8138 = vmatprep.mubr.bf16.mxu0 %v10847_v25 }
 0x1c8   : > { %8191 = vmatmul.mubr.bf16.gmra.mrb[40].mxu1 %v10848_v37 }
 0x1c9   : > { %8194 = vmatprep.mubr.bf16.mxu1 %v10849_v49 }
 0x1ca   : > { %8139 = vmatmul.mubr.bf16.gmra.mrb[4].mxu0 %v10852_v50 }
 0x1cb   : > { %8142 = vmatprep.mubr.bf16.mxu0 %v10855_v18 }
 0x1d0   : > { %8195 = vmatmul.mubr.bf16.gmra.mrb[44].mxu1 %v10856_v40 }
 0x1d1   : > { %8198 = vmatprep.mubr.bf16.mxu1 %v10857_v28 }
 0x1d2   : > { %8143 = vmatmul.mubr.bf16.gmra.mrb[8].mxu0 %v10860_v13 }
 0x1d3   : > { %8146 = vmatprep.mubr.bf16.mxu0 %v10863_v14 }
 0x1d8   : > { %8199 = vmatmul.mubr.bf16.gmra.mrb[48].mxu1 %v10864_v4 }
 0x1d9   : > { %8202 = vmatprep.mubr.bf16.mxu1 %v10865_v17 }
 0x1da   : > { %8147 = vmatmul.mubr.bf16.gmra.mrb[12].mxu0 %v10868_v24 }
 0x1db   : > { %8150 = vmatprep.mubr.bf16.mxu0 %v10871_v22 }
 0x1e0   : > { %8203 = vmatmul.mubr.bf16.gmra.mrb[52].mxu1 %v10872_v23 }
 0x1e1   : > { %8206 = vmatprep.mubr.bf16.mxu1 %v10873_v20 }
 0x1e2   : > { %8151 = vmatmul.mubr.bf16.gmra.mrb[16].mxu0 %v10876_v30 }
 0x1e3   : > { %8154 = vmatprep.mubr.bf16.mxu0 %v10879_v62 }
 0x1e8   : > { %8207 = vmatmul.mubr.bf16.gmra.mrb[56].mxu1 %v10880_v0 }
 0x1e9   : > { %8210 = vmatprep.mubr.bf16.mxu1 %v10881_v10 }
 0x1ea   : > { %8155 = vmatmul.mubr.bf16.gmra.mrb[20].mxu0 %v10884_v56 }
 0x1eb   : > { %8158 = vmatprep.mubr.bf16.mxu0 %v10885_v35 }
 0x1f0   : > { %8211 = vmatmul.mubr.bf16.gmra.mrb[60].mxu1 %v10886_v31 }
 0x1f2   : > { %8159 = vmatmul.mubr.bf16.gmra.mrb[24].mxu0 %v7120_v16 }
 0x1f3   : > { %8162 = vmatprep.mubr.bf16.mxu0 %v7121_v57 }
 0x1fa   : > { %8163 = vmatmul.mubr.bf16.gmra.mrb[28].mxu0 %v7122_v5 }
 0x24b   : > { %v7896_v32 = vpop.f32.mrb[0].mxu1 }
 0x24c   : > { %v2729_v41 = vpop.f32.mrb[1].mxu1 }
 0x24d   : > { %v10586_v1 = vpop.f32.mrb[2].mxu1 }
 0x24e   : > { %v10588_v55 = vpop.f32.mrb[3].mxu1 }
 0x253   : > { %v10590_v21 = vpop.f32.mrb[4].mxu1 }
 0x254   : > { %v10592_v33 = vpop.f32.mrb[5].mxu1 }
 0x255   : > { %v10594_v3 = vpop.f32.mrb[6].mxu1 }
 0x256   : > { %v10596_v44 = vpop.f32.mrb[7].mxu1 }
 0x25b   : > { %v10598_v34 = vpop.f32.mrb[8].mxu1 }
 0x25c   : > { %v10600_v16 = vpop.f32.mrb[9].mxu1 }
 0x25d   : > { %v10602_v45 = vpop.f32.mrb[10].mxu1 }
 0x25e   : > { %v10604_v57 = vpop.f32.mrb[11].mxu1 }
 0x263   : > { %v10606_v8 = vpop.f32.mrb[12].mxu1 }
 0x264   : > { %v10608_v36 = vpop.f32.mrb[13].mxu1 }
 0x265   : > { %v10610_v5 = vpop.f32.mrb[14].mxu1 }
 0x266   : > { %v10612_v39 = vpop.f32.mrb[15].mxu1 }
 0x26b   : > { %v10614_v61 = vpop.f32.mrb[16].mxu1 }
 0x26c   : > { %v10616_v9 = vpop.f32.mrb[17].mxu1 }
 0x26d   : > { %v10618_v43 = vpop.f32.mrb[18].mxu1 }
 0x26e   : > { %v10620_v19 = vpop.f32.mrb[19].mxu1 }
 0x273   : > { %v10622_v29 = vpop.f32.mrb[20].mxu1 }
 0x274   : > { %v10624_v51 = vpop.f32.mrb[21].mxu1 }
 0x275   : > { %v10626_v46 = vpop.f32.mrb[22].mxu1 }
 0x276   : > { %v10628_v53 = vpop.f32.mrb[23].mxu1 }
 0x27b   : > { %v10630_v25 = vpop.f32.mrb[24].mxu1 }
 0x27c   : > { %v10632_v37 = vpop.f32.mrb[25].mxu1 }
 0x27d   : > { %v10634_v49 = vpop.f32.mrb[26].mxu1 }
 0x27e   : > { %v10636_v54 = vpop.f32.mrb[27].mxu1 }
 0x283   : > { %v10638_v42 = vpop.f32.mrb[28].mxu1 }
 0x284   : > { %v10640_v50 = vpop.f32.mrb[29].mxu1 }
 0x285   : > { %v10642_v48 = vpop.f32.mrb[30].mxu1 }
 0x286   : > { %v10644_v47 = vpop.f32.mrb[31].mxu1 }
 0x28b   : > { %v8184_v18 = vpop.f32.mrb[32].mxu1 }
 0x28c   : > { %v6148_v40 = vpop.f32.mrb[33].mxu1  ;;  %v6474_v4 = vmul.f32 %v8184_v18, %v8184_v18 }
 0x28d   : > { %v6472_v28 = vmul.f32 %v6148_v40, %v6148_v40  ;;  %v8185_v15 = vpop.f32.mrb[34].mxu1 }
 0x28e   : > { %v7392_v27 = vpack.c.bf16 %v8185_v15, %v8184_v18  ;;  %v6151_v13 = vpop.f32.mrb[35].mxu1  ;;  %v6475_v60 = vmul.f32 %v8185_v15, %v8185_v15 }
 0x28f   : > { %v7387_v38 = vpack.c.bf16 %v6151_v13, %v6148_v40  ;;  %v6435_v12 = vadd.f32 %v6151_v13, %v6148_v40  ;;  %v6473_v14 = vmul.f32 %v6151_v13, %v6151_v13 }
 0x290   : > { %7479 = vst [vmem:[%s10652_s17 + $0x8] sm:$0xff] %v7392_v27  }
 0x291   : > { %7388 = vst [vmem:[%s10652_s17] sm:$0xff] %v7387_v38   ;;  %v6436_v17 = vadd.f32 %v8184_v18, %v6435_v12  ;;  %v6504_v52 = vadd.f32 %v6473_v14, %v6472_v28 }
 0x293   : > { %v6505_v24 = vadd.f32 %v6504_v52, %v6474_v4  ;;  %v8188_v7 = vpop.f32.mrb[36].mxu1  ;;  %v6437_v26 = vadd.f32 %v8185_v15, %v6436_v17 }
 0x294   : > { %v6164_v22 = vpop.f32.mrb[37].mxu1  ;;  %v6478_v27 = vmul.f32 %v8188_v7, %v8188_v7 }
 0x295   : > { %v8136_v23 = vpop.f32.mrb[0].mxu0  ;;  %v6438_v20 = vadd.f32 %v6437_v26, %v6164_v22  ;;  %v6476_v2 = vmul.f32 %v6164_v22, %v6164_v22  ;;  %v6506_v63 = vadd.f32 %v6505_v24, %v6475_v60  ;;  %v8189_v30 = vpop.f32.mrb[38].mxu1 }
 0x296   : > { %v8214_v11 = vadd.f32 %v8136_v23, %v7896_v32  ;;  %v5620_v59 = vpop.f32.mrb[1].mxu0  ;;  %v7402_v62 = vpack.c.bf16 %v8189_v30, %v8188_v7  ;;  %v6167_v0 = vpop.f32.mrb[39].mxu1  ;;  %v6479_v52 = vmul.f32 %v8189_v30, %v8189_v30 }
 0x297   : > { %v8215_v10 = vadd.f32 %v5620_v59, %v2729_v41  ;;  %v8137_v58 = vpop.f32.mrb[2].mxu0  ;;  %v6507_v6 = vadd.f32 %v6506_v63, %v6476_v2  ;;  %v7397_v56 = vpack.c.bf16 %v6167_v0, %v6164_v22  ;;  %v6439_v35 = vadd.f32 %v6438_v20, %v6167_v0 }
 0x298   : > { %v8216_v31 = vadd.f32 %v8137_v58, %v10586_v1  ;;  %v5623_v18 = vpop.f32.mrb[3].mxu0  ;;  %7481 = vst [vmem:[%s10652_s17 + $0x18] sm:$0xff] %v7402_v62   ;;  %v6477_v40 = vmul.f32 %v6167_v0, %v6167_v0  ;;  %v5978_v17 = vmul.f32 %v8214_v11, %v8214_v11 }
 0x299   : > { %v8217_v32 = vadd.f32 %v5623_v18, %v10588_v55  ;;  %7480 = vst [vmem:[%s10652_s17 + $0x10] sm:$0xff] %v7397_v56   ;;  %v6440_v41 = vadd.f32 %v8188_v7, %v6439_v35  ;;  %v5976_v28 = vmul.f32 %v8215_v10, %v8215_v10 }
 0x29a   : > { %v7312_v15 = vpack.c.bf16 %v8216_v31, %v8214_v11  ;;  %v6508_v13 = vadd.f32 %v6507_v6, %v6477_v40  ;;  %v5979_v7 = vmul.f32 %v8216_v31, %v8216_v31 }
 0x29b   : > { %v7307_v1 = vpack.c.bf16 %v8217_v32, %v8215_v10  ;;  %v5939_v38 = vadd.f32 %v8217_v32, %v8215_v10  ;;  %v5977_v12 = vmul.f32 %v8217_v32, %v8217_v32  ;;  %v8192_v14 = vpop.f32.mrb[40].mxu1  ;;  %v6441_v4 = vadd.f32 %v8189_v30, %v6440_v41 }
 0x29c   : > { %7464 = vst [vmem:[%s10663_s20 + $0x8] sm:$0xff] %v7312_v15   ;;  %v6509_v60 = vadd.f32 %v6508_v13, %v6478_v27  ;;  %v6180_v24 = vpop.f32.mrb[41].mxu1 }
 0x29d   : > { %7308 = vst [vmem:[%s10663_s20] sm:$0xff] %v7307_v1   ;;  %v5940_v26 = vadd.f32 %v8214_v11, %v5939_v38  ;;  %v6008_v55 = vadd.f32 %v5977_v12, %v5976_v28  ;;  %v8140_v22 = vpop.f32.mrb[4].mxu0  ;;  %v6442_v23 = vadd.f32 %v6441_v4, %v6180_v24  ;;  %v6480_v20 = vmul.f32 %v6180_v24, %v6180_v24  ;;  %v8193_v2 = vpop.f32.mrb[42].mxu1 }
 0x29e   : > { %v8218_v63 = vadd.f32 %v8140_v22, %v10590_v21  ;;  %v5636_v59 = vpop.f32.mrb[5].mxu0  ;;  %v6510_v62 = vadd.f32 %v6509_v60, %v6479_v52  ;;  %v7412_v0 = vpack.c.bf16 %v8193_v2, %v8192_v14  ;;  %v6183_v10 = vpop.f32.mrb[43].mxu1  ;;  %v6482_v4 = vmul.f32 %v8192_v14, %v8192_v14 }
 0x29f   : > { %v6009_v58 = vadd.f32 %v6008_v55, %v5978_v17  ;;  %v8219_v30 = vadd.f32 %v5636_v59, %v10592_v33  ;;  %v5941_v6 = vadd.f32 %v8216_v31, %v5940_v26  ;;  %v8141_v56 = vpop.f32.mrb[6].mxu0  ;;  %v7407_v11 = vpack.c.bf16 %v6183_v10, %v6180_v24 }
 0x2a0   : > { %v8220_v35 = vadd.f32 %v8141_v56, %v10594_v3  ;;  %v5639_v18 = vpop.f32.mrb[7].mxu0  ;;  %v6511_v40 = vadd.f32 %v6510_v62, %v6480_v20  ;;  %7483 = vst [vmem:[%s10652_s17 + $0x28] sm:$0xff] %v7412_v0   ;;  %v6443_v32 = vadd.f32 %v6442_v23, %v6183_v10  ;;  %v6481_v33 = vmul.f32 %v6183_v10, %v6183_v10 }
 0x2a1   : > { %v5942_v41 = vadd.f32 %v8219_v30, %v5941_v6  ;;  %v5980_v21 = vmul.f32 %v8219_v30, %v8219_v30  ;;  %v6010_v28 = vadd.f32 %v6009_v58, %v5979_v7  ;;  %v8221_v15 = vadd.f32 %v5639_v18, %v10596_v44  ;;  %7482 = vst [vmem:[%s10652_s17 + $0x20] sm:$0xff] %v7407_v11  }
 0x2a2   : > { %v7322_v27 = vpack.c.bf16 %v8220_v35, %v8218_v63  ;;  %v6444_v13 = vadd.f32 %v8192_v14, %v6443_v32  ;;  %v6483_v17 = vmul.f32 %v8193_v2, %v8193_v2  ;;  %v6512_v52 = vadd.f32 %v6511_v40, %v6481_v33 }
 0x2a3   : > { %v6011_v31 = vadd.f32 %v6010_v28, %v5980_v21  ;;  %v7317_v1 = vpack.c.bf16 %v8221_v15, %v8219_v30  ;;  %v5943_v38 = vadd.f32 %v8221_v15, %v5942_v41  ;;  %v5981_v12 = vmul.f32 %v8221_v15, %v8221_v15  ;;  %v8196_v3 = vpop.f32.mrb[44].mxu1 }
 0x2a4   : > { %7466 = vst [vmem:[%s10663_s20 + $0x18] sm:$0xff] %v7322_v27   ;;  %v6196_v60 = vpop.f32.mrb[45].mxu1  ;;  %v6445_v24 = vadd.f32 %v8193_v2, %v6444_v13  ;;  %v5982_v26 = vmul.f32 %v8218_v63, %v8218_v63  ;;  %v6513_v62 = vadd.f32 %v6512_v52, %v6482_v4  ;;  %v5983_v14 = vmul.f32 %v8220_v35, %v8220_v35 }
 0x2a5   : > { %7465 = vst [vmem:[%s10663_s20 + $0x10] sm:$0xff] %v7317_v1   ;;  %v5944_v55 = vadd.f32 %v8218_v63, %v5943_v38  ;;  %v6012_v44 = vadd.f32 %v6011_v31, %v5981_v12  ;;  %v8144_v22 = vpop.f32.mrb[8].mxu0  ;;  %v6484_v23 = vmul.f32 %v6196_v60, %v6196_v60  ;;  %v8197_v20 = vpop.f32.mrb[46].mxu1  ;;  %v6486_v31 = vmul.f32 %v8196_v3, %v8196_v3 }
 0x2a6   : > { %v8222_v7 = vadd.f32 %v8144_v22, %v10598_v34  ;;  %v5652_v59 = vpop.f32.mrb[9].mxu0  ;;  %v6446_v0 = vadd.f32 %v6445_v24, %v6196_v60  ;;  %v7422_v10 = vpack.c.bf16 %v8197_v20, %v8196_v3  ;;  %v6199_v58 = vpop.f32.mrb[47].mxu1  ;;  %v6514_v18 = vadd.f32 %v6513_v62, %v6483_v17 }
 0x2a7   : > { %v6013_v30 = vadd.f32 %v6012_v44, %v5982_v26  ;;  %v8223_v2 = vadd.f32 %v5652_v59, %v10600_v16  ;;  %v5945_v6 = vadd.f32 %v8220_v35, %v5944_v55  ;;  %v8145_v56 = vpop.f32.mrb[10].mxu0  ;;  %v7417_v40 = vpack.c.bf16 %v6199_v58, %v6196_v60 }
 0x2a8   : > { %v8224_v63 = vadd.f32 %v8145_v56, %v10602_v45  ;;  %v5655_v11 = vpop.f32.mrb[11].mxu0  ;;  %7485 = vst [vmem:[%s10652_s17 + $0x38] sm:$0xff] %v7422_v10   ;;  %v6515_v15 = vadd.f32 %v6514_v18, %v6484_v23  ;;  %v6447_v27 = vadd.f32 %v6446_v0, %v6199_v58  ;;  %v6485_v38 = vmul.f32 %v6199_v58, %v6199_v58 }
 0x2a9   : > { %v5946_v34 = vadd.f32 %v8223_v2, %v5945_v6  ;;  %v5984_v32 = vmul.f32 %v8223_v2, %v8223_v2  ;;  %v6014_v41 = vadd.f32 %v6013_v30, %v5983_v14  ;;  %v8225_v21 = vadd.f32 %v5655_v11, %v10604_v57  ;;  %7484 = vst [vmem:[%s10652_s17 + $0x30] sm:$0xff] %v7417_v40  }
 0x2aa   : > { %v7332_v28 = vpack.c.bf16 %v8224_v63, %v8222_v7  ;;  %v6448_v1 = vadd.f32 %v8196_v3, %v6447_v27  ;;  %v5986_v4 = vmul.f32 %v8222_v7, %v8222_v7  ;;  %v6487_v60 = vmul.f32 %v8197_v20, %v8197_v20 }
 0x2ab   : > { %v6015_v16 = vadd.f32 %v6014_v41, %v5984_v32  ;;  %v7327_v35 = vpack.c.bf16 %v8225_v21, %v8223_v2  ;;  %v5947_v13 = vadd.f32 %v8225_v21, %v5946_v34  ;;  %v5985_v33 = vmul.f32 %v8225_v21, %v8225_v21  ;;  %v8200_v45 = vpop.f32.mrb[48].mxu1 }
 0x2ac   : > { %7468 = vst [vmem:[%s10663_s20 + $0x28] sm:$0xff] %v7332_v28   ;;  %v6212_v12 = vpop.f32.mrb[49].mxu1  ;;  %v6516_v44 = vadd.f32 %v6515_v15, %v6485_v38  ;;  %v6449_v22 = vadd.f32 %v8197_v20, %v6448_v1  ;;  %v5987_v62 = vmul.f32 %v8224_v63, %v8224_v63  ;;  %v6490_v21 = vmul.f32 %v8200_v45, %v8200_v45 }
 0x2ad   : > { %7467 = vst [vmem:[%s10663_s20 + $0x20] sm:$0xff] %v7327_v35   ;;  %v5948_v17 = vadd.f32 %v8222_v7, %v5947_v13  ;;  %v6016_v52 = vadd.f32 %v6015_v16, %v5985_v33  ;;  %v8148_v57 = vpop.f32.mrb[12].mxu0  ;;  %v8201_v24 = vpop.f32.mrb[50].mxu1  ;;  %v6488_v6 = vmul.f32 %v6212_v12, %v6212_v12 }
 0x2ae   : > { %v8226_v26 = vadd.f32 %v8148_v57, %v10606_v8  ;;  %v5668_v55 = vpop.f32.mrb[13].mxu0  ;;  %v7432_v23 = vpack.c.bf16 %v8201_v24, %v8200_v45  ;;  %v6215_v59 = vpop.f32.mrb[51].mxu1  ;;  %v6517_v14 = vadd.f32 %v6516_v44, %v6486_v31  ;;  %v6450_v2 = vadd.f32 %v6449_v22, %v6212_v12 }
 0x2af   : > { %v6017_v0 = vadd.f32 %v6016_v52, %v5986_v4  ;;  %v8227_v3 = vadd.f32 %v5668_v55, %v10608_v36  ;;  %v5949_v10 = vadd.f32 %v8224_v63, %v5948_v17  ;;  %v8149_v58 = vpop.f32.mrb[14].mxu0  ;;  %v7427_v36 = vpack.c.bf16 %v6215_v59, %v6212_v12 }
 0x2b0   : > { %v8228_v7 = vadd.f32 %v8149_v58, %v10610_v5  ;;  %v5671_v30 = vpop.f32.mrb[15].mxu0  ;;  %7487 = vst [vmem:[%s10652_s17 + $0x48] sm:$0xff] %v7432_v23   ;;  %v6518_v40 = vadd.f32 %v6517_v14, %v6487_v60  ;;  %v6451_v15 = vadd.f32 %v6450_v2, %v6215_v59  ;;  %v6489_v27 = vmul.f32 %v6215_v59, %v6215_v59 }
 0x2b1   : > { %v5950_v8 = vadd.f32 %v8227_v3, %v5949_v10  ;;  %v5988_v56 = vmul.f32 %v8227_v3, %v8227_v3  ;;  %v6018_v20 = vadd.f32 %v6017_v0, %v5987_v62  ;;  %v8229_v11 = vadd.f32 %v5671_v30, %v10612_v39  ;;  %7486 = vst [vmem:[%s10652_s17 + $0x40] sm:$0xff] %v7427_v36  }
 0x2b2   : > { %v7342_v18 = vpack.c.bf16 %v8228_v7, %v8226_v26  ;;  %v6519_v28 = vadd.f32 %v6518_v40, %v6488_v6  ;;  %v5990_v35 = vmul.f32 %v8226_v26, %v8226_v26  ;;  %v6491_v31 = vmul.f32 %v8201_v24, %v8201_v24 }
 0x2b3   : > { %v6019_v63 = vadd.f32 %v6018_v20, %v5988_v56  ;;  %v7337_v34 = vpack.c.bf16 %v8229_v11, %v8227_v3  ;;  %v5951_v32 = vadd.f32 %v8229_v11, %v5950_v8  ;;  %v5989_v5 = vmul.f32 %v8229_v11, %v8229_v11  ;;  %v8204_v41 = vpop.f32.mrb[52].mxu1 }
 0x2b4   : > { %7470 = vst [vmem:[%s10663_s20 + $0x38] sm:$0xff] %v7342_v18   ;;  %v6228_v16 = vpop.f32.mrb[53].mxu1  ;;  %v6452_v4 = vadd.f32 %v8200_v45, %v6451_v15  ;;  %v6520_v17 = vadd.f32 %v6519_v28, %v6489_v27  ;;  %v5991_v60 = vmul.f32 %v8228_v7, %v8228_v7  ;;  %v6494_v30 = vmul.f32 %v8204_v41, %v8204_v41 }
 0x2b5   : > { %7469 = vst [vmem:[%s10663_s20 + $0x30] sm:$0xff] %v7337_v34   ;;  %v5952_v13 = vadd.f32 %v8226_v26, %v5951_v32  ;;  %v6020_v39 = vadd.f32 %v6019_v63, %v5989_v5  ;;  %v8152_v33 = vpop.f32.mrb[16].mxu0  ;;  %v8205_v1 = vpop.f32.mrb[54].mxu1  ;;  %v6492_v3 = vmul.f32 %v6228_v16, %v6228_v16 }
 0x2b6   : > { %v8230_v38 = vadd.f32 %v8152_v33, %v10614_v61  ;;  %v5684_v12 = vpop.f32.mrb[17].mxu0  ;;  %v7442_v52 = vpack.c.bf16 %v8205_v1, %v8204_v41  ;;  %v6231_v57 = vpop.f32.mrb[55].mxu1  ;;  %v6521_v59 = vadd.f32 %v6520_v17, %v6490_v21  ;;  %v6453_v0 = vadd.f32 %v8201_v24, %v6452_v4 }
 0x2b7   : > { %v6021_v55 = vadd.f32 %v6020_v39, %v5990_v35  ;;  %v8231_v44 = vadd.f32 %v5684_v12, %v10616_v9  ;;  %v5953_v22 = vadd.f32 %v8228_v7, %v5952_v13  ;;  %v8153_v23 = vpop.f32.mrb[18].mxu0  ;;  %v7437_v20 = vpack.c.bf16 %v6231_v57, %v6228_v16 }
 0x2b8   : > { %v8232_v26 = vadd.f32 %v8153_v23, %v10618_v43  ;;  %v5687_v62 = vpop.f32.mrb[19].mxu0  ;;  %7489 = vst [vmem:[%s10652_s17 + $0x58] sm:$0xff] %v7442_v52   ;;  %v6454_v2 = vadd.f32 %v6453_v0, %v6228_v16  ;;  %v6522_v9 = vadd.f32 %v6521_v59, %v6491_v31  ;;  %v6493_v18 = vmul.f32 %v6231_v57, %v6231_v57 }
 0x2b9   : > { %v5954_v61 = vadd.f32 %v8231_v44, %v5953_v22  ;;  %v5992_v10 = vmul.f32 %v8231_v44, %v8231_v44  ;;  %v6022_v45 = vadd.f32 %v6021_v55, %v5991_v60  ;;  %v8233_v58 = vadd.f32 %v5687_v62, %v10620_v19  ;;  %7488 = vst [vmem:[%s10652_s17 + $0x50] sm:$0xff] %v7437_v20  }
 0x2ba   : > { %v7352_v14 = vpack.c.bf16 %v8232_v26, %v8230_v38  ;;  %v6523_v24 = vadd.f32 %v6522_v9, %v6492_v3  ;;  %v6455_v11 = vadd.f32 %v6454_v2, %v6231_v57  ;;  %v5994_v36 = vmul.f32 %v8230_v38, %v8230_v38 }
 0x2bb   : > { %v6023_v7 = vadd.f32 %v6022_v45, %v5992_v10  ;;  %v7347_v6 = vpack.c.bf16 %v8233_v58, %v8231_v44  ;;  %v5955_v8 = vadd.f32 %v8233_v58, %v5954_v61  ;;  %v5993_v43 = vmul.f32 %v8233_v58, %v8233_v58  ;;  %v8208_v56 = vpop.f32.mrb[56].mxu1 }
 0x2bc   : > { %7472 = vst [vmem:[%s10663_s20 + $0x48] sm:$0xff] %v7352_v14   ;;  %v6244_v40 = vpop.f32.mrb[57].mxu1  ;;  %v6495_v32 = vmul.f32 %v8205_v1, %v8205_v1  ;;  %v6456_v15 = vadd.f32 %v8204_v41, %v6455_v11  ;;  %v6524_v27 = vadd.f32 %v6523_v24, %v6493_v18  ;;  %v5995_v16 = vmul.f32 %v8232_v26, %v8232_v26 }
 0x2bd   : > { %7471 = vst [vmem:[%s10663_s20 + $0x40] sm:$0xff] %v7347_v6   ;;  %v5956_v19 = vadd.f32 %v8230_v38, %v5955_v8  ;;  %v6024_v63 = vadd.f32 %v6023_v7, %v5993_v43  ;;  %v8156_v34 = vpop.f32.mrb[20].mxu0  ;;  %v8209_v5 = vpop.f32.mrb[58].mxu1  ;;  %v6498_v22 = vmul.f32 %v8208_v56, %v8208_v56 }
 0x2be   : > { %v8234_v21 = vadd.f32 %v8156_v34, %v10622_v29  ;;  %v5700_v28 = vpop.f32.mrb[21].mxu0  ;;  %v7452_v35 = vpack.c.bf16 %v8209_v5, %v8208_v56  ;;  %v6247_v13 = vpop.f32.mrb[59].mxu1  ;;  %v6525_v4 = vadd.f32 %v6524_v27, %v6494_v30  ;;  %v6457_v52 = vadd.f32 %v8205_v1, %v6456_v15 }
 0x2bf   : > { %v6025_v39 = vadd.f32 %v6024_v63, %v5994_v36  ;;  %v8235_v33 = vadd.f32 %v5700_v28, %v10624_v51  ;;  %v5957_v31 = vadd.f32 %v8232_v26, %v5956_v19  ;;  %v8157_v12 = vpop.f32.mrb[22].mxu0  ;;  %v6496_v29 = vmul.f32 %v6244_v40, %v6244_v40 }
 0x2c0   : > { %v8236_v38 = vadd.f32 %v8157_v12, %v10626_v46  ;;  %v5703_v17 = vpop.f32.mrb[23].mxu0  ;;  %7491 = vst [vmem:[%s10652_s17 + $0x68] sm:$0xff] %v7452_v35   ;;  %v6458_v23 = vadd.f32 %v6457_v52, %v6244_v40  ;;  %v6526_v51 = vadd.f32 %v6525_v4, %v6495_v32  ;;  %v7447_v3 = vpack.c.bf16 %v6247_v13, %v6244_v40 }
 0x2c1   : > { %v5958_v57 = vadd.f32 %v8235_v33, %v5957_v31  ;;  %v5996_v60 = vmul.f32 %v8235_v33, %v8235_v33  ;;  %v6026_v41 = vadd.f32 %v6025_v39, %v5995_v16  ;;  %v8237_v55 = vadd.f32 %v5703_v17, %v10628_v53 }
 0x2c2   : > { %v7362_v44 = vpack.c.bf16 %v8236_v38, %v8234_v21  ;;  %v6527_v1 = vadd.f32 %v6526_v51, %v6496_v29  ;;  %v6459_v61 = vadd.f32 %v6458_v23, %v6247_v13  ;;  %v6497_v10 = vmul.f32 %v6247_v13, %v6247_v13  ;;  %7490 = vst [vmem:[%s10652_s17 + $0x60] sm:$0xff] %v7447_v3  }
 0x2c3   : > { %v6027_v26 = vadd.f32 %v6026_v41, %v5996_v60  ;;  %v7357_v59 = vpack.c.bf16 %v8237_v55, %v8235_v33  ;;  %v5959_v62 = vadd.f32 %v8237_v55, %v5958_v57  ;;  %v5997_v46 = vmul.f32 %v8237_v55, %v8237_v55  ;;  %v8212_v0 = vpop.f32.mrb[60].mxu1 }
 0x2c4   : > { %7474 = vst [vmem:[%s10663_s20 + $0x58] sm:$0xff] %v7362_v44   ;;  %v6260_v45 = vpop.f32.mrb[61].mxu1  ;;  %v5998_v58 = vmul.f32 %v8234_v21, %v8234_v21  ;;  %v6499_v2 = vmul.f32 %v8209_v5, %v8209_v5  ;;  %v6460_v8 = vadd.f32 %v8208_v56, %v6459_v61  ;;  %v6528_v43 = vadd.f32 %v6527_v1, %v6497_v10 }
 0x2c5   : > { %7473 = vst [vmem:[%s10663_s20 + $0x50] sm:$0xff] %v7357_v59   ;;  %v5960_v53 = vadd.f32 %v8234_v21, %v5959_v62  ;;  %v6028_v14 = vadd.f32 %v6027_v26, %v5997_v46  ;;  %v8160_v30 = vpop.f32.mrb[24].mxu0  ;;  %v8213_v9 = vpop.f32.mrb[62].mxu1  ;;  %v5999_v11 = vmul.f32 %v8236_v38, %v8236_v38  ;;  %v6502_v57 = vmul.f32 %v8212_v0, %v8212_v0 }
 0x2c6   : > { %v8238_v7 = vadd.f32 %v8160_v30, %v10630_v25  ;;  %v5716_v6 = vpop.f32.mrb[25].mxu0  ;;  %v7462_v24 = vpack.c.bf16 %v8213_v9, %v8212_v0  ;;  %v6263_v20 = vpop.f32.mrb[63].mxu1  ;;  %v6529_v34 = vadd.f32 %v6528_v43, %v6498_v22  ;;  %v6461_v21 = vadd.f32 %v8209_v5, %v6460_v8 }
 0x2c7   : > { %v6029_v18 = vadd.f32 %v6028_v14, %v5998_v58  ;;  %v8239_v40 = vadd.f32 %v5716_v6, %v10632_v37  ;;  %v5961_v36 = vadd.f32 %v8236_v38, %v5960_v53  ;;  %v8161_v19 = vpop.f32.mrb[26].mxu0  ;;  %v6500_v25 = vmul.f32 %v6260_v45, %v6260_v45 }
 0x2c8   : > { %v8240_v63 = vadd.f32 %v8161_v19, %v10634_v49  ;;  %v5719_v32 = vpop.f32.mrb[27].mxu0  ;;  %7493 = vst [vmem:[%s10652_s17 + $0x78] sm:$0xff] %v7462_v24   ;;  %v6462_v13 = vadd.f32 %v6461_v21, %v6260_v45  ;;  %v6530_v16 = vadd.f32 %v6529_v34, %v6499_v2  ;;  %v7457_v12 = vpack.c.bf16 %v6263_v20, %v6260_v45 }
 0x2c9   : > { %v5962_v28 = vadd.f32 %v8239_v40, %v5961_v36  ;;  %v6000_v15 = vmul.f32 %v8239_v40, %v8239_v40  ;;  %v6030_v56 = vadd.f32 %v6029_v18, %v5999_v11  ;;  %v8241_v27 = vadd.f32 %v5719_v32, %v10636_v54 }
 0x2ca   : > { %v7372_v35 = vpack.c.bf16 %v8240_v63, %v8238_v7  ;;  %v6531_v31 = vadd.f32 %v6530_v16, %v6500_v25  ;;  %v6463_v5 = vadd.f32 %v6462_v13, %v6263_v20  ;;  %v6501_v38 = vmul.f32 %v6263_v20, %v6263_v20  ;;  %7492 = vst [vmem:[%s10652_s17 + $0x70] sm:$0xff] %v7457_v12  }
 0x2cb   : > { %v6031_v37 = vadd.f32 %v6030_v56, %v6000_v15  ;;  %v7367_v39 = vpack.c.bf16 %v8241_v27, %v8239_v40  ;;  %v5963_v33 = vadd.f32 %v8241_v27, %v5962_v28  ;;  %v6001_v49 = vmul.f32 %v8241_v27, %v8241_v27 }
 0x2cc   : > { %7476 = vst [vmem:[%s10663_s20 + $0x68] sm:$0xff] %v7372_v35   ;;  %v6002_v4 = vmul.f32 %v8238_v7, %v8238_v7  ;;  %v6464_v41 = vadd.f32 %v8212_v0, %v6463_v5  ;;  %v6532_v55 = vadd.f32 %v6531_v31, %v6501_v38  ;;  %v6003_v44 = vmul.f32 %v8240_v63, %v8240_v63 }
 0x2cd   : > { %7475 = vst [vmem:[%s10663_s20 + $0x60] sm:$0xff] %v7367_v39   ;;  %v5964_v17 = vadd.f32 %v8238_v7, %v5963_v33  ;;  %v6032_v52 = vadd.f32 %v6031_v37, %v6001_v49  ;;  %v8164_v29 = vpop.f32.mrb[28].mxu0  ;;  %v6503_v59 = vmul.f32 %v8213_v9, %v8213_v9 }
 0x2ce   : > { %v8242_v54 = vadd.f32 %v8164_v29, %v10638_v42  ;;  %v5732_v60 = vpop.f32.mrb[29].mxu0  ;;  %v6465_v46 = vadd.f32 %v8213_v9, %v6464_v41  ;;  %v6533_v1 = vadd.f32 %v6532_v55, %v6502_v57 }
 0x2cf   : > { %v6033_v22 = vadd.f32 %v6032_v52, %v6002_v4  ;;  %v8243_v23 = vadd.f32 %v5732_v60, %v10640_v50  ;;  %v5965_v51 = vadd.f32 %v8240_v63, %v5964_v17  ;;  %v8165_v26 = vpop.f32.mrb[30].mxu0 }
 0x2d0   : > { %v8244_v62 = vadd.f32 %v8165_v26, %v10642_v48  ;;  %v5735_v3 = vpop.f32.mrb[31].mxu0  ;;  %v6466_v58 = vrot.slane %v6465_v46, 4  ;;  %v6534_v53 = vadd.f32 %v6533_v1, %v6503_v59  ;;  %v6006_v48 = vmul.f32 %v8242_v54, %v8242_v54 }
 0x2d1   : > { %v5966_v61 = vadd.f32 %v8243_v23, %v5965_v51  ;;  %v6004_v42 = vmul.f32 %v8243_v23, %v8243_v23  ;;  %v6034_v10 = vadd.f32 %v6033_v22, %v6003_v44  ;;  %v8245_v0 = vadd.f32 %v5735_v3, %v10644_v47 }
 0x2d2   : > { %v7382_v45 = vpack.c.bf16 %v8244_v62, %v8242_v54  ;;  %v6467_v7 = vadd.f32 %v6466_v58, %v6465_v46  ;;  %v6535_v6 = vrot.slane %v6534_v53, 4  ;;  %v6007_v20 = vmul.f32 %v8244_v62, %v8244_v62 }
 0x2d3   : > { %v6035_v14 = vadd.f32 %v6034_v10, %v6004_v42  ;;  %v7377_v50 = vpack.c.bf16 %v8245_v0, %v8243_v23  ;;  %v5967_v30 = vadd.f32 %v8245_v0, %v5966_v61  ;;  %v6005_v2 = vmul.f32 %v8245_v0, %v8245_v0 }
 0x2d4   : > { %7478 = vst [vmem:[%s10663_s20 + $0x78] sm:$0xff] %v7382_v45   ;;  %v6468_v43 = vrot.slane %v6467_v7, 2  ;;  %v6536_v24 = vadd.f32 %v6535_v6, %v6534_v53 }
 0x2d5   : > { %7477 = vst [vmem:[%s10663_s20 + $0x70] sm:$0xff] %v7377_v50   ;;  %v5968_v9 = vadd.f32 %v8242_v54, %v5967_v30  ;;  %v6036_v8 = vadd.f32 %v6035_v14, %v6005_v2 }
 0x2d6   : > { %v6469_v18 = vadd.f32 %v6468_v43, %v6467_v7  ;;  %v6537_v40 = vrot.slane %v6536_v24, 2 }
 0x2d7   : > { %v5969_v11 = vadd.f32 %v8244_v62, %v5968_v9  ;;  %v6037_v47 = vadd.f32 %v6036_v8, %v6006_v48 }
 0x2d8   : > { %v6470_v63 = vrot.slane %v6469_v18, 1  ;;  %v6538_v34 = vadd.f32 %v6537_v40, %v6536_v24 }
 0x2d9   : > { %v5970_v36 = vrot.slane %v5969_v11, 4  ;;  %v6038_v19 = vadd.f32 %v6037_v47, %v6007_v20 }
 0x2da   : > { %v6539_v25 = vrot.slane %v6538_v34, 1  ;;  %v6471_v56 = vadd.f32 %v6470_v63, %v6469_v18 }
 0x2db   : > { %v5971_v32 = vadd.f32 %v5970_v36, %v5969_v11  ;;  %v6039_v21 = vrot.slane %v6038_v19, 4 }
 0x2dc   : > { %v6540_v27 = vadd.f32 %v6539_v25, %v6538_v34 }
 0x2dd   : > { %v5972_v28 = vrot.slane %v5971_v32, 2  ;;  %v6040_v15 = vadd.f32 %v6039_v21, %v6038_v19 }
 0x2de   : > { %v6541_v16 = vsel %vm293_vm0, %v6471_v56, %v6540_v27 }
 0x2df   : > { %v5973_v35 = vadd.f32 %v5972_v28, %v5971_v32  ;;  %v6041_v13 = vrot.slane %v6040_v15, 2  ;;  %v6542_v37 = vsel %vm6047_vm15, %v6541_v16, 0.0 }
 0x2e0   : > { %6543 = vst [vmem:[%s284_s26] sm:$0xff] %v6542_v37 }
 0x2e1   : > { %v5974_v39 = vrot.slane %v5973_v35, 1  ;;  %v6042_v33 = vadd.f32 %v6041_v13, %v6040_v15 }
 0x2e3   : > { %v6043_v49 = vrot.slane %v6042_v33, 1  ;;  %v5975_v31 = vadd.f32 %v5974_v39, %v5973_v35 }
 0x2e5   : > { %v6044_v12 = vadd.f32 %v6043_v49, %v6042_v33 }
 0x2e7   : > { %v6046_v5 = vsel %vm293_vm0, %v5975_v31, %v6044_v12 }
 0x2e8   : > { %v6048_v38 = vsel %vm6047_vm15, %v6046_v5, 0.0 }
 0x2e9   : > { %6049 = vst [vmem:[%s275_s29] sm:$0xff] %v6048_v38 }
 0x2ea PF: > { %s17_s21 = sadd.s32 1, %s8686_s21  }
 0x2eb   : > { %p14_p4 = scmp.ge.s32.totalorder %s17_s21, 4  }
 0x2ed   :  { %16 = sbr.rel (!%p14_p4) target bundleno = 1 (0x1), region = 109 }

</bundles_post_ra>
